<compile_context>
chip_gen: v6e
topology: v6e:2x2x1
jax: 0.10.0
libtpu: 0.0.40
codegen_flags: <defaults>
</compile_context>

<pallas_src>
import functools

import jax
import jax.numpy as jnp
from jax.experimental import pallas as pl
from jax.experimental.pallas import tpu as pltpu


# Cap well below v7x's 64 MiB physical VMEM; actual usage here is ~1-2 MiB.
_VMEM_LIMIT = 48 * 1024 * 1024


def _round_up(x, m):
    return (x + m - 1) // m * m


def _pad_axis_to(x, axis, mult):
    size = x.shape[axis]
    target = _round_up(size, mult)
    if target == size:
        return x
    pads = [(0, 0)] * x.ndim
    pads[axis] = (0, target - size)
    return jnp.pad(x, pads)


# ----------------------------------------------------------------------------
# Pallas kernel: space-to-depth implicit-GEMM conv (4x4 / stride 2 / pad 1)
# with fused LeakyReLU (layer 1) or fused BatchNorm batch statistics
# (layers 2-4; per-image partial sums, reduced outside).
# ----------------------------------------------------------------------------
def _conv_s2d_kernel(x_ref, w_ref, o_ref, *stats_refs,
                     ws2, wo, activation, compute_stats):
    # x_ref : (1, Rows, K4)   bf16  flattened space-to-depth image (+ spare rows)
    # w_ref : (4, K4, Cout)   bf16  taps (a,b) = (0,0),(0,1),(1,0),(1,1)
    # o_ref : (1, M_eff, Cout) bf16 with M_eff = Ho * Ws2 (seam cols are junk)
    m_eff = o_ref.shape[1]

    # Four tap matmuls; each A slice is a contiguous row window of xs.
    offs = (0, 1, ws2, ws2 + 1)
    acc = jnp.dot(x_ref[0, offs[0]:offs[0] + m_eff, :], w_ref[0],
                  preferred_element_type=jnp.float32)
    for t in range(1, 4):
        acc = acc + jnp.dot(x_ref[0, offs[t]:offs[t] + m_eff, :], w_ref[t],
                            preferred_element_type=jnp.float32)

    if activation == "leaky_relu":
        acc = jnp.where(acc >= 0, acc, 0.2 * acc)     # f32 epilogue (v5e-safe)

    o_ref[0] = acc.astype(o_ref.dtype)

    if compute_stats:
        # Per-channel sum / sum-of-squares over the valid output positions
        # (rows with column index == Wo are the space-to-depth seam -> mask).
        sum_ref, sq_ref = stats_refs
        rid = jax.lax.broadcasted_iota(jnp.int32, (m_eff, 1), 0)
        valid = (rid % ws2) < wo
        av = jnp.where(valid, acc, 0.0)
        sum_ref[0] = jnp.sum(av, axis=0, keepdims=True)
        sq_ref[0] = jnp.sum(av * av, axis=0, keepdims=True)


def pallas_conv_s2d(xs, wr, m_eff, ws2, wo, activation="none",
                    compute_stats=False):
    """xs: (Nb, Rows, K4) bf16 ; wr: (4, K4, Cout) bf16 -> (Nb, M_eff, Cout)."""
    Nb, Rows, K4 = xs.shape
    Cout = wr.shape[2]

    kern = functools.partial(_conv_s2d_kernel, ws2=ws2, wo=wo,
                             activation=activation, compute_stats=compute_stats)

    x_spec = pl.BlockSpec((1, Rows, K4), lambda n: (n, 0, 0))
    # TODO(synk): weight block is grid-invariant; pipeline_mode=pl.Buffered(1)
    # would single-buffer it and save VMEM on v7x at production sizes.
    w_spec = pl.BlockSpec((4, K4, Cout), lambda n: (0, 0, 0))
    y_spec = pl.BlockSpec((1, m_eff, Cout), lambda n: (n, 0, 0))

    if compute_stats:
        out_shape = (jax.ShapeDtypeStruct((Nb, m_eff, Cout), jnp.bfloat16),
                     jax.ShapeDtypeStruct((Nb, 1, Cout), jnp.float32),
                     jax.ShapeDtypeStruct((Nb, 1, Cout), jnp.float32))
        out_specs = (y_spec,
                     pl.BlockSpec((1, 1, Cout), lambda n: (n, 0, 0)),
                     pl.BlockSpec((1, 1, Cout), lambda n: (n, 0, 0)))
    else:
        out_shape = jax.ShapeDtypeStruct((Nb, m_eff, Cout), jnp.bfloat16)
        out_specs = y_spec

    return pl.pallas_call(
        kern,
        out_shape=out_shape,
        grid_spec=pltpu.PrefetchScalarGridSpec(
            num_scalar_prefetch=0, grid=(Nb,),
            in_specs=[x_spec, w_spec], out_specs=out_specs),
        compiler_params=pltpu.CompilerParams(
            dimension_semantics=("parallel",),
            vmem_limit_bytes=_VMEM_LIMIT),
    )(xs, wr)


# ----------------------------------------------------------------------------
# Plain-JAX glue: spectral norm, space-to-depth prep, weight re-layout
# ----------------------------------------------------------------------------
def spectral_normalize(w, u, eps=1e-12):
    # w: (Cout, Cin, kh, kw), u: (1, Cout)  -- mirrors SNConv2d.W_ (Ip=1)
    # TODO(synk): PyTorch updates the `u` power-iteration buffer in place; a
    # functional training loop would need u_new returned and threaded through.
    w_mat = w.reshape(w.shape[0], -1)
    v = u @ w_mat
    v = v / (jnp.linalg.norm(v) + eps)
    u_new = v @ w_mat.T
    u_new = u_new / (jnp.linalg.norm(u_new) + eps)
    sigma = jnp.sum((u_new @ w_mat) * v)
    return w / sigma


def space_to_depth_prep(h_nhwc, pad=1, extra_rows=8):
    """Pad + space-to-depth (factor 2) + flatten rows; XLA fuses the preceding
    BN/LeakyReLU elementwise into this single HBM write (same bytes as input)."""
    Nb, H, W, C = h_nhwc.shape
    assert H % 2 == 0 and W % 2 == 0
    xp = jnp.pad(h_nhwc, ((0, 0), (pad, pad), (pad, pad), (0, 0)))
    Hs, Ws2 = (H + 2 * pad) // 2, (W + 2 * pad) // 2
    xs = xp.reshape(Nb, Hs, 2, Ws2, 2, C).transpose(0, 1, 3, 2, 4, 5)
    xs = xs.reshape(Nb, Hs * Ws2, 4 * C)
    xs = jnp.pad(xs, ((0, 0), (0, extra_rows), (0, 0)))   # spare rows for tap (1,1)
    xs = _pad_axis_to(xs, 2, 8)                            # sublane-friendly K
    Ho, Wo = Hs - 1, Ws2 - 1
    return xs.astype(jnp.bfloat16), (Ho, Wo, Ws2)


def conv_weight_s2d(w_sn):
    """(Cout, Cin, 4, 4) -> (4 taps, 4*Cin, Cout) matching space-to-depth order."""
    Cout, Cin, kh, kw = w_sn.shape
    wt = w_sn.reshape(Cout, Cin, 2, 2, 2, 2)          # (co, ci, a, p, b, q)
    wr = jnp.transpose(wt, (2, 4, 3, 5, 1, 0))        # (a, b, p, q, ci, co)
    wr = wr.reshape(4, 4 * Cin, Cout)
    wr = _pad_axis_to(wr, 1, 8)                       # keep K in sync with xs
    return wr.astype(jnp.bfloat16)


def sn_conv_layer(h, w, u, activation="none", compute_stats=False):
    """SNConv2d(k=4, s=2, p=1) via space-to-depth implicit GEMM."""
    Nb = h.shape[0]
    w_sn = spectral_normalize(w, u)
    xs, (Ho, Wo, Ws2) = space_to_depth_prep(h)
    wr = conv_weight_s2d(w_sn)
    m_eff = Ho * Ws2
    out = pallas_conv_s2d(xs, wr, m_eff, Ws2, Wo,
                          activation=activation, compute_stats=compute_stats)
    if compute_stats:
        y, s, sq = out
        y = y.reshape(Nb, Ho, Ws2, -1)[:, :, :Wo, :]    # drop seam columns
        return y, s.sum(axis=0)[0], sq.sum(axis=0)[0]
    return out.reshape(Nb, Ho, Ws2, -1)[:, :, :Wo, :]


def bn_lrelu(y, s, sq, gamma, beta, count, eps=1e-5):
    """Fold BN (training-mode batch stats from the conv epilogue) + LeakyReLU;
    plain jnp so XLA fuses it into the next layer's pad/space-to-depth."""
    mean = s / count
    # NOTE: E[x^2]-mean^2 in f32 can cancel if |mean| >> std; clamp as guard.
    var = jnp.maximum(sq / count - mean * mean, 0.0)
    scale = gamma / jnp.sqrt(var + eps)
    shift = beta - mean * scale
    h = y.astype(jnp.float32) * scale + shift
    return jnp.where(h >= 0, h, 0.2 * h).astype(jnp.bfloat16)


def final_sigmoid(h, w, u):
    # SNConv2d(8nf -> 1, 4, 1, 0) + Sigmoid: (batch x K) GEMV with N=1 --
    # too small for the MXU/Pallas path, kept in plain JAX (per perf review).
    w_sn = spectral_normalize(w, u)
    Nb, Hh, Wh, C = h.shape
    w_mat = jnp.transpose(w_sn, (2, 3, 1, 0)).reshape(Hh * Wh * C, 1)
    a = h.reshape(Nb, Hh * Wh * C).astype(jnp.float32)
    y = jax.nn.sigmoid(a @ w_mat.astype(jnp.float32))
    return y.reshape(-1)


# ----------------------------------------------------------------------------
# Discriminator forward
# ----------------------------------------------------------------------------
def discriminator_forward(params, x_nchw, matching=False):
    # NCHW f32 -> NHWC bf16 (MXU operands; accumulation stays f32 in-kernel)
    h = jnp.transpose(x_nchw, (0, 2, 3, 1)).astype(jnp.bfloat16)

    # layer 1: SNConv2d -> LeakyReLU(0.2) fused in the conv epilogue
    h = sn_conv_layer(h, params["w1"], params["u1"], activation="leaky_relu")

    # layers 2-4: SNConv2d (+fused batch stats) -> BN affine + LeakyReLU in jnp
    for i in (2, 3, 4):
        y, s, sq = sn_conv_layer(h, params["w%d" % i], params["u%d" % i],
                                 compute_stats=True)
        count = y.shape[0] * y.shape[1] * y.shape[2]
        h = bn_lrelu(y, s, sq, params["g%d" % i], params["b%d" % i], count)

    if matching:
        return jnp.transpose(h.astype(jnp.float32), (0, 3, 1, 2))  # NCHW like PyTorch

    # output: SNConv2d(8nf -> 1, 4, 1, 0) + Sigmoid, then view(-1, 1).squeeze(1)
    return final_sigmoid(h, params["w5"], params["u5"])


def init_params(key, nf=16, n_channels=3):
    ks = jax.random.split(key, 16)
    p = {}
    shapes = {
        "w1": (nf, n_channels, 4, 4),
        "w2": (2 * nf, nf, 4, 4),
        "w3": (4 * nf, 2 * nf, 4, 4),
        "w4": (8 * nf, 4 * nf, 4, 4),
        "w5": (1, 8 * nf, 4, 4),
    }
    for idx, (name, shp) in enumerate(shapes.items()):
        p[name] = 0.02 * jax.random.normal(ks[idx], shp, jnp.float32)
        p["u" + name[1]] = jax.random.normal(ks[5 + idx], (1, shp[0]), jnp.float32)
    p["g2"] = jnp.ones((2 * nf,), jnp.float32)
    p["b2"] = jnp.zeros((2 * nf,), jnp.float32)
    p["g3"] = jnp.ones((4 * nf,), jnp.float32)
    p["b3"] = jnp.zeros((4 * nf,), jnp.float32)
    p["g4"] = jnp.ones((8 * nf,), jnp.float32)
    p["b4"] = jnp.zeros((8 * nf,), jnp.float32)
    return p


if __name__ == "__main__":
    key = jax.random.PRNGKey(0)
    k_param, k_x = jax.random.split(key)
    nf = 16                      # small n_feature_maps for a quick run
    params = init_params(k_param, nf=nf)
    # DCGAN discriminator expects 64x64 images (4 stride-2 convs -> 4x4 -> 1x1)
    x = jax.random.normal(k_x, (2, 3, 64, 64), jnp.float32)

    fwd = jax.jit(functools.partial(discriminator_forward, matching=False))
    out = fwd(params, x)
    jax.block_until_ready(out)
    assert out.shape == (2,)
    assert out.dtype == jnp.float32
    print("KERNEL_OK")
</pallas_src>

<mosaic_0001>
module attributes {stable_mosaic.version = 11 : i64} {
  func.func @_conv_s2d_kernel(%arg0: i32, %arg1: memref<1x1097x16xbf16, #tpu.memory_space<vmem>>, %arg2: memref<4x16x16xbf16, #tpu.memory_space<vmem>>, %arg3: memref<1x1056x16xbf16, #tpu.memory_space<vmem>>) attributes {dimension_semantics = [#tpu.dimension_semantics<parallel>], iteration_bounds = array<i64: 2>, scalar_prefetch = 0 : i64, scratch_operands = 0 : i64, tpu.core_type = #tpu.core_type<tc>, window_params = [{transform_indices = @transform_0, window_bounds = array<i64: 1, 1097, 16>}, {pipeline_mode = #tpu.pipeline_mode<synchronous>, transform_indices = @transform_1, window_bounds = array<i64: 4, 16, 16>}, {transform_indices = @transform_2, window_bounds = array<i64: 1, 1056, 16>}]} {
    %c0 = arith.constant 0 : index
    %c0_0 = arith.constant 0 : index
    %c0_1 = arith.constant 0 : index
    %0 = vector.load %arg1[%c0, %c0_0, %c0_1] : memref<1x1097x16xbf16, #tpu.memory_space<vmem>>, vector<1x1056x16xbf16>
    %1 = vector.shape_cast %0 : vector<1x1056x16xbf16> to vector<1056x16xbf16>
    %c0_2 = arith.constant 0 : index
    %c0_3 = arith.constant 0 : index
    %c0_4 = arith.constant 0 : index
    %2 = vector.load %arg2[%c0_2, %c0_3, %c0_4] : memref<4x16x16xbf16, #tpu.memory_space<vmem>>, vector<1x16x16xbf16>
    %3 = vector.shape_cast %2 : vector<1x16x16xbf16> to vector<16x16xbf16>
    %cst = arith.constant dense<0.000000e+00> : vector<1056x16xf32>
    %4 = tpu.matmul %1, %3, %cst {dimension_numbers = #tpu.dot_dimension_numbers<[1], [0], [0], [1], [0, 0, 1, 1], [], []>} : vector<1056x16xbf16>, vector<16x16xbf16>, vector<1056x16xf32> -> vector<1056x16xf32>
    %c0_5 = arith.constant 0 : index
    %c1 = arith.constant 1 : index
    %c0_6 = arith.constant 0 : index
    %5 = vector.load %arg1[%c0_5, %c1, %c0_6] : memref<1x1097x16xbf16, #tpu.memory_space<vmem>>, vector<1x1056x16xbf16>
    %6 = vector.shape_cast %5 : vector<1x1056x16xbf16> to vector<1056x16xbf16>
    %c1_7 = arith.constant 1 : index
    %c0_8 = arith.constant 0 : index
    %c0_9 = arith.constant 0 : index
    %7 = vector.load %arg2[%c1_7, %c0_8, %c0_9] : memref<4x16x16xbf16, #tpu.memory_space<vmem>>, vector<1x16x16xbf16>
    %8 = vector.shape_cast %7 : vector<1x16x16xbf16> to vector<16x16xbf16>
    %cst_10 = arith.constant dense<0.000000e+00> : vector<1056x16xf32>
    %9 = tpu.matmul %6, %8, %cst_10 {dimension_numbers = #tpu.dot_dimension_numbers<[1], [0], [0], [1], [0, 0, 1, 1], [], []>} : vector<1056x16xbf16>, vector<16x16xbf16>, vector<1056x16xf32> -> vector<1056x16xf32>
    %10 = arith.addf %4, %9 : vector<1056x16xf32>
    %c0_11 = arith.constant 0 : index
    %c33 = arith.constant 33 : index
    %c0_12 = arith.constant 0 : index
    %11 = vector.load %arg1[%c0_11, %c33, %c0_12] : memref<1x1097x16xbf16, #tpu.memory_space<vmem>>, vector<1x1056x16xbf16>
    %12 = vector.shape_cast %11 : vector<1x1056x16xbf16> to vector<1056x16xbf16>
    %c2 = arith.constant 2 : index
    %c0_13 = arith.constant 0 : index
    %c0_14 = arith.constant 0 : index
    %13 = vector.load %arg2[%c2, %c0_13, %c0_14] : memref<4x16x16xbf16, #tpu.memory_space<vmem>>, vector<1x16x16xbf16>
    %14 = vector.shape_cast %13 : vector<1x16x16xbf16> to vector<16x16xbf16>
    %cst_15 = arith.constant dense<0.000000e+00> : vector<1056x16xf32>
    %15 = tpu.matmul %12, %14, %cst_15 {dimension_numbers = #tpu.dot_dimension_numbers<[1], [0], [0], [1], [0, 0, 1, 1], [], []>} : vector<1056x16xbf16>, vector<16x16xbf16>, vector<1056x16xf32> -> vector<1056x16xf32>
    %16 = arith.addf %10, %15 : vector<1056x16xf32>
    %c0_16 = arith.constant 0 : index
    %c34 = arith.constant 34 : index
    %c0_17 = arith.constant 0 : index
    %17 = vector.load %arg1[%c0_16, %c34, %c0_17] : memref<1x1097x16xbf16, #tpu.memory_space<vmem>>, vector<1x1056x16xbf16>
    %18 = vector.shape_cast %17 : vector<1x1056x16xbf16> to vector<1056x16xbf16>
    %c3 = arith.constant 3 : index
    %c0_18 = arith.constant 0 : index
    %c0_19 = arith.constant 0 : index
    %19 = vector.load %arg2[%c3, %c0_18, %c0_19] : memref<4x16x16xbf16, #tpu.memory_space<vmem>>, vector<1x16x16xbf16>
    %20 = vector.shape_cast %19 : vector<1x16x16xbf16> to vector<16x16xbf16>
    %cst_20 = arith.constant dense<0.000000e+00> : vector<1056x16xf32>
    %21 = tpu.matmul %18, %20, %cst_20 {dimension_numbers = #tpu.dot_dimension_numbers<[1], [0], [0], [1], [0, 0, 1, 1], [], []>} : vector<1056x16xbf16>, vector<16x16xbf16>, vector<1056x16xf32> -> vector<1056x16xf32>
    %22 = arith.addf %16, %21 : vector<1056x16xf32>
    %cst_21 = arith.constant 0.000000e+00 : f32
    %23 = vector.broadcast %cst_21 : f32 to vector<1056x16xf32>
    %24 = arith.cmpf oge, %22, %23 : vector<1056x16xf32>
    %cst_22 = arith.constant 2.000000e-01 : f32
    %25 = vector.broadcast %cst_22 : f32 to vector<1056x16xf32>
    %26 = arith.mulf %25, %22 : vector<1056x16xf32>
    %27 = arith.select %24, %22, %26 : vector<1056x16xi1>, vector<1056x16xf32>
    %28 = arith.truncf %27 : vector<1056x16xf32> to vector<1056x16xbf16>
    %c0_23 = arith.constant 0 : index
    %c0_24 = arith.constant 0 : index
    %c0_25 = arith.constant 0 : index
    %29 = vector.load %arg3[%c0_23, %c0_24, %c0_25] : memref<1x1056x16xbf16, #tpu.memory_space<vmem>>, vector<1x1056x16xbf16>
    %30 = vector.shape_cast %29 : vector<1x1056x16xbf16> to vector<1056x16xbf16>
    %31 = vector.shape_cast %28 : vector<1056x16xbf16> to vector<1x1056x16xbf16>
    tpu.vector_store %arg3[%c0_23, %c0_24, %c0_25], %31 {strides = array<i32>} : memref<1x1056x16xbf16, #tpu.memory_space<vmem>>, vector<1x1056x16xbf16>,
    return
  }
  func.func @transform_0(%arg0: i32) -> (i32, i32, i32) {
    %c0_i32 = arith.constant 0 : i32
    %c0_i32_0 = arith.constant 0 : i32
    %c0_i32_1 = arith.constant 0 : i32
    return %arg0, %c0_i32, %c0_i32_0 : i32, i32, i32
  }
  func.func @transform_1(%arg0: i32) -> (i32, i32, i32) {
    %c0_i32 = arith.constant 0 : i32
    %c0_i32_0 = arith.constant 0 : i32
    %c0_i32_1 = arith.constant 0 : i32
    %c0_i32_2 = arith.constant 0 : i32
    return %c0_i32, %c0_i32_0, %c0_i32_1 : i32, i32, i32
  }
  func.func @transform_2(%arg0: i32) -> (i32, i32, i32) {
    %c0_i32 = arith.constant 0 : i32
    %c0_i32_0 = arith.constant 0 : i32
    %c0_i32_1 = arith.constant 0 : i32
    return %arg0, %c0_i32, %c0_i32_0 : i32, i32, i32
  }
}

module attributes {stable_mosaic.version = 11 : i64} {
  func.func @_conv_s2d_kernel(%arg0: i32, %arg1: memref<1x297x64xbf16, #tpu.memory_space<vmem>>, %arg2: memref<4x64x32xbf16, #tpu.memory_space<vmem>>, %arg3: memref<1x272x32xbf16, #tpu.memory_space<vmem>>, %arg4: memref<1x1x32xf32, #tpu.memory_space<vmem>>, %arg5: memref<1x1x32xf32, #tpu.memory_space<vmem>>) attributes {dimension_semantics = [#tpu.dimension_semantics<parallel>], iteration_bounds = array<i64: 2>, scalar_prefetch = 0 : i64, scratch_operands = 0 : i64, tpu.core_type = #tpu.core_type<tc>, window_params = [{transform_indices = @transform_0, window_bounds = array<i64: 1, 297, 64>}, {pipeline_mode = #tpu.pipeline_mode<synchronous>, transform_indices = @transform_1, window_bounds = array<i64: 4, 64, 32>}, {transform_indices = @transform_2, window_bounds = array<i64: 1, 272, 32>}, {transform_indices = @transform_3, window_bounds = array<i64: 1, 1, 32>}, {transform_indices = @transform_4, window_bounds = array<i64: 1, 1, 32>}]} {
    %c0 = arith.constant 0 : index
    %c0_0 = arith.constant 0 : index
    %c0_1 = arith.constant 0 : index
    %0 = vector.load %arg1[%c0, %c0_0, %c0_1] : memref<1x297x64xbf16, #tpu.memory_space<vmem>>, vector<1x272x64xbf16>
    %1 = vector.shape_cast %0 : vector<1x272x64xbf16> to vector<272x64xbf16>
    %c0_2 = arith.constant 0 : index
    %c0_3 = arith.constant 0 : index
    %c0_4 = arith.constant 0 : index
    %2 = vector.load %arg2[%c0_2, %c0_3, %c0_4] : memref<4x64x32xbf16, #tpu.memory_space<vmem>>, vector<1x64x32xbf16>
    %3 = vector.shape_cast %2 : vector<1x64x32xbf16> to vector<64x32xbf16>
    %cst = arith.constant dense<0.000000e+00> : vector<272x32xf32>
    %4 = tpu.matmul %1, %3, %cst {dimension_numbers = #tpu.dot_dimension_numbers<[1], [0], [0], [1], [0, 0, 1, 1], [], []>} : vector<272x64xbf16>, vector<64x32xbf16>, vector<272x32xf32> -> vector<272x32xf32>
    %c0_5 = arith.constant 0 : index
    %c1 = arith.constant 1 : index
    %c0_6 = arith.constant 0 : index
    %5 = vector.load %arg1[%c0_5, %c1, %c0_6] : memref<1x297x64xbf16, #tpu.memory_space<vmem>>, vector<1x272x64xbf16>
    %6 = vector.shape_cast %5 : vector<1x272x64xbf16> to vector<272x64xbf16>
    %c1_7 = arith.constant 1 : index
    %c0_8 = arith.constant 0 : index
    %c0_9 = arith.constant 0 : index
    %7 = vector.load %arg2[%c1_7, %c0_8, %c0_9] : memref<4x64x32xbf16, #tpu.memory_space<vmem>>, vector<1x64x32xbf16>
    %8 = vector.shape_cast %7 : vector<1x64x32xbf16> to vector<64x32xbf16>
    %cst_10 = arith.constant dense<0.000000e+00> : vector<272x32xf32>
    %9 = tpu.matmul %6, %8, %cst_10 {dimension_numbers = #tpu.dot_dimension_numbers<[1], [0], [0], [1], [0, 0, 1, 1], [], []>} : vector<272x64xbf16>, vector<64x32xbf16>, vector<272x32xf32> -> vector<272x32xf32>
    %10 = arith.addf %4, %9 : vector<272x32xf32>
    %c0_11 = arith.constant 0 : index
    %c17 = arith.constant 17 : index
    %c0_12 = arith.constant 0 : index
    %11 = vector.load %arg1[%c0_11, %c17, %c0_12] : memref<1x297x64xbf16, #tpu.memory_space<vmem>>, vector<1x272x64xbf16>
    %12 = vector.shape_cast %11 : vector<1x272x64xbf16> to vector<272x64xbf16>
    %c2 = arith.constant 2 : index
    %c0_13 = arith.constant 0 : index
    %c0_14 = arith.constant 0 : index
    %13 = vector.load %arg2[%c2, %c0_13, %c0_14] : memref<4x64x32xbf16, #tpu.memory_space<vmem>>, vector<1x64x32xbf16>
    %14 = vector.shape_cast %13 : vector<1x64x32xbf16> to vector<64x32xbf16>
    %cst_15 = arith.constant dense<0.000000e+00> : vector<272x32xf32>
    %15 = tpu.matmul %12, %14, %cst_15 {dimension_numbers = #tpu.dot_dimension_numbers<[1], [0], [0], [1], [0, 0, 1, 1], [], []>} : vector<272x64xbf16>, vector<64x32xbf16>, vector<272x32xf32> -> vector<272x32xf32>
    %16 = arith.addf %10, %15 : vector<272x32xf32>
    %c0_16 = arith.constant 0 : index
    %c18 = arith.constant 18 : index
    %c0_17 = arith.constant 0 : index
    %17 = vector.load %arg1[%c0_16, %c18, %c0_17] : memref<1x297x64xbf16, #tpu.memory_space<vmem>>, vector<1x272x64xbf16>
    %18 = vector.shape_cast %17 : vector<1x272x64xbf16> to vector<272x64xbf16>
    %c3 = arith.constant 3 : index
    %c0_18 = arith.constant 0 : index
    %c0_19 = arith.constant 0 : index
    %19 = vector.load %arg2[%c3, %c0_18, %c0_19] : memref<4x64x32xbf16, #tpu.memory_space<vmem>>, vector<1x64x32xbf16>
    %20 = vector.shape_cast %19 : vector<1x64x32xbf16> to vector<64x32xbf16>
    %cst_20 = arith.constant dense<0.000000e+00> : vector<272x32xf32>
    %21 = tpu.matmul %18, %20, %cst_20 {dimension_numbers = #tpu.dot_dimension_numbers<[1], [0], [0], [1], [0, 0, 1, 1], [], []>} : vector<272x64xbf16>, vector<64x32xbf16>, vector<272x32xf32> -> vector<272x32xf32>
    %22 = arith.addf %16, %21 : vector<272x32xf32>
    %23 = arith.truncf %22 : vector<272x32xf32> to vector<272x32xbf16>
    %c0_21 = arith.constant 0 : index
    %c0_22 = arith.constant 0 : index
    %c0_23 = arith.constant 0 : index
    %24 = vector.load %arg3[%c0_21, %c0_22, %c0_23] : memref<1x272x32xbf16, #tpu.memory_space<vmem>>, vector<1x272x32xbf16>
    %25 = vector.shape_cast %24 : vector<1x272x32xbf16> to vector<272x32xbf16>
    %26 = vector.shape_cast %23 : vector<272x32xbf16> to vector<1x272x32xbf16>
    tpu.vector_store %arg3[%c0_21, %c0_22, %c0_23], %26 {strides = array<i32>} : memref<1x272x32xbf16, #tpu.memory_space<vmem>>, vector<1x272x32xbf16>,
    %27 = tpu.iota {dimensions = array<i32: 0>} : vector<272x1xi32>
    %c17_i32 = arith.constant 17 : i32
    %c0_i32 = arith.constant 0 : i32
    %28 = arith.cmpi eq, %c17_i32, %c0_i32 : i32
    %c1_i32 = arith.constant 1 : i32
    %29 = arith.select %28, %c1_i32, %c17_i32 : i32
    %30 = vector.broadcast %29 : i32 to vector<272x1xi32>
    %31 = arith.remsi %27, %30 : vector<272x1xi32>
    %c0_i32_24 = arith.constant 0 : i32
    %32 = vector.broadcast %c0_i32_24 : i32 to vector<272x1xi32>
    %33 = arith.cmpi ne, %31, %32 : vector<272x1xi32>
    %c0_i32_25 = arith.constant 0 : i32
    %34 = vector.broadcast %c0_i32_25 : i32 to vector<272x1xi32>
    %35 = arith.cmpi slt, %31, %34 : vector<272x1xi32>
    %c0_i32_26 = arith.constant 0 : i32
    %36 = arith.cmpi slt, %29, %c0_i32_26 : i32
    %37 = vector.broadcast %36 : i1 to vector<272x1xi1>
    %38 = vector.broadcast %37 : vector<272x1xi1> to vector<272x1xi1>
    %39 = arith.xori %35, %38 : vector<272x1xi1>
    %40 = arith.andi %39, %33 : vector<272x1xi1>
    %41 = vector.broadcast %29 : i32 to vector<272x1xi32>
    %42 = arith.addi %31, %41 : vector<272x1xi32>
    %43 = arith.select %40, %42, %31 : vector<272x1xi1>, vector<272x1xi32>
    %c16_i32 = arith.constant 16 : i32
    %44 = vector.broadcast %c16_i32 : i32 to vector<272x1xi32>
    %45 = arith.cmpi slt, %43, %44 : vector<272x1xi32>
    %cst_27 = arith.constant 0.000000e+00 : f32
    %46 = vector.shape_cast %45 : vector<272x1xi1> to vector<272x1xi1>
    %47 = vector.broadcast %46 : vector<272x1xi1> to vector<272x32xi1>
    %48 = vector.broadcast %cst_27 : f32 to vector<272x32xf32>
    %49 = arith.select %47, %22, %48 : vector<272x32xi1>, vector<272x32xf32>
    %cst_28 = arith.constant dense<0.000000e+00> : vector<32xf32>
    %50 = vector.multi_reduction <add>, %49, %cst_28 [0] : vector<272x32xf32> to vector<32xf32>
    %51 = vector.shape_cast %50 : vector<32xf32> to vector<1x32xf32>
    %c0_29 = arith.constant 0 : index
    %c0_30 = arith.constant 0 : index
    %c0_31 = arith.constant 0 : index
    %52 = vector.load %arg4[%c0_29, %c0_30, %c0_31] : memref<1x1x32xf32, #tpu.memory_space<vmem>>, vector<1x1x32xf32>
    %53 = vector.shape_cast %52 : vector<1x1x32xf32> to vector<1x32xf32>
    %54 = vector.shape_cast %51 : vector<1x32xf32> to vector<1x1x32xf32>
    tpu.vector_store %arg4[%c0_29, %c0_30, %c0_31], %54 {strides = array<i32>} : memref<1x1x32xf32, #tpu.memory_space<vmem>>, vector<1x1x32xf32>,
    %55 = arith.mulf %49, %49 : vector<272x32xf32>
    %cst_32 = arith.constant dense<0.000000e+00> : vector<32xf32>
    %56 = vector.multi_reduction <add>, %55, %cst_32 [0] : vector<272x32xf32> to vector<32xf32>
    %57 = vector.shape_cast %56 : vector<32xf32> to vector<1x32xf32>
    %c0_33 = arith.constant 0 : index
    %c0_34 = arith.constant 0 : index
    %c0_35 = arith.constant 0 : index
    %58 = vector.load %arg5[%c0_33, %c0_34, %c0_35] : memref<1x1x32xf32, #tpu.memory_space<vmem>>, vector<1x1x32xf32>
    %59 = vector.shape_cast %58 : vector<1x1x32xf32> to vector<1x32xf32>
    %60 = vector.shape_cast %57 : vector<1x32xf32> to vector<1x1x32xf32>
    tpu.vector_store %arg5[%c0_33, %c0_34, %c0_35], %60 {strides = array<i32>} : memref<1x1x32xf32, #tpu.memory_space<vmem>>, vector<1x1x32xf32>,
    return
  }
  func.func @transform_0(%arg0: i32) -> (i32, i32, i32) {
    %c0_i32 = arith.constant 0 : i32
    %c0_i32_0 = arith.constant 0 : i32
    %c0_i32_1 = arith.constant 0 : i32
    return %arg0, %c0_i32, %c0_i32_0 : i32, i32, i32
  }
  func.func @transform_1(%arg0: i32) -> (i32, i32, i32) {
    %c0_i32 = arith.constant 0 : i32
    %c0_i32_0 = arith.constant 0 : i32
    %c0_i32_1 = arith.constant 0 : i32
    %c0_i32_2 = arith.constant 0 : i32
    return %c0_i32, %c0_i32_0, %c0_i32_1 : i32, i32, i32
  }
  func.func @transform_2(%arg0: i32) -> (i32, i32, i32) {
    %c0_i32 = arith.constant 0 : i32
    %c0_i32_0 = arith.constant 0 : i32
    %c0_i32_1 = arith.constant 0 : i32
    return %arg0, %c0_i32, %c0_i32_0 : i32, i32, i32
  }
  func.func @transform_3(%arg0: i32) -> (i32, i32, i32) {
    %c0_i32 = arith.constant 0 : i32
    %c0_i32_0 = arith.constant 0 : i32
    %c0_i32_1 = arith.constant 0 : i32
    return %arg0, %c0_i32, %c0_i32_0 : i32, i32, i32
  }
  func.func @transform_4(%arg0: i32) -> (i32, i32, i32) {
    %c0_i32 = arith.constant 0 : i32
    %c0_i32_0 = arith.constant 0 : i32
    %c0_i32_1 = arith.constant 0 : i32
    return %arg0, %c0_i32, %c0_i32_0 : i32, i32, i32
  }
}

module attributes {stable_mosaic.version = 11 : i64} {
  func.func @_conv_s2d_kernel(%arg0: i32, %arg1: memref<1x89x128xbf16, #tpu.memory_space<vmem>>, %arg2: memref<4x128x64xbf16, #tpu.memory_space<vmem>>, %arg3: memref<1x72x64xbf16, #tpu.memory_space<vmem>>, %arg4: memref<1x1x64xf32, #tpu.memory_space<vmem>>, %arg5: memref<1x1x64xf32, #tpu.memory_space<vmem>>) attributes {dimension_semantics = [#tpu.dimension_semantics<parallel>], iteration_bounds = array<i64: 2>, scalar_prefetch = 0 : i64, scratch_operands = 0 : i64, tpu.core_type = #tpu.core_type<tc>, window_params = [{transform_indices = @transform_0, window_bounds = array<i64: 1, 89, 128>}, {pipeline_mode = #tpu.pipeline_mode<synchronous>, transform_indices = @transform_1, window_bounds = array<i64: 4, 128, 64>}, {transform_indices = @transform_2, window_bounds = array<i64: 1, 72, 64>}, {transform_indices = @transform_3, window_bounds = array<i64: 1, 1, 64>}, {transform_indices = @transform_4, window_bounds = array<i64: 1, 1, 64>}]} {
    %c0 = arith.constant 0 : index
    %c0_0 = arith.constant 0 : index
    %c0_1 = arith.constant 0 : index
    %0 = vector.load %arg1[%c0, %c0_0, %c0_1] : memref<1x89x128xbf16, #tpu.memory_space<vmem>>, vector<1x72x128xbf16>
    %1 = vector.shape_cast %0 : vector<1x72x128xbf16> to vector<72x128xbf16>
    %c0_2 = arith.constant 0 : index
    %c0_3 = arith.constant 0 : index
    %c0_4 = arith.constant 0 : index
    %2 = vector.load %arg2[%c0_2, %c0_3, %c0_4] : memref<4x128x64xbf16, #tpu.memory_space<vmem>>, vector<1x128x64xbf16>
    %3 = vector.shape_cast %2 : vector<1x128x64xbf16> to vector<128x64xbf16>
    %cst = arith.constant dense<0.000000e+00> : vector<72x64xf32>
    %4 = tpu.matmul %1, %3, %cst {dimension_numbers = #tpu.dot_dimension_numbers<[1], [0], [0], [1], [0, 0, 1, 1], [], []>} : vector<72x128xbf16>, vector<128x64xbf16>, vector<72x64xf32> -> vector<72x64xf32>
    %c0_5 = arith.constant 0 : index
    %c1 = arith.constant 1 : index
    %c0_6 = arith.constant 0 : index
    %5 = vector.load %arg1[%c0_5, %c1, %c0_6] : memref<1x89x128xbf16, #tpu.memory_space<vmem>>, vector<1x72x128xbf16>
    %6 = vector.shape_cast %5 : vector<1x72x128xbf16> to vector<72x128xbf16>
    %c1_7 = arith.constant 1 : index
    %c0_8 = arith.constant 0 : index
    %c0_9 = arith.constant 0 : index
    %7 = vector.load %arg2[%c1_7, %c0_8, %c0_9] : memref<4x128x64xbf16, #tpu.memory_space<vmem>>, vector<1x128x64xbf16>
    %8 = vector.shape_cast %7 : vector<1x128x64xbf16> to vector<128x64xbf16>
    %cst_10 = arith.constant dense<0.000000e+00> : vector<72x64xf32>
    %9 = tpu.matmul %6, %8, %cst_10 {dimension_numbers = #tpu.dot_dimension_numbers<[1], [0], [0], [1], [0, 0, 1, 1], [], []>} : vector<72x128xbf16>, vector<128x64xbf16>, vector<72x64xf32> -> vector<72x64xf32>
    %10 = arith.addf %4, %9 : vector<72x64xf32>
    %c0_11 = arith.constant 0 : index
    %c9 = arith.constant 9 : index
    %c0_12 = arith.constant 0 : index
    %11 = vector.load %arg1[%c0_11, %c9, %c0_12] : memref<1x89x128xbf16, #tpu.memory_space<vmem>>, vector<1x72x128xbf16>
    %12 = vector.shape_cast %11 : vector<1x72x128xbf16> to vector<72x128xbf16>
    %c2 = arith.constant 2 : index
    %c0_13 = arith.constant 0 : index
    %c0_14 = arith.constant 0 : index
    %13 = vector.load %arg2[%c2, %c0_13, %c0_14] : memref<4x128x64xbf16, #tpu.memory_space<vmem>>, vector<1x128x64xbf16>
    %14 = vector.shape_cast %13 : vector<1x128x64xbf16> to vector<128x64xbf16>
    %cst_15 = arith.constant dense<0.000000e+00> : vector<72x64xf32>
    %15 = tpu.matmul %12, %14, %cst_15 {dimension_numbers = #tpu.dot_dimension_numbers<[1], [0], [0], [1], [0, 0, 1, 1], [], []>} : vector<72x128xbf16>, vector<128x64xbf16>, vector<72x64xf32> -> vector<72x64xf32>
    %16 = arith.addf %10, %15 : vector<72x64xf32>
    %c0_16 = arith.constant 0 : index
    %c10 = arith.constant 10 : index
    %c0_17 = arith.constant 0 : index
    %17 = vector.load %arg1[%c0_16, %c10, %c0_17] : memref<1x89x128xbf16, #tpu.memory_space<vmem>>, vector<1x72x128xbf16>
    %18 = vector.shape_cast %17 : vector<1x72x128xbf16> to vector<72x128xbf16>
    %c3 = arith.constant 3 : index
    %c0_18 = arith.constant 0 : index
    %c0_19 = arith.constant 0 : index
    %19 = vector.load %arg2[%c3, %c0_18, %c0_19] : memref<4x128x64xbf16, #tpu.memory_space<vmem>>, vector<1x128x64xbf16>
    %20 = vector.shape_cast %19 : vector<1x128x64xbf16> to vector<128x64xbf16>
    %cst_20 = arith.constant dense<0.000000e+00> : vector<72x64xf32>
    %21 = tpu.matmul %18, %20, %cst_20 {dimension_numbers = #tpu.dot_dimension_numbers<[1], [0], [0], [1], [0, 0, 1, 1], [], []>} : vector<72x128xbf16>, vector<128x64xbf16>, vector<72x64xf32> -> vector<72x64xf32>
    %22 = arith.addf %16, %21 : vector<72x64xf32>
    %23 = arith.truncf %22 : vector<72x64xf32> to vector<72x64xbf16>
    %c0_21 = arith.constant 0 : index
    %c0_22 = arith.constant 0 : index
    %c0_23 = arith.constant 0 : index
    %24 = vector.load %arg3[%c0_21, %c0_22, %c0_23] : memref<1x72x64xbf16, #tpu.memory_space<vmem>>, vector<1x72x64xbf16>
    %25 = vector.shape_cast %24 : vector<1x72x64xbf16> to vector<72x64xbf16>
    %26 = vector.shape_cast %23 : vector<72x64xbf16> to vector<1x72x64xbf16>
    tpu.vector_store %arg3[%c0_21, %c0_22, %c0_23], %26 {strides = array<i32>} : memref<1x72x64xbf16, #tpu.memory_space<vmem>>, vector<1x72x64xbf16>,
    %27 = tpu.iota {dimensions = array<i32: 0>} : vector<72x1xi32>
    %c9_i32 = arith.constant 9 : i32
    %c0_i32 = arith.constant 0 : i32
    %28 = arith.cmpi eq, %c9_i32, %c0_i32 : i32
    %c1_i32 = arith.constant 1 : i32
    %29 = arith.select %28, %c1_i32, %c9_i32 : i32
    %30 = vector.broadcast %29 : i32 to vector<72x1xi32>
    %31 = arith.remsi %27, %30 : vector<72x1xi32>
    %c0_i32_24 = arith.constant 0 : i32
    %32 = vector.broadcast %c0_i32_24 : i32 to vector<72x1xi32>
    %33 = arith.cmpi ne, %31, %32 : vector<72x1xi32>
    %c0_i32_25 = arith.constant 0 : i32
    %34 = vector.broadcast %c0_i32_25 : i32 to vector<72x1xi32>
    %35 = arith.cmpi slt, %31, %34 : vector<72x1xi32>
    %c0_i32_26 = arith.constant 0 : i32
    %36 = arith.cmpi slt, %29, %c0_i32_26 : i32
    %37 = vector.broadcast %36 : i1 to vector<72x1xi1>
    %38 = vector.broadcast %37 : vector<72x1xi1> to vector<72x1xi1>
    %39 = arith.xori %35, %38 : vector<72x1xi1>
    %40 = arith.andi %39, %33 : vector<72x1xi1>
    %41 = vector.broadcast %29 : i32 to vector<72x1xi32>
    %42 = arith.addi %31, %41 : vector<72x1xi32>
    %43 = arith.select %40, %42, %31 : vector<72x1xi1>, vector<72x1xi32>
    %c8_i32 = arith.constant 8 : i32
    %44 = vector.broadcast %c8_i32 : i32 to vector<72x1xi32>
    %45 = arith.cmpi slt, %43, %44 : vector<72x1xi32>
    %cst_27 = arith.constant 0.000000e+00 : f32
    %46 = vector.shape_cast %45 : vector<72x1xi1> to vector<72x1xi1>
    %47 = vector.broadcast %46 : vector<72x1xi1> to vector<72x64xi1>
    %48 = vector.broadcast %cst_27 : f32 to vector<72x64xf32>
    %49 = arith.select %47, %22, %48 : vector<72x64xi1>, vector<72x64xf32>
    %cst_28 = arith.constant dense<0.000000e+00> : vector<64xf32>
    %50 = vector.multi_reduction <add>, %49, %cst_28 [0] : vector<72x64xf32> to vector<64xf32>
    %51 = vector.shape_cast %50 : vector<64xf32> to vector<1x64xf32>
    %c0_29 = arith.constant 0 : index
    %c0_30 = arith.constant 0 : index
    %c0_31 = arith.constant 0 : index
    %52 = vector.load %arg4[%c0_29, %c0_30, %c0_31] : memref<1x1x64xf32, #tpu.memory_space<vmem>>, vector<1x1x64xf32>
    %53 = vector.shape_cast %52 : vector<1x1x64xf32> to vector<1x64xf32>
    %54 = vector.shape_cast %51 : vector<1x64xf32> to vector<1x1x64xf32>
    tpu.vector_store %arg4[%c0_29, %c0_30, %c0_31], %54 {strides = array<i32>} : memref<1x1x64xf32, #tpu.memory_space<vmem>>, vector<1x1x64xf32>,
    %55 = arith.mulf %49, %49 : vector<72x64xf32>
    %cst_32 = arith.constant dense<0.000000e+00> : vector<64xf32>
    %56 = vector.multi_reduction <add>, %55, %cst_32 [0] : vector<72x64xf32> to vector<64xf32>
    %57 = vector.shape_cast %56 : vector<64xf32> to vector<1x64xf32>
    %c0_33 = arith.constant 0 : index
    %c0_34 = arith.constant 0 : index
    %c0_35 = arith.constant 0 : index
    %58 = vector.load %arg5[%c0_33, %c0_34, %c0_35] : memref<1x1x64xf32, #tpu.memory_space<vmem>>, vector<1x1x64xf32>
    %59 = vector.shape_cast %58 : vector<1x1x64xf32> to vector<1x64xf32>
    %60 = vector.shape_cast %57 : vector<1x64xf32> to vector<1x1x64xf32>
    tpu.vector_store %arg5[%c0_33, %c0_34, %c0_35], %60 {strides = array<i32>} : memref<1x1x64xf32, #tpu.memory_space<vmem>>, vector<1x1x64xf32>,
    return
  }
  func.func @transform_0(%arg0: i32) -> (i32, i32, i32) {
    %c0_i32 = arith.constant 0 : i32
    %c0_i32_0 = arith.constant 0 : i32
    %c0_i32_1 = arith.constant 0 : i32
    return %arg0, %c0_i32, %c0_i32_0 : i32, i32, i32
  }
  func.func @transform_1(%arg0: i32) -> (i32, i32, i32) {
    %c0_i32 = arith.constant 0 : i32
    %c0_i32_0 = arith.constant 0 : i32
    %c0_i32_1 = arith.constant 0 : i32
    %c0_i32_2 = arith.constant 0 : i32
    return %c0_i32, %c0_i32_0, %c0_i32_1 : i32, i32, i32
  }
  func.func @transform_2(%arg0: i32) -> (i32, i32, i32) {
    %c0_i32 = arith.constant 0 : i32
    %c0_i32_0 = arith.constant 0 : i32
    %c0_i32_1 = arith.constant 0 : i32
    return %arg0, %c0_i32, %c0_i32_0 : i32, i32, i32
  }
  func.func @transform_3(%arg0: i32) -> (i32, i32, i32) {
    %c0_i32 = arith.constant 0 : i32
    %c0_i32_0 = arith.constant 0 : i32
    %c0_i32_1 = arith.constant 0 : i32
    return %arg0, %c0_i32, %c0_i32_0 : i32, i32, i32
  }
  func.func @transform_4(%arg0: i32) -> (i32, i32, i32) {
    %c0_i32 = arith.constant 0 : i32
    %c0_i32_0 = arith.constant 0 : i32
    %c0_i32_1 = arith.constant 0 : i32
    return %arg0, %c0_i32, %c0_i32_0 : i32, i32, i32
  }
}

module attributes {stable_mosaic.version = 11 : i64} {
  func.func @_conv_s2d_kernel(%arg0: i32, %arg1: memref<1x33x256xbf16, #tpu.memory_space<vmem>>, %arg2: memref<4x256x128xbf16, #tpu.memory_space<vmem>>, %arg3: memref<1x20x128xbf16, #tpu.memory_space<vmem>>, %arg4: memref<1x1x128xf32, #tpu.memory_space<vmem>>, %arg5: memref<1x1x128xf32, #tpu.memory_space<vmem>>) attributes {dimension_semantics = [#tpu.dimension_semantics<parallel>], iteration_bounds = array<i64: 2>, scalar_prefetch = 0 : i64, scratch_operands = 0 : i64, tpu.core_type = #tpu.core_type<tc>, window_params = [{transform_indices = @transform_0, window_bounds = array<i64: 1, 33, 256>}, {pipeline_mode = #tpu.pipeline_mode<synchronous>, transform_indices = @transform_1, window_bounds = array<i64: 4, 256, 128>}, {transform_indices = @transform_2, window_bounds = array<i64: 1, 20, 128>}, {transform_indices = @transform_3, window_bounds = array<i64: 1, 1, 128>}, {transform_indices = @transform_4, window_bounds = array<i64: 1, 1, 128>}]} {
    %c0 = arith.constant 0 : index
    %c0_0 = arith.constant 0 : index
    %c0_1 = arith.constant 0 : index
    %0 = vector.load %arg1[%c0, %c0_0, %c0_1] : memref<1x33x256xbf16, #tpu.memory_space<vmem>>, vector<1x20x256xbf16>
    %1 = vector.shape_cast %0 : vector<1x20x256xbf16> to vector<20x256xbf16>
    %c0_2 = arith.constant 0 : index
    %c0_3 = arith.constant 0 : index
    %c0_4 = arith.constant 0 : index
    %2 = vector.load %arg2[%c0_2, %c0_3, %c0_4] : memref<4x256x128xbf16, #tpu.memory_space<vmem>>, vector<1x256x128xbf16>
    %3 = vector.shape_cast %2 : vector<1x256x128xbf16> to vector<256x128xbf16>
    %cst = arith.constant dense<0.000000e+00> : vector<20x128xf32>
    %4 = tpu.matmul %1, %3, %cst {dimension_numbers = #tpu.dot_dimension_numbers<[1], [0], [0], [1], [0, 0, 1, 1], [], []>} : vector<20x256xbf16>, vector<256x128xbf16>, vector<20x128xf32> -> vector<20x128xf32>
    %c0_5 = arith.constant 0 : index
    %c1 = arith.constant 1 : index
    %c0_6 = arith.constant 0 : index
    %5 = vector.load %arg1[%c0_5, %c1, %c0_6] : memref<1x33x256xbf16, #tpu.memory_space<vmem>>, vector<1x20x256xbf16>
    %6 = vector.shape_cast %5 : vector<1x20x256xbf16> to vector<20x256xbf16>
    %c1_7 = arith.constant 1 : index
    %c0_8 = arith.constant 0 : index
    %c0_9 = arith.constant 0 : index
    %7 = vector.load %arg2[%c1_7, %c0_8, %c0_9] : memref<4x256x128xbf16, #tpu.memory_space<vmem>>, vector<1x256x128xbf16>
    %8 = vector.shape_cast %7 : vector<1x256x128xbf16> to vector<256x128xbf16>
    %cst_10 = arith.constant dense<0.000000e+00> : vector<20x128xf32>
    %9 = tpu.matmul %6, %8, %cst_10 {dimension_numbers = #tpu.dot_dimension_numbers<[1], [0], [0], [1], [0, 0, 1, 1], [], []>} : vector<20x256xbf16>, vector<256x128xbf16>, vector<20x128xf32> -> vector<20x128xf32>
    %10 = arith.addf %4, %9 : vector<20x128xf32>
    %c0_11 = arith.constant 0 : index
    %c5 = arith.constant 5 : index
    %c0_12 = arith.constant 0 : index
    %11 = vector.load %arg1[%c0_11, %c5, %c0_12] : memref<1x33x256xbf16, #tpu.memory_space<vmem>>, vector<1x20x256xbf16>
    %12 = vector.shape_cast %11 : vector<1x20x256xbf16> to vector<20x256xbf16>
    %c2 = arith.constant 2 : index
    %c0_13 = arith.constant 0 : index
    %c0_14 = arith.constant 0 : index
    %13 = vector.load %arg2[%c2, %c0_13, %c0_14] : memref<4x256x128xbf16, #tpu.memory_space<vmem>>, vector<1x256x128xbf16>
    %14 = vector.shape_cast %13 : vector<1x256x128xbf16> to vector<256x128xbf16>
    %cst_15 = arith.constant dense<0.000000e+00> : vector<20x128xf32>
    %15 = tpu.matmul %12, %14, %cst_15 {dimension_numbers = #tpu.dot_dimension_numbers<[1], [0], [0], [1], [0, 0, 1, 1], [], []>} : vector<20x256xbf16>, vector<256x128xbf16>, vector<20x128xf32> -> vector<20x128xf32>
    %16 = arith.addf %10, %15 : vector<20x128xf32>
    %c0_16 = arith.constant 0 : index
    %c6 = arith.constant 6 : index
    %c0_17 = arith.constant 0 : index
    %17 = vector.load %arg1[%c0_16, %c6, %c0_17] : memref<1x33x256xbf16, #tpu.memory_space<vmem>>, vector<1x20x256xbf16>
    %18 = vector.shape_cast %17 : vector<1x20x256xbf16> to vector<20x256xbf16>
    %c3 = arith.constant 3 : index
    %c0_18 = arith.constant 0 : index
    %c0_19 = arith.constant 0 : index
    %19 = vector.load %arg2[%c3, %c0_18, %c0_19] : memref<4x256x128xbf16, #tpu.memory_space<vmem>>, vector<1x256x128xbf16>
    %20 = vector.shape_cast %19 : vector<1x256x128xbf16> to vector<256x128xbf16>
    %cst_20 = arith.constant dense<0.000000e+00> : vector<20x128xf32>
    %21 = tpu.matmul %18, %20, %cst_20 {dimension_numbers = #tpu.dot_dimension_numbers<[1], [0], [0], [1], [0, 0, 1, 1], [], []>} : vector<20x256xbf16>, vector<256x128xbf16>, vector<20x128xf32> -> vector<20x128xf32>
    %22 = arith.addf %16, %21 : vector<20x128xf32>
    %23 = arith.truncf %22 : vector<20x128xf32> to vector<20x128xbf16>
    %c0_21 = arith.constant 0 : index
    %c0_22 = arith.constant 0 : index
    %c0_23 = arith.constant 0 : index
    %24 = vector.load %arg3[%c0_21, %c0_22, %c0_23] : memref<1x20x128xbf16, #tpu.memory_space<vmem>>, vector<1x20x128xbf16>
    %25 = vector.shape_cast %24 : vector<1x20x128xbf16> to vector<20x128xbf16>
    %26 = vector.shape_cast %23 : vector<20x128xbf16> to vector<1x20x128xbf16>
    tpu.vector_store %arg3[%c0_21, %c0_22, %c0_23], %26 {strides = array<i32>} : memref<1x20x128xbf16, #tpu.memory_space<vmem>>, vector<1x20x128xbf16>,
    %27 = tpu.iota {dimensions = array<i32: 0>} : vector<20x1xi32>
    %c5_i32 = arith.constant 5 : i32
    %c0_i32 = arith.constant 0 : i32
    %28 = arith.cmpi eq, %c5_i32, %c0_i32 : i32
    %c1_i32 = arith.constant 1 : i32
    %29 = arith.select %28, %c1_i32, %c5_i32 : i32
    %30 = vector.broadcast %29 : i32 to vector<20x1xi32>
    %31 = arith.remsi %27, %30 : vector<20x1xi32>
    %c0_i32_24 = arith.constant 0 : i32
    %32 = vector.broadcast %c0_i32_24 : i32 to vector<20x1xi32>
    %33 = arith.cmpi ne, %31, %32 : vector<20x1xi32>
    %c0_i32_25 = arith.constant 0 : i32
    %34 = vector.broadcast %c0_i32_25 : i32 to vector<20x1xi32>
    %35 = arith.cmpi slt, %31, %34 : vector<20x1xi32>
    %c0_i32_26 = arith.constant 0 : i32
    %36 = arith.cmpi slt, %29, %c0_i32_26 : i32
    %37 = vector.broadcast %36 : i1 to vector<20x1xi1>
    %38 = vector.broadcast %37 : vector<20x1xi1> to vector<20x1xi1>
    %39 = arith.xori %35, %38 : vector<20x1xi1>
    %40 = arith.andi %39, %33 : vector<20x1xi1>
    %41 = vector.broadcast %29 : i32 to vector<20x1xi32>
    %42 = arith.addi %31, %41 : vector<20x1xi32>
    %43 = arith.select %40, %42, %31 : vector<20x1xi1>, vector<20x1xi32>
    %c4_i32 = arith.constant 4 : i32
    %44 = vector.broadcast %c4_i32 : i32 to vector<20x1xi32>
    %45 = arith.cmpi slt, %43, %44 : vector<20x1xi32>
    %cst_27 = arith.constant 0.000000e+00 : f32
    %46 = vector.shape_cast %45 : vector<20x1xi1> to vector<20x1xi1>
    %47 = vector.broadcast %46 : vector<20x1xi1> to vector<20x128xi1>
    %48 = vector.broadcast %cst_27 : f32 to vector<20x128xf32>
    %49 = arith.select %47, %22, %48 : vector<20x128xi1>, vector<20x128xf32>
    %cst_28 = arith.constant dense<0.000000e+00> : vector<128xf32>
    %50 = vector.multi_reduction <add>, %49, %cst_28 [0] : vector<20x128xf32> to vector<128xf32>
    %51 = vector.shape_cast %50 : vector<128xf32> to vector<1x128xf32>
    %c0_29 = arith.constant 0 : index
    %c0_30 = arith.constant 0 : index
    %c0_31 = arith.constant 0 : index
    %52 = vector.load %arg4[%c0_29, %c0_30, %c0_31] : memref<1x1x128xf32, #tpu.memory_space<vmem>>, vector<1x1x128xf32>
    %53 = vector.shape_cast %52 : vector<1x1x128xf32> to vector<1x128xf32>
    %54 = vector.shape_cast %51 : vector<1x128xf32> to vector<1x1x128xf32>
    tpu.vector_store %arg4[%c0_29, %c0_30, %c0_31], %54 {strides = array<i32>} : memref<1x1x128xf32, #tpu.memory_space<vmem>>, vector<1x1x128xf32>,
    %55 = arith.mulf %49, %49 : vector<20x128xf32>
    %cst_32 = arith.constant dense<0.000000e+00> : vector<128xf32>
    %56 = vector.multi_reduction <add>, %55, %cst_32 [0] : vector<20x128xf32> to vector<128xf32>
    %57 = vector.shape_cast %56 : vector<128xf32> to vector<1x128xf32>
    %c0_33 = arith.constant 0 : index
    %c0_34 = arith.constant 0 : index
    %c0_35 = arith.constant 0 : index
    %58 = vector.load %arg5[%c0_33, %c0_34, %c0_35] : memref<1x1x128xf32, #tpu.memory_space<vmem>>, vector<1x1x128xf32>
    %59 = vector.shape_cast %58 : vector<1x1x128xf32> to vector<1x128xf32>
    %60 = vector.shape_cast %57 : vector<1x128xf32> to vector<1x1x128xf32>
    tpu.vector_store %arg5[%c0_33, %c0_34, %c0_35], %60 {strides = array<i32>} : memref<1x1x128xf32, #tpu.memory_space<vmem>>, vector<1x1x128xf32>,
    return
  }
  func.func @transform_0(%arg0: i32) -> (i32, i32, i32) {
    %c0_i32 = arith.constant 0 : i32
    %c0_i32_0 = arith.constant 0 : i32
    %c0_i32_1 = arith.constant 0 : i32
    return %arg0, %c0_i32, %c0_i32_0 : i32, i32, i32
  }
  func.func @transform_1(%arg0: i32) -> (i32, i32, i32) {
    %c0_i32 = arith.constant 0 : i32
    %c0_i32_0 = arith.constant 0 : i32
    %c0_i32_1 = arith.constant 0 : i32
    %c0_i32_2 = arith.constant 0 : i32
    return %c0_i32, %c0_i32_0, %c0_i32_1 : i32, i32, i32
  }
  func.func @transform_2(%arg0: i32) -> (i32, i32, i32) {
    %c0_i32 = arith.constant 0 : i32
    %c0_i32_0 = arith.constant 0 : i32
    %c0_i32_1 = arith.constant 0 : i32
    return %arg0, %c0_i32, %c0_i32_0 : i32, i32, i32
  }
  func.func @transform_3(%arg0: i32) -> (i32, i32, i32) {
    %c0_i32 = arith.constant 0 : i32
    %c0_i32_0 = arith.constant 0 : i32
    %c0_i32_1 = arith.constant 0 : i32
    return %arg0, %c0_i32, %c0_i32_0 : i32, i32, i32
  }
  func.func @transform_4(%arg0: i32) -> (i32, i32, i32) {
    %c0_i32 = arith.constant 0 : i32
    %c0_i32_0 = arith.constant 0 : i32
    %c0_i32_1 = arith.constant 0 : i32
    return %arg0, %c0_i32, %c0_i32_0 : i32, i32, i32
  }
}

</mosaic_0001>

<bundles_post_ra>
// kernel: discriminator_forward.4
= control target key start
LH: loop header
LB: loop body
LE: loop exit
PB: predicated region body
PF: predicated region fallthrough
CT: control target
= control target key end

     0   :  { %s8320_s9 = smov 0   ;;  %s9932_s0 = inlined_call_operand.vmem [shape: bf16[2,1097,16], index: 0, kind: input, shape index: {}]   ;;  %s9933_s1 = inlined_call_operand.vmem [shape: bf16[4,16,16], index: 1, kind: input, shape index: {}]   ;;  %s9934_s2 = inlined_call_operand.vmem [shape: bf16[2,1056,16], index: 2, kind: output, shape index: {}]  }
   0x1 LB: > { %s6662_s10 = sadd.s32 4294967295, %s8303_s9   ;;  %p6666_p0 = scmp.ge.s32.totalorder %s8303_s9, 1  ;;  %s8303_s9 = sphi %s8320_s9, %s12_s9  }
   0x2   : > { %p112_p1 = scmp.lt.s32.totalorder %s8303_s9, 3 }
   0x4   : > { %p113_p2 = pnand %p6666_p0, %p112_p1 }
   0x6   : > { %116 = sbr.rel (%p113_p2) target bundleno = 756 (0x2f4), region = 28 }
   0xb   : > { %v8158_v0 = vld [vmem:[%s9933_s1] sm:$0xff]   ;;  %p134_p3 = scmp.lt.s32.totalorder %s6662_s10, 1  ;;  %v8159_v1 = vld [vmem:[%s9933_s1 + $0x8] sm:$0xff]   ;;  %v8162_v2 = vld [vmem:[%s9933_s1 + $0x10] sm:$0xff]   ;;  %vm1155_vm0 = vcmask 130048   ;;  %vm4519_vm2 = vcmask 1046528  }
   0xc   : > { %7746 = vmatprep.subr.bf16.mxu1 %v8158_v0  ;;  %7612 = vmatprep.subr.bf16.mxu0 %v8159_v1  ;;  %v8164_v3 = vld [vmem:[%s9933_s1 + $0x18] sm:$0xff]   ;;  %vm616_vm1 = vsmask.f32 7424  ;;  %vm6474_vm3 = vcmask 125952  }
   0xd   : > { %s10154_s10 = smov (!%p134_p3, %s6662_s10), 1  ;;  %7747 = vmatpush3.bf16.msra.mxu1 %v8158_v0  ;;  %7613 = vmatpush3.bf16.msra.mxu0 %v8159_v1 }
   0xe   : > { %s8148_s17 = smul.u32 552, %s10154_s10  ;;  %7880 = vmatprep.subr.bf16.mxu0 %v8162_v2  ;;  %8014 = vmatprep.subr.bf16.mxu1 %v8164_v3 }
   0xf   : > { %s8149_s23 = smul.u32 528, %s10154_s10 }
  0x10   : > { %s8346_s22 = scalar_lea.vmem %s9932_s0, %s8148_s17 }
  0x11   : > { %v8160_v4 = vld [vmem:[%s8346_s22] sm:$0xff]   ;;  %v8161_v5 = vld [vmem:[%s8346_s22 + $0x8] sm:$0xff]   ;;  %v8163_v10 = vld [vmem:[%s8346_s22 + $0x10] sm:$0xff]   ;;  %s9366_s26 = scalar_lea.vmem %s9934_s2, %s8149_s23 }
  0x12   : > { %7748 = vmatprep.mubr.msk.bf16.mxu1 %vm1155_vm0, %v8160_v4  ;;  %v618_v6 = vshrl.u32 %v8160_v4, 16  ;;  %v620_v7 = vshll.u32 %v8160_v4, 16  ;;  %v625_v8 = vshll.u32 %v8161_v5, 16  ;;  %v629_v9 = vshrl.u32 %v8161_v5, 16  ;;  %v8165_v11 = vld [vmem:[%s8346_s22 + $0x18] sm:$0xff]   ;;  %v8166_v13 = vld [vmem:[%s8346_s22 + $0x20] sm:$0xff]  }
  0x13   : > { %7749 = vmatmul.mubr.msk.bf16.vlgmr.msra.gmra.mxu1 %vm1155_vm0, %v8161_v5  ;;  %v633_v15 = vshll.u32 %v8163_v10, 16  ;;  %v637_v16 = vshrl.u32 %v8163_v10, 16  ;;  %v641_v17 = vshll.u32 %v8165_v11, 16  ;;  %v649_v19 = vshll.u32 %v8166_v13, 16  ;;  %v8167_v24 = vld [vmem:[%s8346_s22 + $0x28] sm:$0xff]   ;;  %v8168_v31 = vld [vmem:[%s8346_s22 + $0x30] sm:$0xff]  }
  0x14   : > { %v622_v12 = vrot.slane %v620_v7, 1  ;;  %8015 = vmatpush3.bf16.msra.mxu1 %v8164_v3  ;;  %v627_v14 = vrot.slane %v625_v8, 1  ;;  %7752 = vmatprep.mubr.msk.bf16.mxu1 %vm1155_vm0, %v8163_v10  ;;  %v645_v23 = vshrl.u32 %v8165_v11, 16  ;;  %v653_v26 = vshrl.u32 %v8166_v13, 16  ;;  %v8169_v36 = vld [vmem:[%s8346_s22 + $0x38] sm:$0xff]   ;;  %v8170_v44 = vld [vmem:[%s8346_s22 + $0x40] sm:$0xff]  }
  0x15   : > { %v635_v21 = vrot.slane %v633_v15, 1  ;;  %v643_v22 = vrot.slane %v641_v17, 1  ;;  %v657_v29 = vshll.u32 %v8167_v24, 16  ;;  %v651_v30 = vrot.slane %v649_v19, 1  ;;  %v8171_v48 = vld [vmem:[%s8346_s22 + $0x48] sm:$0xff]   ;;  %v8172_v56 = vld [vmem:[%s8346_s22 + $0x50] sm:$0xff]  }
  0x16   : > { %v623_v18 = vor.u32 %v622_v12, %v618_v6  ;;  %v631_v20 = vor.u32 %v629_v9, %v627_v14  ;;  %v665_v37 = vshll.u32 %v8168_v31, 16  ;;  %v661_v39 = vshrl.u32 %v8167_v24, 16  ;;  %v8173_v60 = vld [vmem:[%s8346_s22 + $0x58] sm:$0xff]   ;;  %v8174_v4 = vld [vmem:[%s8346_s22 + $0x60] sm:$0xff]   ;;  %v8175_v8 = vld [vmem:[%s8346_s22 + $0x68] sm:$0xff]  }
  0x17   : > { %v639_v28 = vor.u32 %v637_v16, %v635_v21  ;;  %v647_v33 = vor.u32 %v645_v23, %v643_v22  ;;  %v655_v34 = vor.u32 %v653_v26, %v651_v30  ;;  %v659_v35 = vrot.slane %v657_v29, 1  ;;  %v8176_v16 = vld [vmem:[%s8346_s22 + $0x70] sm:$0xff]  }
  0x18   : > { %v628_v25 = vsel %vm616_vm1, %v623_v18, %v627_v14  ;;  %v636_v27 = vsel %vm616_vm1, %v631_v20, %v635_v21  ;;  %v669_v41 = vshrl.u32 %v8168_v31, 16  ;;  %v673_v42 = vshll.u32 %v8169_v36, 16  ;;  %v8177_v20 = vld [vmem:[%s8346_s22 + $0x78] sm:$0xff]  }
  0x19   : > { %7614 = vmatprep.mubr.msk.bf16.mxu0 %vm1155_vm0, %v628_v25  ;;  %v644_v32 = vsel %vm616_vm1, %v639_v28, %v643_v22  ;;  %v652_v38 = vsel %vm616_vm1, %v647_v33, %v651_v30  ;;  %v660_v40 = vsel %vm616_vm1, %v655_v34, %v659_v35  ;;  %v667_v43 = vrot.slane %v665_v37, 1  ;;  %v8178_v28 = vld [vmem:[%s8346_s22 + $0x80] sm:$0xff]  }
  0x1a   : > { %7615 = vmatmul.mubr.msk.bf16.vlgmr.msra.gmra.mxu0 %vm1155_vm0, %v636_v27  ;;  %v663_v45 = vor.u32 %v661_v39, %v659_v35  ;;  %v675_v47 = vrot.slane %v673_v42, 1  ;;  %v681_v49 = vshll.u32 %v8170_v44, 16  ;;  %v677_v51 = vshrl.u32 %v8169_v36, 16 }
  0x1b   : > { %7881 = vmatpush3.bf16.msra.mxu0 %v8162_v2  ;;  %7753 = vmatmul.mubr.msk.bf16.gmra.mxu1 %vm1155_vm0, %v8165_v11  ;;  %v671_v46 = vor.u32 %v669_v41, %v667_v43  ;;  %v685_v53 = vshrl.u32 %v8170_v44, 16  ;;  %v689_v54 = vshll.u32 %v8171_v48, 16  ;;  %v697_v61 = vshll.u32 %v8172_v56, 16 }
  0x1c   : > { %7618 = vmatprep.mubr.msk.bf16.mxu0 %vm1155_vm0, %v644_v32  ;;  %7756 = vmatprep.mubr.msk.bf16.mxu1 %vm1155_vm0, %v8166_v13  ;;  %v668_v50 = vsel %vm616_vm1, %v663_v45, %v667_v43  ;;  %v683_v55 = vrot.slane %v681_v49, 1  ;;  %v679_v57 = vor.u32 %v677_v51, %v675_v47  ;;  %v693_v63 = vshrl.u32 %v8171_v48, 16  ;;  %v8179_v32 = vld [vmem:[%s8346_s22 + $0x88] sm:$0xff]   ;;  %v8182_v51 = vld [vmem:[%s8346_s22 + $0xa0] sm:$0xff]  }
  0x1d   : > { %v676_v52 = vsel %vm616_vm1, %v671_v46, %v675_v47  ;;  %v691_v59 = vrot.slane %v689_v54, 1  ;;  %v701_v1 = vshrl.u32 %v8172_v56, 16  ;;  %v705_v2 = vshll.u32 %v8173_v60, 16  ;;  %v8183_v54 = vld [vmem:[%s8346_s22 + $0xa8] sm:$0xff]  }
  0x1e   : > { %v687_v58 = vor.u32 %v685_v53, %v683_v55  ;;  %v684_v62 = vsel %vm616_vm1, %v679_v57, %v683_v55  ;;  %v699_v3 = vrot.slane %v697_v61, 1  ;;  %v713_v9 = vshll.u32 %v8174_v4, 16 }
  0x1f   : > { %v695_v5 = vor.u32 %v693_v63, %v691_v59  ;;  %v707_v7 = vrot.slane %v705_v2, 1  ;;  %v709_v11 = vshrl.u32 %v8173_v60, 16  ;;  %v717_v13 = vshrl.u32 %v8174_v4, 16  ;;  %v8185_v2 = vld [vmem:[%s8346_s22 + $0xb8] sm:$0xff]  }
  0x20   : > { %v692_v0 = vsel %vm616_vm1, %v687_v58, %v691_v59  ;;  %v703_v6 = vor.u32 %v701_v1, %v699_v3  ;;  %v721_v14 = vshll.u32 %v8175_v8, 16  ;;  %v715_v15 = vrot.slane %v713_v9, 1 }
  0x21   : > { %v700_v10 = vsel %vm616_vm1, %v695_v5, %v699_v3  ;;  %v711_v17 = vor.u32 %v709_v11, %v707_v7  ;;  %v729_v21 = vshll.u32 %v8176_v16, 16  ;;  %v725_v23 = vshrl.u32 %v8175_v8, 16 }
  0x22   : > { %7619 = vmatmul.mubr.msk.bf16.gmra.mxu0 %vm1155_vm0, %v652_v38  ;;  %v708_v12 = vsel %vm616_vm1, %v703_v6, %v707_v7  ;;  %v719_v18 = vor.u32 %v717_v13, %v715_v15  ;;  %v723_v19 = vrot.slane %v721_v14, 1  ;;  %v733_v25 = vshrl.u32 %v8176_v16, 16  ;;  %v8187_v14 = vld [vmem:[%s8346_s22 + $0xc8] sm:$0xff]  }
  0x23   : > { %7757 = vmatmul.mubr.msk.bf16.gmra.mxu1 %vm1155_vm0, %v8167_v24  ;;  %7622 = vmatprep.mubr.msk.bf16.mxu0 %vm1155_vm0, %v660_v40  ;;  %v716_v22 = vsel %vm616_vm1, %v711_v17, %v715_v15  ;;  %v737_v26 = vshll.u32 %v8177_v20, 16  ;;  %v731_v27 = vrot.slane %v729_v21, 1  ;;  %v745_v33 = vshll.u32 %v8178_v28, 16  ;;  %v8180_v40 = vld [vmem:[%s8346_s22 + $0x90] sm:$0xff]  }
  0x24   : > { %7760 = vmatprep.mubr.msk.bf16.mxu1 %vm1155_vm0, %v8168_v31  ;;  %v724_v24 = vsel %vm616_vm1, %v719_v18, %v723_v19  ;;  %v727_v29 = vor.u32 %v725_v23, %v723_v19  ;;  %v741_v35 = vshrl.u32 %v8177_v20, 16  ;;  %v749_v37 = vshrl.u32 %v8178_v28, 16 }
  0x25   : > { %v735_v30 = vor.u32 %v733_v25, %v731_v27  ;;  %v739_v31 = vrot.slane %v737_v26, 1  ;;  %v753_v38 = vshll.u32 %v8179_v32, 16  ;;  %v747_v39 = vrot.slane %v745_v33, 1  ;;  %v8189_v26 = vld [vmem:[%s8346_s22 + $0xd8] sm:$0xff]  }
  0x26   : > { %v732_v34 = vsel %vm616_vm1, %v727_v29, %v731_v27  ;;  %v761_v45 = vshll.u32 %v8180_v40, 16  ;;  %v757_v47 = vshrl.u32 %v8179_v32, 16  ;;  %v765_v49 = vshrl.u32 %v8180_v40, 16 }
  0x27   : > { %v743_v41 = vor.u32 %v741_v35, %v739_v31  ;;  %v751_v42 = vor.u32 %v749_v37, %v747_v39  ;;  %v755_v43 = vrot.slane %v753_v38, 1  ;;  %v777_v58 = vshll.u32 %v8182_v51, 16  ;;  %v8191_v38 = vld [vmem:[%s8346_s22 + $0xe8] sm:$0xff]  }
  0x28   : > { %v785_v61 = vshll.u32 %v8183_v54, 16  ;;  %v789_v5 = vshrl.u32 %v8183_v54, 16  ;;  %v801_v9 = vshll.u32 %v8185_v2, 16  ;;  %v805_v17 = vshrl.u32 %v8185_v2, 16 }
  0x29   : > { %v748_v46 = vsel %vm616_vm1, %v743_v41, %v747_v39  ;;  %v759_v53 = vor.u32 %v757_v47, %v755_v43  ;;  %v779_v63 = vrot.slane %v777_v58, 1  ;;  %v817_v21 = vshll.u32 %v8187_v14, 16 }
  0x2a   : > { %7623 = vmatmul.mubr.msk.bf16.gmra.mxu0 %vm1155_vm0, %v668_v50  ;;  %v821_v29 = vshrl.u32 %v8187_v14, 16  ;;  %v833_v33 = vshll.u32 %v8189_v26, 16  ;;  %v837_v41 = vshrl.u32 %v8189_v26, 16 }
  0x2b   : > { %7761 = vmatmul.mubr.msk.bf16.gmra.mxu1 %vm1155_vm0, %v8169_v36  ;;  %7626 = vmatprep.mubr.msk.bf16.mxu0 %vm1155_vm0, %v676_v52  ;;  %v740_v36 = vsel %vm616_vm1, %v735_v30, %v739_v31  ;;  %v763_v52 = vrot.slane %v761_v45, 1  ;;  %v849_v45 = vshll.u32 %v8191_v38, 16 }
  0x2c   : > { %7764 = vmatprep.mubr.msk.bf16.mxu1 %vm1155_vm0, %v8170_v44  ;;  %v8181_v44 = vld [vmem:[%s8346_s22 + $0x98] sm:$0xff]  }
  0x2d   : > { %v769_v50 = vshll.u32 %v8181_v44, 16  ;;  %v767_v55 = vor.u32 %v765_v49, %v763_v52  ;;  %v773_v57 = vshrl.u32 %v8181_v44, 16  ;;  %v764_v59 = vsel %vm616_vm1, %v759_v53, %v763_v52 }
  0x2e   : > { %v851_v52 = vrot.slane %v849_v45, 1  ;;  %v853_v53 = vshrl.u32 %v8191_v38, 16 }
  0x32   : > { %7627 = vmatmul.mubr.msk.bf16.gmra.mxu0 %vm1155_vm0, %v684_v62 }
  0x33   : > { %7765 = vmatmul.mubr.msk.bf16.gmra.mxu1 %vm1155_vm0, %v8171_v48  ;;  %7630 = vmatprep.mubr.msk.bf16.mxu0 %vm1155_vm0, %v692_v0  ;;  %v756_v48 = vsel %vm616_vm1, %v751_v42, %v755_v43  ;;  %v8184_v0 = vld [vmem:[%s8346_s22 + $0xb0] sm:$0xff]  }
  0x34   : > { %7768 = vmatprep.mubr.msk.bf16.mxu1 %vm1155_vm0, %v8172_v56  ;;  %v771_v56 = vrot.slane %v769_v50, 1  ;;  %v793_v6 = vshll.u32 %v8184_v0, 16  ;;  %v8193_v50 = vld [vmem:[%s8346_s22 + $0xf8] sm:$0xff]  }
  0x36   : > { %v772_v62 = vsel %vm616_vm1, %v767_v55, %v771_v56  ;;  %v775_v1 = vor.u32 %v773_v57, %v771_v56  ;;  %v795_v11 = vrot.slane %v793_v6, 1  ;;  %v865_v57 = vshll.u32 %v8193_v50, 16 }
  0x38   : > { %v780_v7 = vsel %vm616_vm1, %v775_v1, %v779_v63  ;;  %v869_v1 = vshrl.u32 %v8193_v50, 16 }
  0x3a   : > { %7631 = vmatmul.mubr.msk.bf16.gmra.mxu0 %vm1155_vm0, %v700_v10 }
  0x3b   : > { %7769 = vmatmul.mubr.msk.bf16.gmra.mxu1 %vm1155_vm0, %v8173_v60  ;;  %7634 = vmatprep.mubr.msk.bf16.mxu0 %vm1155_vm0, %v708_v12  ;;  %v781_v60 = vshrl.u32 %v8182_v51, 16  ;;  %v8186_v12 = vld [vmem:[%s8346_s22 + $0xc0] sm:$0xff]  }
  0x3c   : > { %7772 = vmatprep.mubr.msk.bf16.mxu1 %vm1155_vm0, %v8174_v4  ;;  %v787_v4 = vrot.slane %v785_v61, 1  ;;  %v809_v18 = vshll.u32 %v8186_v12, 16  ;;  %v855_v61 = vor.u32 %v853_v53, %v851_v52 }
  0x3d   : > { %v783_v3 = vor.u32 %v781_v60, %v779_v63  ;;  %v8194_v60 = vld [vmem:[%s8346_s22 + $0x100] sm:$0xff]  }
  0x3e   : > { %v791_v13 = vor.u32 %v789_v5, %v787_v4  ;;  %v811_v23 = vrot.slane %v809_v18, 1 }
  0x3f   : > { %v788_v10 = vsel %vm616_vm1, %v783_v3, %v787_v4  ;;  %v877_v4 = vshrl.u32 %v8194_v60, 16 }
  0x40   : > { %v796_v19 = vsel %vm616_vm1, %v791_v13, %v795_v11 }
  0x42   : > { %7635 = vmatmul.mubr.msk.bf16.gmra.mxu0 %vm1155_vm0, %v716_v22 }
  0x43   : > { %7773 = vmatmul.mubr.msk.bf16.gmra.mxu1 %vm1155_vm0, %v8175_v8  ;;  %7638 = vmatprep.mubr.msk.bf16.mxu0 %vm1155_vm0, %v724_v24  ;;  %v797_v8 = vshrl.u32 %v8184_v0, 16  ;;  %v8188_v24 = vld [vmem:[%s8346_s22 + $0xd0] sm:$0xff]  }
  0x44   : > { %7776 = vmatprep.mubr.msk.bf16.mxu1 %vm1155_vm0, %v8176_v16  ;;  %v803_v16 = vrot.slane %v801_v9, 1  ;;  %v825_v30 = vshll.u32 %v8188_v24, 16 }
  0x45   : > { %v799_v15 = vor.u32 %v797_v8, %v795_v11  ;;  %v8196_v8 = vld [vmem:[%s8346_s22 + $0x110] sm:$0xff]  }
  0x46   : > { %v807_v25 = vor.u32 %v805_v17, %v803_v16  ;;  %v827_v35 = vrot.slane %v825_v30, 1 }
  0x47   : > { %v804_v22 = vsel %vm616_vm1, %v799_v15, %v803_v16  ;;  %v893_v16 = vshrl.u32 %v8196_v8, 16 }
  0x48   : > { %v812_v31 = vsel %vm616_vm1, %v807_v25, %v811_v23 }
  0x4a   : > { %7639 = vmatmul.mubr.msk.bf16.gmra.mxu0 %vm1155_vm0, %v732_v34 }
  0x4b   : > { %7777 = vmatmul.mubr.msk.bf16.gmra.mxu1 %vm1155_vm0, %v8177_v20  ;;  %7642 = vmatprep.mubr.msk.bf16.mxu0 %vm1155_vm0, %v740_v36  ;;  %v813_v20 = vshrl.u32 %v8186_v12, 16  ;;  %v8190_v36 = vld [vmem:[%s8346_s22 + $0xe0] sm:$0xff]  }
  0x4c   : > { %7780 = vmatprep.mubr.msk.bf16.mxu1 %vm1155_vm0, %v8178_v28  ;;  %v819_v28 = vrot.slane %v817_v21, 1  ;;  %v841_v42 = vshll.u32 %v8190_v36, 16 }
  0x4d   : > { %v815_v27 = vor.u32 %v813_v20, %v811_v23  ;;  %v8198_v20 = vld [vmem:[%s8346_s22 + $0x120] sm:$0xff]  }
  0x4e   : > { %v823_v37 = vor.u32 %v821_v29, %v819_v28  ;;  %v843_v47 = vrot.slane %v841_v42, 1  ;;  %v905_v25 = vshll.u32 %v8198_v20, 16  ;;  %v909_v29 = vshrl.u32 %v8198_v20, 16 }
  0x4f   : > { %v820_v34 = vsel %vm616_vm1, %v815_v27, %v819_v28 }
  0x50   : > { %v828_v43 = vsel %vm616_vm1, %v823_v37, %v827_v35 }
  0x52   : > { %7643 = vmatmul.mubr.msk.bf16.gmra.mxu0 %vm1155_vm0, %v748_v46 }
  0x53   : > { %7781 = vmatmul.mubr.msk.bf16.gmra.mxu1 %vm1155_vm0, %v8179_v32  ;;  %7646 = vmatprep.mubr.msk.bf16.mxu0 %vm1155_vm0, %v756_v48  ;;  %v829_v32 = vshrl.u32 %v8188_v24, 16  ;;  %v8192_v48 = vld [vmem:[%s8346_s22 + $0xf0] sm:$0xff]  }
  0x54   : > { %7784 = vmatprep.mubr.msk.bf16.mxu1 %vm1155_vm0, %v8180_v40  ;;  %v835_v40 = vrot.slane %v833_v33, 1  ;;  %v861_v56 = vshrl.u32 %v8192_v48, 16 }
  0x55   : > { %v831_v39 = vor.u32 %v829_v32, %v827_v35  ;;  %v8200_v32 = vld [vmem:[%s8346_s22 + $0x130] sm:$0xff]  }
  0x56   : > { %v839_v49 = vor.u32 %v837_v41, %v835_v40  ;;  %v921_v37 = vshll.u32 %v8200_v32, 16  ;;  %v925_v41 = vshrl.u32 %v8200_v32, 16 }
  0x57   : > { %v836_v46 = vsel %vm616_vm1, %v831_v39, %v835_v40 }
  0x58   : > { %v844_v55 = vsel %vm616_vm1, %v839_v49, %v843_v47 }
  0x5a   : > { %7647 = vmatmul.mubr.msk.bf16.gmra.mxu0 %vm1155_vm0, %v764_v59 }
  0x5b   : > { %7785 = vmatmul.mubr.msk.bf16.gmra.mxu1 %vm1155_vm0, %v8181_v44  ;;  %7650 = vmatprep.mubr.msk.bf16.mxu0 %vm1155_vm0, %v772_v62  ;;  %v845_v44 = vshrl.u32 %v8190_v36, 16  ;;  %v8195_v62 = vld [vmem:[%s8346_s22 + $0x108] sm:$0xff]  }
  0x5c   : > { %7788 = vmatprep.mubr.msk.bf16.mxu1 %vm1155_vm0, %v8182_v51  ;;  %v881_v5 = vshll.u32 %v8195_v62, 16  ;;  %v885_v13 = vshrl.u32 %v8195_v62, 16 }
  0x5d   : > { %v847_v51 = vor.u32 %v845_v44, %v843_v47  ;;  %v8202_v44 = vld [vmem:[%s8346_s22 + $0x140] sm:$0xff]  }
  0x5e   : > { %v937_v49 = vshll.u32 %v8202_v44, 16  ;;  %v941_v53 = vshrl.u32 %v8202_v44, 16 }
  0x5f   : > { %v852_v58 = vsel %vm616_vm1, %v847_v51, %v851_v52 }
  0x62   : > { %7651 = vmatmul.mubr.msk.bf16.gmra.mxu0 %vm1155_vm0, %v780_v7 }
  0x63   : > { %7789 = vmatmul.mubr.msk.bf16.gmra.mxu1 %vm1155_vm0, %v8183_v54  ;;  %7654 = vmatprep.mubr.msk.bf16.mxu0 %vm1155_vm0, %v788_v10  ;;  %v857_v54 = vshll.u32 %v8192_v48, 16  ;;  %v8197_v10 = vld [vmem:[%s8346_s22 + $0x118] sm:$0xff]  }
  0x64   : > { %7792 = vmatprep.mubr.msk.bf16.mxu1 %vm1155_vm0, %v8184_v0  ;;  %v867_v0 = vrot.slane %v865_v57, 1  ;;  %v897_v17 = vshll.u32 %v8197_v10, 16  ;;  %v901_v27 = vshrl.u32 %v8197_v10, 16 }
  0x65   : > { %v859_v59 = vrot.slane %v857_v54, 1 }
  0x66   : > { %v871_v9 = vor.u32 %v869_v1, %v867_v0  ;;  %v899_v23 = vrot.slane %v897_v17, 1 }
  0x67   : > { %v863_v63 = vor.u32 %v861_v56, %v859_v59  ;;  %v860_v3 = vsel %vm616_vm1, %v855_v61, %v859_v59  ;;  %v8204_v56 = vld [vmem:[%s8346_s22 + $0x150] sm:$0xff]  }
  0x68   : > { %v903_v33 = vor.u32 %v901_v27, %v899_v23  ;;  %v953_v61 = vshll.u32 %v8204_v56, 16  ;;  %v957_v1 = vshrl.u32 %v8204_v56, 16 }
  0x69   : > { %v868_v6 = vsel %vm616_vm1, %v863_v63, %v867_v0 }
  0x6a   : > { %7655 = vmatmul.mubr.msk.bf16.gmra.mxu0 %vm1155_vm0, %v796_v19 }
  0x6b   : > { %7793 = vmatmul.mubr.msk.bf16.gmra.mxu1 %vm1155_vm0, %v8185_v2  ;;  %7658 = vmatprep.mubr.msk.bf16.mxu0 %vm1155_vm0, %v804_v22  ;;  %v873_v2 = vshll.u32 %v8194_v60, 16 }
  0x6c   : > { %7796 = vmatprep.mubr.msk.bf16.mxu1 %vm1155_vm0, %v8186_v12  ;;  %v883_v12 = vrot.slane %v881_v5, 1 }
  0x6d   : > { %v875_v7 = vrot.slane %v873_v2, 1 }
  0x6e   : > { %v887_v21 = vor.u32 %v885_v13, %v883_v12 }
  0x6f   : > { %v879_v11 = vor.u32 %v877_v4, %v875_v7  ;;  %v876_v15 = vsel %vm616_vm1, %v871_v9, %v875_v7  ;;  %v8206_v4 = vld [vmem:[%s8346_s22 + $0x160] sm:$0xff]  }
  0x70   : > { %v969_v9 = vshll.u32 %v8206_v4, 16  ;;  %v973_v13 = vshrl.u32 %v8206_v4, 16 }
  0x71   : > { %v884_v18 = vsel %vm616_vm1, %v879_v11, %v883_v12 }
  0x72   : > { %7659 = vmatmul.mubr.msk.bf16.gmra.mxu0 %vm1155_vm0, %v812_v31  ;;  %v907_v31 = vrot.slane %v905_v25, 1 }
  0x73   : > { %7797 = vmatmul.mubr.msk.bf16.gmra.mxu1 %vm1155_vm0, %v8187_v14  ;;  %7662 = vmatprep.mubr.msk.bf16.mxu0 %vm1155_vm0, %v820_v34  ;;  %v889_v14 = vshll.u32 %v8196_v8, 16 }
  0x74   : > { %7800 = vmatprep.mubr.msk.bf16.mxu1 %vm1155_vm0, %v8188_v24  ;;  %v8199_v24 = vld [vmem:[%s8346_s22 + $0x128] sm:$0xff]   ;;  %v911_v34 = vor.u32 %v909_v29, %v907_v31 }
  0x75   : > { %v891_v19 = vrot.slane %v889_v14, 1  ;;  %v913_v30 = vshll.u32 %v8199_v24, 16  ;;  %v917_v39 = vshrl.u32 %v8199_v24, 16 }
  0x77   : > { %v895_v22 = vor.u32 %v893_v16, %v891_v19  ;;  %v915_v35 = vrot.slane %v913_v30, 1  ;;  %v8208_v16 = vld [vmem:[%s8346_s22 + $0x170] sm:$0xff]  }
  0x78   : > { %v989_v25 = vshrl.u32 %v8208_v16, 16 }
  0x79   : > { %v900_v28 = vsel %vm616_vm1, %v895_v22, %v899_v23  ;;  %v916_v40 = vsel %vm616_vm1, %v911_v34, %v915_v35  ;;  %v919_v45 = vor.u32 %v917_v39, %v915_v35 }
  0x7a   : > { %7663 = vmatmul.mubr.msk.bf16.gmra.mxu0 %vm1155_vm0, %v828_v43  ;;  %v923_v43 = vrot.slane %v921_v37, 1 }
  0x7b   : > { %7801 = vmatmul.mubr.msk.bf16.gmra.mxu1 %vm1155_vm0, %v8189_v26  ;;  %7666 = vmatprep.mubr.msk.bf16.mxu0 %vm1155_vm0, %v836_v46  ;;  %v892_v26 = vsel %vm616_vm1, %v887_v21, %v891_v19  ;;  %v985_v21 = vshll.u32 %v8208_v16, 16 }
  0x7c   : > { %7804 = vmatprep.mubr.msk.bf16.mxu1 %vm1155_vm0, %v8190_v36  ;;  %v8201_v36 = vld [vmem:[%s8346_s22 + $0x138] sm:$0xff]   ;;  %v927_v46 = vor.u32 %v925_v41, %v923_v43 }
  0x7d   : > { %v929_v42 = vshll.u32 %v8201_v36, 16  ;;  %v933_v51 = vshrl.u32 %v8201_v36, 16  ;;  %v987_v27 = vrot.slane %v985_v21, 1 }
  0x7f   : > { %v931_v47 = vrot.slane %v929_v42, 1  ;;  %v991_v30 = vor.u32 %v989_v25, %v987_v27 }
  0x81   : > { %v932_v52 = vsel %vm616_vm1, %v927_v46, %v931_v47  ;;  %v935_v57 = vor.u32 %v933_v51, %v931_v47 }
  0x82   : > { %7667 = vmatmul.mubr.msk.bf16.gmra.mxu0 %vm1155_vm0, %v844_v55  ;;  %v939_v55 = vrot.slane %v937_v49, 1 }
  0x83   : > { %7805 = vmatmul.mubr.msk.bf16.gmra.mxu1 %vm1155_vm0, %v8191_v38  ;;  %7670 = vmatprep.mubr.msk.bf16.mxu0 %vm1155_vm0, %v852_v58  ;;  %v908_v38 = vsel %vm616_vm1, %v903_v33, %v907_v31 }
  0x84   : > { %7808 = vmatprep.mubr.msk.bf16.mxu1 %vm1155_vm0, %v8192_v48  ;;  %v8203_v48 = vld [vmem:[%s8346_s22 + $0x148] sm:$0xff]   ;;  %v943_v58 = vor.u32 %v941_v53, %v939_v55 }
  0x85   : > { %v945_v54 = vshll.u32 %v8203_v48, 16  ;;  %v949_v63 = vshrl.u32 %v8203_v48, 16 }
  0x87   : > { %v947_v59 = vrot.slane %v945_v54, 1 }
  0x89   : > { %v948_v0 = vsel %vm616_vm1, %v943_v58, %v947_v59  ;;  %v951_v5 = vor.u32 %v949_v63, %v947_v59 }
  0x8a   : > { %7671 = vmatmul.mubr.msk.bf16.gmra.mxu0 %vm1155_vm0, %v860_v3  ;;  %v955_v3 = vrot.slane %v953_v61, 1 }
  0x8b   : > { %7809 = vmatmul.mubr.msk.bf16.gmra.mxu1 %vm1155_vm0, %v8193_v50  ;;  %7674 = vmatprep.mubr.msk.bf16.mxu0 %vm1155_vm0, %v868_v6  ;;  %v924_v50 = vsel %vm616_vm1, %v919_v45, %v923_v43 }
  0x8c   : > { %7812 = vmatprep.mubr.msk.bf16.mxu1 %vm1155_vm0, %v8194_v60  ;;  %v8205_v60 = vld [vmem:[%s8346_s22 + $0x158] sm:$0xff]   ;;  %v959_v6 = vor.u32 %v957_v1, %v955_v3 }
  0x8d   : > { %v961_v2 = vshll.u32 %v8205_v60, 16  ;;  %v965_v11 = vshrl.u32 %v8205_v60, 16 }
  0x8f   : > { %v963_v7 = vrot.slane %v961_v2, 1 }
  0x91   : > { %v964_v12 = vsel %vm616_vm1, %v959_v6, %v963_v7  ;;  %v967_v17 = vor.u32 %v965_v11, %v963_v7 }
  0x92   : > { %7675 = vmatmul.mubr.msk.bf16.gmra.mxu0 %vm1155_vm0, %v876_v15  ;;  %v971_v15 = vrot.slane %v969_v9, 1 }
  0x93   : > { %7813 = vmatmul.mubr.msk.bf16.gmra.mxu1 %vm1155_vm0, %v8195_v62  ;;  %7678 = vmatprep.mubr.msk.bf16.mxu0 %vm1155_vm0, %v884_v18  ;;  %v940_v62 = vsel %vm616_vm1, %v935_v57, %v939_v55  ;;  %v8215_v57 = vld [vmem:[%s8346_s22 + $0x1a8] sm:$0xff]  }
  0x94   : > { %7816 = vmatprep.mubr.msk.bf16.mxu1 %vm1155_vm0, %v8196_v8  ;;  %v8207_v8 = vld [vmem:[%s8346_s22 + $0x168] sm:$0xff]   ;;  %v975_v18 = vor.u32 %v973_v13, %v971_v15  ;;  %v972_v22 = vsel %vm616_vm1, %v967_v17, %v971_v15  ;;  %v1041_v1 = vshll.u32 %v8215_v57, 16 }
  0x95   : > { %v977_v14 = vshll.u32 %v8207_v8, 16  ;;  %v981_v23 = vshrl.u32 %v8207_v8, 16 }
  0x96   : > { %v1043_v11 = vrot.slane %v1041_v1, 1 }
  0x97   : > { %v979_v19 = vrot.slane %v977_v14, 1 }
  0x99   : > { %v983_v29 = vor.u32 %v981_v23, %v979_v19 }
  0x9a   : > { %7679 = vmatmul.mubr.msk.bf16.gmra.mxu0 %vm1155_vm0, %v892_v26 }
  0x9b   : > { %7817 = vmatmul.mubr.msk.bf16.gmra.mxu1 %vm1155_vm0, %v8197_v10  ;;  %7682 = vmatprep.mubr.msk.bf16.mxu0 %vm1155_vm0, %v900_v28  ;;  %v956_v10 = vsel %vm616_vm1, %v951_v5, %v955_v3  ;;  %v8210_v28 = vld [vmem:[%s8346_s22 + $0x180] sm:$0xff]   ;;  %v988_v34 = vsel %vm616_vm1, %v983_v29, %v987_v27  ;;  %v8216_v5 = vld [vmem:[%s8346_s22 + $0x1b0] sm:$0xff]  }
  0x9c   : > { %7820 = vmatprep.mubr.msk.bf16.mxu1 %vm1155_vm0, %v8198_v20  ;;  %v8209_v20 = vld [vmem:[%s8346_s22 + $0x178] sm:$0xff]   ;;  %v1001_v33 = vshll.u32 %v8210_v28, 16  ;;  %v1005_v37 = vshrl.u32 %v8210_v28, 16  ;;  %v1053_v23 = vshrl.u32 %v8216_v5, 16  ;;  %v8218_v29 = vld [vmem:[%s8346_s22 + $0x1c0] sm:$0xff]  }
  0x9d   : > { %v993_v26 = vshll.u32 %v8209_v20, 16  ;;  %v997_v35 = vshrl.u32 %v8209_v20, 16 }
  0x9e   : > { %v1003_v39 = vrot.slane %v1001_v33, 1 }
  0x9f   : > { %v995_v31 = vrot.slane %v993_v26, 1 }
  0xa0   : > { %v1007_v42 = vor.u32 %v1005_v37, %v1003_v39 }
  0xa1   : > { %v999_v41 = vor.u32 %v997_v35, %v995_v31 }
  0xa2   : > { %7683 = vmatmul.mubr.msk.bf16.gmra.mxu0 %vm1155_vm0, %v908_v38 }
  0xa3   : > { %7821 = vmatmul.mubr.msk.bf16.gmra.mxu1 %vm1155_vm0, %v8199_v24  ;;  %7686 = vmatprep.mubr.msk.bf16.mxu0 %vm1155_vm0, %v916_v40  ;;  %v980_v24 = vsel %vm616_vm1, %v975_v18, %v979_v19  ;;  %v8212_v40 = vld [vmem:[%s8346_s22 + $0x190] sm:$0xff]   ;;  %v1004_v46 = vsel %vm616_vm1, %v999_v41, %v1003_v39 }
  0xa4   : > { %7824 = vmatprep.mubr.msk.bf16.mxu1 %vm1155_vm0, %v8200_v32  ;;  %v8211_v32 = vld [vmem:[%s8346_s22 + $0x188] sm:$0xff]   ;;  %v1017_v45 = vshll.u32 %v8212_v40, 16  ;;  %v1021_v49 = vshrl.u32 %v8212_v40, 16 }
  0xa5   : > { %v1009_v38 = vshll.u32 %v8211_v32, 16  ;;  %v1013_v47 = vshrl.u32 %v8211_v32, 16 }
  0xa6   : > { %v1019_v51 = vrot.slane %v1017_v45, 1 }
  0xa7   : > { %v1011_v43 = vrot.slane %v1009_v38, 1 }
  0xa8   : > { %v1023_v55 = vor.u32 %v1021_v49, %v1019_v51 }
  0xa9   : > { %v1015_v54 = vor.u32 %v1013_v47, %v1011_v43  ;;  %v1069_v47 = vshrl.u32 %v8218_v29, 16 }
  0xaa   : > { %7687 = vmatmul.mubr.msk.bf16.gmra.mxu0 %vm1155_vm0, %v924_v50 }
  0xab   : > { %7825 = vmatmul.mubr.msk.bf16.gmra.mxu1 %vm1155_vm0, %v8201_v36  ;;  %7690 = vmatprep.mubr.msk.bf16.mxu0 %vm1155_vm0, %v932_v52  ;;  %v996_v36 = vsel %vm616_vm1, %v991_v30, %v995_v31  ;;  %v8214_v52 = vld [vmem:[%s8346_s22 + $0x1a0] sm:$0xff]  }
  0xac   : > { %7828 = vmatprep.mubr.msk.bf16.mxu1 %vm1155_vm0, %v8202_v44  ;;  %v8213_v44 = vld [vmem:[%s8346_s22 + $0x198] sm:$0xff]   ;;  %v1033_v59 = vshll.u32 %v8214_v52, 16 }
  0xad   : > { %v1025_v50 = vshll.u32 %v8213_v44, 16 }
  0xb2   : > { %7691 = vmatmul.mubr.msk.bf16.gmra.mxu0 %vm1155_vm0, %v940_v62  ;;  %v1029_v62 = vshrl.u32 %v8213_v44, 16 }
  0xb3   : > { %7829 = vmatmul.mubr.msk.bf16.gmra.mxu1 %vm1155_vm0, %v8203_v48  ;;  %7694 = vmatprep.mubr.msk.bf16.mxu0 %vm1155_vm0, %v948_v0  ;;  %v1012_v48 = vsel %vm616_vm1, %v1007_v42, %v1011_v43  ;;  %v1037_v0 = vshrl.u32 %v8214_v52, 16 }
  0xb4   : > { %7832 = vmatprep.mubr.msk.bf16.mxu1 %vm1155_vm0, %v8204_v56  ;;  %v1027_v56 = vrot.slane %v1025_v50, 1 }
  0xb6   : > { %v1028_v63 = vsel %vm616_vm1, %v1023_v55, %v1027_v56 }
  0xba   : > { %7695 = vmatmul.mubr.msk.bf16.gmra.mxu0 %vm1155_vm0, %v956_v10 }
  0xbb   : > { %7833 = vmatmul.mubr.msk.bf16.gmra.mxu1 %vm1155_vm0, %v8205_v60  ;;  %7698 = vmatprep.mubr.msk.bf16.mxu0 %vm1155_vm0, %v964_v12  ;;  %v1020_v60 = vsel %vm616_vm1, %v1015_v54, %v1019_v51  ;;  %v8217_v12 = vld [vmem:[%s8346_s22 + $0x1b8] sm:$0xff]  }
  0xbc   : > { %7836 = vmatprep.mubr.msk.bf16.mxu1 %vm1155_vm0, %v8206_v4  ;;  %v1035_v4 = vrot.slane %v1033_v59, 1 }
  0xbe   : > { %v1039_v10 = vor.u32 %v1037_v0, %v1035_v4 }
  0xc2   : > { %7699 = vmatmul.mubr.msk.bf16.gmra.mxu0 %vm1155_vm0, %v972_v22  ;;  %v1044_v22 = vsel %vm616_vm1, %v1039_v10, %v1043_v11 }
  0xc3   : > { %7837 = vmatmul.mubr.msk.bf16.gmra.mxu1 %vm1155_vm0, %v8207_v8  ;;  %7702 = vmatprep.mubr.msk.bf16.mxu0 %vm1155_vm0, %v980_v24  ;;  %v1031_v8 = vor.u32 %v1029_v62, %v1027_v56  ;;  %v1057_v24 = vshll.u32 %v8217_v12, 16 }
  0xc4   : > { %7840 = vmatprep.mubr.msk.bf16.mxu1 %vm1155_vm0, %v8208_v16  ;;  %v1049_v16 = vshll.u32 %v8216_v5, 16 }
  0xc5   : > { %v1036_v18 = vsel %vm616_vm1, %v1031_v8, %v1035_v4  ;;  %v1059_v35 = vrot.slane %v1057_v24, 1 }
  0xca   : > { %7703 = vmatmul.mubr.msk.bf16.gmra.mxu0 %vm1155_vm0, %v988_v34 }
  0xcb   : > { %7841 = vmatmul.mubr.msk.bf16.gmra.mxu1 %vm1155_vm0, %v8209_v20  ;;  %7706 = vmatprep.mubr.msk.bf16.mxu0 %vm1155_vm0, %v996_v36  ;;  %v1045_v20 = vshrl.u32 %v8215_v57, 16  ;;  %v8219_v36 = vld [vmem:[%s8346_s22 + $0x1c8] sm:$0xff]  }
  0xcc   : > { %7844 = vmatprep.mubr.msk.bf16.mxu1 %vm1155_vm0, %v8210_v28  ;;  %v1051_v28 = vrot.slane %v1049_v16, 1  ;;  %v1077_v4 = vshrl.u32 %v8219_v36, 16 }
  0xce   : > { %v1055_v34 = vor.u32 %v1053_v23, %v1051_v28  ;;  %v8223_v23 = vld [vmem:[%s8346_s22 + $0x1e8] sm:$0xff]  }
  0xd2   : > { %7707 = vmatmul.mubr.msk.bf16.gmra.mxu0 %vm1155_vm0, %v1004_v46  ;;  %v1060_v46 = vsel %vm616_vm1, %v1055_v34, %v1059_v35 }
  0xd3   : > { %v7750_v53 = vpop.f32.mrf.mxu1  ;;  %7845 = vmatmul.mubr.msk.bf16.gmra.mxu1 %vm1155_vm0, %v8211_v32  ;;  %7710 = vmatprep.mubr.msk.bf16.mxu0 %vm1155_vm0, %v1012_v48  ;;  %v1047_v32 = vor.u32 %v1045_v20, %v1043_v11  ;;  %v1073_v48 = vshll.u32 %v8219_v36, 16 }
  0xd4   : > { %7848 = vmatprep.mubr.msk.bf16.mxu1 %vm1155_vm0, %v8212_v40  ;;  %v1065_v40 = vshll.u32 %v8218_v29, 16 }
  0xd5   : > { %v2087_v58 = vpop.f32.mrf.mxu1  ;;  %v1052_v42 = vsel %vm616_vm1, %v1047_v32, %v1051_v28  ;;  %v1075_v59 = vrot.slane %v1073_v48, 1 }
  0xd7   : > { %v7751_v61 = vpop.f32.mrf.mxu1 }
  0xd9   : > { %v2090_v2 = vpop.f32.mrf.mxu1 }
  0xda   : > { %v7616_v3 = vpop.f32.mrf.mxu0  ;;  %7711 = vmatmul.mubr.msk.bf16.gmra.mxu0 %vm1155_vm0, %v1020_v60  ;;  %v8221_v60 = vld [vmem:[%s8346_s22 + $0x1d8] sm:$0xff]  }
  0xdb   : > { %v8555_v6 = vadd.f32 %v7750_v53, %v7616_v3  ;;  %v7754_v7 = vpop.f32.mrf.mxu1  ;;  %7849 = vmatmul.mubr.msk.bf16.gmra.mxu1 %vm1155_vm0, %v8213_v44  ;;  %7714 = vmatprep.mubr.msk.bf16.mxu0 %vm1155_vm0, %v1028_v63  ;;  %v1061_v44 = vshrl.u32 %v8217_v12, 16  ;;  %v8220_v53 = vld [vmem:[%s8346_s22 + $0x1d0] sm:$0xff]  }
  0xdc   : > { %v1388_v9 = vpop.f32.mrf.mxu0  ;;  %7852 = vmatprep.mubr.msk.bf16.mxu1 %vm1155_vm0, %v8214_v52  ;;  %v1067_v52 = vrot.slane %v1065_v40, 1  ;;  %v1081_v0 = vshll.u32 %v8220_v53, 16  ;;  %v1085_v8 = vshrl.u32 %v8220_v53, 16 }
  0xdd   : > { %v8561_v13 = vadd.f32 %v2087_v58, %v1388_v9  ;;  %v2103_v14 = vpop.f32.mrf.mxu1  ;;  %v1063_v56 = vor.u32 %v1061_v44, %v1059_v35  ;;  %v1089_v9 = vshll.u32 %v8221_v60, 16  ;;  %v8224_v44 = vld [vmem:[%s8346_s22 + $0x1f0] sm:$0xff]  }
  0xde   : > { %v7617_v15 = vpop.f32.mrf.mxu0  ;;  %v1071_v58 = vor.u32 %v1069_v47, %v1067_v52 }
  0xdf   : > { %v8563_v17 = vadd.f32 %v7751_v61, %v7617_v15  ;;  %v7755_v19 = vpop.f32.mrf.mxu1  ;;  %v8222_v15 = vld [vmem:[%s8346_s22 + $0x1e0] sm:$0xff]  }
  0xe0   : > { %v1391_v21 = vpop.f32.mrf.mxu0  ;;  %v1097_v28 = vshll.u32 %v8222_v15, 16 }
  0xe1   : > { %v8567_v25 = vadd.f32 %v2090_v2, %v1391_v21  ;;  %v2106_v26 = vpop.f32.mrf.mxu1  ;;  %v1068_v2 = vsel %vm616_vm1, %v1063_v56, %v1067_v52  ;;  %v8225_v52 = vld [vmem:[%s8346_s22 + $0x1f8] sm:$0xff]  }
  0xe2   : > { %v7620_v27 = vpop.f32.mrf.mxu0  ;;  %7715 = vmatmul.mubr.msk.bf16.gmra.mxu0 %vm1155_vm0, %v1036_v18 }
  0xe3   : > { %v8571_v30 = vadd.f32 %v7754_v7, %v7620_v27  ;;  %v7758_v31 = vpop.f32.mrf.mxu1  ;;  %7853 = vmatmul.mubr.msk.bf16.gmra.mxu1 %vm1155_vm0, %v8215_v57  ;;  %7718 = vmatprep.mubr.msk.bf16.mxu0 %vm1155_vm0, %v1044_v22  ;;  %v1076_v7 = vsel %vm616_vm1, %v1071_v58, %v1075_v59  ;;  %v1091_v22 = vrot.slane %v1089_v9, 1  ;;  %v8226_v9 = vld [vmem:[%s8346_s22 + $0x200] sm:$0xff]  }
  0xe4   : > { %v1404_v33 = vpop.f32.mrf.mxu0  ;;  %7856 = vmatprep.mubr.msk.bf16.mxu1 %vm1155_vm0, %v8216_v5 }
  0xe5   : > { %v8577_v37 = vadd.f32 %v2103_v14, %v1404_v33  ;;  %v2119_v38 = vpop.f32.mrf.mxu1  ;;  %v1083_v14 = vrot.slane %v1081_v0, 1  ;;  %v1093_v33 = vshrl.u32 %v8221_v60, 16 }
  0xe6   : > { %v7621_v39 = vpop.f32.mrf.mxu0 }
  0xe7   : > { %v8579_v41 = vadd.f32 %v7755_v19, %v7621_v39  ;;  %v7759_v43 = vpop.f32.mrf.mxu1  ;;  %v1079_v19 = vor.u32 %v1077_v4, %v1075_v59  ;;  %v1087_v21 = vor.u32 %v1085_v8, %v1083_v14  ;;  %v1095_v47 = vor.u32 %v1093_v33, %v1091_v22 }
  0xe8   : > { %v1407_v45 = vpop.f32.mrf.mxu0 }
  0xe9   : > { %v8583_v49 = vadd.f32 %v2106_v26, %v1407_v45  ;;  %v2122_v50 = vpop.f32.mrf.mxu1  ;;  %v1092_v35 = vsel %vm616_vm1, %v1087_v21, %v1091_v22 }
  0xea   : > { %v7624_v51 = vpop.f32.mrf.mxu0  ;;  %7719 = vmatmul.mubr.msk.bf16.gmra.mxu0 %vm1155_vm0, %v1052_v42 }
  0xeb   : > { %v8587_v54 = vadd.f32 %v7758_v31, %v7624_v51  ;;  %v7762_v55 = vpop.f32.mrf.mxu1  ;;  %7857 = vmatmul.mubr.msk.bf16.gmra.mxu1 %vm1155_vm0, %v8217_v12  ;;  %7722 = vmatprep.mubr.msk.bf16.mxu0 %vm1155_vm0, %v1060_v46  ;;  %v1084_v31 = vsel %vm616_vm1, %v1079_v19, %v1083_v14 }
  0xec   : > { %v1420_v57 = vpop.f32.mrf.mxu0  ;;  %7860 = vmatprep.mubr.msk.bf16.mxu1 %vm1155_vm0, %v8218_v29 }
  0xed   : > { %v8593_v61 = vadd.f32 %v2119_v38, %v1420_v57  ;;  %v2135_v62 = vpop.f32.mrf.mxu1  ;;  %v1105_v38 = vshll.u32 %v8223_v23, 16  ;;  %v1113_v57 = vshll.u32 %v8224_v44, 16 }
  0xee   : > { %v7625_v63 = vpop.f32.mrf.mxu0 }
  0xef   : > { %v8595_v1 = vadd.f32 %v7759_v43, %v7625_v63  ;;  %v7763_v3 = vpop.f32.mrf.mxu1  ;;  %v1099_v43 = vrot.slane %v1097_v28, 1  ;;  %v1107_v51 = vrot.slane %v1105_v38, 1  ;;  %v1115_v8 = vrot.slane %v1113_v57, 1 }
  0xf0   : > { %v1423_v5 = vpop.f32.mrf.mxu0 }
  0xf1   : > { %v8599_v10 = vadd.f32 %v2122_v50, %v1423_v5  ;;  %v2138_v11 = vpop.f32.mrf.mxu1  ;;  %v1100_v59 = vsel %vm616_vm1, %v1095_v47, %v1099_v43  ;;  %v8653_v47 = vld [vmem:[%s8346_s22 + $0x18] sm:$0xff]  }
  0xf2   : > { %v7628_v12 = vpop.f32.mrf.mxu0  ;;  %7723 = vmatmul.mubr.msk.bf16.gmra.mxu0 %vm1155_vm0, %v1068_v2  ;;  %v1117_v2 = vshrl.u32 %v8224_v44, 16 }
  0xf3   : > { %v8603_v16 = vadd.f32 %v7762_v55, %v7628_v12  ;;  %v7766_v18 = vpop.f32.mrf.mxu1  ;;  %7861 = vmatmul.mubr.msk.bf16.gmra.mxu1 %vm1155_vm0, %v8219_v36  ;;  %7726 = vmatprep.mubr.msk.bf16.mxu0 %vm1155_vm0, %v1076_v7  ;;  %v1101_v36 = vshrl.u32 %v8222_v15, 16 }
  0xf4   : > { %v1436_v20 = vpop.f32.mrf.mxu0  ;;  %7864 = vmatprep.mubr.msk.bf16.mxu1 %vm1155_vm0, %v8220_v53 }
  0xf5   : > { %v8609_v24 = vadd.f32 %v2135_v62, %v1436_v20  ;;  %v2151_v26 = vpop.f32.mrf.mxu1  ;;  %v1103_v50 = vor.u32 %v1101_v36, %v1099_v43  ;;  %v1109_v62 = vshrl.u32 %v8223_v23, 16  ;;  %v8227_v20 = vld [vmem:[%s8346_s22 + $0x208] sm:$0xff]  }
  0xf6   : > { %v7629_v27 = vpop.f32.mrf.mxu0 }
  0xf7   : > { %v8611_v29 = vadd.f32 %v7763_v3, %v7629_v27  ;;  %v7767_v32 = vpop.f32.mrf.mxu1  ;;  %v1108_v0 = vsel %vm616_vm1, %v1103_v50, %v1107_v51  ;;  %v1121_v3 = vshll.u32 %v8225_v52, 16  ;;  %v1111_v14 = vor.u32 %v1109_v62, %v1107_v51  ;;  %v2615_v27 = vld [vmem:[%s8346_s22 + $0x14] sm:$0xf] }
  0xf8   : > { %v1439_v34 = vpop.f32.mrf.mxu0 }
  0xf9   : > { %v8615_v39 = vadd.f32 %v2138_v11, %v1439_v34  ;;  %v2154_v40 = vpop.f32.mrf.mxu1  ;;  %v1123_v19 = vrot.slane %v1121_v3, 1 }
  0xfa   : > { %v7632_v42 = vpop.f32.mrf.mxu0  ;;  %7727 = vmatmul.mubr.msk.bf16.gmra.mxu0 %vm1155_vm0, %v1084_v31  ;;  %v1129_v31 = vshll.u32 %v8226_v9, 16 }
  0xfb   : > { %v8619_v45 = vadd.f32 %v7766_v18, %v7632_v42  ;;  %v7770_v46 = vpop.f32.mrf.mxu1  ;;  %7865 = vmatmul.mubr.msk.bf16.gmra.mxu1 %vm1155_vm0, %v8221_v60  ;;  %7730 = vmatprep.mubr.msk.bf16.mxu0 %vm1155_vm0, %v1092_v35  ;;  %v1119_v18 = vor.u32 %v1117_v2, %v1115_v8  ;;  %v1125_v35 = vshrl.u32 %v8225_v52, 16  ;;  %v1137_v42 = vshll.u32 %v8227_v20, 16 }
  0xfc   : > { %v1452_v48 = vpop.f32.mrf.mxu0  ;;  %7868 = vmatprep.mubr.msk.bf16.mxu1 %vm1155_vm0, %v8222_v15  ;;  %v1131_v51 = vrot.slane %v1129_v31, 1 }
  0xfd   : > { %v8625_v53 = vadd.f32 %v2151_v26, %v1452_v48  ;;  %v2167_v55 = vpop.f32.mrf.mxu1  ;;  %v2614_v26 = vld [vmem:[%s8346_s22 + $0x10] sm:$0xf]  ;;  %v1124_v38 = vsel %vm616_vm1, %v1119_v18, %v1123_v19  ;;  %v1127_v57 = vor.u32 %v1125_v35, %v1123_v19 }
  0xfe   : > { %v7633_v56 = vpop.f32.mrf.mxu0  ;;  %v6874_v43 = vcombine.low %v2614_v26, %v2615_v27  ;;  %v8232_v26 = vld [vmem:[%s8346_s22 + $0x20] sm:$0xff]  }
  0xff   : > { %v8627_v58 = vadd.f32 %v7767_v32, %v7633_v56  ;;  %v7771_v60 = vpop.f32.mrf.mxu1  ;;  %v4512_v32 = vld [vmem:[%s8346_s22 + $0x10] sm:$0xe] }
 0x100   : > { %v1455_v63 = vpop.f32.mrf.mxu0  ;;  %v7010_v48 = vcombine.low %v4512_v32, %v2615_v27 }
 0x101   : > { %v8631_v4 = vadd.f32 %v2154_v40, %v1455_v63  ;;  %v2170_v5 = vpop.f32.mrf.mxu1  ;;  %v1133_v40 = vshrl.u32 %v8226_v9, 16  ;;  %v1139_v63 = vrot.slane %v1137_v42, 1 }
 0x102   : > { %v7636_v7 = vpop.f32.mrf.mxu0  ;;  %7731 = vmatmul.mubr.msk.bf16.gmra.mxu0 %vm1155_vm0, %v1100_v59  ;;  %v8228_v59 = vld [vmem:[%s8346_s22 + $0x210] ss:$0 sps:$4 sm:$0x11]  }
 0x103   : > { %v8635_v11 = vadd.f32 %v7770_v46, %v7636_v7  ;;  %v7774_v12 = vpop.f32.mrf.mxu1  ;;  %7869 = vmatmul.mubr.msk.bf16.gmra.mxu1 %vm1155_vm0, %v8223_v23  ;;  %7734 = vmatprep.mubr.msk.bf16.mxu0 %vm1155_vm0, %v1108_v0  ;;  %v1116_v23 = vsel %vm616_vm1, %v1111_v14, %v1115_v8  ;;  %v1135_v62 = vor.u32 %v1133_v40, %v1131_v51  ;;  %v3086_v0 = vshll.u32 %v6874_v43, 16 }
 0x104   : > { %v1468_v15 = vpop.f32.mrf.mxu0  ;;  %7872 = vmatprep.mubr.msk.bf16.mxu1 %vm1155_vm0, %v8224_v44  ;;  %v4521_v7 = vrot.slane %v8653_v47, 1 }
 0x105   : > { %v8641_v21 = vadd.f32 %v2167_v55, %v1468_v15  ;;  %v2183_v22 = vpop.f32.mrf.mxu1  ;;  %v1141_v15 = vshrl.u32 %v8227_v20, 16  ;;  %v1140_v19 = vsel %vm616_vm1, %v1135_v62, %v1139_v63  ;;  %v3088_v27 = vrot.slane %v3086_v0, 1 }
 0x106   : > { %v7637_v28 = vpop.f32.mrf.mxu0  ;;  %v3095_v0 = vshrl.u32 %v8653_v47, 16 }
 0x107   : > { %v8646_v33 = vadd.f32 %v7771_v60, %v7637_v28  ;;  %v7775_v34 = vpop.f32.mrf.mxu1  ;;  %v3091_v28 = vshll.u32 %v8653_v47, 16  ;;  %v1143_v40 = vor.u32 %v1141_v15, %v1139_v63  ;;  %v3103_v15 = vshrl.u32 %v8232_v26, 16 }
 0x108   : > { %v1471_v36 = vpop.f32.mrf.mxu0 }
 0x109   : > { %9935 = vst [vmem:[#allocation2_spill] sm:$0xff] %v8646_v33  ;;  %v8650_v44 = vadd.f32 %v2170_v5, %v1471_v36  ;;  %v2186_v46 = vpop.f32.mrf.mxu1  ;;  %v4520_v5 = vrot.slane %v7010_v48, 1 }
 0x10a   : > { %v7640_v50 = vpop.f32.mrf.mxu0  ;;  %7735 = vmatmul.mubr.msk.bf16.gmra.mxu0 %vm1155_vm0, %v1116_v23 }
 0x10b   : > { %9936 = vst [vmem:[#allocation3_spill] sm:$0xff] %v8650_v44  ;;  %v8656_v55 = vadd.f32 %v7774_v12, %v7640_v50  ;;  %v7778_v56 = vpop.f32.mrf.mxu1  ;;  %7873 = vmatmul.mubr.msk.bf16.gmra.mxu1 %vm1155_vm0, %v8225_v52  ;;  %7738 = vmatprep.mubr.msk.bf16.mxu0 %vm1155_vm0, %v1124_v38  ;;  %v1132_v12 = vsel %vm616_vm1, %v1127_v57, %v1131_v51  ;;  %v3093_v50 = vrot.slane %v3091_v28, 1  ;;  %v9311_v44 = vld [vmem:[%s8346_s22 + $0x1e8] sm:$0xff]  }
 0x10c   : > { %v1484_v60 = vpop.f32.mrf.mxu0  ;;  %7876 = vmatprep.mubr.msk.bf16.mxu1 %vm1155_vm0, %v8226_v9  ;;  %v1145_v9 = vshll.u32 %v8228_v59, 16  ;;  %v4522_v23 = vsel %vm4519_vm2, %v4520_v5, %v4521_v7 }
 0x10d   : > { %9937 = vst [vmem:[#allocation4_spill] sm:$0xff] %v8656_v55  ;;  %v8662_v2 = vadd.f32 %v2183_v22, %v1484_v60  ;;  %v2199_v3 = vpop.f32.mrf.mxu1  ;;  %v3084_v22 = vshrl.u32 %v6874_v43, 16  ;;  %v3099_v60 = vshll.u32 %v8232_v26, 16 }
 0x10e   : > { %v7641_v8 = vpop.f32.mrf.mxu0  ;;  %v1147_v42 = vrot.slane %v1145_v9, 1 }
 0x10f   : > { %9938 = vst [vmem:[#allocation5_spill] sm:$0xff] %v8662_v2  ;;  %v8665_v52 = vadd.f32 %v7775_v34, %v7641_v8  ;;  %v7779_v14 = vpop.f32.mrf.mxu1  ;;  %v8675_v34 = vld [vmem:[%s8346_s22 + $0x28] sm:$0xff]   ;;  %v3089_v48 = vor.u32 %v3088_v27, %v3084_v22  ;;  %v8698_v22 = vld [vmem:[%s8346_s22 + $0x38] sm:$0xff]   ;;  %v3101_v47 = vrot.slane %v3099_v60, 1 }
 0x110   : > { %v1487_v18 = vpop.f32.mrf.mxu0  ;;  %v1148_v62 = vsel %vm616_vm1, %v1143_v40, %v1147_v42  ;;  %v3107_v9 = vshll.u32 %v8675_v34, 16 }
 0x111   : > { %9939 = vst [vmem:[#allocation6_spill] sm:$0xff] %v8665_v52  ;;  %v8671_v31 = vadd.f32 %v2186_v46, %v1487_v18  ;;  %v2202_v32 = vpop.f32.mrf.mxu1  ;;  %v4523_v46 = vrot.slane %v8232_v26, 1 }
 0x112   : > { %v7644_v35 = vpop.f32.mrf.mxu0  ;;  %7739 = vmatmul.mubr.msk.bf16.gmra.mxu0 %vm1155_vm0, %v1132_v12  ;;  %v3094_v12 = vsel %vm616_vm1, %v3089_v48, %v3093_v50  ;;  %v3109_v40 = vrot.slane %v3107_v9, 1 }
 0x113   : > { %9940 = vst [vmem:[#allocation7_spill] sm:$0xff] %v8671_v31  ;;  %v8678_v36 = vadd.f32 %v7778_v56, %v7644_v35  ;;  %v7782_v38 = vpop.f32.mrf.mxu1  ;;  %7877 = vmatmul.mubr.msk.bf16.gmra.mxu1 %vm1155_vm0, %v8227_v20  ;;  %7742 = vmatprep.mubr.msk.bf16.mxu0 %vm1155_vm0, %v1140_v19  ;;  %v4525_v56 = vrot.slane %v8675_v34, 1  ;;  %v4524_v8 = vsel %vm4519_vm2, %v4521_v7, %v4523_v46 }
 0x114   : > { %v1500_v43 = vpop.f32.mrf.mxu0  ;;  %8016 = vmatprep.mubr.msk.bf16.mxu1 %vm1155_vm0, %v4522_v23  ;;  %v3097_v23 = vor.u32 %v3095_v0, %v3093_v50  ;;  %v3105_v35 = vor.u32 %v3103_v15, %v3101_v47  ;;  %v3123_v15 = vshll.u32 %v8698_v22, 16 }
 0x115   : > { %9941 = vst [vmem:[#allocation8_spill] sm:$0xff] %v8678_v36  ;;  %v8683_v51 = vadd.f32 %v2199_v3, %v1500_v43  ;;  %v2215_v57 = vpop.f32.mrf.mxu1  ;;  %v8234_v3 = vld [vmem:[%s8346_s22 + $0x30] sm:$0xff]  }
 0x116   : > { %v7645_v59 = vpop.f32.mrf.mxu0  ;;  %v3115_v48 = vshll.u32 %v8234_v3, 16  ;;  %v3102_v60 = vsel %vm616_vm1, %v3097_v23, %v3101_v47 }
 0x117   : > { %9942 = vst [vmem:[#allocation9_spill] sm:$0xff] %v8683_v51  ;;  %v8686_v20 = vadd.f32 %v7779_v14, %v7645_v59  ;;  %v7783_v63 = vpop.f32.mrf.mxu1  ;;  %v4526_v14 = vsel %vm4519_vm2, %v4523_v46, %v4525_v56  ;;  %v4529_v46 = vrot.slane %v8698_v22, 1 }
 0x118   : > { %v1503_v5 = vpop.f32.mrf.mxu0 }
 0x119   : > { %9943 = vst [vmem:[#allocation10_spill] sm:$0xff] %v8686_v20  ;;  %v8694_v18 = vadd.f32 %v2202_v32, %v1503_v5  ;;  %v2218_v19 = vpop.f32.mrf.mxu1  ;;  %v4527_v32 = vrot.slane %v8234_v3, 1 }
 0x11a   : > { %v7648_v27 = vpop.f32.mrf.mxu0  ;;  %7743 = vmatmul.mubr.msk.bf16.gmra.mxu0 %vm1155_vm0, %v1148_v62  ;;  %v3111_v62 = vshrl.u32 %v8675_v34, 16  ;;  %v3117_v34 = vrot.slane %v3115_v48, 1 }
 0x11b   : > { %9944 = vst [vmem:[#allocation11_spill] sm:$0xff] %v8694_v18  ;;  %v8701_v28 = vadd.f32 %v7782_v38, %v7648_v27  ;;  %v7786_v7 = vpop.f32.mrf.mxu1  ;;  %8017 = vmatmul.mubr.msk.bf16.vlgmr.msra.gmra.mxu1 %vm1155_vm0, %v4524_v8  ;;  %7882 = vmatprep.mubr.msk.bf16.mxu0 %vm1155_vm0, %v3094_v12  ;;  %v4528_v5 = vsel %vm4519_vm2, %v4525_v56, %v4527_v32  ;;  %v3119_v12 = vshrl.u32 %v8234_v3, 16  ;;  %v8721_v27 = vld [vmem:[%s8346_s22 + $0x48] sm:$0xff]  }
 0x11c   : > { %v1516_v26 = vpop.f32.mrf.mxu0  ;;  %8020 = vmatprep.mubr.msk.bf16.mxu1 %vm1155_vm0, %v4526_v14  ;;  %v3110_v8 = vsel %vm616_vm1, %v3105_v35, %v3109_v40  ;;  %v3113_v23 = vor.u32 %v3111_v62, %v3109_v40  ;;  %v3125_v35 = vrot.slane %v3123_v15, 1  ;;  %v4533_v48 = vrot.slane %v8721_v27, 1 }
 0x11d   : > { %9945 = vst [vmem:[#allocation12_spill] sm:$0xff] %v8701_v28  ;;  %v8706_v42 = vadd.f32 %v2215_v57, %v1516_v26  ;;  %v2231_v43 = vpop.f32.mrf.mxu1  ;;  %v8236_v57 = vld [vmem:[%s8346_s22 + $0x40] sm:$0xff]  }
 0x11e   : > { %v7649_v38 = vpop.f32.mrf.mxu0  ;;  %v3118_v62 = vsel %vm616_vm1, %v3113_v23, %v3117_v34  ;;  %v3135_v15 = vshrl.u32 %v8236_v57, 16 }
 0x11f   : > { %9946 = vst [vmem:[#allocation13_spill] sm:$0xff] %v8706_v42  ;;  %v8709_v59 = vadd.f32 %v7783_v63, %v7649_v38  ;;  %v7787_v50 = vpop.f32.mrf.mxu1  ;;  %v4530_v63 = vsel %vm4519_vm2, %v4527_v32, %v4529_v46  ;;  %v3121_v32 = vor.u32 %v3119_v12, %v3117_v34  ;;  %v9233_v42 = vld [vmem:[%s8346_s22 + $0x1b0] sm:$0xff]  }
 0x120   : > { %v1519_v0 = vpop.f32.mrf.mxu0 }
 0x121   : > { %9947 = vst [vmem:[#allocation14_spill] sm:$0xff] %v8709_v59  ;;  %v8717_v9 = vadd.f32 %v2218_v19, %v1519_v0  ;;  %v2234_v14 = vpop.f32.mrf.mxu1  ;;  %v4531_v19 = vrot.slane %v8236_v57, 1  ;;  %v3126_v12 = vsel %vm616_vm1, %v3121_v32, %v3125_v35 }
 0x122   : > { %v7652_v26 = vpop.f32.mrf.mxu0  ;;  %7883 = vmatmul.mubr.msk.bf16.vlgmr.msra.gmra.mxu0 %vm1155_vm0, %v3102_v60  ;;  %v3131_v60 = vshll.u32 %v8236_v57, 16 }
 0x123   : > { %9948 = vst [vmem:[#allocation15_spill] sm:$0xff] %v8717_v9  ;;  %v8724_v47 = vadd.f32 %v7786_v7, %v7652_v26  ;;  %v7790_v56 = vpop.f32.mrf.mxu1  ;;  %8021 = vmatmul.mubr.msk.bf16.gmra.mxu1 %vm1155_vm0, %v4528_v5  ;;  %7886 = vmatprep.mubr.msk.bf16.mxu0 %vm1155_vm0, %v3110_v8  ;;  %v3127_v5 = vshrl.u32 %v8698_v22, 16 }
 0x124   : > { %v1532_v3 = vpop.f32.mrf.mxu0  ;;  %8024 = vmatprep.mubr.msk.bf16.mxu1 %vm1155_vm0, %v4530_v63  ;;  %v4532_v63 = vsel %vm4519_vm2, %v4529_v46, %v4531_v19  ;;  %v3133_v22 = vrot.slane %v3131_v60, 1 }
 0x125   : > { %9949 = vst [vmem:[#allocation16_spill] sm:$0xff] %v8724_v47  ;;  %v8729_v38 = vadd.f32 %v2231_v43, %v1532_v3  ;;  %v2247_v0 = vpop.f32.mrf.mxu1  ;;  %v8238_v43 = vld [vmem:[%s8346_s22 + $0x50] sm:$0xff]   ;;  %v3139_v3 = vshll.u32 %v8721_v27, 16  ;;  %v3129_v23 = vor.u32 %v3127_v5, %v3125_v35 }
 0x126   : > { %v7653_v7 = vpop.f32.mrf.mxu0 }
 0x127   : > { %9950 = vst [vmem:[#allocation17_spill] sm:$0xff] %v8729_v38  ;;  %v8732_v26 = vadd.f32 %v7787_v50, %v7653_v7  ;;  %v7791_v40 = vpop.f32.mrf.mxu1  ;;  %v4534_v50 = vsel %vm4519_vm2, %v4531_v19, %v4533_v48  ;;  %v8744_v7 = vld [vmem:[%s8346_s22 + $0x58] sm:$0xff]   ;;  %v3137_v19 = vor.u32 %v3135_v15, %v3133_v22  ;;  %v3141_v32 = vrot.slane %v3139_v3, 1 }
 0x128   : > { %v1535_v8 = vpop.f32.mrf.mxu0  ;;  %v4537_v60 = vrot.slane %v8744_v7, 1  ;;  %v3134_v5 = vsel %vm616_vm1, %v3129_v23, %v3133_v22  ;;  %v3151_v3 = vshrl.u32 %v8238_v43, 16 }
 0x129   : > { %9951 = vst [vmem:[#allocation18_spill] sm:$0xff] %v8732_v26  ;;  %v8740_v38 = vadd.f32 %v2234_v14, %v1535_v8  ;;  %v2250_v47 = vpop.f32.mrf.mxu1  ;;  %v4535_v14 = vrot.slane %v8238_v43, 1  ;;  %v3142_v15 = vsel %vm616_vm1, %v3137_v19, %v3141_v32 }
 0x12a   : > { %v7656_v26 = vpop.f32.mrf.mxu0  ;;  %7887 = vmatmul.mubr.msk.bf16.gmra.mxu0 %vm1155_vm0, %v3118_v62 }
 0x12b   : > { %9952 = vst [vmem:[#allocation19_spill] sm:$0xff] %v8740_v38  ;;  %v8747_v34 = vadd.f32 %v7790_v56, %v7656_v26  ;;  %v7794_v46 = vpop.f32.mrf.mxu1  ;;  %8025 = vmatmul.mubr.msk.bf16.gmra.mxu1 %vm1155_vm0, %v4532_v63  ;;  %7890 = vmatprep.mubr.msk.bf16.mxu0 %vm1155_vm0, %v3126_v12  ;;  %v3147_v26 = vshll.u32 %v8238_v43, 16  ;;  %v3143_v63 = vshrl.u32 %v8721_v27, 16 }
 0x12c   : > { %v1548_v57 = vpop.f32.mrf.mxu0  ;;  %8028 = vmatprep.mubr.msk.bf16.mxu1 %vm1155_vm0, %v4534_v50  ;;  %v4536_v50 = vsel %vm4519_vm2, %v4533_v48, %v4535_v14 }
 0x12d   : > { %9953 = vst [vmem:[#allocation20_spill] sm:$0xff] %v8747_v34  ;;  %v8752_v8 = vadd.f32 %v2247_v0, %v1548_v57  ;;  %v2263_v38 = vpop.f32.mrf.mxu1  ;;  %v8240_v0 = vld [vmem:[%s8346_s22 + $0x60] sm:$0xff]   ;;  %v3155_v57 = vshll.u32 %v8744_v7, 16  ;;  %v3149_v27 = vrot.slane %v3147_v26, 1  ;;  %v3145_v23 = vor.u32 %v3143_v63, %v3141_v32 }
 0x12e   : > { %v7657_v56 = vpop.f32.mrf.mxu0 }
 0x12f   : > { %9954 = vst [vmem:[#allocation21_spill] sm:$0xff] %v8752_v8  ;;  %v8755_v62 = vadd.f32 %v7791_v40, %v7657_v56  ;;  %v7795_v35 = vpop.f32.mrf.mxu1  ;;  %v4538_v40 = vsel %vm4519_vm2, %v4535_v14, %v4537_v60  ;;  %v8767_v56 = vld [vmem:[%s8346_s22 + $0x68] sm:$0xff]   ;;  %v3153_v14 = vor.u32 %v3151_v3, %v3149_v27  ;;  %v3157_v19 = vrot.slane %v3155_v57, 1 }
 0x130   : > { %v1551_v12 = vpop.f32.mrf.mxu0  ;;  %v4541_v26 = vrot.slane %v8767_v56, 1  ;;  %v3150_v63 = vsel %vm616_vm1, %v3145_v23, %v3149_v27  ;;  %v3167_v57 = vshrl.u32 %v8240_v0, 16 }
 0x131   : > { %9955 = vst [vmem:[#allocation22_spill] sm:$0xff] %v8755_v62  ;;  %v8763_v8 = vadd.f32 %v2250_v47, %v1551_v12  ;;  %v2266_v34 = vpop.f32.mrf.mxu1  ;;  %v4539_v47 = vrot.slane %v8240_v0, 1  ;;  %v3158_v3 = vsel %vm616_vm1, %v3153_v14, %v3157_v19 }
 0x132   : > { %v7660_v62 = vpop.f32.mrf.mxu0  ;;  %7891 = vmatmul.mubr.msk.bf16.gmra.mxu0 %vm1155_vm0, %v3134_v5 }
 0x133   : > { %9956 = vst [vmem:[#allocation23_spill] sm:$0xff] %v8763_v8  ;;  %v8770_v22 = vadd.f32 %v7794_v46, %v7660_v62  ;;  %v7798_v48 = vpop.f32.mrf.mxu1  ;;  %8029 = vmatmul.mubr.msk.bf16.gmra.mxu1 %vm1155_vm0, %v4536_v50  ;;  %7894 = vmatprep.mubr.msk.bf16.mxu0 %vm1155_vm0, %v3142_v15  ;;  %v3163_v62 = vshll.u32 %v8240_v0, 16  ;;  %v3159_v50 = vshrl.u32 %v8744_v7, 16 }
 0x134   : > { %v1564_v43 = vpop.f32.mrf.mxu0  ;;  %8032 = vmatprep.mubr.msk.bf16.mxu1 %vm1155_vm0, %v4538_v40  ;;  %v4540_v40 = vsel %vm4519_vm2, %v4537_v60, %v4539_v47 }
 0x135   : > { %9957 = vst [vmem:[#allocation24_spill] sm:$0xff] %v8770_v22  ;;  %v8775_v12 = vadd.f32 %v2263_v38, %v1564_v43  ;;  %v2279_v8 = vpop.f32.mrf.mxu1  ;;  %v8242_v38 = vld [vmem:[%s8346_s22 + $0x70] sm:$0xff]   ;;  %v3171_v43 = vshll.u32 %v8767_v56, 16  ;;  %v3165_v7 = vrot.slane %v3163_v62, 1  ;;  %v3161_v23 = vor.u32 %v3159_v50, %v3157_v19 }
 0x136   : > { %v7661_v46 = vpop.f32.mrf.mxu0 }
 0x137   : > { %9958 = vst [vmem:[#allocation25_spill] sm:$0xff] %v8775_v12  ;;  %v8778_v5 = vadd.f32 %v7795_v35, %v7661_v46  ;;  %v7799_v32 = vpop.f32.mrf.mxu1  ;;  %v4542_v35 = vsel %vm4519_vm2, %v4539_v47, %v4541_v26  ;;  %v8790_v46 = vld [vmem:[%s8346_s22 + $0x78] sm:$0xff]   ;;  %v3169_v47 = vor.u32 %v3167_v57, %v3165_v7  ;;  %v3173_v14 = vrot.slane %v3171_v43, 1 }
 0x138   : > { %v1567_v15 = vpop.f32.mrf.mxu0  ;;  %v4545_v62 = vrot.slane %v8790_v46, 1  ;;  %v3166_v50 = vsel %vm616_vm1, %v3161_v23, %v3165_v7  ;;  %v3183_v43 = vshrl.u32 %v8242_v38, 16 }
 0x139   : > { %9959 = vst [vmem:[#allocation26_spill] sm:$0xff] %v8778_v5  ;;  %v8786_v12 = vadd.f32 %v2266_v34, %v1567_v15  ;;  %v2282_v22 = vpop.f32.mrf.mxu1  ;;  %v4543_v34 = vrot.slane %v8242_v38, 1  ;;  %v3174_v57 = vsel %vm616_vm1, %v3169_v47, %v3173_v14 }
 0x13a   : > { %v7664_v5 = vpop.f32.mrf.mxu0  ;;  %7895 = vmatmul.mubr.msk.bf16.gmra.mxu0 %vm1155_vm0, %v3150_v63 }
 0x13b   : > { %9960 = vst [vmem:[#allocation27_spill] sm:$0xff] %v8786_v12  ;;  %v8793_v27 = vadd.f32 %v7798_v48, %v7664_v5  ;;  %v7802_v60 = vpop.f32.mrf.mxu1  ;;  %8033 = vmatmul.mubr.msk.bf16.gmra.mxu1 %vm1155_vm0, %v4540_v40  ;;  %7898 = vmatprep.mubr.msk.bf16.mxu0 %vm1155_vm0, %v3158_v3  ;;  %v3179_v5 = vshll.u32 %v8242_v38, 16  ;;  %v3175_v40 = vshrl.u32 %v8767_v56, 16 }
 0x13c   : > { %v1580_v0 = vpop.f32.mrf.mxu0  ;;  %8036 = vmatprep.mubr.msk.bf16.mxu1 %vm1155_vm0, %v4542_v35  ;;  %v4544_v35 = vsel %vm4519_vm2, %v4541_v26, %v4543_v34 }
 0x13d   : > { %9961 = vst [vmem:[#allocation28_spill] sm:$0xff] %v8793_v27  ;;  %v8798_v15 = vadd.f32 %v2279_v8, %v1580_v0  ;;  %v2295_v12 = vpop.f32.mrf.mxu1  ;;  %v8244_v8 = vld [vmem:[%s8346_s22 + $0x80] sm:$0xff]   ;;  %v3187_v0 = vshll.u32 %v8790_v46, 16  ;;  %v3181_v56 = vrot.slane %v3179_v5, 1  ;;  %v3177_v23 = vor.u32 %v3175_v40, %v3173_v14 }
 0x13e   : > { %v7665_v48 = vpop.f32.mrf.mxu0 }
 0x13f   : > { %9962 = vst [vmem:[#allocation29_spill] sm:$0xff] %v8798_v15  ;;  %v8801_v63 = vadd.f32 %v7799_v32, %v7665_v48  ;;  %v7803_v19 = vpop.f32.mrf.mxu1  ;;  %v4546_v32 = vsel %vm4519_vm2, %v4543_v34, %v4545_v62  ;;  %v8813_v48 = vld [vmem:[%s8346_s22 + $0x88] sm:$0xff]   ;;  %v3185_v34 = vor.u32 %v3183_v43, %v3181_v56  ;;  %v3189_v47 = vrot.slane %v3187_v0, 1 }
 0x140   : > { %v1583_v3 = vpop.f32.mrf.mxu0  ;;  %v4549_v5 = vrot.slane %v8813_v48, 1  ;;  %v3182_v40 = vsel %vm616_vm1, %v3177_v23, %v3181_v56  ;;  %v3199_v0 = vshrl.u32 %v8244_v8, 16 }
 0x141   : > { %9963 = vst [vmem:[#allocation30_spill] sm:$0xff] %v8801_v63  ;;  %v8809_v15 = vadd.f32 %v2282_v22, %v1583_v3  ;;  %v2298_v27 = vpop.f32.mrf.mxu1  ;;  %v4547_v22 = vrot.slane %v8244_v8, 1  ;;  %v3190_v43 = vsel %vm616_vm1, %v3185_v34, %v3189_v47 }
 0x142   : > { %v7668_v63 = vpop.f32.mrf.mxu0  ;;  %7899 = vmatmul.mubr.msk.bf16.gmra.mxu0 %vm1155_vm0, %v3166_v50 }
 0x143   : > { %9964 = vst [vmem:[#allocation31_spill] sm:$0xff] %v8809_v15  ;;  %v8816_v7 = vadd.f32 %v7802_v60, %v7668_v63  ;;  %v7806_v26 = vpop.f32.mrf.mxu1  ;;  %8037 = vmatmul.mubr.msk.bf16.gmra.mxu1 %vm1155_vm0, %v4544_v35  ;;  %7902 = vmatprep.mubr.msk.bf16.mxu0 %vm1155_vm0, %v3174_v57  ;;  %v3195_v63 = vshll.u32 %v8244_v8, 16  ;;  %v3191_v35 = vshrl.u32 %v8790_v46, 16 }
 0x144   : > { %v1596_v38 = vpop.f32.mrf.mxu0  ;;  %8040 = vmatprep.mubr.msk.bf16.mxu1 %vm1155_vm0, %v4546_v32  ;;  %v4548_v32 = vsel %vm4519_vm2, %v4545_v62, %v4547_v22 }
 0x145   : > { %9965 = vst [vmem:[#allocation32_spill] sm:$0xff] %v8816_v7  ;;  %v8821_v3 = vadd.f32 %v2295_v12, %v1596_v38  ;;  %v2311_v15 = vpop.f32.mrf.mxu1  ;;  %v8246_v12 = vld [vmem:[%s8346_s22 + $0x90] sm:$0xff]   ;;  %v3203_v38 = vshll.u32 %v8813_v48, 16  ;;  %v3197_v46 = vrot.slane %v3195_v63, 1  ;;  %v3193_v23 = vor.u32 %v3191_v35, %v3189_v47 }
 0x146   : > { %v7669_v60 = vpop.f32.mrf.mxu0 }
 0x147   : > { %9966 = vst [vmem:[#allocation33_spill] sm:$0xff] %v8821_v3  ;;  %v8824_v50 = vadd.f32 %v7803_v19, %v7669_v60  ;;  %v7807_v14 = vpop.f32.mrf.mxu1  ;;  %v4550_v19 = vsel %vm4519_vm2, %v4547_v22, %v4549_v5  ;;  %v8836_v60 = vld [vmem:[%s8346_s22 + $0x98] sm:$0xff]   ;;  %v3201_v22 = vor.u32 %v3199_v0, %v3197_v46  ;;  %v3205_v34 = vrot.slane %v3203_v38, 1 }
 0x148   : > { %v1599_v57 = vpop.f32.mrf.mxu0  ;;  %v4553_v63 = vrot.slane %v8836_v60, 1  ;;  %v3198_v35 = vsel %vm616_vm1, %v3193_v23, %v3197_v46  ;;  %v3215_v38 = vshrl.u32 %v8246_v12, 16 }
 0x149   : > { %9967 = vst [vmem:[#allocation34_spill] sm:$0xff] %v8824_v50  ;;  %v8832_v3 = vadd.f32 %v2298_v27, %v1599_v57  ;;  %v2314_v7 = vpop.f32.mrf.mxu1  ;;  %v4551_v27 = vrot.slane %v8246_v12, 1  ;;  %v3206_v0 = vsel %vm616_vm1, %v3201_v22, %v3205_v34 }
 0x14a   : > { %v7672_v50 = vpop.f32.mrf.mxu0  ;;  %7903 = vmatmul.mubr.msk.bf16.gmra.mxu0 %vm1155_vm0, %v3182_v40 }
 0x14b   : > { %9968 = vst [vmem:[#allocation35_spill] sm:$0xff] %v8832_v3  ;;  %v8839_v56 = vadd.f32 %v7806_v26, %v7672_v50  ;;  %v7810_v62 = vpop.f32.mrf.mxu1  ;;  %8041 = vmatmul.mubr.msk.bf16.gmra.mxu1 %vm1155_vm0, %v4548_v32  ;;  %7906 = vmatprep.mubr.msk.bf16.mxu0 %vm1155_vm0, %v3190_v43  ;;  %v3211_v50 = vshll.u32 %v8246_v12, 16  ;;  %v3207_v32 = vshrl.u32 %v8813_v48, 16 }
 0x14c   : > { %v1612_v8 = vpop.f32.mrf.mxu0  ;;  %8044 = vmatprep.mubr.msk.bf16.mxu1 %vm1155_vm0, %v4550_v19  ;;  %v4552_v19 = vsel %vm4519_vm2, %v4549_v5, %v4551_v27 }
 0x14d   : > { %9969 = vst [vmem:[#allocation36_spill] sm:$0xff] %v8839_v56  ;;  %v8844_v57 = vadd.f32 %v2311_v15, %v1612_v8  ;;  %v2327_v3 = vpop.f32.mrf.mxu1  ;;  %v8248_v15 = vld [vmem:[%s8346_s22 + $0xa0] sm:$0xff]   ;;  %v3219_v8 = vshll.u32 %v8836_v60, 16  ;;  %v3213_v48 = vrot.slane %v3211_v50, 1  ;;  %v3209_v23 = vor.u32 %v3207_v32, %v3205_v34 }
 0x14e   : > { %v7673_v26 = vpop.f32.mrf.mxu0 }
 0x14f   : > { %9970 = vst [vmem:[#allocation37_spill] sm:$0xff] %v8844_v57  ;;  %v8847_v40 = vadd.f32 %v7807_v14, %v7673_v26  ;;  %v7811_v47 = vpop.f32.mrf.mxu1  ;;  %v4554_v14 = vsel %vm4519_vm2, %v4551_v27, %v4553_v63  ;;  %v8859_v26 = vld [vmem:[%s8346_s22 + $0xa8] sm:$0xff]   ;;  %v3217_v27 = vor.u32 %v3215_v38, %v3213_v48  ;;  %v3221_v22 = vrot.slane %v3219_v8, 1 }
 0x150   : > { %v1615_v43 = vpop.f32.mrf.mxu0  ;;  %v4557_v50 = vrot.slane %v8859_v26, 1  ;;  %v3214_v32 = vsel %vm616_vm1, %v3209_v23, %v3213_v48  ;;  %v3231_v8 = vshrl.u32 %v8248_v15, 16 }
 0x151   : > { %9971 = vst [vmem:[#allocation38_spill] sm:$0xff] %v8847_v40  ;;  %v8855_v57 = vadd.f32 %v2314_v7, %v1615_v43  ;;  %v2330_v56 = vpop.f32.mrf.mxu1  ;;  %v4555_v7 = vrot.slane %v8248_v15, 1  ;;  %v3222_v38 = vsel %vm616_vm1, %v3217_v27, %v3221_v22 }
 0x152   : > { %v7676_v40 = vpop.f32.mrf.mxu0  ;;  %7907 = vmatmul.mubr.msk.bf16.gmra.mxu0 %vm1155_vm0, %v3198_v35 }
 0x153   : > { %9972 = vst [vmem:[#allocation39_spill] sm:$0xff] %v8855_v57  ;;  %v8862_v46 = vadd.f32 %v7810_v62, %v7676_v40  ;;  %v7814_v5 = vpop.f32.mrf.mxu1  ;;  %8045 = vmatmul.mubr.msk.bf16.gmra.mxu1 %vm1155_vm0, %v4552_v19  ;;  %7910 = vmatprep.mubr.msk.bf16.mxu0 %vm1155_vm0, %v3206_v0  ;;  %v3227_v40 = vshll.u32 %v8248_v15, 16  ;;  %v3223_v19 = vshrl.u32 %v8836_v60, 16 }
 0x154   : > { %v1628_v12 = vpop.f32.mrf.mxu0  ;;  %8048 = vmatprep.mubr.msk.bf16.mxu1 %vm1155_vm0, %v4554_v14  ;;  %v4556_v14 = vsel %vm4519_vm2, %v4553_v63, %v4555_v7 }
 0x155   : > { %9973 = vst [vmem:[#allocation40_spill] sm:$0xff] %v8862_v46  ;;  %v8867_v43 = vadd.f32 %v2327_v3, %v1628_v12  ;;  %v2343_v57 = vpop.f32.mrf.mxu1  ;;  %v8250_v3 = vld [vmem:[%s8346_s22 + $0xb0] sm:$0xff]   ;;  %v3235_v12 = vshll.u32 %v8859_v26, 16  ;;  %v3229_v60 = vrot.slane %v3227_v40, 1  ;;  %v3225_v23 = vor.u32 %v3223_v19, %v3221_v22 }
 0x156   : > { %v7677_v62 = vpop.f32.mrf.mxu0 }
 0x157   : > { %9974 = vst [vmem:[#allocation41_spill] sm:$0xff] %v8867_v43  ;;  %v8870_v35 = vadd.f32 %v7811_v47, %v7677_v62  ;;  %v7815_v34 = vpop.f32.mrf.mxu1  ;;  %v4558_v47 = vsel %vm4519_vm2, %v4555_v7, %v4557_v50  ;;  %v8882_v62 = vld [vmem:[%s8346_s22 + $0xb8] sm:$0xff]   ;;  %v3233_v7 = vor.u32 %v3231_v8, %v3229_v60  ;;  %v3237_v27 = vrot.slane %v3235_v12, 1 }
 0x158   : > { %v1631_v0 = vpop.f32.mrf.mxu0  ;;  %v4561_v40 = vrot.slane %v8882_v62, 1  ;;  %v3230_v19 = vsel %vm616_vm1, %v3225_v23, %v3229_v60  ;;  %v3247_v12 = vshrl.u32 %v8250_v3, 16 }
 0x159   : > { %9975 = vst [vmem:[#allocation42_spill] sm:$0xff] %v8870_v35  ;;  %v8878_v43 = vadd.f32 %v2330_v56, %v1631_v0  ;;  %v2346_v46 = vpop.f32.mrf.mxu1  ;;  %v4559_v56 = vrot.slane %v8250_v3, 1  ;;  %v3238_v8 = vsel %vm616_vm1, %v3233_v7, %v3237_v27 }
 0x15a   : > { %v7680_v35 = vpop.f32.mrf.mxu0  ;;  %7911 = vmatmul.mubr.msk.bf16.gmra.mxu0 %vm1155_vm0, %v3214_v32 }
 0x15b   : > { %9976 = vst [vmem:[#allocation43_spill] sm:$0xff] %v8878_v43  ;;  %v8885_v48 = vadd.f32 %v7814_v5, %v7680_v35  ;;  %v7818_v63 = vpop.f32.mrf.mxu1  ;;  %8049 = vmatmul.mubr.msk.bf16.gmra.mxu1 %vm1155_vm0, %v4556_v14  ;;  %7914 = vmatprep.mubr.msk.bf16.mxu0 %vm1155_vm0, %v3222_v38  ;;  %v3243_v35 = vshll.u32 %v8250_v3, 16  ;;  %v3239_v14 = vshrl.u32 %v8859_v26, 16 }
 0x15c   : > { %v1644_v15 = vpop.f32.mrf.mxu0  ;;  %8052 = vmatprep.mubr.msk.bf16.mxu1 %vm1155_vm0, %v4558_v47  ;;  %v4560_v47 = vsel %vm4519_vm2, %v4557_v50, %v4559_v56 }
 0x15d   : > { %9977 = vst [vmem:[#allocation44_spill] sm:$0xff] %v8885_v48  ;;  %v8890_v0 = vadd.f32 %v2343_v57, %v1644_v15  ;;  %v2359_v43 = vpop.f32.mrf.mxu1  ;;  %v8252_v57 = vld [vmem:[%s8346_s22 + $0xc0] sm:$0xff]   ;;  %v3251_v15 = vshll.u32 %v8882_v62, 16  ;;  %v3245_v26 = vrot.slane %v3243_v35, 1  ;;  %v3241_v23 = vor.u32 %v3239_v14, %v3237_v27 }
 0x15e   : > { %v7681_v5 = vpop.f32.mrf.mxu0 }
 0x15f   : > { %9978 = vst [vmem:[#allocation45_spill] sm:$0xff] %v8890_v0  ;;  %v8893_v32 = vadd.f32 %v7815_v34, %v7681_v5  ;;  %v7819_v22 = vpop.f32.mrf.mxu1  ;;  %v4562_v34 = vsel %vm4519_vm2, %v4559_v56, %v4561_v40  ;;  %v8905_v5 = vld [vmem:[%s8346_s22 + $0xc8] sm:$0xff]   ;;  %v3249_v56 = vor.u32 %v3247_v12, %v3245_v26  ;;  %v3253_v7 = vrot.slane %v3251_v15, 1 }
 0x160   : > { %v1647_v38 = vpop.f32.mrf.mxu0  ;;  %v4565_v35 = vrot.slane %v8905_v5, 1  ;;  %v3246_v14 = vsel %vm616_vm1, %v3241_v23, %v3245_v26  ;;  %v3263_v15 = vshrl.u32 %v8252_v57, 16 }
 0x161   : > { %9979 = vst [vmem:[#allocation46_spill] sm:$0xff] %v8893_v32  ;;  %v8901_v0 = vadd.f32 %v2346_v46, %v1647_v38  ;;  %v2362_v48 = vpop.f32.mrf.mxu1  ;;  %v4563_v46 = vrot.slane %v8252_v57, 1  ;;  %v3254_v12 = vsel %vm616_vm1, %v3249_v56, %v3253_v7 }
 0x162   : > { %v7684_v32 = vpop.f32.mrf.mxu0  ;;  %7915 = vmatmul.mubr.msk.bf16.gmra.mxu0 %vm1155_vm0, %v3230_v19 }
 0x163   : > { %9980 = vst [vmem:[#allocation47_spill] sm:$0xff] %v8901_v0  ;;  %v8908_v60 = vadd.f32 %v7818_v63, %v7684_v32  ;;  %v7822_v50 = vpop.f32.mrf.mxu1  ;;  %8053 = vmatmul.mubr.msk.bf16.gmra.mxu1 %vm1155_vm0, %v4560_v47  ;;  %7918 = vmatprep.mubr.msk.bf16.mxu0 %vm1155_vm0, %v3238_v8  ;;  %v3259_v32 = vshll.u32 %v8252_v57, 16  ;;  %v3255_v47 = vshrl.u32 %v8882_v62, 16 }
 0x164   : > { %v1660_v3 = vpop.f32.mrf.mxu0  ;;  %8056 = vmatprep.mubr.msk.bf16.mxu1 %vm1155_vm0, %v4562_v34  ;;  %v4564_v34 = vsel %vm4519_vm2, %v4561_v40, %v4563_v46 }
 0x165   : > { %9981 = vst [vmem:[#allocation48_spill] sm:$0xff] %v8908_v60  ;;  %v8913_v38 = vadd.f32 %v2359_v43, %v1660_v3  ;;  %v2375_v0 = vpop.f32.mrf.mxu1  ;;  %v8254_v43 = vld [vmem:[%s8346_s22 + $0xd0] sm:$0xff]   ;;  %v3267_v3 = vshll.u32 %v8905_v5, 16  ;;  %v3261_v62 = vrot.slane %v3259_v32, 1  ;;  %v3257_v23 = vor.u32 %v3255_v47, %v3253_v7 }
 0x166   : > { %v7685_v63 = vpop.f32.mrf.mxu0 }
 0x167   : > { %9982 = vst [vmem:[#allocation49_spill] sm:$0xff] %v8913_v38  ;;  %v8916_v19 = vadd.f32 %v7819_v22, %v7685_v63  ;;  %v7823_v27 = vpop.f32.mrf.mxu1  ;;  %v4566_v22 = vsel %vm4519_vm2, %v4563_v46, %v4565_v35  ;;  %v8928_v63 = vld [vmem:[%s8346_s22 + $0xd8] sm:$0xff]   ;;  %v3265_v46 = vor.u32 %v3263_v15, %v3261_v62  ;;  %v3269_v56 = vrot.slane %v3267_v3, 1 }
 0x168   : > { %v1663_v8 = vpop.f32.mrf.mxu0  ;;  %v4569_v32 = vrot.slane %v8928_v63, 1  ;;  %v3262_v47 = vsel %vm616_vm1, %v3257_v23, %v3261_v62  ;;  %v3279_v3 = vshrl.u32 %v8254_v43, 16 }
 0x169   : > { %9983 = vst [vmem:[#allocation50_spill] sm:$0xff] %v8916_v19  ;;  %v8924_v38 = vadd.f32 %v2362_v48, %v1663_v8  ;;  %v2378_v60 = vpop.f32.mrf.mxu1  ;;  %v4567_v48 = vrot.slane %v8254_v43, 1  ;;  %v3270_v15 = vsel %vm616_vm1, %v3265_v46, %v3269_v56 }
 0x16a   : > { %v7688_v19 = vpop.f32.mrf.mxu0  ;;  %7919 = vmatmul.mubr.msk.bf16.gmra.mxu0 %vm1155_vm0, %v3246_v14 }
 0x16b   : > { %9984 = vst [vmem:[#allocation51_spill] sm:$0xff] %v8924_v38  ;;  %v8931_v26 = vadd.f32 %v7822_v50, %v7688_v19  ;;  %v7826_v40 = vpop.f32.mrf.mxu1  ;;  %8057 = vmatmul.mubr.msk.bf16.gmra.mxu1 %vm1155_vm0, %v4564_v34  ;;  %7922 = vmatprep.mubr.msk.bf16.mxu0 %vm1155_vm0, %v3254_v12  ;;  %v3275_v19 = vshll.u32 %v8254_v43, 16  ;;  %v3271_v34 = vshrl.u32 %v8905_v5, 16 }
 0x16c   : > { %v1676_v57 = vpop.f32.mrf.mxu0  ;;  %8060 = vmatprep.mubr.msk.bf16.mxu1 %vm1155_vm0, %v4566_v22  ;;  %v4568_v22 = vsel %vm4519_vm2, %v4565_v35, %v4567_v48 }
 0x16d   : > { %9985 = vst [vmem:[#allocation52_spill] sm:$0xff] %v8931_v26  ;;  %v8936_v8 = vadd.f32 %v2375_v0, %v1676_v57  ;;  %v2391_v38 = vpop.f32.mrf.mxu1  ;;  %v8256_v0 = vld [vmem:[%s8346_s22 + $0xe0] sm:$0xff]   ;;  %v3283_v57 = vshll.u32 %v8928_v63, 16  ;;  %v3277_v5 = vrot.slane %v3275_v19, 1  ;;  %v3273_v23 = vor.u32 %v3271_v34, %v3269_v56 }
 0x16e   : > { %v7689_v50 = vpop.f32.mrf.mxu0 }
 0x16f   : > { %9986 = vst [vmem:[#allocation53_spill] sm:$0xff] %v8936_v8  ;;  %v8939_v14 = vadd.f32 %v7823_v27, %v7689_v50  ;;  %v7827_v7 = vpop.f32.mrf.mxu1  ;;  %v4570_v27 = vsel %vm4519_vm2, %v4567_v48, %v4569_v32  ;;  %v8951_v50 = vld [vmem:[%s8346_s22 + $0xe8] sm:$0xff]   ;;  %v3281_v48 = vor.u32 %v3279_v3, %v3277_v5  ;;  %v3285_v46 = vrot.slane %v3283_v57, 1 }
 0x170   : > { %v1679_v12 = vpop.f32.mrf.mxu0  ;;  %v4573_v19 = vrot.slane %v8951_v50, 1  ;;  %v3278_v34 = vsel %vm616_vm1, %v3273_v23, %v3277_v5  ;;  %v3295_v57 = vshrl.u32 %v8256_v0, 16 }
 0x171   : > { %9987 = vst [vmem:[#allocation54_spill] sm:$0xff] %v8939_v14  ;;  %v8947_v8 = vadd.f32 %v2378_v60, %v1679_v12  ;;  %v2394_v26 = vpop.f32.mrf.mxu1  ;;  %v4571_v60 = vrot.slane %v8256_v0, 1  ;;  %v3286_v3 = vsel %vm616_vm1, %v3281_v48, %v3285_v46 }
 0x172   : > { %v7692_v14 = vpop.f32.mrf.mxu0  ;;  %7923 = vmatmul.mubr.msk.bf16.gmra.mxu0 %vm1155_vm0, %v3262_v47 }
 0x173   : > { %9988 = vst [vmem:[#allocation55_spill] sm:$0xff] %v8947_v8  ;;  %v8954_v62 = vadd.f32 %v7826_v40, %v7692_v14  ;;  %v7830_v35 = vpop.f32.mrf.mxu1  ;;  %8061 = vmatmul.mubr.msk.bf16.gmra.mxu1 %vm1155_vm0, %v4568_v22  ;;  %7926 = vmatprep.mubr.msk.bf16.mxu0 %vm1155_vm0, %v3270_v15  ;;  %v3291_v14 = vshll.u32 %v8256_v0, 16  ;;  %v3287_v22 = vshrl.u32 %v8928_v63, 16 }
 0x174   : > { %v1692_v43 = vpop.f32.mrf.mxu0  ;;  %8064 = vmatprep.mubr.msk.bf16.mxu1 %vm1155_vm0, %v4570_v27  ;;  %v4572_v27 = vsel %vm4519_vm2, %v4569_v32, %v4571_v60 }
 0x175   : > { %9989 = vst [vmem:[#allocation56_spill] sm:$0xff] %v8954_v62  ;;  %v8959_v12 = vadd.f32 %v2391_v38, %v1692_v43  ;;  %v2407_v8 = vpop.f32.mrf.mxu1  ;;  %v8258_v38 = vld [vmem:[%s8346_s22 + $0xf0] sm:$0xff]   ;;  %v3299_v43 = vshll.u32 %v8951_v50, 16  ;;  %v3293_v63 = vrot.slane %v3291_v14, 1  ;;  %v3289_v23 = vor.u32 %v3287_v22, %v3285_v46 }
 0x176   : > { %v7693_v40 = vpop.f32.mrf.mxu0 }
 0x177   : > { %9990 = vst [vmem:[#allocation57_spill] sm:$0xff] %v8959_v12  ;;  %v8962_v47 = vadd.f32 %v7827_v7, %v7693_v40  ;;  %v7831_v56 = vpop.f32.mrf.mxu1  ;;  %v4574_v7 = vsel %vm4519_vm2, %v4571_v60, %v4573_v19  ;;  %v8974_v40 = vld [vmem:[%s8346_s22 + $0xf8] sm:$0xff]   ;;  %v3297_v60 = vor.u32 %v3295_v57, %v3293_v63  ;;  %v3301_v48 = vrot.slane %v3299_v43, 1 }
 0x178   : > { %v1695_v15 = vpop.f32.mrf.mxu0  ;;  %v4577_v14 = vrot.slane %v8974_v40, 1  ;;  %v3294_v22 = vsel %vm616_vm1, %v3289_v23, %v3293_v63  ;;  %v3311_v43 = vshrl.u32 %v8258_v38, 16 }
 0x179   : > { %9991 = vst [vmem:[#allocation58_spill] sm:$0xff] %v8962_v47  ;;  %v8970_v12 = vadd.f32 %v2394_v26, %v1695_v15  ;;  %v2410_v62 = vpop.f32.mrf.mxu1  ;;  %v4575_v26 = vrot.slane %v8258_v38, 1  ;;  %v3302_v57 = vsel %vm616_vm1, %v3297_v60, %v3301_v48 }
 0x17a   : > { %v7696_v47 = vpop.f32.mrf.mxu0  ;;  %7927 = vmatmul.mubr.msk.bf16.gmra.mxu0 %vm1155_vm0, %v3278_v34 }
 0x17b   : > { %9992 = vst [vmem:[#allocation59_spill] sm:$0xff] %v8970_v12  ;;  %v8977_v5 = vadd.f32 %v7830_v35, %v7696_v47  ;;  %v7834_v32 = vpop.f32.mrf.mxu1  ;;  %8065 = vmatmul.mubr.msk.bf16.gmra.mxu1 %vm1155_vm0, %v4572_v27  ;;  %7930 = vmatprep.mubr.msk.bf16.mxu0 %vm1155_vm0, %v3286_v3  ;;  %v3307_v47 = vshll.u32 %v8258_v38, 16  ;;  %v3303_v27 = vshrl.u32 %v8951_v50, 16 }
 0x17c   : > { %v1708_v0 = vpop.f32.mrf.mxu0  ;;  %8068 = vmatprep.mubr.msk.bf16.mxu1 %vm1155_vm0, %v4574_v7  ;;  %v4576_v7 = vsel %vm4519_vm2, %v4573_v19, %v4575_v26 }
 0x17d   : > { %9993 = vst [vmem:[#allocation60_spill] sm:$0xff] %v8977_v5  ;;  %v8982_v15 = vadd.f32 %v2407_v8, %v1708_v0  ;;  %v2423_v12 = vpop.f32.mrf.mxu1  ;;  %v8260_v8 = vld [vmem:[%s8346_s22 + $0x100] sm:$0xff]   ;;  %v3315_v0 = vshll.u32 %v8974_v40, 16  ;;  %v3309_v50 = vrot.slane %v3307_v47, 1  ;;  %v3305_v23 = vor.u32 %v3303_v27, %v3301_v48 }
 0x17e   : > { %v7697_v35 = vpop.f32.mrf.mxu0 }
 0x17f   : > { %9994 = vst [vmem:[#allocation61_spill] sm:$0xff] %v8982_v15  ;;  %v8985_v34 = vadd.f32 %v7831_v56, %v7697_v35  ;;  %v7835_v46 = vpop.f32.mrf.mxu1  ;;  %v4578_v56 = vsel %vm4519_vm2, %v4575_v26, %v4577_v14  ;;  %v8997_v35 = vld [vmem:[%s8346_s22 + $0x108] sm:$0xff]   ;;  %v3313_v26 = vor.u32 %v3311_v43, %v3309_v50  ;;  %v3317_v60 = vrot.slane %v3315_v0, 1 }
 0x180   : > { %v1711_v3 = vpop.f32.mrf.mxu0  ;;  %v4581_v47 = vrot.slane %v8997_v35, 1  ;;  %v3310_v27 = vsel %vm616_vm1, %v3305_v23, %v3309_v50  ;;  %v3327_v0 = vshrl.u32 %v8260_v8, 16 }
 0x181   : > { %9995 = vst [vmem:[#allocation62_spill] sm:$0xff] %v8985_v34  ;;  %v8993_v15 = vadd.f32 %v2410_v62, %v1711_v3  ;;  %v2426_v5 = vpop.f32.mrf.mxu1  ;;  %v4579_v62 = vrot.slane %v8260_v8, 1  ;;  %v3318_v43 = vsel %vm616_vm1, %v3313_v26, %v3317_v60 }
 0x182   : > { %v7700_v34 = vpop.f32.mrf.mxu0  ;;  %7931 = vmatmul.mubr.msk.bf16.gmra.mxu0 %vm1155_vm0, %v3294_v22 }
 0x183   : > { %9996 = vst [vmem:[#allocation63_spill] sm:$0xff] %v8993_v15  ;;  %v9000_v63 = vadd.f32 %v7834_v32, %v7700_v34  ;;  %v7838_v19 = vpop.f32.mrf.mxu1  ;;  %8069 = vmatmul.mubr.msk.bf16.gmra.mxu1 %vm1155_vm0, %v4576_v7  ;;  %7934 = vmatprep.mubr.msk.bf16.mxu0 %vm1155_vm0, %v3302_v57  ;;  %v3323_v34 = vshll.u32 %v8260_v8, 16  ;;  %v3319_v7 = vshrl.u32 %v8974_v40, 16 }
 0x184   : > { %v1724_v38 = vpop.f32.mrf.mxu0  ;;  %8072 = vmatprep.mubr.msk.bf16.mxu1 %vm1155_vm0, %v4578_v56  ;;  %v4580_v56 = vsel %vm4519_vm2, %v4577_v14, %v4579_v62 }
 0x185   : > { %9997 = vst [vmem:[#allocation64_spill] sm:$0xff] %v9000_v63  ;;  %v9005_v3 = vadd.f32 %v2423_v12, %v1724_v38  ;;  %v2439_v15 = vpop.f32.mrf.mxu1  ;;  %v8262_v12 = vld [vmem:[%s8346_s22 + $0x110] sm:$0xff]   ;;  %v3331_v38 = vshll.u32 %v8997_v35, 16  ;;  %v3325_v40 = vrot.slane %v3323_v34, 1  ;;  %v3321_v23 = vor.u32 %v3319_v7, %v3317_v60 }
 0x186   : > { %v7701_v32 = vpop.f32.mrf.mxu0 }
 0x187   : > { %9998 = vst [vmem:[#allocation65_spill] sm:$0xff] %v9005_v3  ;;  %v9008_v22 = vadd.f32 %v7835_v46, %v7701_v32  ;;  %v7839_v48 = vpop.f32.mrf.mxu1  ;;  %v4582_v46 = vsel %vm4519_vm2, %v4579_v62, %v4581_v47  ;;  %v9020_v32 = vld [vmem:[%s8346_s22 + $0x118] sm:$0xff]   ;;  %v3329_v62 = vor.u32 %v3327_v0, %v3325_v40  ;;  %v3333_v26 = vrot.slane %v3331_v38, 1 }
 0x188   : > { %v1727_v57 = vpop.f32.mrf.mxu0  ;;  %v4585_v34 = vrot.slane %v9020_v32, 1  ;;  %v3326_v7 = vsel %vm616_vm1, %v3321_v23, %v3325_v40  ;;  %v3343_v38 = vshrl.u32 %v8262_v12, 16 }
 0x189   : > { %9999 = vst [vmem:[#allocation66_spill] sm:$0xff] %v9008_v22  ;;  %v9016_v3 = vadd.f32 %v2426_v5, %v1727_v57  ;;  %v2442_v63 = vpop.f32.mrf.mxu1  ;;  %v4583_v5 = vrot.slane %v8262_v12, 1  ;;  %v3334_v0 = vsel %vm616_vm1, %v3329_v62, %v3333_v26 }
 0x18a   : > { %v7704_v22 = vpop.f32.mrf.mxu0  ;;  %7935 = vmatmul.mubr.msk.bf16.gmra.mxu0 %vm1155_vm0, %v3310_v27 }
 0x18b   : > { %10000 = vst [vmem:[#allocation67_spill] sm:$0xff] %v9016_v3  ;;  %v9023_v50 = vadd.f32 %v7838_v19, %v7704_v22  ;;  %v7842_v14 = vpop.f32.mrf.mxu1  ;;  %8073 = vmatmul.mubr.msk.bf16.gmra.mxu1 %vm1155_vm0, %v4580_v56  ;;  %7938 = vmatprep.mubr.msk.bf16.mxu0 %vm1155_vm0, %v3318_v43  ;;  %v3339_v22 = vshll.u32 %v8262_v12, 16  ;;  %v3335_v56 = vshrl.u32 %v8997_v35, 16 }
 0x18c   : > { %v1740_v8 = vpop.f32.mrf.mxu0  ;;  %8076 = vmatprep.mubr.msk.bf16.mxu1 %vm1155_vm0, %v4582_v46  ;;  %v4584_v46 = vsel %vm4519_vm2, %v4581_v47, %v4583_v5 }
 0x18d   : > { %10001 = vst [vmem:[#allocation68_spill] sm:$0xff] %v9023_v50  ;;  %v9028_v57 = vadd.f32 %v2439_v15, %v1740_v8  ;;  %v2455_v3 = vpop.f32.mrf.mxu1  ;;  %v8264_v15 = vld [vmem:[%s8346_s22 + $0x120] sm:$0xff]   ;;  %v3347_v8 = vshll.u32 %v9020_v32, 16  ;;  %v3341_v35 = vrot.slane %v3339_v22, 1  ;;  %v3337_v23 = vor.u32 %v3335_v56, %v3333_v26 }
 0x18e   : > { %v7705_v19 = vpop.f32.mrf.mxu0 }
 0x18f   : > { %10002 = vst [vmem:[#allocation69_spill] sm:$0xff] %v9028_v57  ;;  %v9031_v27 = vadd.f32 %v7839_v48, %v7705_v19  ;;  %v7843_v60 = vpop.f32.mrf.mxu1  ;;  %v4586_v48 = vsel %vm4519_vm2, %v4583_v5, %v4585_v34  ;;  %v9043_v19 = vld [vmem:[%s8346_s22 + $0x128] sm:$0xff]   ;;  %v3345_v5 = vor.u32 %v3343_v38, %v3341_v35  ;;  %v3349_v62 = vrot.slane %v3347_v8, 1 }
 0x190   : > { %v1743_v43 = vpop.f32.mrf.mxu0  ;;  %v4589_v22 = vrot.slane %v9043_v19, 1  ;;  %v3342_v56 = vsel %vm616_vm1, %v3337_v23, %v3341_v35  ;;  %v3359_v8 = vshrl.u32 %v8264_v15, 16 }
 0x191   : > { %10003 = vst [vmem:[#allocation70_spill] sm:$0xff] %v9031_v27  ;;  %v9039_v57 = vadd.f32 %v2442_v63, %v1743_v43  ;;  %v2458_v50 = vpop.f32.mrf.mxu1  ;;  %v4587_v63 = vrot.slane %v8264_v15, 1  ;;  %v3350_v38 = vsel %vm616_vm1, %v3345_v5, %v3349_v62 }
 0x192   : > { %v7708_v27 = vpop.f32.mrf.mxu0  ;;  %7939 = vmatmul.mubr.msk.bf16.gmra.mxu0 %vm1155_vm0, %v3326_v7 }
 0x193   : > { %10004 = vst [vmem:[#allocation71_spill] sm:$0xff] %v9039_v57  ;;  %v9046_v40 = vadd.f32 %v7842_v14, %v7708_v27  ;;  %v7846_v47 = vpop.f32.mrf.mxu1  ;;  %8077 = vmatmul.mubr.msk.bf16.gmra.mxu1 %vm1155_vm0, %v4584_v46  ;;  %7942 = vmatprep.mubr.msk.bf16.mxu0 %vm1155_vm0, %v3334_v0  ;;  %v3355_v27 = vshll.u32 %v8264_v15, 16  ;;  %v3351_v46 = vshrl.u32 %v9020_v32, 16 }
 0x194   : > { %v1756_v12 = vpop.f32.mrf.mxu0  ;;  %8080 = vmatprep.mubr.msk.bf16.mxu1 %vm1155_vm0, %v4586_v48  ;;  %v4588_v48 = vsel %vm4519_vm2, %v4585_v34, %v4587_v63 }
 0x195   : > { %10005 = vst [vmem:[#allocation72_spill] sm:$0xff] %v9046_v40  ;;  %v9051_v43 = vadd.f32 %v2455_v3, %v1756_v12  ;;  %v2471_v57 = vpop.f32.mrf.mxu1  ;;  %v8266_v3 = vld [vmem:[%s8346_s22 + $0x130] sm:$0xff]   ;;  %v3363_v12 = vshll.u32 %v9043_v19, 16  ;;  %v3357_v32 = vrot.slane %v3355_v27, 1  ;;  %v3353_v23 = vor.u32 %v3351_v46, %v3349_v62 }
 0x196   : > { %v7709_v14 = vpop.f32.mrf.mxu0 }
 0x197   : > { %10006 = vst [vmem:[#allocation73_spill] sm:$0xff] %v9051_v43  ;;  %v9054_v7 = vadd.f32 %v7843_v60, %v7709_v14  ;;  %v7847_v26 = vpop.f32.mrf.mxu1  ;;  %v4590_v60 = vsel %vm4519_vm2, %v4587_v63, %v4589_v22  ;;  %v9066_v14 = vld [vmem:[%s8346_s22 + $0x138] sm:$0xff]   ;;  %v3361_v63 = vor.u32 %v3359_v8, %v3357_v32  ;;  %v3365_v5 = vrot.slane %v3363_v12, 1 }
 0x198   : > { %v1759_v0 = vpop.f32.mrf.mxu0  ;;  %v4593_v27 = vrot.slane %v9066_v14, 1  ;;  %v3358_v46 = vsel %vm616_vm1, %v3353_v23, %v3357_v32  ;;  %v3375_v12 = vshrl.u32 %v8266_v3, 16 }
 0x199   : > { %10007 = vst [vmem:[#allocation74_spill] sm:$0xff] %v9054_v7  ;;  %v9062_v43 = vadd.f32 %v2458_v50, %v1759_v0  ;;  %v2474_v40 = vpop.f32.mrf.mxu1  ;;  %v4591_v50 = vrot.slane %v8266_v3, 1  ;;  %v3366_v8 = vsel %vm616_vm1, %v3361_v63, %v3365_v5 }
 0x19a   : > { %v7712_v7 = vpop.f32.mrf.mxu0  ;;  %7943 = vmatmul.mubr.msk.bf16.gmra.mxu0 %vm1155_vm0, %v3342_v56 }
 0x19b   : > { %10008 = vst [vmem:[#allocation75_spill] sm:$0xff] %v9062_v43  ;;  %v9069_v35 = vadd.f32 %v7846_v47, %v7712_v7  ;;  %v7850_v34 = vpop.f32.mrf.mxu1  ;;  %8081 = vmatmul.mubr.msk.bf16.gmra.mxu1 %vm1155_vm0, %v4588_v48  ;;  %7946 = vmatprep.mubr.msk.bf16.mxu0 %vm1155_vm0, %v3350_v38  ;;  %v3371_v7 = vshll.u32 %v8266_v3, 16  ;;  %v3367_v48 = vshrl.u32 %v9043_v19, 16 }
 0x19c   : > { %v1772_v15 = vpop.f32.mrf.mxu0  ;;  %8084 = vmatprep.mubr.msk.bf16.mxu1 %vm1155_vm0, %v4590_v60  ;;  %v4592_v60 = vsel %vm4519_vm2, %v4589_v22, %v4591_v50 }
 0x19d   : > { %10009 = vst [vmem:[#allocation76_spill] sm:$0xff] %v9069_v35  ;;  %v9074_v0 = vadd.f32 %v2471_v57, %v1772_v15  ;;  %v2487_v43 = vpop.f32.mrf.mxu1  ;;  %v8268_v57 = vld [vmem:[%s8346_s22 + $0x140] sm:$0xff]   ;;  %v3379_v15 = vshll.u32 %v9066_v14, 16  ;;  %v3373_v19 = vrot.slane %v3371_v7, 1  ;;  %v3369_v23 = vor.u32 %v3367_v48, %v3365_v5 }
 0x19e   : > { %v7713_v47 = vpop.f32.mrf.mxu0 }
 0x19f   : > { %10010 = vst [vmem:[#allocation77_spill] sm:$0xff] %v9074_v0  ;;  %v9077_v56 = vadd.f32 %v7847_v26, %v7713_v47  ;;  %v7851_v62 = vpop.f32.mrf.mxu1  ;;  %v4594_v26 = vsel %vm4519_vm2, %v4591_v50, %v4593_v27  ;;  %v9089_v47 = vld [vmem:[%s8346_s22 + $0x148] sm:$0xff]   ;;  %v3377_v50 = vor.u32 %v3375_v12, %v3373_v19  ;;  %v3381_v63 = vrot.slane %v3379_v15, 1 }
 0x1a0   : > { %v1775_v38 = vpop.f32.mrf.mxu0  ;;  %v4597_v7 = vrot.slane %v9089_v47, 1  ;;  %v3374_v48 = vsel %vm616_vm1, %v3369_v23, %v3373_v19  ;;  %v3391_v15 = vshrl.u32 %v8268_v57, 16 }
 0x1a1   : > { %10011 = vst [vmem:[#allocation78_spill] sm:$0xff] %v9077_v56  ;;  %v9085_v0 = vadd.f32 %v2474_v40, %v1775_v38  ;;  %v2490_v35 = vpop.f32.mrf.mxu1  ;;  %v4595_v40 = vrot.slane %v8268_v57, 1  ;;  %v3382_v12 = vsel %vm616_vm1, %v3377_v50, %v3381_v63 }
 0x1a2   : > { %v7716_v56 = vpop.f32.mrf.mxu0  ;;  %7947 = vmatmul.mubr.msk.bf16.gmra.mxu0 %vm1155_vm0, %v3358_v46 }
 0x1a3   : > { %10012 = vst [vmem:[#allocation79_spill] sm:$0xff] %v9085_v0  ;;  %v9092_v32 = vadd.f32 %v7850_v34, %v7716_v56  ;;  %v7854_v22 = vpop.f32.mrf.mxu1  ;;  %8085 = vmatmul.mubr.msk.bf16.gmra.mxu1 %vm1155_vm0, %v4592_v60  ;;  %7950 = vmatprep.mubr.msk.bf16.mxu0 %vm1155_vm0, %v3366_v8  ;;  %v3387_v56 = vshll.u32 %v8268_v57, 16  ;;  %v3383_v60 = vshrl.u32 %v9066_v14, 16 }
 0x1a4   : > { %v1788_v3 = vpop.f32.mrf.mxu0  ;;  %8088 = vmatprep.mubr.msk.bf16.mxu1 %vm1155_vm0, %v4594_v26  ;;  %v4596_v26 = vsel %vm4519_vm2, %v4593_v27, %v4595_v40 }
 0x1a5   : > { %10013 = vst [vmem:[#allocation80_spill] sm:$0xff] %v9092_v32  ;;  %v9097_v38 = vadd.f32 %v2487_v43, %v1788_v3  ;;  %v2503_v0 = vpop.f32.mrf.mxu1  ;;  %v8270_v43 = vld [vmem:[%s8346_s22 + $0x150] sm:$0xff]   ;;  %v3395_v3 = vshll.u32 %v9089_v47, 16  ;;  %v3389_v14 = vrot.slane %v3387_v56, 1  ;;  %v3385_v23 = vor.u32 %v3383_v60, %v3381_v63 }
 0x1a6   : > { %v7717_v34 = vpop.f32.mrf.mxu0 }
 0x1a7   : > { %10014 = vst [vmem:[#allocation81_spill] sm:$0xff] %v9097_v38  ;;  %v9100_v46 = vadd.f32 %v7851_v62, %v7717_v34  ;;  %v7855_v5 = vpop.f32.mrf.mxu1  ;;  %v4598_v62 = vsel %vm4519_vm2, %v4595_v40, %v4597_v7  ;;  %v9112_v34 = vld [vmem:[%s8346_s22 + $0x158] sm:$0xff]   ;;  %v3393_v40 = vor.u32 %v3391_v15, %v3389_v14  ;;  %v3397_v50 = vrot.slane %v3395_v3, 1 }
 0x1a8   : > { %v1791_v8 = vpop.f32.mrf.mxu0  ;;  %v4601_v56 = vrot.slane %v9112_v34, 1  ;;  %v3390_v60 = vsel %vm616_vm1, %v3385_v23, %v3389_v14  ;;  %v3407_v3 = vshrl.u32 %v8270_v43, 16 }
 0x1a9   : > { %10015 = vst [vmem:[#allocation82_spill] sm:$0xff] %v9100_v46  ;;  %v9108_v38 = vadd.f32 %v2490_v35, %v1791_v8  ;;  %v2506_v32 = vpop.f32.mrf.mxu1  ;;  %v4599_v35 = vrot.slane %v8270_v43, 1  ;;  %v3398_v15 = vsel %vm616_vm1, %v3393_v40, %v3397_v50 }
 0x1aa   : > { %v7720_v46 = vpop.f32.mrf.mxu0  ;;  %7951 = vmatmul.mubr.msk.bf16.gmra.mxu0 %vm1155_vm0, %v3374_v48 }
 0x1ab   : > { %10016 = vst [vmem:[#allocation83_spill] sm:$0xff] %v9108_v38  ;;  %v9115_v19 = vadd.f32 %v7854_v22, %v7720_v46  ;;  %v7858_v27 = vpop.f32.mrf.mxu1  ;;  %8089 = vmatmul.mubr.msk.bf16.gmra.mxu1 %vm1155_vm0, %v4596_v26  ;;  %7954 = vmatprep.mubr.msk.bf16.mxu0 %vm1155_vm0, %v3382_v12  ;;  %v3403_v46 = vshll.u32 %v8270_v43, 16  ;;  %v3399_v26 = vshrl.u32 %v9089_v47, 16 }
 0x1ac   : > { %v1804_v57 = vpop.f32.mrf.mxu0  ;;  %8092 = vmatprep.mubr.msk.bf16.mxu1 %vm1155_vm0, %v4598_v62  ;;  %v4600_v62 = vsel %vm4519_vm2, %v4597_v7, %v4599_v35 }
 0x1ad   : > { %10017 = vst [vmem:[#allocation84_spill] sm:$0xff] %v9115_v19  ;;  %v9120_v8 = vadd.f32 %v2503_v0, %v1804_v57  ;;  %v2519_v38 = vpop.f32.mrf.mxu1  ;;  %v8272_v0 = vld [vmem:[%s8346_s22 + $0x160] sm:$0xff]   ;;  %v3411_v57 = vshll.u32 %v9112_v34, 16  ;;  %v3405_v47 = vrot.slane %v3403_v46, 1  ;;  %v3401_v23 = vor.u32 %v3399_v26, %v3397_v50 }
 0x1ae   : > { %v7721_v22 = vpop.f32.mrf.mxu0 }
 0x1af   : > { %10018 = vst [vmem:[#allocation85_spill] sm:$0xff] %v9120_v8  ;;  %v9123_v48 = vadd.f32 %v7855_v5, %v7721_v22  ;;  %v7859_v63 = vpop.f32.mrf.mxu1  ;;  %v4602_v5 = vsel %vm4519_vm2, %v4599_v35, %v4601_v56  ;;  %v9135_v22 = vld [vmem:[%s8346_s22 + $0x168] sm:$0xff]   ;;  %v3409_v35 = vor.u32 %v3407_v3, %v3405_v47  ;;  %v3413_v40 = vrot.slane %v3411_v57, 1 }
 0x1b0   : > { %v1807_v12 = vpop.f32.mrf.mxu0  ;;  %v4605_v46 = vrot.slane %v9135_v22, 1  ;;  %v3406_v26 = vsel %vm616_vm1, %v3401_v23, %v3405_v47  ;;  %v3423_v57 = vshrl.u32 %v8272_v0, 16 }
 0x1b1   : > { %10019 = vst [vmem:[#allocation86_spill] sm:$0xff] %v9123_v48  ;;  %v9131_v8 = vadd.f32 %v2506_v32, %v1807_v12  ;;  %v2522_v19 = vpop.f32.mrf.mxu1  ;;  %v4603_v32 = vrot.slane %v8272_v0, 1  ;;  %v3414_v3 = vsel %vm616_vm1, %v3409_v35, %v3413_v40 }
 0x1b2   : > { %v7724_v48 = vpop.f32.mrf.mxu0  ;;  %7955 = vmatmul.mubr.msk.bf16.gmra.mxu0 %vm1155_vm0, %v3390_v60 }
 0x1b3   : > { %10020 = vst [vmem:[#allocation87_spill] sm:$0xff] %v9131_v8  ;;  %v9138_v14 = vadd.f32 %v7858_v27, %v7724_v48  ;;  %v7862_v7 = vpop.f32.mrf.mxu1  ;;  %8093 = vmatmul.mubr.msk.bf16.gmra.mxu1 %vm1155_vm0, %v4600_v62  ;;  %7958 = vmatprep.mubr.msk.bf16.mxu0 %vm1155_vm0, %v3398_v15  ;;  %v3419_v48 = vshll.u32 %v8272_v0, 16  ;;  %v3415_v62 = vshrl.u32 %v9112_v34, 16 }
 0x1b4   : > { %v1820_v43 = vpop.f32.mrf.mxu0  ;;  %8096 = vmatprep.mubr.msk.bf16.mxu1 %vm1155_vm0, %v4602_v5  ;;  %v4604_v5 = vsel %vm4519_vm2, %v4601_v56, %v4603_v32 }
 0x1b5   : > { %10021 = vst [vmem:[#allocation88_spill] sm:$0xff] %v9138_v14  ;;  %v9143_v12 = vadd.f32 %v2519_v38, %v1820_v43  ;;  %v2535_v8 = vpop.f32.mrf.mxu1  ;;  %v8274_v38 = vld [vmem:[%s8346_s22 + $0x170] sm:$0xff]   ;;  %v3427_v43 = vshll.u32 %v9135_v22, 16  ;;  %v3421_v34 = vrot.slane %v3419_v48, 1  ;;  %v3417_v23 = vor.u32 %v3415_v62, %v3413_v40 }
 0x1b6   : > { %v7725_v27 = vpop.f32.mrf.mxu0 }
 0x1b7   : > { %10022 = vst [vmem:[#allocation89_spill] sm:$0xff] %v9143_v12  ;;  %v9146_v60 = vadd.f32 %v7859_v63, %v7725_v27  ;;  %v7863_v50 = vpop.f32.mrf.mxu1  ;;  %v4606_v63 = vsel %vm4519_vm2, %v4603_v32, %v4605_v46  ;;  %v9158_v27 = vld [vmem:[%s8346_s22 + $0x178] sm:$0xff]   ;;  %v3425_v32 = vor.u32 %v3423_v57, %v3421_v34  ;;  %v3429_v35 = vrot.slane %v3427_v43, 1 }
 0x1b8   : > { %v1823_v15 = vpop.f32.mrf.mxu0  ;;  %v4609_v48 = vrot.slane %v9158_v27, 1  ;;  %v3422_v62 = vsel %vm616_vm1, %v3417_v23, %v3421_v34  ;;  %v3439_v43 = vshrl.u32 %v8274_v38, 16 }
 0x1b9   : > { %10023 = vst [vmem:[#allocation90_spill] sm:$0xff] %v9146_v60  ;;  %v9154_v12 = vadd.f32 %v2522_v19, %v1823_v15  ;;  %v2538_v14 = vpop.f32.mrf.mxu1  ;;  %v4607_v19 = vrot.slane %v8274_v38, 1  ;;  %v3430_v57 = vsel %vm616_vm1, %v3425_v32, %v3429_v35 }
 0x1ba   : > { %v7728_v60 = vpop.f32.mrf.mxu0  ;;  %7959 = vmatmul.mubr.msk.bf16.gmra.mxu0 %vm1155_vm0, %v3406_v26 }
 0x1bb   : > { %10024 = vst [vmem:[#allocation91_spill] sm:$0xff] %v9154_v12  ;;  %v9161_v47 = vadd.f32 %v7862_v7, %v7728_v60  ;;  %v7866_v56 = vpop.f32.mrf.mxu1  ;;  %8097 = vmatmul.mubr.msk.bf16.gmra.mxu1 %vm1155_vm0, %v4604_v5  ;;  %7962 = vmatprep.mubr.msk.bf16.mxu0 %vm1155_vm0, %v3414_v3  ;;  %v3435_v60 = vshll.u32 %v8274_v38, 16  ;;  %v3431_v5 = vshrl.u32 %v9135_v22, 16 }
 0x1bc   : > { %v1836_v0 = vpop.f32.mrf.mxu0  ;;  %8100 = vmatprep.mubr.msk.bf16.mxu1 %vm1155_vm0, %v4606_v63  ;;  %v4608_v63 = vsel %vm4519_vm2, %v4605_v46, %v4607_v19 }
 0x1bd   : > { %10025 = vst [vmem:[#allocation92_spill] sm:$0xff] %v9161_v47  ;;  %v9166_v15 = vadd.f32 %v2535_v8, %v1836_v0  ;;  %v2551_v12 = vpop.f32.mrf.mxu1  ;;  %v8276_v8 = vld [vmem:[%s8346_s22 + $0x180] sm:$0xff]   ;;  %v3443_v0 = vshll.u32 %v9158_v27, 16  ;;  %v3437_v22 = vrot.slane %v3435_v60, 1  ;;  %v3433_v23 = vor.u32 %v3431_v5, %v3429_v35 }
 0x1be   : > { %v7729_v7 = vpop.f32.mrf.mxu0  ;;  %v4611_v38 = vrot.slane %v8276_v8, 1 }
 0x1bf   : > { %10026 = vst [vmem:[#allocation93_spill] sm:$0xff] %v9166_v15  ;;  %v9169_v26 = vadd.f32 %v7863_v50, %v7729_v7  ;;  %v7867_v40 = vpop.f32.mrf.mxu1  ;;  %v4610_v50 = vsel %vm4519_vm2, %v4607_v19, %v4609_v48  ;;  %v9181_v7 = vld [vmem:[%s8346_s22 + $0x188] sm:$0xff]   ;;  %v3441_v19 = vor.u32 %v3439_v43, %v3437_v22  ;;  %v3445_v32 = vrot.slane %v3443_v0, 1 }
 0x1c0   : > { %v1839_v3 = vpop.f32.mrf.mxu0  ;;  %v4613_v60 = vrot.slane %v9181_v7, 1  ;;  %v3438_v5 = vsel %vm616_vm1, %v3433_v23, %v3437_v22  ;;  %v9210_v23 = vld [vmem:[%s8346_s22 + $0x1a8] sm:$0xff]  }
 0x1c1   : > { %10027 = vst [vmem:[#allocation94_spill] sm:$0xff] %v9169_v26  ;;  %v9177_v15 = vadd.f32 %v2538_v14, %v1839_v3  ;;  %v2554_v47 = vpop.f32.mrf.mxu1  ;;  %v3446_v0 = vsel %vm616_vm1, %v3441_v19, %v3445_v32 }
 0x1c2   : > { %v7732_v26 = vpop.f32.mrf.mxu0  ;;  %7963 = vmatmul.mubr.msk.bf16.gmra.mxu0 %vm1155_vm0, %v3422_v62 }
 0x1c3   : > { %10028 = vst [vmem:[#allocation95_spill] sm:$0xff] %v9177_v15  ;;  %v9184_v34 = vadd.f32 %v7866_v56, %v7732_v26  ;;  %v7870_v46 = vpop.f32.mrf.mxu1  ;;  %8101 = vmatmul.mubr.msk.bf16.gmra.mxu1 %vm1155_vm0, %v4608_v63  ;;  %7966 = vmatprep.mubr.msk.bf16.mxu0 %vm1155_vm0, %v3430_v57  ;;  %v3451_v26 = vshll.u32 %v8276_v8, 16  ;;  %v3447_v63 = vshrl.u32 %v9158_v27, 16  ;;  %v9197_v57 = vld [vmem:[%s8346_s22 + $0x190] sm:$0xff]  }
 0x1c4   : > { %v1852_v14 = vpop.f32.mrf.mxu0  ;;  %8104 = vmatprep.mubr.msk.bf16.mxu1 %vm1155_vm0, %v4610_v50  ;;  %v3455_v50 = vshrl.u32 %v8276_v8, 16  ;;  %v3471_v9 = vshrl.u32 %v9197_v57, 16 }
 0x1c5   : > { %10029 = vst [vmem:[#allocation96_spill] sm:$0xff] %v9184_v34  ;;  %v9189_v3 = vadd.f32 %v2551_v12, %v1852_v14  ;;  %v2567_v15 = vpop.f32.mrf.mxu1  ;;  %v4612_v12 = vsel %vm4519_vm2, %v4609_v48, %v4611_v38  ;;  %v3459_v14 = vshll.u32 %v9181_v7, 16  ;;  %v3453_v27 = vrot.slane %v3451_v26, 1 }
 0x1c6   : > { %v7733_v56 = vpop.f32.mrf.mxu0  ;;  %v3449_v8 = vor.u32 %v3447_v63, %v3445_v32  ;;  %v3467_v26 = vshll.u32 %v9197_v57, 16  ;;  %v8280_v63 = vld [vmem:[%s8346_s22 + $0x1a0] sm:$0xff]  }
 0x1c7   : > { %10030 = vst [vmem:[#allocation97_spill] sm:$0xff] %v9189_v3  ;;  %v9192_v62 = vadd.f32 %v7867_v40, %v7733_v56  ;;  %v7871_v35 = vpop.f32.mrf.mxu1  ;;  %v4614_v56 = vsel %vm4519_vm2, %v4611_v38, %v4613_v60  ;;  %v3457_v19 = vor.u32 %v3455_v50, %v3453_v27  ;;  %v3483_v59 = vshll.u32 %v8280_v63, 16 }
 0x1c8   : > { %v1855_v43 = vpop.f32.mrf.mxu0  ;;  %v3454_v50 = vsel %vm616_vm1, %v3449_v8, %v3453_v27 }
 0x1c9   : > { %10031 = vst [vmem:[#allocation98_spill] sm:$0xff] %v9192_v62  ;;  %v9202_v3 = vadd.f32 %v2554_v47, %v1855_v43  ;;  %v2570_v40 = vpop.f32.mrf.mxu1  ;;  %v9206_v62 = vld [vmem:[%s8346_s22 + $0x198] sm:$0xff]   ;;  %v4615_v47 = vrot.slane %v9197_v57, 1  ;;  %v3461_v43 = vrot.slane %v3459_v14, 1  ;;  %v3499_v57 = vshll.u32 %v9233_v42, 16 }
 0x1ca   : > { %v7736_v22 = vpop.f32.mrf.mxu0  ;;  %7967 = vmatmul.mubr.msk.bf16.gmra.mxu0 %vm1155_vm0, %v3438_v5  ;;  %v3479_v27 = vshrl.u32 %v9206_v62, 16 }
 0x1cb   : > { %10032 = vst [vmem:[#allocation99_spill] sm:$0xff] %v9202_v3  ;;  %v9212_v34 = vadd.f32 %v7870_v46, %v7736_v22  ;;  %v7874_v48 = vpop.f32.mrf.mxu1  ;;  %8105 = vmatmul.mubr.msk.bf16.gmra.mxu1 %vm1155_vm0, %v4612_v12  ;;  %7970 = vmatprep.mubr.msk.bf16.mxu0 %vm1155_vm0, %v3446_v0  ;;  %v4617_v22 = vrot.slane %v9206_v62, 1  ;;  %v3475_v12 = vshll.u32 %v9206_v62, 16  ;;  %v3491_v0 = vshll.u32 %v9210_v23, 16 }
 0x1cc   : > { %v1868_v38 = vpop.f32.mrf.mxu0  ;;  %8108 = vmatprep.mubr.msk.bf16.mxu1 %vm1155_vm0, %v4614_v56  ;;  %v4616_v14 = vsel %vm4519_vm2, %v4613_v60, %v4615_v47 }
 0x1cd   : > { %10033 = vst [vmem:[#allocation100_spill] sm:$0xff] %v9212_v34  ;;  %v9219_v5 = vadd.f32 %v2567_v15, %v1868_v38  ;;  %v2583_v46 = vpop.f32.mrf.mxu1  ;;  %v3463_v15 = vshrl.u32 %v9181_v7, 16  ;;  %v3462_v38 = vsel %vm616_vm1, %v3457_v19, %v3461_v43  ;;  %v3487_v7 = vshrl.u32 %v8280_v63, 16 }
 0x1ce   : > { %v7737_v32 = vpop.f32.mrf.mxu0  ;;  %v3493_v8 = vrot.slane %v3491_v0, 1  ;;  %v3495_v19 = vshrl.u32 %v9210_v23, 16  ;;  %v3485_v0 = vrot.slane %v3483_v59, 1 }
 0x1cf   : > { %10034 = vst [vmem:[#allocation101_spill] sm:$0xff] %v9219_v5  ;;  %v9225_v34 = vadd.f32 %v7871_v35, %v7737_v32  ;;  %v7875_v3 = vpop.f32.mrf.mxu1  ;;  %v3469_v5 = vrot.slane %v3467_v26, 1  ;;  %v4618_v32 = vsel %vm4519_vm2, %v4615_v47, %v4617_v22  ;;  %v3465_v47 = vor.u32 %v3463_v15, %v3461_v43 }
 0x1d0   : > { %v1871_v56 = vpop.f32.mrf.mxu0  ;;  %v4623_v15 = vrot.slane %v9233_v42, 1 }
 0x1d1   : > { %10035 = vst [vmem:[#allocation102_spill] sm:$0xff] %v9225_v34  ;;  %v9235_v28 = vadd.f32 %v2570_v40, %v1871_v56  ;;  %v2586_v35 = vpop.f32.mrf.mxu1  ;;  %v3477_v34 = vrot.slane %v3475_v12, 1  ;;  %v4619_v12 = vrot.slane %v8280_v63, 1  ;;  %v9248_v56 = vld [vmem:[%s8346_s22 + $0x1b8] sm:$0xff]  }
 0x1d2   : > { %v7740_v60 = vpop.f32.mrf.mxu0  ;;  %7971 = vmatmul.mubr.msk.bf16.gmra.mxu0 %vm1155_vm0, %v3454_v50  ;;  %v3473_v50 = vor.u32 %v3471_v9, %v3469_v5  ;;  %v9258_v63 = vld [vmem:[%s8346_s22 + $0x1d8] sm:$0xff]   ;;  %v3507_v20 = vshll.u32 %v9248_v56, 16 }
 0x1d3   : > { %10036 = vst [vmem:[#allocation103_spill] sm:$0xff] %v9235_v28  ;;  %v9242_v26 = vadd.f32 %v7874_v48, %v7740_v60  ;;  %v7878_v40 = vpop.f32.mrf.mxu1  ;;  %8109 = vmatmul.mubr.msk.bf16.gmra.mxu1 %vm1155_vm0, %v4616_v14  ;;  %7974 = vmatprep.mubr.msk.bf16.mxu0 %vm1155_vm0, %v3462_v38  ;;  %v3481_v48 = vor.u32 %v3479_v27, %v3477_v34  ;;  %v4621_v60 = vrot.slane %v9210_v23, 1  ;;  %v9254_v14 = vld [vmem:[%s8346_s22 + $0x1c8] sm:$0xff]  }
 0x1d4   : > { %v1884_v62 = vpop.f32.mrf.mxu0  ;;  %8112 = vmatprep.mubr.msk.bf16.mxu1 %vm1155_vm0, %v4618_v32  ;;  %v3489_v38 = vor.u32 %v3487_v7, %v3485_v0  ;;  %v3501_v32 = vrot.slane %v3499_v57, 1  ;;  %v4620_v27 = vsel %vm4519_vm2, %v4617_v22, %v4619_v12  ;;  %v3478_v23 = vsel %vm616_vm1, %v3473_v50, %v3477_v34 }
 0x1d5   : > { %10037 = vst [vmem:[#allocation104_spill] sm:$0xff] %v9242_v26  ;;  %v9250_v28 = vadd.f32 %v2583_v46, %v1884_v62  ;;  %v2599_v18 = vpop.f32.mrf.mxu1  ;;  %v3497_v26 = vor.u32 %v3495_v19, %v3493_v8  ;;  %v3470_v46 = vsel %vm616_vm1, %v3465_v47, %v3469_v5  ;;  %v3486_v57 = vsel %vm616_vm1, %v3481_v48, %v3485_v0 }
 0x1d6   : > { %v7741_v43 = vpop.f32.mrf.mxu0  ;;  %v4624_v22 = vsel %vm4519_vm2, %v4621_v60, %v4623_v15  ;;  %v3494_v34 = vsel %vm616_vm1, %v3489_v38, %v3493_v8  ;;  %v3539_v50 = vshll.u32 %v9258_v63, 16  ;;  %v4625_v48 = vrot.slane %v9248_v56, 1 }
 0x1d7   : > { %10038 = vst [vmem:[#allocation105_spill] sm:$0xff] %v9250_v28  ;;  %v9260_v59 = vadd.f32 %v7875_v3, %v7741_v43  ;;  %v7879_v9 = vpop.f32.mrf.mxu1  ;;  %v9266_v28 = vld [vmem:[%s8346_s22 + $0x1c0] sm:$0xff]   ;;  %v4622_v3 = vsel %vm4519_vm2, %v4619_v12, %v4621_v60  ;;  %v3523_v43 = vshll.u32 %v9254_v14, 16  ;;  %v9278_v47 = vsel %vm616_vm1, %v3497_v26, %v3501_v32 }
 0x1d8   : > { %v1887_v62 = vpop.f32.mrf.mxu0  ;;  %v3503_v60 = vshrl.u32 %v9233_v42, 16  ;;  %v3515_v8 = vshll.u32 %v9266_v28, 16  ;;  %v4627_v38 = vrot.slane %v9266_v28, 1  ;;  %v3541_v51 = vrot.slane %v3539_v50, 1 }
 0x1d9   : > { %10039 = vst [vmem:[#allocation106_spill] sm:$0xff] %v9260_v59  ;;  %v9269_v7 = vadd.f32 %v2586_v35, %v1887_v62  ;;  %v2602_v19 = vpop.f32.mrf.mxu1  ;;  %v9281_v35 = vld [vmem:[%s8346_s22 + $0x1d0] sm:$0xff]   ;;  %v3525_v42 = vrot.slane %v3523_v43, 1  ;;  %v4629_v52 = vrot.slane %v9254_v14, 1 }
 0x1da   : > { %v7744_v5 = vpop.f32.mrf.mxu0  ;;  %7975 = vmatmul.mubr.msk.bf16.gmra.mxu0 %vm1155_vm0, %v3470_v46  ;;  %v3509_v46 = vrot.slane %v3507_v20, 1  ;;  %v3531_v62 = vshll.u32 %v9281_v35, 16  ;;  %v3543_v20 = vshrl.u32 %v9258_v63, 16  ;;  %v4631_v2 = vrot.slane %v9281_v35, 1 }
 0x1db   : > { %10040 = vst [vmem:[#allocation107_spill] sm:$0xff] %v9269_v7  ;;  %v9284_v0 = vadd.f32 %v7878_v40, %v7744_v5  ;;  %v8018_v12 = vpop.f32.mrf.mxu1  ;;  %8113 = vmatmul.mubr.msk.bf16.gmra.mxu1 %vm1155_vm0, %v4620_v27  ;;  %7978 = vmatprep.mubr.msk.bf16.mxu0 %vm1155_vm0, %v3478_v23  ;;  %v3511_v40 = vshrl.u32 %v9248_v56, 16  ;;  %v9296_v5 = vld [vmem:[%s8346_s22 + $0x1e0] sm:$0xff]   ;;  %v3527_v7 = vshrl.u32 %v9254_v14, 16 }
 0x1dc   : > { %v1900_v26 = vpop.f32.mrf.mxu0  ;;  %8116 = vmatprep.mubr.msk.bf16.mxu1 %vm1155_vm0, %v4622_v3  ;;  %v3535_v3 = vshrl.u32 %v9281_v35, 16  ;;  %v3547_v56 = vshll.u32 %v9296_v5, 16  ;;  %v3533_v55 = vrot.slane %v3531_v62, 1  ;;  %v3545_v14 = vor.u32 %v3543_v20, %v3541_v51 }
 0x1dd   : > { %10041 = vst [vmem:[#allocation108_spill] sm:$0xff] %v9284_v0  ;;  %v9298_v27 = vadd.f32 %v2599_v18, %v1900_v26  ;;  %v4891_v23 = vpop.f32.mrf.mxu1  ;;  %v3519_v0 = vshrl.u32 %v9266_v28, 16  ;;  %v4626_v18 = vsel %vm4519_vm2, %v4623_v15, %v4625_v48  ;;  %v3505_v26 = vor.u32 %v3503_v60, %v3501_v32 }
 0x1de   : > { %v7745_v59 = vpop.f32.mrf.mxu0  ;;  %v3513_v43 = vor.u32 %v3511_v40, %v3509_v46  ;;  %v4635_v32 = vrot.slane %v9296_v5, 1  ;;  %v3537_v60 = vor.u32 %v3535_v3, %v3533_v55  ;;  %v3549_v35 = vrot.slane %v3547_v56, 1 }
 0x1df   : > { %10042 = vst [vmem:[#allocation109_spill] sm:$0xff] %v9298_v27  ;;  %v9305_v36 = vadd.f32 %v7879_v9, %v7745_v59  ;;  %v8019_v31 = vpop.f32.mrf.mxu1  ;;  %v3517_v27 = vrot.slane %v3515_v8, 1  ;;  %v3529_v9 = vor.u32 %v3527_v7, %v3525_v42  ;;  %v4628_v7 = vsel %vm4519_vm2, %v4625_v48, %v4627_v38 }
 0x1e0   : > { %v1903_v28 = vpop.f32.mrf.mxu0  ;;  %v4630_v40 = vsel %vm4519_vm2, %v4627_v38, %v4629_v52  ;;  %v9357_v38 = vld [vmem:[%s8346_s22 + $0x1f0] sm:$0xff]  }
 0x1e1   : > { %10043 = vst [vmem:[#allocation110_spill] sm:$0xff] %v9305_v36  ;;  %v9313_v50 = vadd.f32 %v2602_v19, %v1903_v28  ;;  %v9315_v33 = vpop.f32.mrf.mxu1  ;;  %v3521_v59 = vor.u32 %v3519_v0, %v3517_v27  ;;  %v4633_v36 = vrot.slane %v9258_v63, 1  ;;  %v3510_v63 = vsel %vm616_vm1, %v3505_v26, %v3509_v46 }
 0x1e2   : > { %v7884_v15 = vpop.f32.mrf.mxu0  ;;  %7979 = vmatmul.mubr.msk.bf16.gmra.mxu0 %vm1155_vm0, %v3486_v57  ;;  %v9327_v57 = vsel %vm616_vm1, %v3513_v43, %v3517_v27  ;;  %v9340_v3 = vsel %vm616_vm1, %v3529_v9, %v3533_v55  ;;  %v4637_v26 = vrot.slane %v9311_v44, 1 }
 0x1e3   : > { %v4382_v8 = vadd.f32 %v7884_v15, %v8555_v6  ;;  %v8022_v19 = vpop.f32.mrf.mxu1  ;;  %8117 = vmatmul.mubr.msk.bf16.gmra.mxu1 %vm1155_vm0, %v4624_v22  ;;  %7982 = vmatprep.mubr.msk.bf16.mxu0 %vm1155_vm0, %v3494_v34  ;;  %v9331_v6 = vsel %vm4519_vm2, %v4629_v52, %v4631_v2  ;;  %v3555_v22 = vshll.u32 %v9311_v44, 16  ;;  %v9337_v46 = vsel %vm616_vm1, %v3521_v59, %v3525_v42 }
 0x1e4   : > { %v3853_v0 = vpop.f32.mrf.mxu0  ;;  %8120 = vmatprep.mubr.msk.bf16.mxu1 %vm1155_vm0, %v4626_v18  ;;  %v9343_v20 = vsel %vm4519_vm2, %v4631_v2, %v4633_v36  ;;  %v9348_v52 = vsel %vm4519_vm2, %v4633_v36, %v4635_v32  ;;  %v3551_v36 = vshrl.u32 %v9296_v5, 16 }
 0x1e5   : > { %v5420_v34 = vadd.f32 %v8018_v12, %v4382_v8  ;;  %v4380_v48 = vadd.f32 %v3853_v0, %v8561_v13  ;;  %v4907_v62 = vpop.f32.mrf.mxu1  ;;  %v9351_v12 = vsel %vm616_vm1, %v3537_v60, %v3541_v51  ;;  %v9354_v13 = vsel %vm616_vm1, %v3545_v14, %v3549_v35 }
 0x1e6   : > { %v7885_v27 = vpop.f32.mrf.mxu0  ;;  %v3557_v28 = vrot.slane %v3555_v22, 1  ;;  %v3559_v51 = vshrl.u32 %v9311_v44, 16  ;;  %v4639_v44 = vrot.slane %v9357_v38, 1  ;;  %v3563_v14 = vshll.u32 %v9357_v38, 16 }
 0x1e7   : > { %vm5552_vm4 = vcmp.ge.f32.partialorder %v5420_v34, 0.0  ;;  %v5684_v55 = vmul.f32 0.2, %v5420_v34  ;;  %v5418_v42 = vadd.f32 %v4891_v23, %v4380_v48  ;;  %v4383_v56 = vadd.f32 %v7885_v27, %v8563_v17  ;;  %v8023_v2 = vpop.f32.mrf.mxu1  ;;  %v9388_v27 = vld [vmem:[%s8346_s22 + $0x1f8] sm:$0xff]  }
 0x1e8   : > { %v3856_v18 = vpop.f32.mrf.mxu0  ;;  %v9385_v48 = vsel %vm4519_vm2, %v4635_v32, %v4637_v26  ;;  %v3565_v5 = vrot.slane %v3563_v14, 1 }
 0x1e9   : > { %v5816_v43 = vsel %vm5552_vm4, %v5420_v34, %v5684_v55  ;;  %vm5550_vm5 = vcmp.ge.f32.partialorder %v5418_v42, 0.0  ;;  %v5682_v59 = vmul.f32 0.2, %v5418_v42  ;;  %v5421_v23 = vadd.f32 %v8019_v31, %v4383_v56  ;;  %v9368_v17 = vpop.f32.mrf.mxu1 }
 0x1ea   : > { %v7214_v9 = vpack.c.bf16 %v5816_v43, %v5816_v43  ;;  %v4381_v15 = vadd.f32 %v3856_v18, %v8567_v25  ;;  %v7888_v60 = vpop.f32.mrf.mxu0  ;;  %7983 = vmatmul.mubr.msk.bf16.gmra.mxu0 %vm1155_vm0, %v9278_v47  ;;  %v3561_v56 = vor.u32 %v3559_v51, %v3557_v28  ;;  %v9399_v51 = vsel %vm4519_vm2, %v4637_v26, %v4639_v44 }
 0x1eb   : > { %v5814_v8 = vsel %vm5550_vm5, %v5418_v42, %v5682_v59  ;;  %vm5553_vm6 = vcmp.ge.f32.partialorder %v5421_v23, 0.0  ;;  %v5685_v0 = vmul.f32 0.2, %v5421_v23  ;;  %v4386_v22 = vadd.f32 %v7888_v60, %v8571_v30  ;;  %v8026_v31 = vpop.f32.mrf.mxu1  ;;  %8121 = vmatmul.mubr.msk.bf16.gmra.mxu1 %vm1155_vm0, %v4628_v7  ;;  %7986 = vmatprep.mubr.msk.bf16.mxu0 %vm1155_vm0, %v3510_v63 }
 0x1ec   : > { %6477 = vst.msk [vmem:[%s9366_s26 + $0x8] sm:$0xf] %vm6474_vm3, %v7214_v9  ;;  %v7212_v25 = vpack.c.bf16 %v5814_v8, %v5814_v8  ;;  %v5419_v47 = vadd.f32 %v9315_v33, %v4381_v15  ;;  %v3869_v34 = vpop.f32.mrf.mxu0  ;;  %8124 = vmatprep.mubr.msk.bf16.mxu1 %vm1155_vm0, %v4630_v40  ;;  %v3553_v30 = vor.u32 %v3551_v36, %v3549_v35 }
 0x1ed   : > { %v5817_v55 = vsel %vm5553_vm6, %v5421_v23, %v5685_v0  ;;  %v5424_v7 = vadd.f32 %v8022_v19, %v4386_v22  ;;  %v4384_v63 = vadd.f32 %v3869_v34, %v8577_v37  ;;  %v4923_v42 = vpop.f32.mrf.mxu1  ;;  %v3571_v23 = vshll.u32 %v9388_v27, 16 }
 0x1ee   : > { %6475 = vst.msk [vmem:[%s9366_s26] sm:$0xf] %vm6474_vm3, %v7212_v25  ;;  %v7215_v33 = vpack.c.bf16 %v5817_v55, %v5817_v55  ;;  %vm5551_vm7 = vcmp.ge.f32.partialorder %v5419_v47, 0.0  ;;  %v5683_v40 = vmul.f32 0.2, %v5419_v47  ;;  %v7889_v18 = vpop.f32.mrf.mxu0  ;;  %v9402_v59 = vsel %vm616_vm1, %v3553_v30, %v3557_v28 }
 0x1ef   : > { %vm5556_vm8 = vcmp.ge.f32.partialorder %v5424_v7, 0.0  ;;  %v5688_v32 = vmul.f32 0.2, %v5424_v7  ;;  %v5422_v43 = vadd.f32 %v4907_v62, %v4384_v63  ;;  %v4387_v35 = vadd.f32 %v7889_v18, %v8579_v41  ;;  %v8027_v36 = vpop.f32.mrf.mxu1 }
 0x1f0   : > { %6478 = vst.msk [vmem:[%s9366_s26 + $0xc] sm:$0xf] %vm6474_vm3, %v7215_v33  ;;  %v5815_v19 = vsel %vm5551_vm7, %v5419_v47, %v5683_v40  ;;  %v3872_v37 = vpop.f32.mrf.mxu0  ;;  %v9411_v26 = vsel %vm616_vm1, %v3561_v56, %v3565_v5  ;;  %v3575_v63 = vshrl.u32 %v9388_v27, 16 }
 0x1f1   : > { %v7213_v9 = vpack.c.bf16 %v5815_v19, %v5815_v19  ;;  %v5820_v62 = vsel %vm5556_vm8, %v5424_v7, %v5688_v32  ;;  %vm5554_vm9 = vcmp.ge.f32.partialorder %v5422_v43, 0.0  ;;  %v5686_v41 = vmul.f32 0.2, %v5422_v43  ;;  %v9405_v15 = vpop.f32.mrf.mxu1 }
 0x1f2   : > { %v7218_v60 = vpack.c.bf16 %v5820_v62, %v5820_v62  ;;  %v5425_v14 = vadd.f32 %v8023_v2, %v4387_v35  ;;  %v4385_v8 = vadd.f32 %v3872_v37, %v8583_v49  ;;  %v7892_v0 = vpop.f32.mrf.mxu0  ;;  %7987 = vmatmul.mubr.msk.bf16.gmra.mxu0 %vm1155_vm0, %v9327_v57  ;;  %v4641_v49 = vrot.slane %v9388_v27, 1 }
 0x1f3   : > { %6476 = vst.msk [vmem:[%s9366_s26 + $0x4] sm:$0xf] %vm6474_vm3, %v7213_v9  ;;  %v5818_v28 = vsel %vm5554_vm9, %v5422_v43, %v5686_v41  ;;  %v4390_v22 = vadd.f32 %v7892_v0, %v8587_v54  ;;  %v8030_v25 = vpop.f32.mrf.mxu1  ;;  %8125 = vmatmul.mubr.msk.bf16.gmra.mxu1 %vm1155_vm0, %v9331_v6  ;;  %7990 = vmatprep.mubr.msk.bf16.mxu0 %vm1155_vm0, %v9337_v46  ;;  %v3567_v57 = vshrl.u32 %v9357_v38, 16  ;;  %v9428_v6 = vld [vmem:[%s8346_s22 + $0x200] sm:$0xff]   ;;  %v3573_v7 = vrot.slane %v3571_v23, 1 }
 0x1f4   : > { %6481 = vst.msk [vmem:[%s9366_s26 + $0x18] sm:$0xf] %vm6474_vm3, %v7218_v60  ;;  %v7216_v2 = vpack.c.bf16 %v5818_v28, %v5818_v28  ;;  %vm5557_vm10 = vcmp.ge.f32.partialorder %v5425_v14, 0.0  ;;  %v5689_v47 = vmul.f32 0.2, %v5425_v14  ;;  %v5423_v34 = vadd.f32 %v9368_v17, %v4385_v8  ;;  %v3885_v54 = vpop.f32.mrf.mxu0  ;;  %8128 = vmatprep.mubr.msk.bf16.mxu1 %vm1155_vm0, %v9343_v20  ;;  %v9454_v8 = vld [vmem:[%s8346_s22 + $0x208] sm:$0xff]  }
 0x1f5   : > { %v5428_v30 = vadd.f32 %v8026_v31, %v4390_v22  ;;  %v4388_v46 = vadd.f32 %v3885_v54, %v8593_v61  ;;  %v4939_v55 = vpop.f32.mrf.mxu1  ;;  %v3579_v40 = vshll.u32 %v9428_v6, 16  ;;  %v4643_v19 = vrot.slane %v9428_v6, 1 }
 0x1f6   : > { %6479 = vst.msk [vmem:[%s9366_s26 + $0x10] sm:$0xf] %vm6474_vm3, %v7216_v2  ;;  %v5821_v56 = vsel %vm5557_vm10, %v5425_v14, %v5689_v47  ;;  %vm5555_vm11 = vcmp.ge.f32.partialorder %v5423_v34, 0.0  ;;  %v5687_v33 = vmul.f32 0.2, %v5423_v34  ;;  %v7893_v17 = vpop.f32.mrf.mxu0  ;;  %v3569_v37 = vor.u32 %v3567_v57, %v3565_v5 }
 0x1f7   : > { %v7219_v18 = vpack.c.bf16 %v5821_v56, %v5821_v56  ;;  %vm5560_vm12 = vcmp.ge.f32.partialorder %v5428_v30, 0.0  ;;  %v5692_v20 = vmul.f32 0.2, %v5428_v30  ;;  %v5426_v32 = vadd.f32 %v4923_v42, %v4388_v46  ;;  %v9435_v31 = vpop.f32.mrf.mxu1 }
 0x1f8   : > { %v5819_v61 = vsel %vm5555_vm11, %v5423_v34, %v5687_v33  ;;  %v4391_v43 = vadd.f32 %v7893_v17, %v8595_v1  ;;  %v3888_v35 = vpop.f32.mrf.mxu0  ;;  %v9451_v5 = vsel %vm4519_vm2, %v4639_v44, %v4641_v49  ;;  %v9479_v47 = vsel %vm616_vm1, %v3569_v37, %v3573_v7  ;;  %v9485_v34 = vld [vmem:[%s8346_s22 + $0x210] sm:$0xff]  }
 0x1f9   : > { %6482 = vst.msk [vmem:[%s9366_s26 + $0x1c] sm:$0xf] %vm6474_vm3, %v7219_v18  ;;  %v7217_v23 = vpack.c.bf16 %v5819_v61, %v5819_v61  ;;  %v5824_v9 = vsel %vm5560_vm12, %v5428_v30, %v5692_v20  ;;  %vm5558_vm13 = vcmp.ge.f32.partialorder %v5426_v32, 0.0  ;;  %v5690_v62 = vmul.f32 0.2, %v5426_v32  ;;  %v9441_v41 = vpop.f32.mrf.mxu1 }
 0x1fa   : > { %v7222_v42 = vpack.c.bf16 %v5824_v9, %v5824_v9  ;;  %v5429_v60 = vadd.f32 %v8027_v36, %v4391_v43  ;;  %v4389_v14 = vadd.f32 %v3888_v35, %v8599_v10  ;;  %v7896_v1 = vpop.f32.mrf.mxu0  ;;  %7991 = vmatmul.mubr.msk.bf16.gmra.mxu0 %vm1155_vm0, %v9340_v3  ;;  %v3577_v10 = vor.u32 %v3575_v63, %v3573_v7 }
 0x1fb   : > { %6480 = vst.msk [vmem:[%s9366_s26 + $0x14] sm:$0xf] %vm6474_vm3, %v7217_v23  ;;  %v5822_v0 = vsel %vm5558_vm13, %v5426_v32, %v5690_v62  ;;  %v4394_v36 = vadd.f32 %v7896_v1, %v8603_v16  ;;  %v8034_v28 = vpop.f32.mrf.mxu1  ;;  %8129 = vmatmul.mubr.msk.bf16.gmra.mxu1 %vm1155_vm0, %v9348_v52  ;;  %7994 = vmatprep.mubr.msk.bf16.mxu0 %vm1155_vm0, %v9351_v12  ;;  %v9463_v3 = vrot.slane %v3579_v40, 1  ;;  %v3587_v33 = vshll.u32 %v9454_v8, 16 }
 0x1fc   : > { %6485 = vst.msk [vmem:[%s9366_s26 + $0x28] sm:$0xf] %vm6474_vm3, %v7222_v42  ;;  %v7220_v38 = vpack.c.bf16 %v5822_v0, %v5822_v0  ;;  %vm5561_vm14 = vcmp.ge.f32.partialorder %v5429_v60, 0.0  ;;  %v5693_v44 = vmul.f32 0.2, %v5429_v60  ;;  %v5427_v22 = vadd.f32 %v9405_v15, %v4389_v14  ;;  %v3901_v16 = vpop.f32.mrf.mxu0  ;;  %8132 = vmatprep.mubr.msk.bf16.mxu1 %vm1155_vm0, %v9385_v48 }
 0x1fd   : > { %v5432_v52 = vadd.f32 %v8030_v25, %v4394_v36  ;;  %v4392_v57 = vadd.f32 %v3901_v16, %v8609_v24  ;;  %v4955_v2 = vpop.f32.mrf.mxu1  ;;  %v9476_v12 = vsel %vm4519_vm2, %v4641_v49, %v4643_v19  ;;  %v4645_v24 = vrot.slane %v9454_v8, 1 }
 0x1fe   : > { %6483 = vst.msk [vmem:[%s9366_s26 + $0x20] sm:$0xf] %vm6474_vm3, %v7220_v38  ;;  %v5825_v15 = vsel %vm5561_vm14, %v5429_v60, %v5693_v44  ;;  %vm5559_vm15 = vcmp.ge.f32.partialorder %v5427_v22, 0.0  ;;  %v5691_v48 = vmul.f32 0.2, %v5427_v22  ;;  %v7897_v25 = vpop.f32.mrf.mxu0  ;;  %v9490_v56 = vsel %vm616_vm1, %v3577_v10, %v9463_v3 }
 0x1ff   : > { %v7223_v54 = vpack.c.bf16 %v5825_v15, %v5825_v15  ;;  %vm5564_vm4 = vcmp.ge.f32.partialorder %v5432_v52, 0.0  ;;  %v5696_v27 = vmul.f32 0.2, %v5432_v52  ;;  %v5430_v30 = vadd.f32 %v4939_v55, %v4392_v57  ;;  %v8035_v49 = vpop.f32.mrf.mxu1 }
 0x200   : > { %v5823_v46 = vsel %vm5559_vm15, %v5427_v22, %v5691_v48  ;;  %v4395_v7 = vadd.f32 %v7897_v25, %v8611_v29  ;;  %v3904_v63 = vpop.f32.mrf.mxu0  ;;  %v4647_v43 = vrot.slane %v9485_v34, 1  ;;  %v3589_v60 = vrot.slane %v3587_v33, 1 }
 0x201   : > { %6486 = vst.msk [vmem:[%s9366_s26 + $0x2c] sm:$0xf] %vm6474_vm3, %v7223_v54  ;;  %v7221_v17 = vpack.c.bf16 %v5823_v46, %v5823_v46  ;;  %v5828_v40 = vsel %vm5564_vm4, %v5432_v52, %v5696_v27  ;;  %vm5562_vm5 = vcmp.ge.f32.partialorder %v5430_v30, 0.0  ;;  %v5694_v18 = vmul.f32 0.2, %v5430_v30  ;;  %v9495_v55 = vpop.f32.mrf.mxu1 }
 0x202   : > { %v7226_v20 = vpack.c.bf16 %v5828_v40, %v5828_v40  ;;  %v5433_v29 = vadd.f32 %v9435_v31, %v4395_v7  ;;  %v4393_v32 = vadd.f32 %v3904_v63, %v8615_v39  ;;  %v7900_v61 = vpop.f32.mrf.mxu0  ;;  %7995 = vmatmul.mubr.msk.bf16.gmra.mxu0 %vm1155_vm0, %v9354_v13  ;;  %v4646_v39 = vsel %vm4519_vm2, %v4643_v19, %v4645_v24 }
 0x203   : > { %6484 = vst.msk [vmem:[%s9366_s26 + $0x24] sm:$0xf] %vm6474_vm3, %v7221_v17  ;;  %v5826_v35 = vsel %vm5562_vm5, %v5430_v30, %v5694_v18  ;;  %v4398_v37 = vadd.f32 %v7900_v61, %v8619_v45  ;;  %v8038_v23 = vpop.f32.mrf.mxu1  ;;  %8133 = vmatmul.mubr.msk.bf16.gmra.mxu1 %vm1155_vm0, %v9399_v51  ;;  %7998 = vmatprep.mubr.msk.bf16.mxu0 %vm1155_vm0, %v9402_v59  ;;  %v3583_v13 = vshrl.u32 %v9428_v6, 16  ;;  %v3591_v19 = vshrl.u32 %v9454_v8, 16 }
 0x204   : > { %6489 = vst.msk [vmem:[%s9366_s26 + $0x38] sm:$0xf] %vm6474_vm3, %v7226_v20  ;;  %v7224_v31 = vpack.c.bf16 %v5826_v35, %v5826_v35  ;;  %vm5565_vm6 = vcmp.ge.f32.partialorder %v5433_v29, 0.0  ;;  %v5697_v9 = vmul.f32 0.2, %v5433_v29  ;;  %v5431_v45 = vadd.f32 %v9441_v41, %v4393_v32  ;;  %v3917_v62 = vpop.f32.mrf.mxu0  ;;  %8136 = vmatprep.mubr.msk.bf16.mxu1 %vm1155_vm0, %v9451_v5 }
 0x205   : > { %v5436_v51 = vadd.f32 %v8034_v28, %v4398_v37  ;;  %v4396_v59 = vadd.f32 %v3917_v62, %v8625_v53  ;;  %v4971_v42 = vpop.f32.mrf.mxu1  ;;  %v3595_v41 = vshll.u32 %v9485_v34, 16  ;;  %v9526_v53 = vld [vmem:[%s8346_s22 + $0x218] sm:$0xff]   ;;  %v9532_v44 = vsel %vm4519_vm2, %v4645_v24, %v4647_v43  ;;  %v10044_v37 = vld [vmem:[#allocation2_spill] sm:$0xff] }
 0x206   : > { %6487 = vst.msk [vmem:[%s9366_s26 + $0x30] sm:$0xf] %vm6474_vm3, %v7224_v31  ;;  %v5829_v6 = vsel %vm5565_vm6, %v5433_v29, %v5697_v9  ;;  %vm5563_vm7 = vcmp.ge.f32.partialorder %v5431_v45, 0.0  ;;  %v5695_v14 = vmul.f32 0.2, %v5431_v45  ;;  %v7901_v1 = vpop.f32.mrf.mxu0  ;;  %v3585_v22 = vor.u32 %v3583_v13, %v9463_v3 }
 0x207   : > { %v7227_v0 = vpack.c.bf16 %v5829_v6, %v5829_v6  ;;  %vm5568_vm8 = vcmp.ge.f32.partialorder %v5436_v51, 0.0  ;;  %v5700_v5 = vmul.f32 0.2, %v5436_v51  ;;  %v5434_v36 = vadd.f32 %v4955_v2, %v4396_v59  ;;  %v9523_v28 = vpop.f32.mrf.mxu1 }
 0x208   : > { %v5827_v10 = vsel %vm5563_vm7, %v5431_v45, %v5695_v14  ;;  %v4399_v8 = vadd.f32 %v7901_v1, %v8627_v58  ;;  %v3920_v38 = vpop.f32.mrf.mxu0  ;;  %v9542_v24 = vor.u32 %v3591_v19, %v3589_v60  ;;  %v4649_v30 = vrot.slane %v9526_v53, 1  ;;  %v10046_v14 = vld [vmem:[#allocation4_spill] sm:$0xff] }
 0x209   : > { %6490 = vst.msk [vmem:[%s9366_s26 + $0x3c] sm:$0xf] %vm6474_vm3, %v7227_v0  ;;  %v7225_v16 = vpack.c.bf16 %v5827_v10, %v5827_v10  ;;  %v5832_v52 = vsel %vm5568_vm8, %v5436_v51, %v5700_v5  ;;  %vm5566_vm9 = vcmp.ge.f32.partialorder %v5434_v36, 0.0  ;;  %v5698_v57 = vmul.f32 0.2, %v5434_v36  ;;  %v9537_v2 = vpop.f32.mrf.mxu1 }
 0x20a   : > { %v7230_v15 = vpack.c.bf16 %v5832_v52, %v5832_v52  ;;  %v5437_v58 = vadd.f32 %v8035_v49, %v4399_v8  ;;  %v4397_v48 = vadd.f32 %v3920_v38, %v8631_v4  ;;  %v7904_v25 = vpop.f32.mrf.mxu0  ;;  %7999 = vmatmul.mubr.msk.bf16.gmra.mxu0 %vm1155_vm0, %v9411_v26  ;;  %v3597_v4 = vrot.slane %v3595_v41, 1  ;;  %v10047_v38 = vld [vmem:[#allocation5_spill] sm:$0xff] }
 0x20b   : > { %6488 = vst.msk [vmem:[%s9366_s26 + $0x34] sm:$0xf] %vm6474_vm3, %v7225_v16  ;;  %v5830_v3 = vsel %vm5566_vm9, %v5434_v36, %v5698_v57  ;;  %v4402_v54 = vadd.f32 %v7904_v25, %v8635_v11  ;;  %v8042_v27 = vpop.f32.mrf.mxu1  ;;  %8137 = vmatmul.mubr.msk.bf16.gmra.mxu1 %vm1155_vm0, %v9476_v12  ;;  %8002 = vmatprep.mubr.msk.bf16.mxu0 %vm1155_vm0, %v9479_v47  ;;  %v9557_v11 = vld [vmem:[%s8346_s22 + $0x220] ss:$0 sps:$4 sm:$0x11]   ;;  %v3603_v17 = vshll.u32 %v9526_v53, 16 }
 0x20c   : > { %6493 = vst.msk [vmem:[%s9366_s26 + $0x48] sm:$0xf] %vm6474_vm3, %v7230_v15  ;;  %v7228_v26 = vpack.c.bf16 %v5830_v3, %v5830_v3  ;;  %vm5569_vm10 = vcmp.ge.f32.partialorder %v5437_v58, 0.0  ;;  %v5701_v49 = vmul.f32 0.2, %v5437_v58  ;;  %v5435_v46 = vadd.f32 %v9495_v55, %v4397_v48  ;;  %v3933_v7 = vpop.f32.mrf.mxu0  ;;  %8140 = vmatprep.mubr.msk.bf16.mxu1 %vm1155_vm0, %v4646_v39 }
 0x20d   : > { %v5440_v12 = vadd.f32 %v8038_v23, %v4402_v54  ;;  %v4400_v63 = vadd.f32 %v3933_v7, %v8641_v21  ;;  %v4987_v47 = vpop.f32.mrf.mxu1  ;;  %v3590_v33 = vsel %vm616_vm1, %v3585_v22, %v3589_v60  ;;  %v3599_v20 = vshrl.u32 %v9485_v34, 16  ;;  %v10045_v60 = vld [vmem:[#allocation3_spill] sm:$0xff] }
 0x20e   : > { %6491 = vst.msk [vmem:[%s9366_s26 + $0x40] sm:$0xf] %vm6474_vm3, %v7228_v26  ;;  %v5833_v40 = vsel %vm5569_vm10, %v5437_v58, %v5701_v49  ;;  %vm5567_vm11 = vcmp.ge.f32.partialorder %v5435_v46, 0.0  ;;  %v5699_v18 = vmul.f32 0.2, %v5435_v46  ;;  %v7905_v55 = vpop.f32.mrf.mxu0  ;;  %v4650_v13 = vsel %vm4519_vm2, %v4647_v43, %v4649_v30 }
 0x20f   : > { %v7231_v29 = vpack.c.bf16 %v5833_v40, %v5833_v40  ;;  %vm5572_vm12 = vcmp.ge.f32.partialorder %v5440_v12, 0.0  ;;  %v5704_v32 = vmul.f32 0.2, %v5440_v12  ;;  %v5438_v61 = vadd.f32 %v4971_v42, %v4400_v63  ;;  %v8043_v35 = vpop.f32.mrf.mxu1 }
 0x210   : > { %v5831_v21 = vsel %vm5567_vm11, %v5435_v46, %v5699_v18  ;;  %v4403_v23 = vadd.f32 %v7905_v55, %v10044_v37  ;;  %v3936_v39 = vpop.f32.mrf.mxu0  ;;  %v4651_v31 = vrot.slane %v9557_v11, 1  ;;  %v3605_v34 = vrot.slane %v3603_v17, 1  ;;  %v10050_v55 = vld [vmem:[#allocation8_spill] sm:$0xff] }
 0x211   : > { %6494 = vst.msk [vmem:[%s9366_s26 + $0x4c] sm:$0xf] %vm6474_vm3, %v7231_v29  ;;  %v7229_v9 = vpack.c.bf16 %v5831_v21, %v5831_v21  ;;  %v5836_v45 = vsel %vm5572_vm12, %v5440_v12, %v5704_v32  ;;  %vm5570_vm13 = vcmp.ge.f32.partialorder %v5438_v61, 0.0  ;;  %v5702_v62 = vmul.f32 0.2, %v5438_v61  ;;  %v9572_v51 = vpop.f32.mrf.mxu1 }
 0x212   : > { %v7234_v59 = vpack.c.bf16 %v5836_v45, %v5836_v45  ;;  %v5441_v42 = vadd.f32 %v9523_v28, %v4403_v23  ;;  %v4401_v19 = vadd.f32 %v3936_v39, %v10045_v60  ;;  %v7908_v6 = vpop.f32.mrf.mxu0  ;;  %8003 = vmatmul.mubr.msk.bf16.gmra.mxu0 %vm1155_vm0, %v9490_v56  ;;  %v3601_v0 = vor.u32 %v3599_v20, %v3597_v4  ;;  %v10051_v23 = vld [vmem:[#allocation9_spill] sm:$0xff] }
 0x213   : > { %6492 = vst.msk [vmem:[%s9366_s26 + $0x44] sm:$0xf] %vm6474_vm3, %v7229_v9  ;;  %v5834_v43 = vsel %vm5570_vm13, %v5438_v61, %v5702_v62  ;;  %v4406_v1 = vadd.f32 %v7908_v6, %v10046_v14  ;;  %v8046_v41 = vpop.f32.mrf.mxu1  ;;  %8141 = vmatmul.mubr.msk.bf16.gmra.mxu1 %vm1155_vm0, %v9532_v44  ;;  %8006 = vmatprep.mubr.msk.bf16.mxu0 %vm1155_vm0, %v3590_v33  ;;  %v3607_v5 = vshrl.u32 %v9526_v53, 16  ;;  %v10052_v6 = vld [vmem:[#allocation10_spill] sm:$0xff] }
 0x214   : > { %6497 = vst.msk [vmem:[%s9366_s26 + $0x58] sm:$0xf] %vm6474_vm3, %v7234_v59  ;;  %v7232_v36 = vpack.c.bf16 %v5834_v43, %v5834_v43  ;;  %vm5573_vm14 = vcmp.ge.f32.partialorder %v5441_v42, 0.0  ;;  %v5705_v56 = vmul.f32 0.2, %v5441_v42  ;;  %v5439_v28 = vadd.f32 %v9537_v2, %v4401_v19  ;;  %v3949_v10 = vpop.f32.mrf.mxu0  ;;  %8144 = vmatprep.mubr.msk.bf16.mxu1 %vm1155_vm0, %v4650_v13 }
 0x215   : > { %v5444_v8 = vadd.f32 %v8042_v27, %v4406_v1  ;;  %v4404_v22 = vadd.f32 %v3949_v10, %v10047_v38  ;;  %v5003_v44 = vpop.f32.mrf.mxu1  ;;  %v3598_v16 = vsel %vm616_vm1, %v9542_v24, %v3597_v4  ;;  %v4652_v52 = vsel %vm4519_vm2, %v4649_v30, %v4651_v31  ;;  %v10048_v27 = vld [vmem:[#allocation6_spill] sm:$0xff]  ;;  %v10054_v38 = vld [vmem:[#allocation12_spill] sm:$0xff] }
 0x216   : > { %6495 = vst.msk [vmem:[%s9366_s26 + $0x50] sm:$0xf] %vm6474_vm3, %v7232_v36  ;;  %v5837_v53 = vsel %vm5573_vm14, %v5441_v42, %v5705_v56  ;;  %vm5571_vm15 = vcmp.ge.f32.partialorder %v5439_v28, 0.0  ;;  %v5703_v57 = vmul.f32 0.2, %v5439_v28  ;;  %v7909_v15 = vpop.f32.mrf.mxu0  ;;  %v3611_v2 = vshll.u32 %v9557_v11, 16 }
 0x217   : > { %v7235_v58 = vpack.c.bf16 %v5837_v53, %v5837_v53  ;;  %vm5576_vm4 = vcmp.ge.f32.partialorder %v5444_v8, 0.0  ;;  %v5708_v48 = vmul.f32 0.2, %v5444_v8  ;;  %v5442_v25 = vadd.f32 %v4987_v47, %v4404_v22  ;;  %v8047_v3 = vpop.f32.mrf.mxu1  ;;  %v10049_v47 = vld [vmem:[#allocation7_spill] sm:$0xff] }
 0x218   : > { %v5835_v54 = vsel %vm5571_vm15, %v5439_v28, %v5703_v57  ;;  %v4407_v26 = vadd.f32 %v7909_v15, %v10048_v27  ;;  %v3952_v24 = vpop.f32.mrf.mxu0  ;;  %v3606_v4 = vsel %vm616_vm1, %v3601_v0, %v3605_v34  ;;  %v3609_v30 = vor.u32 %v3607_v5, %v3605_v34  ;;  %v10053_v56 = vld [vmem:[#allocation11_spill] sm:$0xff] }
 0x219   : > { %6498 = vst.msk [vmem:[%s9366_s26 + $0x5c] sm:$0xf] %vm6474_vm3, %v7235_v58  ;;  %v7233_v49 = vpack.c.bf16 %v5835_v54, %v5835_v54  ;;  %v5840_v46 = vsel %vm5576_vm4, %v5444_v8, %v5708_v48  ;;  %vm5574_vm2 = vcmp.ge.f32.partialorder %v5442_v25, 0.0  ;;  %v5706_v7 = vmul.f32 0.2, %v5442_v25  ;;  %v5006_v11 = vpop.f32.mrf.mxu1 }
 0x21a   : > { %v7238_v12 = vpack.c.bf16 %v5840_v46, %v5840_v46  ;;  %v5445_v63 = vadd.f32 %v8043_v35, %v4407_v26  ;;  %v4405_v33 = vadd.f32 %v3952_v24, %v10049_v47  ;;  %v7912_v17 = vpop.f32.mrf.mxu0  ;;  %8007 = vmatmul.mubr.msk.bf16.gmra.mxu0 %vm1155_vm0, %v3598_v16  ;;  %v3613_v40 = vrot.slane %v3611_v2, 1  ;;  %v10055_v2 = vld [vmem:[#allocation13_spill] sm:$0xff] }
 0x21b   : > { %6496 = vst.msk [vmem:[%s9366_s26 + $0x54] sm:$0xf] %vm6474_vm3, %v7233_v49  ;;  %v5838_v18 = vsel %vm5574_vm2, %v5442_v25, %v5706_v7  ;;  %v4410_v20 = vadd.f32 %v7912_v17, %v10050_v55  ;;  %v8050_v29 = vpop.f32.mrf.mxu1  ;;  %8145 = vmatmul.mubr.msk.bf16.gmra.mxu1 %vm1155_vm0, %v4652_v52  ;;  %8010 = vmatprep.mubr.msk.bf16.mxu0 %vm1155_vm0, %v3606_v4  ;;  %v10056_v49 = vld [vmem:[#allocation14_spill] sm:$0xff] }
 0x21c   : > { %6501 = vst.msk [vmem:[%s9366_s26 + $0x68] sm:$0xf] %vm6474_vm3, %v7238_v12  ;;  %v7236_v32 = vpack.c.bf16 %v5838_v18, %v5838_v18  ;;  %vm5577_vm5 = vcmp.ge.f32.partialorder %v5445_v63, 0.0  ;;  %v5709_v61 = vmul.f32 0.2, %v5445_v63  ;;  %v5443_v35 = vadd.f32 %v9572_v51, %v4405_v33  ;;  %v3965_v21 = vpop.f32.mrf.mxu0 }
 0x21d   : > { %v5448_v37 = vadd.f32 %v8046_v41, %v4410_v20  ;;  %v4408_v39 = vadd.f32 %v3965_v21, %v10051_v23  ;;  %v5019_v13 = vpop.f32.mrf.mxu1  ;;  %v3614_v62 = vsel %vm616_vm1, %v3609_v30, %v3613_v40  ;;  %v10057_v40 = vld [vmem:[#allocation15_spill] sm:$0xff] }
 0x21e   : > { %6499 = vst.msk [vmem:[%s9366_s26 + $0x60] sm:$0xf] %vm6474_vm3, %v7236_v32  ;;  %v5841_v31 = vsel %vm5577_vm5, %v5445_v63, %v5709_v61  ;;  %vm5575_vm6 = vcmp.ge.f32.partialorder %v5443_v35, 0.0  ;;  %v5707_v9 = vmul.f32 0.2, %v5443_v35  ;;  %v7913_v45 = vpop.f32.mrf.mxu0 }
 0x21f   : > { %v7239_v59 = vpack.c.bf16 %v5841_v31, %v5841_v31  ;;  %vm5580_vm7 = vcmp.ge.f32.partialorder %v5448_v37, 0.0  ;;  %v5712_v42 = vmul.f32 0.2, %v5448_v37  ;;  %v5446_v60 = vadd.f32 %v5003_v44, %v4408_v39  ;;  %v8051_v51 = vpop.f32.mrf.mxu1 }
 0x220   : > { %v5839_v19 = vsel %vm5575_vm6, %v5443_v35, %v5707_v9  ;;  %v4411_v34 = vadd.f32 %v7913_v45, %v10052_v6  ;;  %v3968_v43 = vpop.f32.mrf.mxu0 }
 0x221   : > { %6502 = vst.msk [vmem:[%s9366_s26 + $0x6c] sm:$0xf] %vm6474_vm3, %v7239_v59  ;;  %v7237_v14 = vpack.c.bf16 %v5839_v19, %v5839_v19  ;;  %v5844_v1 = vsel %vm5580_vm7, %v5448_v37, %v5712_v42  ;;  %vm5578_vm8 = vcmp.ge.f32.partialorder %v5446_v60, 0.0  ;;  %v5710_v41 = vmul.f32 0.2, %v5446_v60  ;;  %v5022_v0 = vpop.f32.mrf.mxu1 }
 0x222   : > { %v7242_v5 = vpack.c.bf16 %v5844_v1, %v5844_v1  ;;  %v5449_v36 = vadd.f32 %v8047_v3, %v4411_v34  ;;  %v4409_v28 = vadd.f32 %v3968_v43, %v10053_v56  ;;  %v7916_v10 = vpop.f32.mrf.mxu0  ;;  %8011 = vmatmul.mubr.msk.bf16.gmra.mxu0 %vm1155_vm0, %v3614_v62  ;;  %v10060_v34 = vld [vmem:[#allocation18_spill] sm:$0xff] }
 0x223   : > { %6500 = vst.msk [vmem:[%s9366_s26 + $0x64] sm:$0xf] %vm6474_vm3, %v7237_v14  ;;  %v5842_v8 = vsel %vm5578_vm8, %v5446_v60, %v5710_v41  ;;  %v4414_v22 = vadd.f32 %v7916_v10, %v10054_v38  ;;  %v8054_v44 = vpop.f32.mrf.mxu1 }
 0x224   : > { %6505 = vst.msk [vmem:[%s9366_s26 + $0x78] sm:$0xf] %vm6474_vm3, %v7242_v5  ;;  %v7240_v16 = vpack.c.bf16 %v5842_v8, %v5842_v8  ;;  %vm5581_vm1 = vcmp.ge.f32.partialorder %v5449_v36, 0.0  ;;  %v5713_v52 = vmul.f32 0.2, %v5449_v36  ;;  %v5447_v53 = vadd.f32 %v5006_v11, %v4409_v28  ;;  %v3981_v57 = vpop.f32.mrf.mxu0  ;;  %v10061_v28 = vld [vmem:[#allocation19_spill] sm:$0xff] }
 0x225   : > { %v5452_v15 = vadd.f32 %v8050_v29, %v4414_v22  ;;  %v4412_v58 = vadd.f32 %v3981_v57, %v10055_v2  ;;  %v5035_v48 = vpop.f32.mrf.mxu1  ;;  %v10058_v29 = vld [vmem:[#allocation16_spill] sm:$0xff] }
 0x226   : > { %6503 = vst.msk [vmem:[%s9366_s26 + $0x70] sm:$0xf] %vm6474_vm3, %v7240_v16  ;;  %v5845_v25 = vsel %vm5581_vm1, %v5449_v36, %v5713_v52  ;;  %vm5579_vm0 = vcmp.ge.f32.partialorder %v5447_v53, 0.0  ;;  %v5711_v3 = vmul.f32 0.2, %v5447_v53  ;;  %v7917_v54 = vpop.f32.mrf.mxu0  ;;  %v10062_v22 = vld [vmem:[#allocation20_spill] sm:$0xff] }
 0x227   : > { %v7243_v27 = vpack.c.bf16 %v5845_v25, %v5845_v25  ;;  %vm5584_vm9 = vcmp.ge.f32.partialorder %v5452_v15, 0.0  ;;  %v5716_v26 = vmul.f32 0.2, %v5452_v15  ;;  %v5450_v24 = vadd.f32 %v5019_v13, %v4412_v58  ;;  %v8055_v4 = vpop.f32.mrf.mxu1  ;;  %v10059_v13 = vld [vmem:[#allocation17_spill] sm:$0xff] }
 0x228   : > { %v5843_v30 = vsel %vm5579_vm0, %v5447_v53, %v5711_v3  ;;  %v4415_v46 = vadd.f32 %v7917_v54, %v10056_v49  ;;  %v3984_v7 = vpop.f32.mrf.mxu0  ;;  %v10063_v58 = vld [vmem:[#allocation21_spill] sm:$0xff] }
 0x229   : > { %6506 = vst.msk [vmem:[%s9366_s26 + $0x7c] sm:$0xf] %vm6474_vm3, %v7243_v27  ;;  %v7241_v11 = vpack.c.bf16 %v5843_v30, %v5843_v30  ;;  %v5848_v12 = vsel %vm5584_vm9, %v5452_v15, %v5716_v26  ;;  %vm5582_vm10 = vcmp.ge.f32.partialorder %v5450_v24, 0.0  ;;  %v5714_v63 = vmul.f32 0.2, %v5450_v24  ;;  %v5038_v47 = vpop.f32.mrf.mxu1 }
 0x22a   : > { %v7246_v33 = vpack.c.bf16 %v5848_v12, %v5848_v12  ;;  %v5453_v17 = vadd.f32 %v8051_v51, %v4415_v46  ;;  %v4413_v18 = vadd.f32 %v3984_v7, %v10057_v40  ;;  %v7920_v55 = vpop.f32.mrf.mxu0  ;;  %v10064_v46 = vld [vmem:[#allocation22_spill] sm:$0xff] }
 0x22b   : > { %6504 = vst.msk [vmem:[%s9366_s26 + $0x74] sm:$0xf] %vm6474_vm3, %v7241_v11  ;;  %v5846_v20 = vsel %vm5582_vm10, %v5450_v24, %v5714_v63  ;;  %v4418_v32 = vadd.f32 %v7920_v55, %v10058_v29  ;;  %v8058_v61 = vpop.f32.mrf.mxu1 }
 0x22c   : > { %6509 = vst.msk [vmem:[%s9366_s26 + $0x88] sm:$0xf] %vm6474_vm3, %v7246_v33  ;;  %v7244_v35 = vpack.c.bf16 %v5846_v20, %v5846_v20  ;;  %vm5585_vm11 = vcmp.ge.f32.partialorder %v5453_v17, 0.0  ;;  %v5717_v21 = vmul.f32 0.2, %v5453_v17  ;;  %v5451_v37 = vadd.f32 %v5022_v0, %v4413_v18  ;;  %v3997_v23 = vpop.f32.mrf.mxu0  ;;  %v10065_v18 = vld [vmem:[#allocation23_spill] sm:$0xff] }
 0x22d   : > { %v5456_v39 = vadd.f32 %v8054_v44, %v4418_v32  ;;  %v4416_v31 = vadd.f32 %v3997_v23, %v10059_v13  ;;  %v5051_v9 = vpop.f32.mrf.mxu1  ;;  %v10066_v32 = vld [vmem:[#allocation24_spill] sm:$0xff] }
 0x22e   : > { %6507 = vst.msk [vmem:[%s9366_s26 + $0x80] sm:$0xf] %vm6474_vm3, %v7244_v35  ;;  %v5849_v45 = vsel %vm5585_vm11, %v5453_v17, %v5717_v21  ;;  %vm5583_vm12 = vcmp.ge.f32.partialorder %v5451_v37, 0.0  ;;  %v5715_v62 = vmul.f32 0.2, %v5451_v37  ;;  %v7921_v59 = vpop.f32.mrf.mxu0 }
 0x22f   : > { %v7247_v42 = vpack.c.bf16 %v5849_v45, %v5849_v45  ;;  %vm5588_vm13 = vcmp.ge.f32.partialorder %v5456_v39, 0.0  ;;  %v5720_v60 = vmul.f32 0.2, %v5456_v39  ;;  %v5454_v51 = vadd.f32 %v5035_v48, %v4416_v31  ;;  %v8059_v19 = vpop.f32.mrf.mxu1  ;;  %v10067_v31 = vld [vmem:[#allocation25_spill] sm:$0xff] }
 0x230   : > { %v5847_v6 = vsel %vm5583_vm12, %v5451_v37, %v5715_v62  ;;  %v4419_v43 = vadd.f32 %v7921_v59, %v10060_v34  ;;  %v4000_v14 = vpop.f32.mrf.mxu0 }
 0x231   : > { %6510 = vst.msk [vmem:[%s9366_s26 + $0x8c] sm:$0xf] %vm6474_vm3, %v7247_v42  ;;  %v7245_v1 = vpack.c.bf16 %v5847_v6, %v5847_v6  ;;  %v5852_v41 = vsel %vm5588_vm13, %v5456_v39, %v5720_v60  ;;  %vm5586_vm14 = vcmp.ge.f32.partialorder %v5454_v51, 0.0  ;;  %v5718_v0 = vmul.f32 0.2, %v5454_v51  ;;  %v5054_v5 = vpop.f32.mrf.mxu1 }
 0x232   : > { %v7250_v36 = vpack.c.bf16 %v5852_v41, %v5852_v41  ;;  %v5457_v56 = vadd.f32 %v8055_v4, %v4419_v43  ;;  %v4417_v10 = vadd.f32 %v4000_v14, %v10061_v28  ;;  %v7924_v8 = vpop.f32.mrf.mxu0  ;;  %v10068_v43 = vld [vmem:[#allocation26_spill] sm:$0xff] }
 0x233   : > { %6508 = vst.msk [vmem:[%s9366_s26 + $0x84] sm:$0xf] %vm6474_vm3, %v7245_v1  ;;  %v5850_v38 = vsel %vm5586_vm14, %v5454_v51, %v5718_v0  ;;  %v4422_v44 = vadd.f32 %v7924_v8, %v10062_v22  ;;  %v8062_v16 = vpop.f32.mrf.mxu1 }
 0x234   : > { %6513 = vst.msk [vmem:[%s9366_s26 + $0x98] sm:$0xf] %vm6474_vm3, %v7250_v36  ;;  %v7248_v52 = vpack.c.bf16 %v5850_v38, %v5850_v38  ;;  %vm5589_vm15 = vcmp.ge.f32.partialorder %v5457_v56, 0.0  ;;  %v5721_v53 = vmul.f32 0.2, %v5457_v56  ;;  %v5455_v57 = vadd.f32 %v5038_v47, %v4417_v10  ;;  %v4013_v15 = vpop.f32.mrf.mxu0  ;;  %v10069_v10 = vld [vmem:[#allocation27_spill] sm:$0xff] }
 0x235   : > { %v5460_v2 = vadd.f32 %v8058_v61, %v4422_v44  ;;  %v4420_v48 = vadd.f32 %v4013_v15, %v10063_v58  ;;  %v5067_v25 = vpop.f32.mrf.mxu1  ;;  %v10070_v44 = vld [vmem:[#allocation28_spill] sm:$0xff] }
 0x236   : > { %6511 = vst.msk [vmem:[%s9366_s26 + $0x90] sm:$0xf] %vm6474_vm3, %v7248_v52  ;;  %v5853_v3 = vsel %vm5589_vm15, %v5457_v56, %v5721_v53  ;;  %vm5587_vm4 = vcmp.ge.f32.partialorder %v5455_v57, 0.0  ;;  %v5719_v54 = vmul.f32 0.2, %v5455_v57  ;;  %v7925_v27 = vpop.f32.mrf.mxu0 }
 0x237   : > { %v7251_v26 = vpack.c.bf16 %v5853_v3, %v5853_v3  ;;  %vm5592_vm2 = vcmp.ge.f32.partialorder %v5460_v2, 0.0  ;;  %v5724_v24 = vmul.f32 0.2, %v5460_v2  ;;  %v5458_v4 = vadd.f32 %v5051_v9, %v4420_v48  ;;  %v8063_v30 = vpop.f32.mrf.mxu1  ;;  %v10071_v48 = vld [vmem:[#allocation29_spill] sm:$0xff] }
 0x238   : > { %v5851_v49 = vsel %vm5587_vm4, %v5455_v57, %v5719_v54  ;;  %v4423_v7 = vadd.f32 %v7925_v27, %v10064_v46  ;;  %v4016_v11 = vpop.f32.mrf.mxu0 }
 0x239   : > { %6514 = vst.msk [vmem:[%s9366_s26 + $0x9c] sm:$0xf] %vm6474_vm3, %v7251_v26  ;;  %v7249_v12 = vpack.c.bf16 %v5851_v49, %v5851_v49  ;;  %v5856_v63 = vsel %vm5592_vm2, %v5460_v2, %v5724_v24  ;;  %vm5590_vm5 = vcmp.ge.f32.partialorder %v5458_v4, 0.0  ;;  %v5722_v47 = vmul.f32 0.2, %v5458_v4  ;;  %v5070_v33 = vpop.f32.mrf.mxu1 }
 0x23a   : > { %v7254_v17 = vpack.c.bf16 %v5856_v63, %v5856_v63  ;;  %v5461_v40 = vadd.f32 %v8059_v19, %v4423_v7  ;;  %v4421_v55 = vadd.f32 %v4016_v11, %v10065_v18  ;;  %v7928_v20 = vpop.f32.mrf.mxu0  ;;  %v10072_v7 = vld [vmem:[#allocation30_spill] sm:$0xff] }
 0x23b   : > { %6512 = vst.msk [vmem:[%s9366_s26 + $0x94] sm:$0xf] %vm6474_vm3, %v7249_v12  ;;  %v5854_v29 = vsel %vm5590_vm5, %v5458_v4, %v5722_v47  ;;  %v4426_v61 = vadd.f32 %v7928_v20, %v10066_v32  ;;  %v8066_v35 = vpop.f32.mrf.mxu1 }
 0x23c   : > { %6517 = vst.msk [vmem:[%s9366_s26 + $0xa8] sm:$0xf] %vm6474_vm3, %v7254_v17  ;;  %v7252_v21 = vpack.c.bf16 %v5854_v29, %v5854_v29  ;;  %vm5593_vm6 = vcmp.ge.f32.partialorder %v5461_v40, 0.0  ;;  %v5725_v37 = vmul.f32 0.2, %v5461_v40  ;;  %v5459_v23 = vadd.f32 %v5054_v5, %v4421_v55  ;;  %v4029_v39 = vpop.f32.mrf.mxu0  ;;  %v10073_v55 = vld [vmem:[#allocation31_spill] sm:$0xff] }
 0x23d   : > { %v5464_v13 = vadd.f32 %v8062_v16, %v4426_v61  ;;  %v4424_v9 = vadd.f32 %v4029_v39, %v10067_v31  ;;  %v5083_v45 = vpop.f32.mrf.mxu1  ;;  %v10074_v61 = vld [vmem:[#allocation32_spill] sm:$0xff] }
 0x23e   : > { %6515 = vst.msk [vmem:[%s9366_s26 + $0xa0] sm:$0xf] %vm6474_vm3, %v7252_v21  ;;  %v5857_v62 = vsel %vm5593_vm6, %v5461_v40, %v5725_v37  ;;  %vm5591_vm7 = vcmp.ge.f32.partialorder %v5459_v23, 0.0  ;;  %v5723_v59 = vmul.f32 0.2, %v5459_v23  ;;  %v7929_v42 = vpop.f32.mrf.mxu0 }
 0x23f   : > { %v7255_v60 = vpack.c.bf16 %v5857_v62, %v5857_v62  ;;  %vm5596_vm8 = vcmp.ge.f32.partialorder %v5464_v13, 0.0  ;;  %v5728_v51 = vmul.f32 0.2, %v5464_v13  ;;  %v5462_v19 = vadd.f32 %v5067_v25, %v4424_v9  ;;  %v8067_v6 = vpop.f32.mrf.mxu1  ;;  %v10075_v9 = vld [vmem:[#allocation33_spill] sm:$0xff] }
 0x240   : > { %v5855_v34 = vsel %vm5591_vm7, %v5459_v23, %v5723_v59  ;;  %v4427_v14 = vadd.f32 %v7929_v42, %v10068_v43  ;;  %v4032_v1 = vpop.f32.mrf.mxu0 }
 0x241   : > { %6518 = vst.msk [vmem:[%s9366_s26 + $0xac] sm:$0xf] %vm6474_vm3, %v7255_v60  ;;  %v7253_v41 = vpack.c.bf16 %v5855_v34, %v5855_v34  ;;  %v5860_v0 = vsel %vm5596_vm8, %v5464_v13, %v5728_v51  ;;  %vm5594_vm1 = vcmp.ge.f32.partialorder %v5462_v19, 0.0  ;;  %v5726_v5 = vmul.f32 0.2, %v5462_v19  ;;  %v5086_v36 = vpop.f32.mrf.mxu1 }
 0x242   : > { %v7258_v56 = vpack.c.bf16 %v5860_v0, %v5860_v0  ;;  %v5465_v28 = vadd.f32 %v8063_v30, %v4427_v14  ;;  %v4425_v8 = vadd.f32 %v4032_v1, %v10069_v10  ;;  %v7932_v38 = vpop.f32.mrf.mxu0  ;;  %v10076_v14 = vld [vmem:[#allocation34_spill] sm:$0xff] }
 0x243   : > { %6516 = vst.msk [vmem:[%s9366_s26 + $0xa4] sm:$0xf] %vm6474_vm3, %v7253_v41  ;;  %v5858_v22 = vsel %vm5594_vm1, %v5462_v19, %v5726_v5  ;;  %v4430_v16 = vadd.f32 %v7932_v38, %v10070_v44  ;;  %v8070_v52 = vpop.f32.mrf.mxu1 }
 0x244   : > { %6521 = vst.msk [vmem:[%s9366_s26 + $0xb8] sm:$0xf] %vm6474_vm3, %v7258_v56  ;;  %v7256_v53 = vpack.c.bf16 %v5858_v22, %v5858_v22  ;;  %vm5597_vm0 = vcmp.ge.f32.partialorder %v5465_v28, 0.0  ;;  %v5729_v57 = vmul.f32 0.2, %v5465_v28  ;;  %v5463_v15 = vadd.f32 %v5070_v33, %v4425_v8  ;;  %v4045_v2 = vpop.f32.mrf.mxu0  ;;  %v10077_v8 = vld [vmem:[#allocation35_spill] sm:$0xff] }
 0x245   : > { %v5468_v58 = vadd.f32 %v8066_v35, %v4430_v16  ;;  %v4428_v25 = vadd.f32 %v4045_v2, %v10071_v48  ;;  %v5099_v3 = vpop.f32.mrf.mxu1  ;;  %v10078_v16 = vld [vmem:[#allocation36_spill] sm:$0xff] }
 0x246   : > { %6519 = vst.msk [vmem:[%s9366_s26 + $0xb0] sm:$0xf] %vm6474_vm3, %v7256_v53  ;;  %v5861_v54 = vsel %vm5597_vm0, %v5465_v28, %v5729_v57  ;;  %vm5595_vm9 = vcmp.ge.f32.partialorder %v5463_v15, 0.0  ;;  %v5727_v27 = vmul.f32 0.2, %v5463_v15  ;;  %v7933_v26 = vpop.f32.mrf.mxu0 }
 0x247   : > { %v7259_v24 = vpack.c.bf16 %v5861_v54, %v5861_v54  ;;  %vm5600_vm10 = vcmp.ge.f32.partialorder %v5468_v58, 0.0  ;;  %v5732_v4 = vmul.f32 0.2, %v5468_v58  ;;  %v5466_v30 = vadd.f32 %v5083_v45, %v4428_v25  ;;  %v8071_v49 = vpop.f32.mrf.mxu1  ;;  %v10079_v25 = vld [vmem:[#allocation37_spill] sm:$0xff] }
 0x248   : > { %v5859_v46 = vsel %vm5595_vm9, %v5463_v15, %v5727_v27  ;;  %v4431_v11 = vadd.f32 %v7933_v26, %v10072_v7  ;;  %v4048_v12 = vpop.f32.mrf.mxu0 }
 0x249   : > { %6522 = vst.msk [vmem:[%s9366_s26 + $0xbc] sm:$0xf] %vm6474_vm3, %v7259_v24  ;;  %v7257_v63 = vpack.c.bf16 %v5859_v46, %v5859_v46  ;;  %v5864_v47 = vsel %vm5600_vm10, %v5468_v58, %v5732_v4  ;;  %vm5598_vm11 = vcmp.ge.f32.partialorder %v5466_v30, 0.0  ;;  %v5730_v33 = vmul.f32 0.2, %v5466_v30  ;;  %v5102_v17 = vpop.f32.mrf.mxu1 }
 0x24a   : > { %v7262_v40 = vpack.c.bf16 %v5864_v47, %v5864_v47  ;;  %v5469_v18 = vadd.f32 %v8067_v6, %v4431_v11  ;;  %v4429_v20 = vadd.f32 %v4048_v12, %v10073_v55  ;;  %v7936_v29 = vpop.f32.mrf.mxu0  ;;  %v10080_v11 = vld [vmem:[#allocation38_spill] sm:$0xff] }
 0x24b   : > { %6520 = vst.msk [vmem:[%s9366_s26 + $0xb4] sm:$0xf] %vm6474_vm3, %v7257_v63  ;;  %v5862_v32 = vsel %vm5598_vm11, %v5466_v30, %v5730_v33  ;;  %v4434_v35 = vadd.f32 %v7936_v29, %v10074_v61  ;;  %v8074_v21 = vpop.f32.mrf.mxu1 }
 0x24c   : > { %6525 = vst.msk [vmem:[%s9366_s26 + $0xc8] sm:$0xf] %vm6474_vm3, %v7262_v40  ;;  %v7260_v37 = vpack.c.bf16 %v5862_v32, %v5862_v32  ;;  %vm5601_vm12 = vcmp.ge.f32.partialorder %v5469_v18, 0.0  ;;  %v5733_v23 = vmul.f32 0.2, %v5469_v18  ;;  %v5467_v39 = vadd.f32 %v5086_v36, %v4429_v20  ;;  %v4061_v13 = vpop.f32.mrf.mxu0  ;;  %v10081_v20 = vld [vmem:[#allocation39_spill] sm:$0xff] }
 0x24d   : > { %v5472_v31 = vadd.f32 %v8070_v52, %v4434_v35  ;;  %v4432_v45 = vadd.f32 %v4061_v13, %v10075_v9  ;;  %v5115_v62 = vpop.f32.mrf.mxu1  ;;  %v10082_v35 = vld [vmem:[#allocation40_spill] sm:$0xff] }
 0x24e   : > { %6523 = vst.msk [vmem:[%s9366_s26 + $0xc0] sm:$0xf] %vm6474_vm3, %v7260_v37  ;;  %v5865_v59 = vsel %vm5601_vm12, %v5469_v18, %v5733_v23  ;;  %vm5599_vm13 = vcmp.ge.f32.partialorder %v5467_v39, 0.0  ;;  %v5731_v42 = vmul.f32 0.2, %v5467_v39  ;;  %v7937_v60 = vpop.f32.mrf.mxu0 }
 0x24f   : > { %v7263_v51 = vpack.c.bf16 %v5865_v59, %v5865_v59  ;;  %vm5604_vm14 = vcmp.ge.f32.partialorder %v5472_v31, 0.0  ;;  %v5736_v19 = vmul.f32 0.2, %v5472_v31  ;;  %v5470_v6 = vadd.f32 %v5099_v3, %v4432_v45  ;;  %v8075_v34 = vpop.f32.mrf.mxu1  ;;  %v10083_v45 = vld [vmem:[#allocation41_spill] sm:$0xff] }
 0x250   : > { %v5863_v43 = vsel %vm5599_vm13, %v5467_v39, %v5731_v42  ;;  %v4435_v1 = vadd.f32 %v7937_v60, %v10076_v14  ;;  %v4064_v41 = vpop.f32.mrf.mxu0 }
 0x251   : > { %6526 = vst.msk [vmem:[%s9366_s26 + $0xcc] sm:$0xf] %vm6474_vm3, %v7263_v51  ;;  %v7261_v0 = vpack.c.bf16 %v5863_v43, %v5863_v43  ;;  %v5868_v5 = vsel %vm5604_vm14, %v5472_v31, %v5736_v19  ;;  %vm5602_vm15 = vcmp.ge.f32.partialorder %v5470_v6, 0.0  ;;  %v5734_v36 = vmul.f32 0.2, %v5470_v6  ;;  %v5118_v56 = vpop.f32.mrf.mxu1 }
 0x252   : > { %v7266_v28 = vpack.c.bf16 %v5868_v5, %v5868_v5  ;;  %v5473_v10 = vadd.f32 %v8071_v49, %v4435_v1  ;;  %v4433_v38 = vadd.f32 %v4064_v41, %v10077_v8  ;;  %v7940_v22 = vpop.f32.mrf.mxu0  ;;  %v10084_v1 = vld [vmem:[#allocation42_spill] sm:$0xff] }
 0x253   : > { %6524 = vst.msk [vmem:[%s9366_s26 + $0xc4] sm:$0xf] %vm6474_vm3, %v7261_v0  ;;  %v5866_v44 = vsel %vm5602_vm15, %v5470_v6, %v5734_v36  ;;  %v4438_v52 = vadd.f32 %v7940_v22, %v10078_v16  ;;  %v8078_v53 = vpop.f32.mrf.mxu1 }
 0x254   : > { %6529 = vst.msk [vmem:[%s9366_s26 + $0xd8] sm:$0xf] %vm6474_vm3, %v7266_v28  ;;  %v7264_v57 = vpack.c.bf16 %v5866_v44, %v5866_v44  ;;  %vm5605_vm4 = vcmp.ge.f32.partialorder %v5473_v10, 0.0  ;;  %v5737_v15 = vmul.f32 0.2, %v5473_v10  ;;  %v5471_v2 = vadd.f32 %v5102_v17, %v4433_v38  ;;  %v4077_v58 = vpop.f32.mrf.mxu0  ;;  %v10085_v38 = vld [vmem:[#allocation43_spill] sm:$0xff] }
 0x255   : > { %v5476_v48 = vadd.f32 %v8074_v21, %v4438_v52  ;;  %v4436_v3 = vadd.f32 %v4077_v58, %v10079_v25  ;;  %v5131_v54 = vpop.f32.mrf.mxu1  ;;  %v10086_v52 = vld [vmem:[#allocation44_spill] sm:$0xff] }
 0x256   : > { %6527 = vst.msk [vmem:[%s9366_s26 + $0xd0] sm:$0xf] %vm6474_vm3, %v7264_v57  ;;  %v5869_v27 = vsel %vm5605_vm4, %v5473_v10, %v5737_v15  ;;  %vm5603_vm2 = vcmp.ge.f32.partialorder %v5471_v2, 0.0  ;;  %v5735_v26 = vmul.f32 0.2, %v5471_v2  ;;  %v7941_v24 = vpop.f32.mrf.mxu0 }
 0x257   : > { %v7267_v4 = vpack.c.bf16 %v5869_v27, %v5869_v27  ;;  %vm5608_vm5 = vcmp.ge.f32.partialorder %v5476_v48, 0.0  ;;  %v5740_v30 = vmul.f32 0.2, %v5476_v48  ;;  %v5474_v49 = vadd.f32 %v5115_v62, %v4436_v3  ;;  %v8079_v46 = vpop.f32.mrf.mxu1  ;;  %v10087_v3 = vld [vmem:[#allocation45_spill] sm:$0xff] }
 0x258   : > { %v5867_v7 = vsel %vm5603_vm2, %v5471_v2, %v5735_v26  ;;  %v4439_v12 = vadd.f32 %v7941_v24, %v10080_v11  ;;  %v4080_v63 = vpop.f32.mrf.mxu0 }
 0x259   : > { %6530 = vst.msk [vmem:[%s9366_s26 + $0xdc] sm:$0xf] %vm6474_vm3, %v7267_v4  ;;  %v7265_v47 = vpack.c.bf16 %v5867_v7, %v5867_v7  ;;  %v5872_v33 = vsel %vm5608_vm5, %v5476_v48, %v5740_v30  ;;  %vm5606_vm6 = vcmp.ge.f32.partialorder %v5474_v49, 0.0  ;;  %v5738_v17 = vmul.f32 0.2, %v5474_v49  ;;  %v5134_v40 = vpop.f32.mrf.mxu1 }
 0x25a   : > { %v7270_v18 = vpack.c.bf16 %v5872_v33, %v5872_v33  ;;  %v5477_v55 = vadd.f32 %v8075_v34, %v4439_v12  ;;  %v4437_v29 = vadd.f32 %v4080_v63, %v10081_v20  ;;  %v7944_v32 = vpop.f32.mrf.mxu0  ;;  %v10088_v12 = vld [vmem:[#allocation46_spill] sm:$0xff] }
 0x25b   : > { %6528 = vst.msk [vmem:[%s9366_s26 + $0xd4] sm:$0xf] %vm6474_vm3, %v7265_v47  ;;  %v5870_v61 = vsel %vm5606_vm6, %v5474_v49, %v5738_v17  ;;  %v4442_v21 = vadd.f32 %v7944_v32, %v10082_v35  ;;  %v8082_v37 = vpop.f32.mrf.mxu1 }
 0x25c   : > { %6533 = vst.msk [vmem:[%s9366_s26 + $0xe8] sm:$0xf] %vm6474_vm3, %v7270_v18  ;;  %v7268_v23 = vpack.c.bf16 %v5870_v61, %v5870_v61  ;;  %vm5609_vm7 = vcmp.ge.f32.partialorder %v5477_v55, 0.0  ;;  %v5741_v39 = vmul.f32 0.2, %v5477_v55  ;;  %v5475_v13 = vadd.f32 %v5118_v56, %v4437_v29  ;;  %v4093_v31 = vpop.f32.mrf.mxu0  ;;  %v10089_v29 = vld [vmem:[#allocation47_spill] sm:$0xff] }
 0x25d   : > { %v5480_v9 = vadd.f32 %v8078_v53, %v4442_v21  ;;  %v4440_v62 = vadd.f32 %v4093_v31, %v10083_v45  ;;  %v5147_v59 = vpop.f32.mrf.mxu1  ;;  %v10090_v21 = vld [vmem:[#allocation48_spill] sm:$0xff] }
 0x25e   : > { %6531 = vst.msk [vmem:[%s9366_s26 + $0xe0] sm:$0xf] %vm6474_vm3, %v7268_v23  ;;  %v5873_v42 = vsel %vm5609_vm7, %v5477_v55, %v5741_v39  ;;  %vm5607_vm8 = vcmp.ge.f32.partialorder %v5475_v13, 0.0  ;;  %v5739_v60 = vmul.f32 0.2, %v5475_v13  ;;  %v7945_v51 = vpop.f32.mrf.mxu0 }
 0x25f   : > { %v7271_v19 = vpack.c.bf16 %v5873_v42, %v5873_v42  ;;  %vm5612_vm1 = vcmp.ge.f32.partialorder %v5480_v9, 0.0  ;;  %v5744_v6 = vmul.f32 0.2, %v5480_v9  ;;  %v5478_v34 = vadd.f32 %v5131_v54, %v4440_v62  ;;  %v8083_v43 = vpop.f32.mrf.mxu1  ;;  %v10091_v62 = vld [vmem:[#allocation49_spill] sm:$0xff] }
 0x260   : > { %v5871_v14 = vsel %vm5607_vm8, %v5475_v13, %v5739_v60  ;;  %v4443_v41 = vadd.f32 %v7945_v51, %v10084_v1  ;;  %v4096_v0 = vpop.f32.mrf.mxu0 }
 0x261   : > { %6534 = vst.msk [vmem:[%s9366_s26 + $0xec] sm:$0xf] %vm6474_vm3, %v7271_v19  ;;  %v7269_v5 = vpack.c.bf16 %v5871_v14, %v5871_v14  ;;  %v5876_v36 = vsel %vm5612_vm1, %v5480_v9, %v5744_v6  ;;  %vm5610_vm0 = vcmp.ge.f32.partialorder %v5478_v34, 0.0  ;;  %v5742_v56 = vmul.f32 0.2, %v5478_v34  ;;  %v5150_v28 = vpop.f32.mrf.mxu1 }
 0x262   : > { %v7274_v10 = vpack.c.bf16 %v5876_v36, %v5876_v36  ;;  %v5481_v8 = vadd.f32 %v8079_v46, %v4443_v41  ;;  %v4441_v22 = vadd.f32 %v4096_v0, %v10085_v38  ;;  %v7948_v44 = vpop.f32.mrf.mxu0  ;;  %v10092_v41 = vld [vmem:[#allocation50_spill] sm:$0xff] }
 0x263   : > { %6532 = vst.msk [vmem:[%s9366_s26 + $0xe4] sm:$0xf] %vm6474_vm3, %v7269_v5  ;;  %v5874_v16 = vsel %vm5610_vm0, %v5478_v34, %v5742_v56  ;;  %v4446_v53 = vadd.f32 %v7948_v44, %v10086_v52  ;;  %v8086_v57 = vpop.f32.mrf.mxu1 }
 0x264   : > { %6537 = vst.msk [vmem:[%s9366_s26 + $0xf8] sm:$0xf] %vm6474_vm3, %v7274_v10  ;;  %v7272_v15 = vpack.c.bf16 %v5874_v16, %v5874_v16  ;;  %vm5613_vm9 = vcmp.ge.f32.partialorder %v5481_v8, 0.0  ;;  %v5745_v2 = vmul.f32 0.2, %v5481_v8  ;;  %v5479_v58 = vadd.f32 %v5134_v40, %v4441_v22  ;;  %v4109_v48 = vpop.f32.mrf.mxu0  ;;  %v10093_v22 = vld [vmem:[#allocation51_spill] sm:$0xff] }
 0x265   : > { %v5484_v25 = vadd.f32 %v8082_v37, %v4446_v53  ;;  %v4444_v54 = vadd.f32 %v4109_v48, %v10087_v3  ;;  %v5163_v27 = vpop.f32.mrf.mxu1  ;;  %v10094_v53 = vld [vmem:[#allocation52_spill] sm:$0xff] }
 0x266   : > { %6535 = vst.msk [vmem:[%s9366_s26 + $0xf0] sm:$0xf] %vm6474_vm3, %v7272_v15  ;;  %v5877_v26 = vsel %vm5613_vm9, %v5481_v8, %v5745_v2  ;;  %vm5611_vm10 = vcmp.ge.f32.partialorder %v5479_v58, 0.0  ;;  %v5743_v24 = vmul.f32 0.2, %v5479_v58  ;;  %v7949_v4 = vpop.f32.mrf.mxu0 }
 0x267   : > { %v7275_v30 = vpack.c.bf16 %v5877_v26, %v5877_v26  ;;  %vm5616_vm11 = vcmp.ge.f32.partialorder %v5484_v25, 0.0  ;;  %v5748_v49 = vmul.f32 0.2, %v5484_v25  ;;  %v5482_v46 = vadd.f32 %v5147_v59, %v4444_v54  ;;  %v8087_v7 = vpop.f32.mrf.mxu1  ;;  %v10095_v54 = vld [vmem:[#allocation53_spill] sm:$0xff] }
 0x268   : > { %v5875_v11 = vsel %vm5611_vm10, %v5479_v58, %v5743_v24  ;;  %v4447_v63 = vadd.f32 %v7949_v4, %v10088_v12  ;;  %v4112_v47 = vpop.f32.mrf.mxu0 }
 0x269   : > { %6538 = vst.msk [vmem:[%s9366_s26 + $0xfc] sm:$0xf] %vm6474_vm3, %v7275_v30  ;;  %v7273_v33 = vpack.c.bf16 %v5875_v11, %v5875_v11  ;;  %v5880_v17 = vsel %vm5616_vm11, %v5484_v25, %v5748_v49  ;;  %vm5614_vm12 = vcmp.ge.f32.partialorder %v5482_v46, 0.0  ;;  %v5746_v40 = vmul.f32 0.2, %v5482_v46  ;;  %v5166_v18 = vpop.f32.mrf.mxu1 }
 0x26a   : > { %v7278_v55 = vpack.c.bf16 %v5880_v17, %v5880_v17  ;;  %v5485_v20 = vadd.f32 %v8083_v43, %v4447_v63  ;;  %v4445_v32 = vadd.f32 %v4112_v47, %v10089_v29  ;;  %v7952_v61 = vpop.f32.mrf.mxu0  ;;  %v10096_v63 = vld [vmem:[#allocation54_spill] sm:$0xff] }
 0x26b   : > { %6536 = vst.msk [vmem:[%s9366_s26 + $0xf4] sm:$0xf] %vm6474_vm3, %v7273_v33  ;;  %v5878_v35 = vsel %vm5614_vm12, %v5482_v46, %v5746_v40  ;;  %v4450_v37 = vadd.f32 %v7952_v61, %v10090_v21  ;;  %v8090_v23 = vpop.f32.mrf.mxu1 }
 0x26c   : > { %6541 = vst.msk [vmem:[%s9366_s26 + $0x108] sm:$0xf] %vm6474_vm3, %v7278_v55  ;;  %v7276_v39 = vpack.c.bf16 %v5878_v35, %v5878_v35  ;;  %vm5617_vm13 = vcmp.ge.f32.partialorder %v5485_v20, 0.0  ;;  %v5749_v13 = vmul.f32 0.2, %v5485_v20  ;;  %v5483_v31 = vadd.f32 %v5150_v28, %v4445_v32  ;;  %v4125_v9 = vpop.f32.mrf.mxu0  ;;  %v10097_v32 = vld [vmem:[#allocation55_spill] sm:$0xff] }
 0x26d   : > { %v5488_v45 = vadd.f32 %v8086_v57, %v4450_v37  ;;  %v4448_v59 = vadd.f32 %v4125_v9, %v10091_v62  ;;  %v5179_v42 = vpop.f32.mrf.mxu1  ;;  %v10098_v37 = vld [vmem:[#allocation56_spill] sm:$0xff] }
 0x26e   : > { %6539 = vst.msk [vmem:[%s9366_s26 + $0x100] sm:$0xf] %vm6474_vm3, %v7276_v39  ;;  %v5881_v60 = vsel %vm5617_vm13, %v5485_v20, %v5749_v13  ;;  %vm5615_vm14 = vcmp.ge.f32.partialorder %v5483_v31, 0.0  ;;  %v5747_v51 = vmul.f32 0.2, %v5483_v31  ;;  %v7953_v19 = vpop.f32.mrf.mxu0 }
 0x26f   : > { %v7279_v6 = vpack.c.bf16 %v5881_v60, %v5881_v60  ;;  %vm5620_vm15 = vcmp.ge.f32.partialorder %v5488_v45, 0.0  ;;  %v5752_v34 = vmul.f32 0.2, %v5488_v45  ;;  %v5486_v43 = vadd.f32 %v5163_v27, %v4448_v59  ;;  %v8091_v14 = vpop.f32.mrf.mxu1  ;;  %v10099_v59 = vld [vmem:[#allocation57_spill] sm:$0xff] }
 0x270   : > { %v5879_v1 = vsel %vm5615_vm14, %v5483_v31, %v5747_v51  ;;  %v4451_v0 = vadd.f32 %v7953_v19, %v10092_v41  ;;  %v4128_v5 = vpop.f32.mrf.mxu0 }
 0x271   : > { %6542 = vst.msk [vmem:[%s9366_s26 + $0x10c] sm:$0xf] %vm6474_vm3, %v7279_v6  ;;  %v7277_v36 = vpack.c.bf16 %v5879_v1, %v5879_v1  ;;  %v5884_v56 = vsel %vm5620_vm15, %v5488_v45, %v5752_v34  ;;  %vm5618_vm4 = vcmp.ge.f32.partialorder %v5486_v43, 0.0  ;;  %v5750_v28 = vmul.f32 0.2, %v5486_v43  ;;  %v5182_v10 = vpop.f32.mrf.mxu1 }
 0x272   : > { %v7282_v8 = vpack.c.bf16 %v5884_v56, %v5884_v56  ;;  %v5489_v38 = vadd.f32 %v8087_v7, %v4451_v0  ;;  %v4449_v44 = vadd.f32 %v4128_v5, %v10093_v22  ;;  %v7956_v16 = vpop.f32.mrf.mxu0  ;;  %v10100_v0 = vld [vmem:[#allocation58_spill] sm:$0xff] }
 0x273   : > { %6540 = vst.msk [vmem:[%s9366_s26 + $0x104] sm:$0xf] %vm6474_vm3, %v7277_v36  ;;  %v5882_v52 = vsel %vm5618_vm4, %v5486_v43, %v5750_v28  ;;  %v4454_v57 = vadd.f32 %v7956_v16, %v10094_v53  ;;  %v8094_v15 = vpop.f32.mrf.mxu1 }
 0x274   : > { %6545 = vst.msk [vmem:[%s9366_s26 + $0x118] sm:$0xf] %vm6474_vm3, %v7282_v8  ;;  %v7280_v2 = vpack.c.bf16 %v5882_v52, %v5882_v52  ;;  %vm5621_vm2 = vcmp.ge.f32.partialorder %v5489_v38, 0.0  ;;  %v5753_v58 = vmul.f32 0.2, %v5489_v38  ;;  %v5487_v48 = vadd.f32 %v5166_v18, %v4449_v44  ;;  %v4141_v25 = vpop.f32.mrf.mxu0  ;;  %v10101_v44 = vld [vmem:[#allocation59_spill] sm:$0xff] }
 0x275   : > { %v5492_v3 = vadd.f32 %v8090_v23, %v4454_v57  ;;  %v4452_v27 = vadd.f32 %v4141_v25, %v10095_v54  ;;  %v5195_v26 = vpop.f32.mrf.mxu1  ;;  %v10102_v57 = vld [vmem:[#allocation60_spill] sm:$0xff] }
 0x276   : > { %6543 = vst.msk [vmem:[%s9366_s26 + $0x110] sm:$0xf] %vm6474_vm3, %v7280_v2  ;;  %v5885_v24 = vsel %vm5621_vm2, %v5489_v38, %v5753_v58  ;;  %vm5619_vm5 = vcmp.ge.f32.partialorder %v5487_v48, 0.0  ;;  %v5751_v4 = vmul.f32 0.2, %v5487_v48  ;;  %v7957_v30 = vpop.f32.mrf.mxu0 }
 0x277   : > { %v7283_v49 = vpack.c.bf16 %v5885_v24, %v5885_v24  ;;  %vm5624_vm6 = vcmp.ge.f32.partialorder %v5492_v3, 0.0  ;;  %v5756_v46 = vmul.f32 0.2, %v5492_v3  ;;  %v5490_v7 = vadd.f32 %v5179_v42, %v4452_v27  ;;  %v8095_v11 = vpop.f32.mrf.mxu1  ;;  %v10103_v27 = vld [vmem:[#allocation61_spill] sm:$0xff] }
 0x278   : > { %v5883_v12 = vsel %vm5619_vm5, %v5487_v48, %v5751_v4  ;;  %v4455_v47 = vadd.f32 %v7957_v30, %v10096_v63  ;;  %v4144_v33 = vpop.f32.mrf.mxu0 }
 0x279   : > { %6546 = vst.msk [vmem:[%s9366_s26 + $0x11c] sm:$0xf] %vm6474_vm3, %v7283_v49  ;;  %v7281_v17 = vpack.c.bf16 %v5883_v12, %v5883_v12  ;;  %v5888_v40 = vsel %vm5624_vm6, %v5492_v3, %v5756_v46  ;;  %vm5622_vm7 = vcmp.ge.f32.partialorder %v5490_v7, 0.0  ;;  %v5754_v18 = vmul.f32 0.2, %v5490_v7  ;;  %v5198_v55 = vpop.f32.mrf.mxu1 }
 0x27a   : > { %v7286_v20 = vpack.c.bf16 %v5888_v40, %v5888_v40  ;;  %v5493_v29 = vadd.f32 %v8091_v14, %v4455_v47  ;;  %v4453_v61 = vadd.f32 %v4144_v33, %v10097_v32  ;;  %v7960_v35 = vpop.f32.mrf.mxu0  ;;  %v10104_v47 = vld [vmem:[#allocation62_spill] sm:$0xff] }
 0x27b   : > { %6544 = vst.msk [vmem:[%s9366_s26 + $0x114] sm:$0xf] %vm6474_vm3, %v7281_v17  ;;  %v5886_v21 = vsel %vm5622_vm7, %v5490_v7, %v5754_v18  ;;  %v4458_v23 = vadd.f32 %v7960_v35, %v10098_v37  ;;  %v8098_v39 = vpop.f32.mrf.mxu1 }
 0x27c   : > { %6549 = vst.msk [vmem:[%s9366_s26 + $0x128] sm:$0xf] %vm6474_vm3, %v7286_v20  ;;  %v7284_v13 = vpack.c.bf16 %v5886_v21, %v5886_v21  ;;  %vm5625_vm8 = vcmp.ge.f32.partialorder %v5493_v29, 0.0  ;;  %v5757_v31 = vmul.f32 0.2, %v5493_v29  ;;  %v5491_v9 = vadd.f32 %v5182_v10, %v4453_v61  ;;  %v4157_v45 = vpop.f32.mrf.mxu0  ;;  %v10105_v61 = vld [vmem:[#allocation63_spill] sm:$0xff] }
 0x27d   : > { %v5496_v62 = vadd.f32 %v8094_v15, %v4458_v23  ;;  %v4456_v42 = vadd.f32 %v4157_v45, %v10099_v59  ;;  %v5211_v60 = vpop.f32.mrf.mxu1  ;;  %v10106_v23 = vld [vmem:[#allocation64_spill] sm:$0xff] }
 0x27e   : > { %6547 = vst.msk [vmem:[%s9366_s26 + $0x120] sm:$0xf] %vm6474_vm3, %v7284_v13  ;;  %v5889_v51 = vsel %vm5625_vm8, %v5493_v29, %v5757_v31  ;;  %vm5623_vm1 = vcmp.ge.f32.partialorder %v5491_v9, 0.0  ;;  %v5755_v19 = vmul.f32 0.2, %v5491_v9  ;;  %v7961_v6 = vpop.f32.mrf.mxu0 }
 0x27f   : > { %v7287_v34 = vpack.c.bf16 %v5889_v51, %v5889_v51  ;;  %vm5628_vm0 = vcmp.ge.f32.partialorder %v5496_v62, 0.0  ;;  %v5760_v43 = vmul.f32 0.2, %v5496_v62  ;;  %v5494_v14 = vadd.f32 %v5195_v26, %v4456_v42  ;;  %v8099_v1 = vpop.f32.mrf.mxu1  ;;  %v10107_v42 = vld [vmem:[#allocation65_spill] sm:$0xff] }
 0x280   : > { %v5887_v41 = vsel %vm5623_vm1, %v5491_v9, %v5755_v19  ;;  %v4459_v5 = vadd.f32 %v7961_v6, %v10100_v0  ;;  %v4160_v36 = vpop.f32.mrf.mxu0 }
 0x281   : > { %6550 = vst.msk [vmem:[%s9366_s26 + $0x12c] sm:$0xf] %vm6474_vm3, %v7287_v34  ;;  %v7285_v56 = vpack.c.bf16 %v5887_v41, %v5887_v41  ;;  %v5892_v28 = vsel %vm5628_vm0, %v5496_v62, %v5760_v43  ;;  %vm5626_vm9 = vcmp.ge.f32.partialorder %v5494_v14, 0.0  ;;  %v5758_v10 = vmul.f32 0.2, %v5494_v14  ;;  %v5214_v8 = vpop.f32.mrf.mxu1 }
 0x282   : > { %v7290_v38 = vpack.c.bf16 %v5892_v28, %v5892_v28  ;;  %v5497_v22 = vadd.f32 %v8095_v11, %v4459_v5  ;;  %v4457_v16 = vadd.f32 %v4160_v36, %v10101_v44  ;;  %v7964_v52 = vpop.f32.mrf.mxu0  ;;  %v10108_v5 = vld [vmem:[#allocation66_spill] sm:$0xff] }
 0x283   : > { %6548 = vst.msk [vmem:[%s9366_s26 + $0x124] sm:$0xf] %vm6474_vm3, %v7285_v56  ;;  %v5890_v53 = vsel %vm5626_vm9, %v5494_v14, %v5758_v10  ;;  %v4462_v15 = vadd.f32 %v7964_v52, %v10102_v57  ;;  %v8102_v2 = vpop.f32.mrf.mxu1 }
 0x284   : > { %6553 = vst.msk [vmem:[%s9366_s26 + $0x138] sm:$0xf] %vm6474_vm3, %v7290_v38  ;;  %v7288_v58 = vpack.c.bf16 %v5890_v53, %v5890_v53  ;;  %vm5629_vm10 = vcmp.ge.f32.partialorder %v5497_v22, 0.0  ;;  %v5761_v48 = vmul.f32 0.2, %v5497_v22  ;;  %v5495_v25 = vadd.f32 %v5198_v55, %v4457_v16  ;;  %v4173_v3 = vpop.f32.mrf.mxu0  ;;  %v10109_v16 = vld [vmem:[#allocation67_spill] sm:$0xff] }
 0x285   : > { %v5500_v54 = vadd.f32 %v8098_v39, %v4462_v15  ;;  %v4460_v26 = vadd.f32 %v4173_v3, %v10103_v27  ;;  %v5227_v24 = vpop.f32.mrf.mxu1  ;;  %v10110_v15 = vld [vmem:[#allocation68_spill] sm:$0xff] }
 0x286   : > { %6551 = vst.msk [vmem:[%s9366_s26 + $0x130] sm:$0xf] %vm6474_vm3, %v7288_v58  ;;  %v5893_v4 = vsel %vm5629_vm10, %v5497_v22, %v5761_v48  ;;  %vm5627_vm11 = vcmp.ge.f32.partialorder %v5495_v25, 0.0  ;;  %v5759_v30 = vmul.f32 0.2, %v5495_v25  ;;  %v7965_v49 = vpop.f32.mrf.mxu0 }
 0x287   : > { %v7291_v46 = vpack.c.bf16 %v5893_v4, %v5893_v4  ;;  %vm5632_vm12 = vcmp.ge.f32.partialorder %v5500_v54, 0.0  ;;  %v5764_v7 = vmul.f32 0.2, %v5500_v54  ;;  %v5498_v11 = vadd.f32 %v5211_v60, %v4460_v26  ;;  %v8103_v12 = vpop.f32.mrf.mxu1  ;;  %v10111_v26 = vld [vmem:[#allocation69_spill] sm:$0xff] }
 0x288   : > { %v5891_v63 = vsel %vm5627_vm11, %v5495_v25, %v5759_v30  ;;  %v4463_v33 = vadd.f32 %v7965_v49, %v10104_v47  ;;  %v4176_v17 = vpop.f32.mrf.mxu0 }
 0x289   : > { %6554 = vst.msk [vmem:[%s9366_s26 + $0x13c] sm:$0xf] %vm6474_vm3, %v7291_v46  ;;  %v7289_v40 = vpack.c.bf16 %v5891_v63, %v5891_v63  ;;  %v5896_v18 = vsel %vm5632_vm12, %v5500_v54, %v5764_v7  ;;  %vm5630_vm13 = vcmp.ge.f32.partialorder %v5498_v11, 0.0  ;;  %v5762_v55 = vmul.f32 0.2, %v5498_v11  ;;  %v5230_v20 = vpop.f32.mrf.mxu1 }
 0x28a   : > { %v7294_v29 = vpack.c.bf16 %v5896_v18, %v5896_v18  ;;  %v5501_v32 = vadd.f32 %v8099_v1, %v4463_v33  ;;  %v4461_v35 = vadd.f32 %v4176_v17, %v10105_v61  ;;  %v7968_v21 = vpop.f32.mrf.mxu0  ;;  %v10112_v33 = vld [vmem:[#allocation70_spill] sm:$0xff] }
 0x28b   : > { %6552 = vst.msk [vmem:[%s9366_s26 + $0x134] sm:$0xf] %vm6474_vm3, %v7289_v40  ;;  %v5894_v37 = vsel %vm5630_vm13, %v5498_v11, %v5762_v55  ;;  %v4466_v39 = vadd.f32 %v7968_v21, %v10106_v23  ;;  %v8106_v13 = vpop.f32.mrf.mxu1 }
 0x28c   : > { %6557 = vst.msk [vmem:[%s9366_s26 + $0x148] sm:$0xf] %vm6474_vm3, %v7294_v29  ;;  %v7292_v31 = vpack.c.bf16 %v5894_v37, %v5894_v37  ;;  %vm5633_vm14 = vcmp.ge.f32.partialorder %v5501_v32, 0.0  ;;  %v5765_v9 = vmul.f32 0.2, %v5501_v32  ;;  %v5499_v45 = vadd.f32 %v5214_v8, %v4461_v35  ;;  %v4189_v62 = vpop.f32.mrf.mxu0  ;;  %v10113_v35 = vld [vmem:[#allocation71_spill] sm:$0xff] }
 0x28d   : > { %v5504_v59 = vadd.f32 %v8102_v2, %v4466_v39  ;;  %v4464_v60 = vadd.f32 %v4189_v62, %v10107_v42  ;;  %v5243_v51 = vpop.f32.mrf.mxu1  ;;  %v10114_v39 = vld [vmem:[#allocation72_spill] sm:$0xff] }
 0x28e   : > { %6555 = vst.msk [vmem:[%s9366_s26 + $0x140] sm:$0xf] %vm6474_vm3, %v7292_v31  ;;  %v5897_v19 = vsel %vm5633_vm14, %v5501_v32, %v5765_v9  ;;  %vm5631_vm15 = vcmp.ge.f32.partialorder %v5499_v45, 0.0  ;;  %v5763_v6 = vmul.f32 0.2, %v5499_v45  ;;  %v7969_v34 = vpop.f32.mrf.mxu0 }
 0x28f   : > { %v7295_v43 = vpack.c.bf16 %v5897_v19, %v5897_v19  ;;  %vm5636_vm4 = vcmp.ge.f32.partialorder %v5504_v59, 0.0  ;;  %v5768_v14 = vmul.f32 0.2, %v5504_v59  ;;  %v5502_v1 = vadd.f32 %v5227_v24, %v4464_v60  ;;  %v8107_v41 = vpop.f32.mrf.mxu1  ;;  %v10115_v60 = vld [vmem:[#allocation73_spill] sm:$0xff] }
 0x290   : > { %v5895_v0 = vsel %vm5631_vm15, %v5499_v45, %v5763_v6  ;;  %v4467_v36 = vadd.f32 %v7969_v34, %v10108_v5  ;;  %v4192_v56 = vpop.f32.mrf.mxu0 }
 0x291   : > { %6558 = vst.msk [vmem:[%s9366_s26 + $0x14c] sm:$0xf] %vm6474_vm3, %v7295_v43  ;;  %v7293_v28 = vpack.c.bf16 %v5895_v0, %v5895_v0  ;;  %v5900_v10 = vsel %vm5636_vm4, %v5504_v59, %v5768_v14  ;;  %vm5634_vm2 = vcmp.ge.f32.partialorder %v5502_v1, 0.0  ;;  %v5766_v8 = vmul.f32 0.2, %v5502_v1  ;;  %v5246_v38 = vpop.f32.mrf.mxu1 }
 0x292   : > { %v7298_v22 = vpack.c.bf16 %v5900_v10, %v5900_v10  ;;  %v5505_v44 = vadd.f32 %v8103_v12, %v4467_v36  ;;  %v4465_v52 = vadd.f32 %v4192_v56, %v10109_v16  ;;  %v7972_v53 = vpop.f32.mrf.mxu0  ;;  %v10116_v36 = vld [vmem:[#allocation74_spill] sm:$0xff] }
 0x293   : > { %6556 = vst.msk [vmem:[%s9366_s26 + $0x144] sm:$0xf] %vm6474_vm3, %v7293_v28  ;;  %v5898_v57 = vsel %vm5634_vm2, %v5502_v1, %v5766_v8  ;;  %v4470_v2 = vadd.f32 %v7972_v53, %v10110_v15  ;;  %v8110_v58 = vpop.f32.mrf.mxu1 }
 0x294   : > { %6561 = vst.msk [vmem:[%s9366_s26 + $0x158] sm:$0xf] %vm6474_vm3, %v7298_v22  ;;  %v7296_v48 = vpack.c.bf16 %v5898_v57, %v5898_v57  ;;  %vm5637_vm5 = vcmp.ge.f32.partialorder %v5505_v44, 0.0  ;;  %v5769_v25 = vmul.f32 0.2, %v5505_v44  ;;  %v5503_v3 = vadd.f32 %v5230_v20, %v4465_v52  ;;  %v4205_v54 = vpop.f32.mrf.mxu0  ;;  %v10117_v52 = vld [vmem:[#allocation75_spill] sm:$0xff] }
 0x295   : > { %v5508_v27 = vadd.f32 %v8106_v13, %v4470_v2  ;;  %v4468_v24 = vadd.f32 %v4205_v54, %v10111_v26  ;;  %v5259_v4 = vpop.f32.mrf.mxu1  ;;  %v10118_v2 = vld [vmem:[#allocation76_spill] sm:$0xff] }
 0x296   : > { %6559 = vst.msk [vmem:[%s9366_s26 + $0x150] sm:$0xf] %vm6474_vm3, %v7296_v48  ;;  %v5901_v30 = vsel %vm5637_vm5, %v5505_v44, %v5769_v25  ;;  %vm5635_vm6 = vcmp.ge.f32.partialorder %v5503_v3, 0.0  ;;  %v5767_v49 = vmul.f32 0.2, %v5503_v3  ;;  %v7973_v46 = vpop.f32.mrf.mxu0 }
 0x297   : > { %v7299_v7 = vpack.c.bf16 %v5901_v30, %v5901_v30  ;;  %vm5640_vm7 = vcmp.ge.f32.partialorder %v5508_v27, 0.0  ;;  %v5772_v11 = vmul.f32 0.2, %v5508_v27  ;;  %v5506_v12 = vadd.f32 %v5243_v51, %v4468_v24  ;;  %v8111_v63 = vpop.f32.mrf.mxu1  ;;  %v10119_v24 = vld [vmem:[#allocation77_spill] sm:$0xff] }
 0x298   : > { %v5899_v47 = vsel %vm5635_vm6, %v5503_v3, %v5767_v49  ;;  %v4471_v17 = vadd.f32 %v7973_v46, %v10112_v33  ;;  %v4208_v40 = vpop.f32.mrf.mxu0 }
 0x299   : > { %6562 = vst.msk [vmem:[%s9366_s26 + $0x15c] sm:$0xf] %vm6474_vm3, %v7299_v7  ;;  %v7297_v18 = vpack.c.bf16 %v5899_v47, %v5899_v47  ;;  %v5904_v55 = vsel %vm5640_vm7, %v5508_v27, %v5772_v11  ;;  %vm5638_vm8 = vcmp.ge.f32.partialorder %v5506_v12, 0.0  ;;  %v5770_v20 = vmul.f32 0.2, %v5506_v12  ;;  %v5262_v29 = vpop.f32.mrf.mxu1 }
 0x29a   : > { %v7302_v32 = vpack.c.bf16 %v5904_v55, %v5904_v55  ;;  %v5509_v61 = vadd.f32 %v8107_v41, %v4471_v17  ;;  %v4469_v21 = vadd.f32 %v4208_v40, %v10113_v35  ;;  %v7976_v37 = vpop.f32.mrf.mxu0  ;;  %v10120_v17 = vld [vmem:[#allocation78_spill] sm:$0xff] }
 0x29b   : > { %6560 = vst.msk [vmem:[%s9366_s26 + $0x154] sm:$0xf] %vm6474_vm3, %v7297_v18  ;;  %v5902_v23 = vsel %vm5638_vm8, %v5506_v12, %v5770_v20  ;;  %v4474_v13 = vadd.f32 %v7976_v37, %v10114_v39  ;;  %v8114_v31 = vpop.f32.mrf.mxu1 }
 0x29c   : > { %6565 = vst.msk [vmem:[%s9366_s26 + $0x168] sm:$0xf] %vm6474_vm3, %v7302_v32  ;;  %v7300_v9 = vpack.c.bf16 %v5902_v23, %v5902_v23  ;;  %vm5641_vm1 = vcmp.ge.f32.partialorder %v5509_v61, 0.0  ;;  %v5773_v45 = vmul.f32 0.2, %v5509_v61  ;;  %v5507_v62 = vadd.f32 %v5246_v38, %v4469_v21  ;;  %v4221_v59 = vpop.f32.mrf.mxu0  ;;  %v10121_v21 = vld [vmem:[#allocation79_spill] sm:$0xff] }
 0x29d   : > { %v5512_v42 = vadd.f32 %v8110_v58, %v4474_v13  ;;  %v4472_v51 = vadd.f32 %v4221_v59, %v10115_v60  ;;  %v5275_v19 = vpop.f32.mrf.mxu1  ;;  %v10122_v13 = vld [vmem:[#allocation80_spill] sm:$0xff] }
 0x29e   : > { %6563 = vst.msk [vmem:[%s9366_s26 + $0x160] sm:$0xf] %vm6474_vm3, %v7300_v9  ;;  %v5905_v6 = vsel %vm5641_vm1, %v5509_v61, %v5773_v45  ;;  %vm5639_vm0 = vcmp.ge.f32.partialorder %v5507_v62, 0.0  ;;  %v5771_v34 = vmul.f32 0.2, %v5507_v62  ;;  %v7977_v43 = vpop.f32.mrf.mxu0 }
 0x29f   : > { %v7303_v14 = vpack.c.bf16 %v5905_v6, %v5905_v6  ;;  %vm5644_vm9 = vcmp.ge.f32.partialorder %v5512_v42, 0.0  ;;  %v5776_v1 = vmul.f32 0.2, %v5512_v42  ;;  %v5510_v41 = vadd.f32 %v5259_v4, %v4472_v51  ;;  %v8115_v0 = vpop.f32.mrf.mxu1  ;;  %v10123_v51 = vld [vmem:[#allocation81_spill] sm:$0xff] }
 0x2a0   : > { %v5903_v5 = vsel %vm5639_vm0, %v5507_v62, %v5771_v34  ;;  %v4475_v56 = vadd.f32 %v7977_v43, %v10116_v36  ;;  %v4224_v28 = vpop.f32.mrf.mxu0 }
 0x2a1   : > { %6566 = vst.msk [vmem:[%s9366_s26 + $0x16c] sm:$0xf] %vm6474_vm3, %v7303_v14  ;;  %v7301_v10 = vpack.c.bf16 %v5903_v5, %v5903_v5  ;;  %v5908_v8 = vsel %vm5644_vm9, %v5512_v42, %v5776_v1  ;;  %vm5642_vm10 = vcmp.ge.f32.partialorder %v5510_v41, 0.0  ;;  %v5774_v38 = vmul.f32 0.2, %v5510_v41  ;;  %v5278_v22 = vpop.f32.mrf.mxu1 }
 0x2a2   : > { %v7306_v44 = vpack.c.bf16 %v5908_v8, %v5908_v8  ;;  %v5513_v16 = vadd.f32 %v8111_v63, %v4475_v56  ;;  %v4473_v53 = vadd.f32 %v4224_v28, %v10117_v52  ;;  %v7980_v57 = vpop.f32.mrf.mxu0  ;;  %v10124_v56 = vld [vmem:[#allocation82_spill] sm:$0xff] }
 0x2a3   : > { %6564 = vst.msk [vmem:[%s9366_s26 + $0x164] sm:$0xf] %vm6474_vm3, %v7301_v10  ;;  %v5906_v15 = vsel %vm5642_vm10, %v5510_v41, %v5774_v38  ;;  %v4478_v58 = vadd.f32 %v7980_v57, %v10118_v2  ;;  %v8118_v48 = vpop.f32.mrf.mxu1 }
 0x2a4   : > { %6569 = vst.msk [vmem:[%s9366_s26 + $0x178] sm:$0xf] %vm6474_vm3, %v7306_v44  ;;  %v7304_v25 = vpack.c.bf16 %v5906_v15, %v5906_v15  ;;  %vm5645_vm11 = vcmp.ge.f32.partialorder %v5513_v16, 0.0  ;;  %v5777_v3 = vmul.f32 0.2, %v5513_v16  ;;  %v5511_v54 = vadd.f32 %v5262_v29, %v4473_v53  ;;  %v4237_v27 = vpop.f32.mrf.mxu0  ;;  %v10125_v53 = vld [vmem:[#allocation83_spill] sm:$0xff] }
 0x2a5   : > { %v5516_v26 = vadd.f32 %v8114_v31, %v4478_v58  ;;  %v4476_v4 = vadd.f32 %v4237_v27, %v10119_v24  ;;  %v5291_v30 = vpop.f32.mrf.mxu1  ;;  %v10126_v58 = vld [vmem:[#allocation84_spill] sm:$0xff] }
 0x2a6   : > { %6567 = vst.msk [vmem:[%s9366_s26 + $0x170] sm:$0xf] %vm6474_vm3, %v7304_v25  ;;  %v5909_v49 = vsel %vm5645_vm11, %v5513_v16, %v5777_v3  ;;  %vm5643_vm12 = vcmp.ge.f32.partialorder %v5511_v54, 0.0  ;;  %v5775_v46 = vmul.f32 0.2, %v5511_v54  ;;  %v7981_v7 = vpop.f32.mrf.mxu0 }
 0x2a7   : > { %v7307_v11 = vpack.c.bf16 %v5909_v49, %v5909_v49  ;;  %vm5648_vm13 = vcmp.ge.f32.partialorder %v5516_v26, 0.0  ;;  %v5780_v12 = vmul.f32 0.2, %v5516_v26  ;;  %v5514_v63 = vadd.f32 %v5275_v19, %v4476_v4  ;;  %v8119_v47 = vpop.f32.mrf.mxu1  ;;  %v10127_v4 = vld [vmem:[#allocation85_spill] sm:$0xff] }
 0x2a8   : > { %v5907_v33 = vsel %vm5643_vm12, %v5511_v54, %v5775_v46  ;;  %v4479_v40 = vadd.f32 %v7981_v7, %v10120_v17  ;;  %v4240_v18 = vpop.f32.mrf.mxu0 }
 0x2a9   : > { %6570 = vst.msk [vmem:[%s9366_s26 + $0x17c] sm:$0xf] %vm6474_vm3, %v7307_v11  ;;  %v7305_v55 = vpack.c.bf16 %v5907_v33, %v5907_v33  ;;  %v5912_v20 = vsel %vm5648_vm13, %v5516_v26, %v5780_v12  ;;  %vm5646_vm14 = vcmp.ge.f32.partialorder %v5514_v63, 0.0  ;;  %v5778_v29 = vmul.f32 0.2, %v5514_v63  ;;  %v5294_v32 = vpop.f32.mrf.mxu1 }
 0x2aa   : > { %v7310_v61 = vpack.c.bf16 %v5912_v20, %v5912_v20  ;;  %v5517_v35 = vadd.f32 %v8115_v0, %v4479_v40  ;;  %v4477_v37 = vadd.f32 %v4240_v18, %v10121_v21  ;;  %v7984_v23 = vpop.f32.mrf.mxu0  ;;  %v10128_v40 = vld [vmem:[#allocation86_spill] sm:$0xff] }
 0x2ab   : > { %6568 = vst.msk [vmem:[%s9366_s26 + $0x174] sm:$0xf] %vm6474_vm3, %v7305_v55  ;;  %v5910_v39 = vsel %vm5646_vm14, %v5514_v63, %v5778_v29  ;;  %v4482_v31 = vadd.f32 %v7984_v23, %v10122_v13  ;;  %v8122_v9 = vpop.f32.mrf.mxu1 }
 0x2ac   : > { %6573 = vst.msk [vmem:[%s9366_s26 + $0x188] sm:$0xf] %vm6474_vm3, %v7310_v61  ;;  %v7308_v45 = vpack.c.bf16 %v5910_v39, %v5910_v39  ;;  %vm5649_vm15 = vcmp.ge.f32.partialorder %v5517_v35, 0.0  ;;  %v5781_v62 = vmul.f32 0.2, %v5517_v35  ;;  %v5515_v59 = vadd.f32 %v5278_v22, %v4477_v37  ;;  %v4253_v42 = vpop.f32.mrf.mxu0  ;;  %v10129_v37 = vld [vmem:[#allocation87_spill] sm:$0xff] }
 0x2ad   : > { %v5520_v60 = vadd.f32 %v8118_v48, %v4482_v31  ;;  %v4480_v19 = vadd.f32 %v4253_v42, %v10123_v51  ;;  %v5307_v6 = vpop.f32.mrf.mxu1  ;;  %v10130_v31 = vld [vmem:[#allocation88_spill] sm:$0xff] }
 0x2ae   : > { %6571 = vst.msk [vmem:[%s9366_s26 + $0x180] sm:$0xf] %vm6474_vm3, %v7308_v45  ;;  %v5913_v34 = vsel %vm5649_vm15, %v5517_v35, %v5781_v62  ;;  %vm5647_vm4 = vcmp.ge.f32.partialorder %v5515_v59, 0.0  ;;  %v5779_v43 = vmul.f32 0.2, %v5515_v59  ;;  %v7985_v14 = vpop.f32.mrf.mxu0 }
 0x2af   : > { %v7311_v1 = vpack.c.bf16 %v5913_v34, %v5913_v34  ;;  %vm5652_vm2 = vcmp.ge.f32.partialorder %v5520_v60, 0.0  ;;  %v5784_v41 = vmul.f32 0.2, %v5520_v60  ;;  %v5518_v0 = vadd.f32 %v5291_v30, %v4480_v19  ;;  %v8123_v5 = vpop.f32.mrf.mxu1  ;;  %v10131_v19 = vld [vmem:[#allocation89_spill] sm:$0xff] }
 0x2b0   : > { %v5911_v36 = vsel %vm5647_vm4, %v5515_v59, %v5779_v43  ;;  %v4483_v28 = vadd.f32 %v7985_v14, %v10124_v56  ;;  %v4256_v10 = vpop.f32.mrf.mxu0 }
 0x2b1   : > { %6574 = vst.msk [vmem:[%s9366_s26 + $0x18c] sm:$0xf] %vm6474_vm3, %v7311_v1  ;;  %v7309_v8 = vpack.c.bf16 %v5911_v36, %v5911_v36  ;;  %v5916_v38 = vsel %vm5652_vm2, %v5520_v60, %v5784_v41  ;;  %vm5650_vm5 = vcmp.ge.f32.partialorder %v5518_v0, 0.0  ;;  %v5782_v22 = vmul.f32 0.2, %v5518_v0  ;;  %v5310_v44 = vpop.f32.mrf.mxu1 }
 0x2b2   : > { %v7314_v16 = vpack.c.bf16 %v5916_v38, %v5916_v38  ;;  %v5521_v52 = vadd.f32 %v8119_v47, %v4483_v28  ;;  %v4481_v57 = vadd.f32 %v4256_v10, %v10125_v53  ;;  %v7988_v15 = vpop.f32.mrf.mxu0  ;;  %v10132_v28 = vld [vmem:[#allocation90_spill] sm:$0xff] }
 0x2b3   : > { %6572 = vst.msk [vmem:[%s9366_s26 + $0x184] sm:$0xf] %vm6474_vm3, %v7309_v8  ;;  %v5914_v2 = vsel %vm5650_vm5, %v5518_v0, %v5782_v22  ;;  %v4486_v48 = vadd.f32 %v7988_v15, %v10126_v58  ;;  %v8126_v25 = vpop.f32.mrf.mxu1 }
 0x2b4   : > { %6577 = vst.msk [vmem:[%s9366_s26 + $0x198] sm:$0xf] %vm6474_vm3, %v7314_v16  ;;  %v7312_v3 = vpack.c.bf16 %v5914_v2, %v5914_v2  ;;  %vm5653_vm6 = vcmp.ge.f32.partialorder %v5521_v52, 0.0  ;;  %v5785_v54 = vmul.f32 0.2, %v5521_v52  ;;  %v5519_v27 = vadd.f32 %v5294_v32, %v4481_v57  ;;  %v4269_v26 = vpop.f32.mrf.mxu0  ;;  %v10133_v57 = vld [vmem:[#allocation91_spill] sm:$0xff] }
 0x2b5   : > { %v5524_v24 = vadd.f32 %v8122_v9, %v4486_v48  ;;  %v4484_v30 = vadd.f32 %v4269_v26, %v10127_v4  ;;  %v5323_v49 = vpop.f32.mrf.mxu1  ;;  %v10134_v48 = vld [vmem:[#allocation92_spill] sm:$0xff] }
 0x2b6   : > { %6575 = vst.msk [vmem:[%s9366_s26 + $0x190] sm:$0xf] %vm6474_vm3, %v7312_v3  ;;  %v5917_v46 = vsel %vm5653_vm6, %v5521_v52, %v5785_v54  ;;  %vm5651_vm7 = vcmp.ge.f32.partialorder %v5519_v27, 0.0  ;;  %v5783_v7 = vmul.f32 0.2, %v5519_v27  ;;  %v7989_v11 = vpop.f32.mrf.mxu0 }
 0x2b7   : > { %v7315_v12 = vpack.c.bf16 %v5917_v46, %v5917_v46  ;;  %vm5656_vm8 = vcmp.ge.f32.partialorder %v5524_v24, 0.0  ;;  %v5788_v63 = vmul.f32 0.2, %v5524_v24  ;;  %v5522_v47 = vadd.f32 %v5307_v6, %v4484_v30  ;;  %v8127_v33 = vpop.f32.mrf.mxu1  ;;  %v10135_v30 = vld [vmem:[#allocation93_spill] sm:$0xff] }
 0x2b8   : > { %v5915_v17 = vsel %vm5651_vm7, %v5519_v27, %v5783_v7  ;;  %v4487_v18 = vadd.f32 %v7989_v11, %v10128_v40  ;;  %v4272_v55 = vpop.f32.mrf.mxu0 }
 0x2b9   : > { %6578 = vst.msk [vmem:[%s9366_s26 + $0x19c] sm:$0xf] %vm6474_vm3, %v7315_v12  ;;  %v7313_v20 = vpack.c.bf16 %v5915_v17, %v5915_v17  ;;  %v5920_v29 = vsel %vm5656_vm8, %v5524_v24, %v5788_v63  ;;  %vm5654_vm1 = vcmp.ge.f32.partialorder %v5522_v47, 0.0  ;;  %v5786_v32 = vmul.f32 0.2, %v5522_v47  ;;  %v5326_v61 = vpop.f32.mrf.mxu1 }
 0x2ba   : > { %v7318_v35 = vpack.c.bf16 %v5920_v29, %v5920_v29  ;;  %v5525_v21 = vadd.f32 %v8123_v5, %v4487_v18  ;;  %v4485_v23 = vadd.f32 %v4272_v55, %v10129_v37  ;;  %v7992_v39 = vpop.f32.mrf.mxu0  ;;  %v10136_v18 = vld [vmem:[#allocation94_spill] sm:$0xff] }
 0x2bb   : > { %6576 = vst.msk [vmem:[%s9366_s26 + $0x194] sm:$0xf] %vm6474_vm3, %v7313_v20  ;;  %v5918_v13 = vsel %vm5654_vm1, %v5522_v47, %v5786_v32  ;;  %v4490_v9 = vadd.f32 %v7992_v39, %v10130_v31  ;;  %v8130_v45 = vpop.f32.mrf.mxu1 }
 0x2bc   : > { %6581 = vst.msk [vmem:[%s9366_s26 + $0x1a8] sm:$0xf] %vm6474_vm3, %v7318_v35  ;;  %v7316_v62 = vpack.c.bf16 %v5918_v13, %v5918_v13  ;;  %vm5657_vm0 = vcmp.ge.f32.partialorder %v5525_v21, 0.0  ;;  %v5789_v59 = vmul.f32 0.2, %v5525_v21  ;;  %v5523_v42 = vadd.f32 %v5310_v44, %v4485_v23  ;;  %v4285_v60 = vpop.f32.mrf.mxu0  ;;  %v10137_v23 = vld [vmem:[#allocation95_spill] sm:$0xff] }
 0x2bd   : > { %v5528_v51 = vadd.f32 %v8126_v25, %v4490_v9  ;;  %v4488_v6 = vadd.f32 %v4285_v60, %v10131_v19  ;;  %v5339_v34 = vpop.f32.mrf.mxu1  ;;  %v10138_v9 = vld [vmem:[#allocation96_spill] sm:$0xff] }
 0x2be   : > { %6579 = vst.msk [vmem:[%s9366_s26 + $0x1a0] sm:$0xf] %vm6474_vm3, %v7316_v62  ;;  %v5921_v43 = vsel %vm5657_vm0, %v5525_v21, %v5789_v59  ;;  %vm5655_vm9 = vcmp.ge.f32.partialorder %v5523_v42, 0.0  ;;  %v5787_v14 = vmul.f32 0.2, %v5523_v42  ;;  %v7993_v1 = vpop.f32.mrf.mxu0 }
 0x2bf   : > { %v7319_v41 = vpack.c.bf16 %v5921_v43, %v5921_v43  ;;  %vm5660_vm10 = vcmp.ge.f32.partialorder %v5528_v51, 0.0  ;;  %v5792_v0 = vmul.f32 0.2, %v5528_v51  ;;  %v5526_v5 = vadd.f32 %v5323_v49, %v4488_v6  ;;  %v8131_v36 = vpop.f32.mrf.mxu1  ;;  %v10139_v6 = vld [vmem:[#allocation97_spill] sm:$0xff] }
 0x2c0   : > { %v5919_v56 = vsel %vm5655_vm9, %v5523_v42, %v5787_v14  ;;  %v4491_v10 = vadd.f32 %v7993_v1, %v10132_v28  ;;  %v4288_v8 = vpop.f32.mrf.mxu0 }
 0x2c1   : > { %6582 = vst.msk [vmem:[%s9366_s26 + $0x1ac] sm:$0xf] %vm6474_vm3, %v7319_v41  ;;  %v7317_v38 = vpack.c.bf16 %v5919_v56, %v5919_v56  ;;  %v5924_v22 = vsel %vm5660_vm10, %v5528_v51, %v5792_v0  ;;  %vm5658_vm11 = vcmp.ge.f32.partialorder %v5526_v5, 0.0  ;;  %v5790_v44 = vmul.f32 0.2, %v5526_v5  ;;  %v5342_v16 = vpop.f32.mrf.mxu1 }
 0x2c2   : > { %v7322_v52 = vpack.c.bf16 %v5924_v22, %v5924_v22  ;;  %v5529_v53 = vadd.f32 %v8127_v33, %v4491_v10  ;;  %v4489_v15 = vadd.f32 %v4288_v8, %v10133_v57  ;;  %v7996_v2 = vpop.f32.mrf.mxu0  ;;  %v10140_v10 = vld [vmem:[#allocation98_spill] sm:$0xff] }
 0x2c3   : > { %6580 = vst.msk [vmem:[%s9366_s26 + $0x1a4] sm:$0xf] %vm6474_vm3, %v7317_v38  ;;  %v5922_v58 = vsel %vm5658_vm11, %v5526_v5, %v5790_v44  ;;  %v4494_v25 = vadd.f32 %v7996_v2, %v10134_v48  ;;  %v8134_v3 = vpop.f32.mrf.mxu1 }
 0x2c4   : > { %6585 = vst.msk [vmem:[%s9366_s26 + $0x1b8] sm:$0xf] %vm6474_vm3, %v7322_v52  ;;  %v7320_v54 = vpack.c.bf16 %v5922_v58, %v5922_v58  ;;  %vm5661_vm12 = vcmp.ge.f32.partialorder %v5529_v53, 0.0  ;;  %v5793_v27 = vmul.f32 0.2, %v5529_v53  ;;  %v5527_v26 = vadd.f32 %v5326_v61, %v4489_v15  ;;  %v4301_v24 = vpop.f32.mrf.mxu0  ;;  %v10141_v15 = vld [vmem:[#allocation99_spill] sm:$0xff] }
 0x2c5   : > { %v5532_v4 = vadd.f32 %v8130_v45, %v4494_v25  ;;  %v4492_v49 = vadd.f32 %v4301_v24, %v10135_v30  ;;  %v5355_v46 = vpop.f32.mrf.mxu1  ;;  %v10142_v25 = vld [vmem:[#allocation100_spill] sm:$0xff] }
 0x2c6   : > { %6583 = vst.msk [vmem:[%s9366_s26 + $0x1b0] sm:$0xf] %vm6474_vm3, %v7320_v54  ;;  %v5925_v7 = vsel %vm5661_vm12, %v5529_v53, %v5793_v27  ;;  %vm5659_vm13 = vcmp.ge.f32.partialorder %v5527_v26, 0.0  ;;  %v5791_v11 = vmul.f32 0.2, %v5527_v26  ;;  %v7997_v12 = vpop.f32.mrf.mxu0 }
 0x2c7   : > { %v7323_v63 = vpack.c.bf16 %v5925_v7, %v5925_v7  ;;  %vm5664_vm14 = vcmp.ge.f32.partialorder %v5532_v4, 0.0  ;;  %v5796_v47 = vmul.f32 0.2, %v5532_v4  ;;  %v5530_v33 = vadd.f32 %v5339_v34, %v4492_v49  ;;  %v8135_v17 = vpop.f32.mrf.mxu1  ;;  %v10143_v49 = vld [vmem:[#allocation101_spill] sm:$0xff] }
 0x2c8   : > { %v5923_v40 = vsel %vm5659_vm13, %v5527_v26, %v5791_v11  ;;  %v4495_v55 = vadd.f32 %v7997_v12, %v10136_v18  ;;  %v4304_v20 = vpop.f32.mrf.mxu0 }
 0x2c9   : > { %6586 = vst.msk [vmem:[%s9366_s26 + $0x1bc] sm:$0xf] %vm6474_vm3, %v7323_v63  ;;  %v7321_v29 = vpack.c.bf16 %v5923_v40, %v5923_v40  ;;  %v5928_v32 = vsel %vm5664_vm14, %v5532_v4, %v5796_v47  ;;  %vm5662_vm15 = vcmp.ge.f32.partialorder %v5530_v33, 0.0  ;;  %v5794_v61 = vmul.f32 0.2, %v5530_v33  ;;  %v5358_v35 = vpop.f32.mrf.mxu1 }
 0x2ca   : > { %v7326_v21 = vpack.c.bf16 %v5928_v32, %v5928_v32  ;;  %v5533_v37 = vadd.f32 %v8131_v36, %v4495_v55  ;;  %v4493_v39 = vadd.f32 %v4304_v20, %v10137_v23  ;;  %v8000_v13 = vpop.f32.mrf.mxu0  ;;  %v10144_v55 = vld [vmem:[#allocation102_spill] sm:$0xff]  ;;  %v10145_v23 = vld [vmem:[#allocation103_spill] sm:$0xff] }
 0x2cb   : > { %6584 = vst.msk [vmem:[%s9366_s26 + $0x1b4] sm:$0xf] %vm6474_vm3, %v7321_v29  ;;  %v5926_v31 = vsel %vm5662_vm15, %v5530_v33, %v5794_v61  ;;  %v4498_v45 = vadd.f32 %v8000_v13, %v10138_v9  ;;  %v8138_v62 = vpop.f32.mrf.mxu1  ;;  %v10146_v9 = vld [vmem:[#allocation104_spill] sm:$0xff] }
 0x2cc   : > { %6589 = vst.msk [vmem:[%s9366_s26 + $0x1c8] sm:$0xf] %vm6474_vm3, %v7326_v21  ;;  %v7324_v59 = vpack.c.bf16 %v5926_v31, %v5926_v31  ;;  %vm5665_vm4 = vcmp.ge.f32.partialorder %v5533_v37, 0.0  ;;  %v5797_v42 = vmul.f32 0.2, %v5533_v37  ;;  %v5531_v60 = vadd.f32 %v5342_v16, %v4493_v39  ;;  %v4317_v51 = vpop.f32.mrf.mxu0 }
 0x2cd   : > { %v5536_v19 = vadd.f32 %v8134_v3, %v4498_v45  ;;  %v4496_v34 = vadd.f32 %v4317_v51, %v10139_v6  ;;  %v5371_v43 = vpop.f32.mrf.mxu1  ;;  %v10147_v6 = vld [vmem:[#allocation105_spill] sm:$0xff] }
 0x2ce   : > { %6587 = vst.msk [vmem:[%s9366_s26 + $0x1c0] sm:$0xf] %vm6474_vm3, %v7324_v59  ;;  %v5929_v14 = vsel %vm5665_vm4, %v5533_v37, %v5797_v42  ;;  %vm5663_vm2 = vcmp.ge.f32.partialorder %v5531_v60, 0.0  ;;  %v5795_v1 = vmul.f32 0.2, %v5531_v60  ;;  %v8001_v41 = vpop.f32.mrf.mxu0 }
 0x2cf   : > { %v7327_v0 = vpack.c.bf16 %v5929_v14, %v5929_v14  ;;  %vm5668_vm5 = vcmp.ge.f32.partialorder %v5536_v19, 0.0  ;;  %v5800_v5 = vmul.f32 0.2, %v5536_v19  ;;  %v5534_v36 = vadd.f32 %v5355_v46, %v4496_v34  ;;  %v8139_v56 = vpop.f32.mrf.mxu1 }
 0x2d0   : > { %v5927_v28 = vsel %vm5663_vm2, %v5531_v60, %v5795_v1  ;;  %v4499_v8 = vadd.f32 %v8001_v41, %v10140_v10  ;;  %v4320_v38 = vpop.f32.mrf.mxu0 }
 0x2d1   : > { %6590 = vst.msk [vmem:[%s9366_s26 + $0x1cc] sm:$0xf] %vm6474_vm3, %v7327_v0  ;;  %v7325_v22 = vpack.c.bf16 %v5927_v28, %v5927_v28  ;;  %v5932_v44 = vsel %vm5668_vm5, %v5536_v19, %v5800_v5  ;;  %vm5666_vm6 = vcmp.ge.f32.partialorder %v5534_v36, 0.0  ;;  %v5798_v16 = vmul.f32 0.2, %v5534_v36  ;;  %v5374_v52 = vpop.f32.mrf.mxu1  ;;  %v10148_v28 = vld [vmem:[#allocation106_spill] sm:$0xff] }
 0x2d2   : > { %v7330_v53 = vpack.c.bf16 %v5932_v44, %v5932_v44  ;;  %v5537_v57 = vadd.f32 %v8135_v17, %v4499_v8  ;;  %v4497_v2 = vadd.f32 %v4320_v38, %v10141_v15  ;;  %v8004_v58 = vpop.f32.mrf.mxu0 }
 0x2d3   : > { %6588 = vst.msk [vmem:[%s9366_s26 + $0x1c4] sm:$0xf] %vm6474_vm3, %v7325_v22  ;;  %v5930_v48 = vsel %vm5666_vm6, %v5534_v36, %v5798_v16  ;;  %v4502_v3 = vadd.f32 %v8004_v58, %v10142_v25  ;;  %v8142_v54 = vpop.f32.mrf.mxu1 }
 0x2d4   : > { %6593 = vst.msk [vmem:[%s9366_s26 + $0x1d8] sm:$0xf] %vm6474_vm3, %v7330_v53  ;;  %v7328_v27 = vpack.c.bf16 %v5930_v48, %v5930_v48  ;;  %vm5669_vm7 = vcmp.ge.f32.partialorder %v5537_v57, 0.0  ;;  %v5801_v26 = vmul.f32 0.2, %v5537_v57  ;;  %v5535_v24 = vadd.f32 %v5358_v35, %v4497_v2  ;;  %v4333_v4 = vpop.f32.mrf.mxu0  ;;  %v10149_v53 = vld [vmem:[#allocation107_spill] sm:$0xff] }
 0x2d5   : > { %v5540_v30 = vadd.f32 %v8138_v62, %v4502_v3  ;;  %v4500_v46 = vadd.f32 %v4333_v4, %v10143_v49  ;;  %v5387_v7 = vpop.f32.mrf.mxu1  ;;  %v10150_v48 = vld [vmem:[#allocation108_spill] sm:$0xff]  ;;  %v10151_v4 = vld [vmem:[#allocation109_spill] sm:$0xff] }
 0x2d6   : > { %6591 = vst.msk [vmem:[%s9366_s26 + $0x1d0] sm:$0xf] %vm6474_vm3, %v7328_v27  ;;  %v5933_v11 = vsel %vm5669_vm7, %v5537_v57, %v5801_v26  ;;  %vm5667_vm8 = vcmp.ge.f32.partialorder %v5535_v24, 0.0  ;;  %v5799_v12 = vmul.f32 0.2, %v5535_v24  ;;  %v8005_v63 = vpop.f32.mrf.mxu0 }
 0x2d7   : > { %v7331_v47 = vpack.c.bf16 %v5933_v11, %v5933_v11  ;;  %vm5672_vm1 = vcmp.ge.f32.partialorder %v5540_v30, 0.0  ;;  %v5804_v33 = vmul.f32 0.2, %v5540_v30  ;;  %v5538_v17 = vadd.f32 %v5371_v43, %v4500_v46  ;;  %v8143_v40 = vpop.f32.mrf.mxu1 }
 0x2d8   : > { %v5931_v18 = vsel %vm5667_vm8, %v5535_v24, %v5799_v12  ;;  %v4503_v20 = vadd.f32 %v8005_v63, %v10144_v55  ;;  %v4336_v29 = vpop.f32.mrf.mxu0 }
 0x2d9   : > { %6594 = vst.msk [vmem:[%s9366_s26 + $0x1dc] sm:$0xf] %vm6474_vm3, %v7331_v47  ;;  %v7329_v32 = vpack.c.bf16 %v5931_v18, %v5931_v18  ;;  %v5936_v61 = vsel %vm5672_vm1, %v5540_v30, %v5804_v33  ;;  %vm5670_vm0 = vcmp.ge.f32.partialorder %v5538_v17, 0.0  ;;  %v5802_v35 = vmul.f32 0.2, %v5538_v17  ;;  %v5390_v62 = vpop.f32.mrf.mxu1 }
 0x2da   : > { %v7334_v21 = vpack.c.bf16 %v5936_v61, %v5936_v61  ;;  %v5541_v37 = vadd.f32 %v8139_v56, %v4503_v20  ;;  %v4501_v39 = vadd.f32 %v4336_v29, %v10145_v23  ;;  %v8008_v13 = vpop.f32.mrf.mxu0 }
 0x2db   : > { %6592 = vst.msk [vmem:[%s9366_s26 + $0x1d4] sm:$0xf] %vm6474_vm3, %v7329_v32  ;;  %v5934_v31 = vsel %vm5670_vm0, %v5538_v17, %v5802_v35  ;;  %v4506_v45 = vadd.f32 %v8008_v13, %v10146_v9  ;;  %v8146_v36 = vpop.f32.mrf.mxu1  ;;  %v10152_v17 = vld [vmem:[#allocation110_spill] sm:$0xff] }
 0x2dc   : > { %6597 = vst.msk [vmem:[%s9366_s26 + $0x1e8] sm:$0xf] %vm6474_vm3, %v7334_v21  ;;  %v7332_v59 = vpack.c.bf16 %v5934_v31, %v5934_v31  ;;  %vm5673_vm9 = vcmp.ge.f32.partialorder %v5541_v37, 0.0  ;;  %v5805_v42 = vmul.f32 0.2, %v5541_v37  ;;  %v5539_v60 = vadd.f32 %v5374_v52, %v4501_v39  ;;  %v4349_v51 = vpop.f32.mrf.mxu0 }
 0x2dd   : > { %v5544_v19 = vadd.f32 %v8142_v54, %v4506_v45  ;;  %v4504_v34 = vadd.f32 %v4349_v51, %v10147_v6  ;;  %v5403_v58 = vpop.f32.mrf.mxu1 }
 0x2de   : > { %6595 = vst.msk [vmem:[%s9366_s26 + $0x1e0] sm:$0xf] %vm6474_vm3, %v7332_v59  ;;  %v5937_v43 = vsel %vm5673_vm9, %v5541_v37, %v5805_v42  ;;  %vm5671_vm10 = vcmp.ge.f32.partialorder %v5539_v60, 0.0  ;;  %v5803_v14 = vmul.f32 0.2, %v5539_v60  ;;  %v8009_v1 = vpop.f32.mrf.mxu0 }
 0x2df   : > { %v7335_v41 = vpack.c.bf16 %v5937_v43, %v5937_v43  ;;  %vm5676_vm11 = vcmp.ge.f32.partialorder %v5544_v19, 0.0  ;;  %v5808_v0 = vmul.f32 0.2, %v5544_v19  ;;  %v5542_v5 = vadd.f32 %v5387_v7, %v4504_v34  ;;  %v8147_v63 = vpop.f32.mrf.mxu1 }
 0x2e0   : > { %v5935_v56 = vsel %vm5671_vm10, %v5539_v60, %v5803_v14  ;;  %v4507_v10 = vadd.f32 %v8009_v1, %v10148_v28  ;;  %v4352_v8 = vpop.f32.mrf.mxu0 }
 0x2e1   : > { %6598 = vst.msk [vmem:[%s9366_s26 + $0x1ec] sm:$0xf] %vm6474_vm3, %v7335_v41  ;;  %v7333_v38 = vpack.c.bf16 %v5935_v56, %v5935_v56  ;;  %v5940_v22 = vsel %vm5676_vm11, %v5544_v19, %v5808_v0  ;;  %vm5674_vm12 = vcmp.ge.f32.partialorder %v5542_v5, 0.0  ;;  %v5806_v44 = vmul.f32 0.2, %v5542_v5  ;;  %v5406_v37 = vpop.f32.mrf.mxu1 }
 0x2e2   : > { %v7338_v16 = vpack.c.bf16 %v5940_v22, %v5940_v22  ;;  %v5545_v52 = vadd.f32 %v8143_v40, %v4507_v10  ;;  %v4505_v57 = vadd.f32 %v4352_v8, %v10149_v53  ;;  %v8012_v15 = vpop.f32.mrf.mxu0 }
 0x2e3   : > { %6596 = vst.msk [vmem:[%s9366_s26 + $0x1e4] sm:$0xf] %vm6474_vm3, %v7333_v38  ;;  %v5938_v2 = vsel %vm5674_vm12, %v5542_v5, %v5806_v44  ;;  %v4510_v25 = vadd.f32 %v8012_v15, %v10150_v48 }
 0x2e4   : > { %6601 = vst.msk [vmem:[%s9366_s26 + $0x1f8] sm:$0xf] %vm6474_vm3, %v7338_v16  ;;  %v7336_v3 = vpack.c.bf16 %v5938_v2, %v5938_v2  ;;  %vm5677_vm13 = vcmp.ge.f32.partialorder %v5545_v52, 0.0  ;;  %v5809_v54 = vmul.f32 0.2, %v5545_v52  ;;  %v5543_v27 = vadd.f32 %v5390_v62, %v4505_v57  ;;  %v4365_v26 = vpop.f32.mrf.mxu0 }
 0x2e5   : > { %v5548_v24 = vadd.f32 %v8146_v36, %v4510_v25  ;;  %v4508_v30 = vadd.f32 %v4365_v26, %v10151_v4 }
 0x2e6   : > { %6599 = vst.msk [vmem:[%s9366_s26 + $0x1f0] sm:$0xf] %vm6474_vm3, %v7336_v3  ;;  %v5941_v49 = vsel %vm5677_vm13, %v5545_v52, %v5809_v54  ;;  %vm5675_vm14 = vcmp.ge.f32.partialorder %v5543_v27, 0.0  ;;  %v5807_v46 = vmul.f32 0.2, %v5543_v27  ;;  %v8013_v7 = vpop.f32.mrf.mxu0 }
 0x2e7   : > { %v7339_v11 = vpack.c.bf16 %v5941_v49, %v5941_v49  ;;  %vm5680_vm15 = vcmp.ge.f32.partialorder %v5548_v24, 0.0  ;;  %v5812_v12 = vmul.f32 0.2, %v5548_v24  ;;  %v5546_v47 = vadd.f32 %v5403_v58, %v4508_v30 }
 0x2e8   : > { %v5939_v33 = vsel %vm5675_vm14, %v5543_v27, %v5807_v46  ;;  %v4511_v40 = vadd.f32 %v8013_v7, %v10152_v17  ;;  %v4368_v18 = vpop.f32.mrf.mxu0 }
 0x2e9   : > { %6602 = vst.msk [vmem:[%s9366_s26 + $0x1fc] sm:$0xf] %vm6474_vm3, %v7339_v11  ;;  %v7337_v55 = vpack.c.bf16 %v5939_v33, %v5939_v33  ;;  %v5944_v20 = vsel %vm5680_vm15, %v5548_v24, %v5812_v12  ;;  %vm5678_vm4 = vcmp.ge.f32.partialorder %v5546_v47, 0.0  ;;  %v5810_v29 = vmul.f32 0.2, %v5546_v47 }
 0x2ea   : > { %v7342_v32 = vpack.c.bf16 %v5944_v20, %v5944_v20  ;;  %v5549_v61 = vadd.f32 %v8147_v63, %v4511_v40  ;;  %v4509_v35 = vadd.f32 %v4368_v18, %v9313_v50 }
 0x2eb   : > { %6600 = vst.msk [vmem:[%s9366_s26 + $0x1f4] sm:$0xf] %vm6474_vm3, %v7337_v55  ;;  %v5942_v21 = vsel %vm5678_vm4, %v5546_v47, %v5810_v29 }
 0x2ec   : > { %6605 = vst.msk [vmem:[%s9366_s26 + $0x208] sm:$0xf] %vm6474_vm3, %v7342_v32  ;;  %v7340_v23 = vpack.c.bf16 %v5942_v21, %v5942_v21  ;;  %vm5681_vm2 = vcmp.ge.f32.partialorder %v5549_v61, 0.0  ;;  %v5813_v39 = vmul.f32 0.2, %v5549_v61  ;;  %v5547_v13 = vadd.f32 %v5406_v37, %v4509_v35 }
 0x2ee   : > { %6603 = vst.msk [vmem:[%s9366_s26 + $0x200] sm:$0xf] %vm6474_vm3, %v7340_v23  ;;  %v5945_v31 = vsel %vm5681_vm2, %v5549_v61, %v5813_v39  ;;  %vm5679_vm5 = vcmp.ge.f32.partialorder %v5547_v13, 0.0  ;;  %v5811_v9 = vmul.f32 0.2, %v5547_v13 }
 0x2ef   : > { %v7343_v45 = vpack.c.bf16 %v5945_v31, %v5945_v31 }
 0x2f0   : > { %v5943_v62 = vsel %vm5679_vm5, %v5547_v13, %v5811_v9 }
 0x2f1   : > { %6606 = vst.msk [vmem:[%s9366_s26 + $0x20c] sm:$0xf] %vm6474_vm3, %v7343_v45  ;;  %v7341_v50 = vpack.c.bf16 %v5943_v62, %v5943_v62 }
 0x2f3   : > { %6604 = vst.msk [vmem:[%s9366_s26 + $0x204] sm:$0xf] %vm6474_vm3, %v7341_v50 }
 0x2f4 PF: > { %s12_s9 = sadd.s32 1, %s8303_s9  }
 0x2f5   : > { %p9_p4 = scmp.ge.s32.totalorder %s12_s9, 4  }
 0x2f7   :  { %11 = sbr.rel (!%p9_p4) target bundleno = 1 (0x1), region = 61 }

// kernel: discriminator_forward.5
= control target key start
LH: loop header
LB: loop body
LE: loop exit
PB: predicated region body
PF: predicated region fallthrough
CT: control target
= control target key end

     0   :  { %s3799_s15 = smov 0   ;;  %s5588_s0 = inlined_call_operand.vmem [shape: bf16[2,297,64], index: 0, kind: input, shape index: {}]   ;;  %s5589_s1 = inlined_call_operand.vmem [shape: bf16[4,64,32], index: 1, kind: input, shape index: {}]   ;;  %s5590_s2 = inlined_call_operand.vmem [shape: bf16[2,272,32], index: 2, kind: output, shape index: {0}]   ;;  %s5591_s3 = inlined_call_operand.vmem [shape: f32[2,1,32], index: 3, kind: output, shape index: {1}]   ;;  %s5592_s4 = inlined_call_operand.vmem [shape: f32[2,1,32], index: 4, kind: output, shape index: {2}]  }
   0x1 LB: > { %s3021_s16 = sadd.s32 4294967295, %s3770_s15   ;;  %p3025_p0 = scmp.ge.s32.totalorder %s3770_s15, 1  ;;  %s3770_s15 = sphi %s3799_s15, %s15_s15  }
   0x2   : > { %p167_p1 = scmp.lt.s32.totalorder %s3770_s15, 3 }
   0x4   : > { %p168_p2 = pnand %p3025_p0, %p167_p1 }
   0x6   : > { %171 = sbr.rel (%p168_p2) target bundleno = 517 (0x205), region = 28 }
   0xb   : > { %v3711_v0 = vld [vmem:[%s5589_s1 + $0x38] sm:$0xff]   ;;  %v3772_v1 = vmov 0.0   ;;  %v3713_v3 = vld [vmem:[%s5589_s1 + $0x30] sm:$0xff]   ;;  %vm3773_vm0 = vmmov 0   ;;  %p199_p3 = scmp.lt.s32.totalorder %s3021_s16, 1  ;;  %v3715_v5 = vld [vmem:[%s5589_s1 + $0x28] sm:$0xff]  }
   0xc   : > { %3327 = vmatprep.subr.bf16.mxu0 %v3772_v1  ;;  %3403 = vmatprep.subr.bf16.mxu1 %v3772_v1  ;;  %v3712_v2 = vld [vmem:[%s5589_s1 + $0x18] sm:$0xff]   ;;  %v3714_v4 = vld [vmem:[%s5589_s1 + $0x10] sm:$0xff]   ;;  %v3716_v6 = vld [vmem:[%s5589_s1 + $0x8] sm:$0xff]   ;;  %vm356_vm1 = vsmask.f32 7424  ;;  %vm521_vm2 = vcmask 523264  }
   0xd   : > { %3328 = vmatpush3.bf16.msra.mxu0 %v3711_v0  ;;  %3335 = vmatprep.mubr.msk.bf16.mxu0 %vm3773_vm0, %v3772_v1  ;;  %s5854_s16 = smov (!%p199_p3, %s3021_s16), 1  ;;  %v3717_v7 = vld [vmem:[%s5589_s1 + $0x20] sm:$0xff]   ;;  %v3721_v17 = vld [vmem:[%s5589_s1 + $0x58] sm:$0xff]   ;;  %v3728_v24 = vld [vmem:[%s5589_s1 + $0x70] sm:$0xff]   ;;  %vm1532_vm3 = vcmask 1046528  }
   0xe   : > { %3404 = vmatpush3.bf16.msra.mxu1 %v3712_v2  ;;  %3329 = vmatprep.subr.bf16.mxu0 %v3772_v1  ;;  %s3631_s27 = smul.u32 152, %s5854_s16  ;;  %v3718_v8 = vld [vmem:[%s5589_s1] sm:$0xff]   ;;  %v3722_v18 = vld [vmem:[%s5589_s1 + $0x78] sm:$0xff]   ;;  %v3727_v27 = vld [vmem:[%s5589_s1 + $0x50] sm:$0xff]   ;;  %s211_s9 = scalar_lea.vmem %s5591_s3, %s5854_s16 }
   0xf   : > { %3405 = vmatprep.subr.bf16.mxu1 %v3772_v1  ;;  %3411 = vmatprep.mubr.msk.bf16.mxu1 %vm3773_vm0, %v3772_v1  ;;  %v3733_v31 = vld [vmem:[%s5589_s1 + $0x48] sm:$0xff]   ;;  %v3739_v39 = vld [vmem:[%s5589_s1 + $0x40] sm:$0xff]   ;;  %s3632_s29 = smul.u32 136, %s5854_s16  ;;  %s214_s12 = scalar_lea.vmem %s5592_s4, %s5854_s16 }
  0x10   : > { %s3844_s8 = scalar_lea.vmem %s5588_s0, %s3631_s27  ;;  %v3734_v32 = vld [vmem:[%s5589_s1 + $0x68] sm:$0xff]   ;;  %v3741_v40 = vld [vmem:[%s5589_s1 + $0x60] sm:$0xff]  }
  0x11   : > { %3330 = vmatpush3.bf16.msra.mxu0 %v3713_v3  ;;  %v3719_v9 = vld [vmem:[%s3844_s8] sm:$0xff]   ;;  %v3720_v10 = vld [vmem:[%s3844_s8 + $0x8] sm:$0xff]   ;;  %v3723_v14 = vld [vmem:[%s3844_s8 + $0x10] sm:$0xff]   ;;  %s4563_s6 = scalar_lea.vmem %s5590_s2, %s3632_s29 }
  0x12   : > { %3406 = vmatpush3.bf16.msra.mxu1 %v3714_v4  ;;  %3331 = vmatprep.subr.bf16.mxu0 %v3772_v1  ;;  %v358_v11 = vshrl.u32 %v3719_v9, 16  ;;  %v360_v12 = vshll.u32 %v3719_v9, 16  ;;  %v365_v13 = vshll.u32 %v3720_v10, 16  ;;  %v369_v20 = vshrl.u32 %v3720_v10, 16  ;;  %v3724_v23 = vld [vmem:[%s3844_s8 + $0x18] sm:$0xff]   ;;  %v3725_v35 = vld [vmem:[%s3844_s8 + $0x20] sm:$0xff]  }
  0x13   : > { %3407 = vmatprep.subr.bf16.mxu1 %v3772_v1  ;;  %v373_v21 = vshll.u32 %v3723_v14, 16  ;;  %v377_v28 = vshrl.u32 %v3723_v14, 16  ;;  %v381_v30 = vshll.u32 %v3724_v23, 16  ;;  %v385_v37 = vshrl.u32 %v3724_v23, 16  ;;  %v3726_v43 = vld [vmem:[%s3844_s8 + $0x28] sm:$0xff]   ;;  %v3729_v47 = vld [vmem:[%s3844_s8 + $0x30] sm:$0xff]  }
  0x14   : > { %v362_v15 = vrot.slane %v360_v12, 1  ;;  %v367_v16 = vrot.slane %v365_v13, 1  ;;  %v389_v38 = vshll.u32 %v3725_v35, 16  ;;  %v393_v45 = vshrl.u32 %v3725_v35, 16  ;;  %v3730_v55 = vld [vmem:[%s3844_s8 + $0x38] sm:$0xff]   ;;  %v3731_v61 = vld [vmem:[%s3844_s8 + $0x40] sm:$0xff]  }
  0x15   : > { %3332 = vmatpush3.bf16.msra.mxu0 %v3715_v5  ;;  %v375_v26 = vrot.slane %v373_v21, 1  ;;  %v383_v34 = vrot.slane %v381_v30, 1  ;;  %v397_v46 = vshll.u32 %v3726_v43, 16  ;;  %v401_v50 = vshrl.u32 %v3726_v43, 16  ;;  %v3732_v4 = vld [vmem:[%s3844_s8 + $0x48] sm:$0xff]  }
  0x16   : > { %3408 = vmatpush3.bf16.msra.mxu1 %v3716_v6  ;;  %3333 = vmatprep.subr.bf16.mxu0 %v3772_v1  ;;  %v363_v19 = vor.u32 %v362_v15, %v358_v11  ;;  %v371_v25 = vor.u32 %v369_v20, %v367_v16  ;;  %v391_v42 = vrot.slane %v389_v38, 1  ;;  %v405_v51 = vshll.u32 %v3729_v47, 16 }
  0x17   : > { %3409 = vmatprep.subr.bf16.mxu1 %v3772_v1  ;;  %v379_v33 = vor.u32 %v377_v28, %v375_v26  ;;  %v387_v41 = vor.u32 %v385_v37, %v383_v34  ;;  %v399_v49 = vrot.slane %v397_v46, 1  ;;  %v409_v57 = vshrl.u32 %v3729_v47, 16  ;;  %v3738_v28 = vld [vmem:[%s3844_s8 + $0x68] sm:$0xff]   ;;  %v3743_v46 = vld [vmem:[%s3844_s8 + $0x80] sm:$0xff]  }
  0x18   : > { %v368_v22 = vsel %vm356_vm1, %v363_v19, %v367_v16  ;;  %v376_v29 = vsel %vm356_vm1, %v371_v25, %v375_v26  ;;  %v395_v48 = vor.u32 %v393_v45, %v391_v42  ;;  %v407_v54 = vrot.slane %v405_v51, 1  ;;  %v3736_v16 = vld [vmem:[%s3844_s8 + $0x58] sm:$0xff]  }
  0x19   : > { %3334 = vmatpush3.bf16.msra.mxu0 %v3717_v7  ;;  %v384_v36 = vsel %vm356_vm1, %v379_v33, %v383_v34  ;;  %v392_v44 = vsel %vm356_vm1, %v387_v41, %v391_v42  ;;  %v403_v53 = vor.u32 %v401_v50, %v399_v49  ;;  %v413_v58 = vshll.u32 %v3730_v55, 16  ;;  %v3740_v34 = vld [vmem:[%s3844_s8 + $0x70] sm:$0xff]  }
  0x1a   : > { %3410 = vmatpush3.bf16.msra.mxu1 %v3718_v8  ;;  %3479 = vmatprep.subr.bf16.mxu0 %v3772_v1  ;;  %v400_v52 = vsel %vm356_vm1, %v395_v48, %v399_v49  ;;  %v411_v59 = vor.u32 %v409_v57, %v407_v54  ;;  %v417_v63 = vshrl.u32 %v3730_v55, 16  ;;  %v421_v0 = vshll.u32 %v3731_v61, 16 }
  0x1b   : > { %3555 = vmatprep.subr.bf16.mxu1 %v3772_v1  ;;  %v408_v56 = vsel %vm356_vm1, %v403_v53, %v407_v54  ;;  %v415_v60 = vrot.slane %v413_v58, 1  ;;  %v425_v6 = vshrl.u32 %v3731_v61, 16  ;;  %v429_v7 = vshll.u32 %v3732_v4, 16  ;;  %v969_v53 = vld [vmem:[%s3844_s8 + $0x8] sm:$0xf] }
  0x1c   : > { %3336 = vmatmul.mubr.msk.bf16.vlgmr.msra.gmra.mxu0 %vm521_vm2, %v368_v22  ;;  %v423_v3 = vrot.slane %v421_v0, 1  ;;  %v433_v12 = vshrl.u32 %v3732_v4, 16  ;;  %v445_v19 = vshll.u32 %v3736_v16, 16  ;;  %v3737_v22 = vld [vmem:[%s3844_s8 + $0x60] sm:$0xff]   ;;  %v469_v37 = vshll.u32 %v3740_v34, 16 }
  0x1d   : > { %3412 = vmatmul.mubr.msk.bf16.vlgmr.msra.gmra.mxu1 %vm521_vm2, %v3719_v9  ;;  %3480 = vmatpush3.bf16.msra.mxu0 %v3721_v17  ;;  %v416_v62 = vsel %vm356_vm1, %v411_v59, %v415_v60  ;;  %v419_v2 = vor.u32 %v417_v63, %v415_v60  ;;  %v431_v9 = vrot.slane %v429_v7, 1  ;;  %v453_v25 = vshll.u32 %v3737_v22, 16  ;;  %v970_v54 = vld [vmem:[%s3844_s8 + $0xc] sm:$0xf]  ;;  %v1519_v63 = vld [vmem:[%s3844_s8 + $0x8] sm:$0xe] }
  0x1e   : > { %3556 = vmatpush3.bf16.msra.mxu1 %v3722_v18  ;;  %3339 = vmatprep.mubr.msk.bf16.mxu0 %vm3773_vm0, %v3772_v1  ;;  %v427_v8 = vor.u32 %v425_v6, %v423_v3  ;;  %v447_v21 = vrot.slane %v445_v19, 1  ;;  %v457_v30 = vshrl.u32 %v3737_v22, 16  ;;  %v473_v42 = vshrl.u32 %v3740_v34, 16 }
  0x1f   : > { %3415 = vmatprep.mubr.msk.bf16.mxu1 %vm3773_vm0, %v3772_v1  ;;  %3481 = vmatprep.subr.bf16.mxu0 %v3772_v1  ;;  %v424_v5 = vsel %vm356_vm1, %v419_v2, %v423_v3  ;;  %v485_v49 = vshll.u32 %v3743_v46, 16  ;;  %v3104_v58 = vcombine.low %v969_v53, %v970_v54  ;;  %v3151_v0 = vcombine.low %v1519_v63, %v970_v54 }
  0x20   : > { %3557 = vmatprep.subr.bf16.mxu1 %v3772_v1  ;;  %v432_v11 = vsel %vm356_vm1, %v427_v8, %v431_v9 }
  0x21   : > { %3482 = vmatpush3.bf16.msra.mxu0 %v3727_v27  ;;  %v455_v27 = vrot.slane %v453_v25, 1  ;;  %v487_v51 = vrot.slane %v485_v49, 1  ;;  %v1102_v3 = vshrl.u32 %v3104_v58, 16  ;;  %v1533_v6 = vrot.slane %v3151_v0, 1 }
  0x22   : > { %3558 = vmatpush3.bf16.msra.mxu1 %v3728_v24  ;;  %3483 = vmatprep.subr.bf16.mxu0 %v3772_v1  ;;  %v449_v24 = vshrl.u32 %v3736_v16, 16 }
  0x23   : > { %3559 = vmatprep.subr.bf16.mxu1 %v3772_v1 }
  0x24   : > { %3340 = vmatmul.mubr.msk.bf16.gmra.mxu0 %vm521_vm2, %v376_v29  ;;  %v451_v26 = vor.u32 %v449_v24, %v447_v21 }
  0x25   : > { %3416 = vmatmul.mubr.msk.bf16.gmra.mxu1 %vm521_vm2, %v3720_v10  ;;  %3343 = vmatprep.mubr.msk.bf16.mxu0 %vm3773_vm0, %v3772_v1  ;;  %v3735_v10 = vld [vmem:[%s3844_s8 + $0x50] sm:$0xff]  }
  0x26   : > { %3419 = vmatprep.mubr.msk.bf16.mxu1 %vm3773_vm0, %v3772_v1  ;;  %3484 = vmatpush3.bf16.msra.mxu0 %v3733_v31  ;;  %v437_v13 = vshll.u32 %v3735_v10, 16  ;;  %v441_v18 = vshrl.u32 %v3735_v10, 16  ;;  %v456_v29 = vsel %vm356_vm1, %v451_v26, %v455_v27  ;;  %v461_v31 = vshll.u32 %v3738_v28, 16  ;;  %v3750_v26 = vld [vmem:[%s3844_s8 + $0x28] sm:$0xff]  }
  0x27   : > { %3560 = vmatpush3.bf16.msra.mxu1 %v3734_v32  ;;  %3485 = vmatprep.subr.bf16.mxu0 %v3772_v1  ;;  %v459_v32 = vor.u32 %v457_v30, %v455_v27  ;;  %v1133_v30 = vshll.u32 %v3750_v26, 16 }
  0x28   : > { %3561 = vmatprep.subr.bf16.mxu1 %v3772_v1  ;;  %v439_v15 = vrot.slane %v437_v13, 1  ;;  %v463_v33 = vrot.slane %v461_v31, 1  ;;  %v1540_v31 = vrot.slane %v3750_v26, 1 }
  0x2a   : > { %3486 = vmatpush3.bf16.msra.mxu0 %v3739_v39  ;;  %v443_v20 = vor.u32 %v441_v18, %v439_v15  ;;  %v471_v39 = vrot.slane %v469_v37, 1  ;;  %v3749_v18 = vld [vmem:[%s3844_s8 + $0x20] sm:$0xff]   ;;  %v1137_v37 = vshrl.u32 %v3750_v26, 16 }
  0x2b   : > { %3562 = vmatpush3.bf16.msra.mxu1 %v3741_v40  ;;  %v3742_v40 = vld [vmem:[%s3844_s8 + $0x78] sm:$0xff]  }
  0x2c   : > { %3344 = vmatmul.mubr.msk.bf16.gmra.mxu0 %vm521_vm2, %v384_v36  ;;  %v465_v36 = vshrl.u32 %v3738_v28, 16  ;;  %v481_v48 = vshrl.u32 %v3742_v40, 16 }
  0x2d   : > { %3420 = vmatmul.mubr.msk.bf16.gmra.mxu1 %vm521_vm2, %v3723_v14  ;;  %3347 = vmatprep.mubr.msk.bf16.mxu0 %vm3773_vm0, %v3772_v1  ;;  %v435_v14 = vor.u32 %v433_v12, %v431_v9 }
  0x2e   : > { %3423 = vmatprep.mubr.msk.bf16.mxu1 %vm3773_vm0, %v3772_v1  ;;  %v467_v38 = vor.u32 %v465_v36, %v463_v33 }
  0x2f   : > { %v440_v17 = vsel %vm356_vm1, %v435_v14, %v439_v15 }
  0x30   : > { %v472_v41 = vsel %vm356_vm1, %v467_v38, %v471_v39 }
  0x34   : > { %3348 = vmatmul.mubr.msk.bf16.gmra.mxu0 %vm521_vm2, %v392_v44  ;;  %v475_v44 = vor.u32 %v473_v42, %v471_v39  ;;  %v3752_v42 = vld [vmem:[%s3844_s8 + $0x38] sm:$0xff]  }
  0x35   : > { %3424 = vmatmul.mubr.msk.bf16.gmra.mxu1 %vm521_vm2, %v3724_v23  ;;  %3351 = vmatprep.mubr.msk.bf16.mxu0 %vm3773_vm0, %v3772_v1  ;;  %v448_v23 = vsel %vm356_vm1, %v443_v20, %v447_v21  ;;  %v1153_v53 = vshrl.u32 %v3752_v42, 16 }
  0x36   : > { %3427 = vmatprep.mubr.msk.bf16.mxu1 %vm3773_vm0, %v3772_v1 }
  0x3c   : > { %3352 = vmatmul.mubr.msk.bf16.gmra.mxu0 %vm521_vm2, %v400_v52  ;;  %v3744_v52 = vld [vmem:[%s3844_s8 + $0x88] ss:$0 sps:$4 sm:$0x11]  }
  0x3d   : > { %3428 = vmatmul.mubr.msk.bf16.gmra.mxu1 %vm521_vm2, %v3725_v35  ;;  %3355 = vmatprep.mubr.msk.bf16.mxu0 %vm3773_vm0, %v3772_v1  ;;  %v464_v35 = vsel %vm356_vm1, %v459_v32, %v463_v33  ;;  %v493_v57 = vshll.u32 %v3744_v52, 16  ;;  %v1135_v33 = vrot.slane %v1133_v30, 1 }
  0x3e   : > { %3431 = vmatprep.mubr.msk.bf16.mxu1 %vm3773_vm0, %v3772_v1 }
  0x3f   : > { %v495_v60 = vrot.slane %v493_v57, 1 }
  0x44   : > { %3356 = vmatmul.mubr.msk.bf16.gmra.mxu0 %vm521_vm2, %v408_v56  ;;  %v489_v56 = vshrl.u32 %v3743_v46, 16 }
  0x45   : > { %3432 = vmatmul.mubr.msk.bf16.gmra.mxu1 %vm521_vm2, %v3726_v43  ;;  %3359 = vmatprep.mubr.msk.bf16.mxu0 %vm3773_vm0, %v3772_v1  ;;  %v477_v43 = vshll.u32 %v3742_v40, 16 }
  0x46   : > { %3435 = vmatprep.mubr.msk.bf16.mxu1 %vm3773_vm0, %v3772_v1  ;;  %v491_v59 = vor.u32 %v489_v56, %v487_v51 }
  0x47   : > { %v479_v45 = vrot.slane %v477_v43, 1 }
  0x48   : > { %v496_v2 = vsel %vm356_vm1, %v491_v59, %v495_v60 }
  0x49   : > { %v483_v50 = vor.u32 %v481_v48, %v479_v45 }
  0x4c   : > { %3360 = vmatmul.mubr.msk.bf16.gmra.mxu0 %vm521_vm2, %v416_v62  ;;  %v1104_v62 = vshll.u32 %v3104_v58, 16  ;;  %v3754_v58 = vld [vmem:[%s3844_s8 + $0x48] sm:$0xff]  }
  0x4d   : > { %3436 = vmatmul.mubr.msk.bf16.gmra.mxu1 %vm521_vm2, %v3729_v47  ;;  %3363 = vmatprep.mubr.msk.bf16.mxu0 %vm3773_vm0, %v3772_v1  ;;  %v480_v47 = vsel %vm356_vm1, %v475_v44, %v479_v45  ;;  %v1548_v63 = vrot.slane %v3754_v58, 1 }
  0x4e   : > { %3439 = vmatprep.mubr.msk.bf16.mxu1 %vm3773_vm0, %v3772_v1 }
  0x54   : > { %3364 = vmatmul.mubr.msk.bf16.gmra.mxu0 %vm521_vm2, %v424_v5 }
  0x55   : > { %3440 = vmatmul.mubr.msk.bf16.gmra.mxu1 %vm521_vm2, %v3730_v55  ;;  %3367 = vmatprep.mubr.msk.bf16.mxu0 %vm3773_vm0, %v3772_v1  ;;  %v488_v55 = vsel %vm356_vm1, %v483_v50, %v487_v51  ;;  %v3753_v50 = vld [vmem:[%s3844_s8 + $0x40] sm:$0xff]  }
  0x56   : > { %3443 = vmatprep.mubr.msk.bf16.mxu1 %vm3773_vm0, %v3772_v1  ;;  %v1157_v54 = vshll.u32 %v3753_v50, 16 }
  0x58   : > { %v1159_v57 = vrot.slane %v1157_v54, 1 }
  0x5c   : > { %3368 = vmatmul.mubr.msk.bf16.gmra.mxu0 %vm521_vm2, %v432_v11 }
  0x5d   : > { %3444 = vmatmul.mubr.msk.bf16.gmra.mxu1 %vm521_vm2, %v3731_v61  ;;  %3371 = vmatprep.mubr.msk.bf16.mxu0 %vm3773_vm0, %v3772_v1  ;;  %v3746_v61 = vld [vmem:[%s3844_s8 + $0x10] sm:$0xff]  }
  0x5e   : > { %3447 = vmatprep.mubr.msk.bf16.mxu1 %vm3773_vm0, %v3772_v1  ;;  %v1109_v5 = vshll.u32 %v3746_v61, 16  ;;  %v1534_v7 = vrot.slane %v3746_v61, 1  ;;  %v1113_v13 = vshrl.u32 %v3746_v61, 16  ;;  %v1161_v61 = vshrl.u32 %v3753_v50, 16 }
  0x60   : > { %v1111_v9 = vrot.slane %v1109_v5, 1  ;;  %v1535_v11 = vsel %vm1532_vm3, %v1533_v6, %v1534_v7  ;;  %v1163_v0 = vor.u32 %v1161_v61, %v1159_v57  ;;  %v1169_v6 = vshrl.u32 %v3754_v58, 16 }
  0x64   : > { %3372 = vmatmul.mubr.msk.bf16.gmra.mxu0 %vm521_vm2, %v440_v17 }
  0x65   : > { %3448 = vmatmul.mubr.msk.bf16.gmra.mxu1 %vm521_vm2, %v3732_v4  ;;  %3375 = vmatprep.mubr.msk.bf16.mxu0 %vm3773_vm0, %v3772_v1  ;;  %v1106_v4 = vrot.slane %v1104_v62, 1  ;;  %v1165_v62 = vshll.u32 %v3754_v58, 16 }
  0x66   : > { %3451 = vmatprep.mubr.msk.bf16.mxu1 %vm3773_vm0, %v3772_v1 }
  0x67   : > { %v1107_v8 = vor.u32 %v1106_v4, %v1102_v3  ;;  %v3755_v3 = vld [vmem:[%s3844_s8 + $0x50] sm:$0xff]  }
  0x69   : > { %v1112_v12 = vsel %vm356_vm1, %v1107_v8, %v1111_v9 }
  0x6c   : > { %3376 = vmatmul.mubr.msk.bf16.gmra.mxu0 %vm521_vm2, %v448_v23  ;;  %v1538_v23 = vrot.slane %v3749_v18, 1 }
  0x6d   : > { %3452 = vmatmul.mubr.msk.bf16.gmra.mxu1 %vm521_vm2, %v3735_v10  ;;  %3379 = vmatprep.mubr.msk.bf16.mxu0 %vm3773_vm0, %v3772_v1  ;;  %v3748_v10 = vld [vmem:[%s3844_s8 + $0x18] sm:$0xff]  }
  0x6e   : > { %3455 = vmatprep.mubr.msk.bf16.mxu1 %vm3773_vm0, %v3772_v1  ;;  %v1117_v14 = vshll.u32 %v3748_v10, 16  ;;  %v1536_v15 = vrot.slane %v3748_v10, 1  ;;  %v1121_v21 = vshrl.u32 %v3748_v10, 16  ;;  %v1550_v10 = vrot.slane %v3755_v3, 1 }
  0x70   : > { %v1119_v17 = vrot.slane %v1117_v14, 1  ;;  %v1537_v19 = vsel %vm1532_vm3, %v1534_v7, %v1536_v15  ;;  %v1539_v27 = vsel %vm1532_vm3, %v1536_v15, %v1538_v23  ;;  %v1173_v7 = vshll.u32 %v3755_v3, 16  ;;  %v3756_v15 = vld [vmem:[%s3844_s8 + $0x58] sm:$0xff]  }
  0x72   : > { %v1123_v24 = vor.u32 %v1121_v21, %v1119_v17  ;;  %v1175_v14 = vrot.slane %v1173_v7, 1 }
  0x74   : > { %3380 = vmatmul.mubr.msk.bf16.gmra.mxu0 %vm521_vm2, %v456_v29  ;;  %v1129_v29 = vshrl.u32 %v3749_v18, 16 }
  0x75   : > { %3456 = vmatmul.mubr.msk.bf16.gmra.mxu1 %vm521_vm2, %v3736_v16  ;;  %3383 = vmatprep.mubr.msk.bf16.mxu0 %vm3773_vm0, %v3772_v1  ;;  %v1115_v16 = vor.u32 %v1113_v13, %v1111_v9 }
  0x76   : > { %3459 = vmatprep.mubr.msk.bf16.mxu1 %vm3773_vm0, %v3772_v1 }
  0x77   : > { %v1120_v20 = vsel %vm356_vm1, %v1115_v16, %v1119_v17 }
  0x7c   : > { %3384 = vmatmul.mubr.msk.bf16.gmra.mxu0 %vm521_vm2, %v464_v35  ;;  %v1541_v35 = vsel %vm1532_vm3, %v1538_v23, %v1540_v31  ;;  %v1177_v23 = vshrl.u32 %v3755_v3, 16 }
  0x7d   : > { %3460 = vmatmul.mubr.msk.bf16.gmra.mxu1 %vm521_vm2, %v3737_v22  ;;  %3387 = vmatprep.mubr.msk.bf16.mxu0 %vm3773_vm0, %v3772_v1  ;;  %v1125_v22 = vshll.u32 %v3749_v18, 16 }
  0x7e   : > { %3463 = vmatprep.mubr.msk.bf16.mxu1 %vm3773_vm0, %v3772_v1 }
  0x7f   : > { %v1127_v25 = vrot.slane %v1125_v22, 1 }
  0x81   : > { %v1131_v32 = vor.u32 %v1129_v29, %v1127_v25 }
  0x83   : > { %v1136_v36 = vsel %vm356_vm1, %v1131_v32, %v1135_v33 }
  0x84   : > { %3388 = vmatmul.mubr.msk.bf16.gmra.mxu0 %vm521_vm2, %v472_v41 }
  0x85   : > { %3464 = vmatmul.mubr.msk.bf16.gmra.mxu1 %vm521_vm2, %v3738_v28  ;;  %3391 = vmatprep.mubr.msk.bf16.mxu0 %vm3773_vm0, %v3772_v1  ;;  %v1128_v28 = vsel %vm356_vm1, %v1123_v24, %v1127_v25  ;;  %v1181_v24 = vshll.u32 %v3756_v15, 16 }
  0x86   : > { %3467 = vmatprep.mubr.msk.bf16.mxu1 %vm3773_vm0, %v3772_v1 }
  0x87   : > { %v1183_v32 = vrot.slane %v1181_v24, 1 }
  0x8c   : > { %3392 = vmatmul.mubr.msk.bf16.gmra.mxu0 %vm521_vm2, %v480_v47  ;;  %v1544_v47 = vrot.slane %v3752_v42, 1 }
  0x8d   : > { %3468 = vmatmul.mubr.msk.bf16.gmra.mxu1 %vm521_vm2, %v3740_v34  ;;  %3395 = vmatprep.mubr.msk.bf16.mxu0 %vm3773_vm0, %v3772_v1  ;;  %v3751_v34 = vld [vmem:[%s3844_s8 + $0x30] sm:$0xff]  }
  0x8e   : > { %3471 = vmatprep.mubr.msk.bf16.mxu1 %vm3773_vm0, %v3772_v1  ;;  %v1141_v38 = vshll.u32 %v3751_v34, 16  ;;  %v1542_v39 = vrot.slane %v3751_v34, 1  ;;  %v1145_v45 = vshrl.u32 %v3751_v34, 16 }
  0x90   : > { %v1143_v41 = vrot.slane %v1141_v38, 1  ;;  %v1543_v43 = vsel %vm1532_vm3, %v1540_v31, %v1542_v39  ;;  %v1545_v51 = vsel %vm1532_vm3, %v1542_v39, %v1544_v47  ;;  %v1179_v31 = vor.u32 %v1177_v23, %v1175_v14 }
  0x92   : > { %v1147_v48 = vor.u32 %v1145_v45, %v1143_v41 }
  0x94   : > { %3396 = vmatmul.mubr.msk.bf16.gmra.mxu0 %vm521_vm2, %v488_v55  ;;  %v1546_v55 = vrot.slane %v3753_v50, 1 }
  0x95   : > { %3472 = vmatmul.mubr.msk.bf16.gmra.mxu1 %vm521_vm2, %v3742_v40  ;;  %3399 = vmatprep.mubr.msk.bf16.mxu0 %vm3773_vm0, %v3772_v1  ;;  %v1139_v40 = vor.u32 %v1137_v37, %v1135_v33  ;;  %v3757_v33 = vld [vmem:[%s3844_s8 + $0x60] sm:$0xff]  }
  0x96   : > { %3475 = vmatprep.mubr.msk.bf16.mxu1 %vm3773_vm0, %v3772_v1  ;;  %v1547_v59 = vsel %vm1532_vm3, %v1544_v47, %v1546_v55  ;;  %v1549_v4 = vsel %vm1532_vm3, %v1546_v55, %v1548_v63 }
  0x97   : > { %v1144_v44 = vsel %vm356_vm1, %v1139_v40, %v1143_v41  ;;  %v1184_v40 = vsel %vm356_vm1, %v1179_v31, %v1183_v32  ;;  %v1185_v41 = vshrl.u32 %v3756_v15, 16 }
  0x9c   : > { %3400 = vmatmul.mubr.msk.bf16.gmra.mxu0 %vm521_vm2, %v496_v2  ;;  %v1167_v2 = vrot.slane %v1165_v62, 1 }
  0x9d   : > { %3476 = vmatmul.mubr.msk.bf16.gmra.mxu1 %vm521_vm2, %v3743_v46  ;;  %3487 = vmatprep.mubr.msk.bf16.mxu0 %vm3773_vm0, %v3772_v1  ;;  %v1149_v46 = vshll.u32 %v3752_v42, 16  ;;  %v1189_v42 = vshll.u32 %v3757_v33, 16 }
  0x9e   : > { %3563 = vmatprep.mubr.msk.bf16.mxu1 %vm3773_vm0, %v3772_v1  ;;  %v1168_v5 = vsel %vm356_vm1, %v1163_v0, %v1167_v2  ;;  %v1171_v13 = vor.u32 %v1169_v6, %v1167_v2  ;;  %v3759_v6 = vld [vmem:[%s3844_s8 + $0x70] sm:$0xff]  }
  0x9f   : > { %v1151_v49 = vrot.slane %v1149_v46, 1  ;;  %v1554_v46 = vrot.slane %v3757_v33, 1  ;;  %v1191_v50 = vrot.slane %v1189_v42, 1 }
  0xa0   : > { %v1176_v22 = vsel %vm356_vm1, %v1171_v13, %v1175_v14 }
  0xa1   : > { %v1152_v52 = vsel %vm356_vm1, %v1147_v48, %v1151_v49  ;;  %v1155_v56 = vor.u32 %v1153_v53, %v1151_v49  ;;  %v1187_v49 = vor.u32 %v1185_v41, %v1183_v32 }
  0xa3   : > { %v1160_v60 = vsel %vm356_vm1, %v1155_v56, %v1159_v57  ;;  %v1192_v58 = vsel %vm356_vm1, %v1187_v49, %v1191_v50 }
  0xa4   : > { %3488 = vmatmul.mubr.msk.bf16.vlgmr.msra.gmra.mxu0 %vm521_vm2, %v1112_v12 }
  0xa5   : > { %3564 = vmatmul.mubr.msk.bf16.vlgmr.msra.gmra.mxu1 %vm521_vm2, %v1535_v11  ;;  %3491 = vmatprep.mubr.msk.bf16.mxu0 %vm3773_vm0, %v3772_v1 }
  0xa6   : > { %3567 = vmatprep.mubr.msk.bf16.mxu1 %vm3773_vm0, %v3772_v1 }
  0xac   : > { %3492 = vmatmul.mubr.msk.bf16.gmra.mxu0 %vm521_vm2, %v1120_v20 }
  0xad   : > { %3568 = vmatmul.mubr.msk.bf16.gmra.mxu1 %vm521_vm2, %v1537_v19  ;;  %3495 = vmatprep.mubr.msk.bf16.mxu0 %vm3773_vm0, %v3772_v1  ;;  %v1551_v19 = vsel %vm1532_vm3, %v1548_v63, %v1550_v10 }
  0xae   : > { %3571 = vmatprep.mubr.msk.bf16.mxu1 %vm3773_vm0, %v3772_v1 }
  0xb4   : > { %3496 = vmatmul.mubr.msk.bf16.gmra.mxu0 %vm521_vm2, %v1128_v28  ;;  %v1552_v28 = vrot.slane %v3756_v15, 1 }
  0xb5   : > { %3572 = vmatmul.mubr.msk.bf16.gmra.mxu1 %vm521_vm2, %v1539_v27  ;;  %3499 = vmatprep.mubr.msk.bf16.mxu0 %vm3773_vm0, %v3772_v1 }
  0xb6   : > { %3575 = vmatprep.mubr.msk.bf16.mxu1 %vm3773_vm0, %v3772_v1  ;;  %v1553_v37 = vsel %vm1532_vm3, %v1550_v10, %v1552_v28  ;;  %v1555_v55 = vsel %vm1532_vm3, %v1552_v28, %v1554_v46 }
  0xbc   : > { %3500 = vmatmul.mubr.msk.bf16.gmra.mxu0 %vm521_vm2, %v1136_v36 }
  0xbd   : > { %3576 = vmatmul.mubr.msk.bf16.gmra.mxu1 %vm521_vm2, %v1541_v35  ;;  %3503 = vmatprep.mubr.msk.bf16.mxu0 %vm3773_vm0, %v3772_v1 }
  0xbe   : > { %3579 = vmatprep.mubr.msk.bf16.mxu1 %vm3773_vm0, %v3772_v1 }
  0xc4   : > { %3504 = vmatmul.mubr.msk.bf16.gmra.mxu0 %vm521_vm2, %v1144_v44 }
  0xc5   : > { %3580 = vmatmul.mubr.msk.bf16.gmra.mxu1 %vm521_vm2, %v1543_v43  ;;  %3507 = vmatprep.mubr.msk.bf16.mxu0 %vm3773_vm0, %v3772_v1 }
  0xc6   : > { %3583 = vmatprep.mubr.msk.bf16.mxu1 %vm3773_vm0, %v3772_v1 }
  0xcc   : > { %3508 = vmatmul.mubr.msk.bf16.gmra.mxu0 %vm521_vm2, %v1152_v52 }
  0xcd   : > { %3584 = vmatmul.mubr.msk.bf16.gmra.mxu1 %vm521_vm2, %v1545_v51  ;;  %3511 = vmatprep.mubr.msk.bf16.mxu0 %vm3773_vm0, %v3772_v1  ;;  %v3758_v51 = vld [vmem:[%s3844_s8 + $0x68] sm:$0xff]  }
  0xce   : > { %3587 = vmatprep.mubr.msk.bf16.mxu1 %vm3773_vm0, %v3772_v1  ;;  %v1556_v0 = vrot.slane %v3758_v51, 1  ;;  %v1201_v15 = vshrl.u32 %v3758_v51, 16 }
  0xd0   : > { %v1557_v10 = vsel %vm1532_vm3, %v1554_v46, %v1556_v0  ;;  %v3761_v46 = vld [vmem:[%s3844_s8 + $0x80] sm:$0xff]  }
  0xd4   : > { %3512 = vmatmul.mubr.msk.bf16.gmra.mxu0 %vm521_vm2, %v1160_v60  ;;  %v1197_v60 = vshll.u32 %v3758_v51, 16 }
  0xd5   : > { %3588 = vmatmul.mubr.msk.bf16.gmra.mxu1 %vm521_vm2, %v1547_v59  ;;  %3515 = vmatprep.mubr.msk.bf16.mxu0 %vm3773_vm0, %v3772_v1  ;;  %v1193_v59 = vshrl.u32 %v3757_v33, 16 }
  0xd6   : > { %3591 = vmatprep.mubr.msk.bf16.mxu1 %vm3773_vm0, %v3772_v1 }
  0xd7   : > { %v1195_v3 = vor.u32 %v1193_v59, %v1191_v50 }
  0xdc   : > { %v607_v9 = vpop.f32.mrf.mxu0  ;;  %3516 = vmatmul.mubr.msk.bf16.gmra.mxu0 %vm521_vm2, %v1168_v5  ;;  %v1199_v5 = vrot.slane %v1197_v60, 1 }
  0xdd   : > { %v834_v8 = vpop.f32.mrf.mxu1  ;;  %3592 = vmatmul.mubr.msk.bf16.gmra.mxu1 %vm521_vm2, %v1549_v4  ;;  %3519 = vmatprep.mubr.msk.bf16.mxu0 %vm3773_vm0, %v3772_v1 }
  0xde   : > { %3595 = vmatprep.mubr.msk.bf16.mxu1 %vm3773_vm0, %v3772_v1  ;;  %v4094_v11 = vadd.f32 %v834_v8, %v607_v9  ;;  %v3337_v16 = vpop.f32.mrf.mxu0  ;;  %v1200_v14 = vsel %vm356_vm1, %v1195_v3, %v1199_v5  ;;  %v1203_v24 = vor.u32 %v1201_v15, %v1199_v5 }
  0xdf   : > { %v3413_v12 = vpop.f32.mrf.mxu1  ;;  %v1205_v16 = vshll.u32 %v3759_v6, 16 }
  0xe0   : > { %v610_v18 = vpop.f32.mrf.mxu0 }
  0xe1   : > { %v837_v17 = vpop.f32.mrf.mxu1 }
  0xe2   : > { %v4100_v20 = vadd.f32 %v837_v17, %v610_v18  ;;  %v3338_v25 = vpop.f32.mrf.mxu0 }
  0xe3   : > { %v3414_v21 = vpop.f32.mrf.mxu1  ;;  %v1207_v25 = vrot.slane %v1205_v16, 1 }
  0xe4   : > { %v615_v27 = vpop.f32.mrf.mxu0  ;;  %3520 = vmatmul.mubr.msk.bf16.gmra.mxu0 %vm521_vm2, %v1176_v22  ;;  %v1558_v21 = vrot.slane %v3759_v6, 1 }
  0xe5   : > { %v842_v26 = vpop.f32.mrf.mxu1  ;;  %3596 = vmatmul.mubr.msk.bf16.gmra.mxu1 %vm521_vm2, %v1551_v19  ;;  %3523 = vmatprep.mubr.msk.bf16.mxu0 %vm3773_vm0, %v3772_v1 }
  0xe6   : > { %3599 = vmatprep.mubr.msk.bf16.mxu1 %vm3773_vm0, %v3772_v1  ;;  %v4107_v29 = vadd.f32 %v842_v26, %v615_v27  ;;  %v3341_v34 = vpop.f32.mrf.mxu0  ;;  %v3760_v26 = vld [vmem:[%s3844_s8 + $0x78] sm:$0xff]   ;;  %v1559_v31 = vsel %vm1532_vm3, %v1556_v0, %v1558_v21 }
  0xe7   : > { %v3417_v30 = vpop.f32.mrf.mxu1  ;;  %v1208_v34 = vsel %vm356_vm1, %v1203_v24, %v1207_v25  ;;  %v1560_v41 = vrot.slane %v3760_v26, 1 }
  0xe8   : > { %v618_v36 = vpop.f32.mrf.mxu0 }
  0xe9   : > { %v845_v35 = vpop.f32.mrf.mxu1  ;;  %v1561_v51 = vsel %vm1532_vm3, %v1558_v21, %v1560_v41 }
  0xea   : > { %v4113_v38 = vadd.f32 %v845_v35, %v618_v36  ;;  %v3342_v43 = vpop.f32.mrf.mxu0  ;;  %v1209_v35 = vshrl.u32 %v3759_v6, 16  ;;  %v1213_v36 = vshll.u32 %v3760_v26, 16 }
  0xeb   : > { %v3418_v39 = vpop.f32.mrf.mxu1 }
  0xec   : > { %v623_v45 = vpop.f32.mrf.mxu0  ;;  %3524 = vmatmul.mubr.msk.bf16.gmra.mxu0 %vm521_vm2, %v1184_v40 }
  0xed   : > { %v850_v44 = vpop.f32.mrf.mxu1  ;;  %3600 = vmatmul.mubr.msk.bf16.gmra.mxu1 %vm521_vm2, %v1553_v37  ;;  %3527 = vmatprep.mubr.msk.bf16.mxu0 %vm3773_vm0, %v3772_v1 }
  0xee   : > { %3603 = vmatprep.mubr.msk.bf16.mxu1 %vm3773_vm0, %v3772_v1  ;;  %v4120_v47 = vadd.f32 %v850_v44, %v623_v45  ;;  %v3345_v52 = vpop.f32.mrf.mxu0  ;;  %v1211_v44 = vor.u32 %v1209_v35, %v1207_v25  ;;  %v1215_v45 = vrot.slane %v1213_v36, 1 }
  0xef   : > { %v3421_v48 = vpop.f32.mrf.mxu1 }
  0xf0   : > { %v626_v54 = vpop.f32.mrf.mxu0 }
  0xf1   : > { %v853_v53 = vpop.f32.mrf.mxu1 }
  0xf2   : > { %v4126_v56 = vadd.f32 %v853_v53, %v626_v54  ;;  %v3346_v61 = vpop.f32.mrf.mxu0  ;;  %v1216_v54 = vsel %vm356_vm1, %v1211_v44, %v1215_v45 }
  0xf3   : > { %v3422_v57 = vpop.f32.mrf.mxu1  ;;  %v1562_v61 = vrot.slane %v3761_v46, 1 }
  0xf4   : > { %v631_v63 = vpop.f32.mrf.mxu0  ;;  %3528 = vmatmul.mubr.msk.bf16.gmra.mxu0 %vm521_vm2, %v1192_v58  ;;  %v1221_v57 = vshll.u32 %v3761_v46, 16 }
  0xf5   : > { %v858_v62 = vpop.f32.mrf.mxu1  ;;  %3604 = vmatmul.mubr.msk.bf16.gmra.mxu1 %vm521_vm2, %v1555_v55  ;;  %3531 = vmatprep.mubr.msk.bf16.mxu0 %vm3773_vm0, %v3772_v1  ;;  %v1217_v55 = vshrl.u32 %v3760_v26, 16  ;;  %v3763_v26 = vld [vmem:[%s3844_s8 + $0x90] ss:$0 sps:$4 sm:$0x11]  }
  0xf6   : > { %3607 = vmatprep.mubr.msk.bf16.mxu1 %vm3773_vm0, %v3772_v1  ;;  %v4133_v2 = vadd.f32 %v858_v62, %v631_v63  ;;  %v3349_v7 = vpop.f32.mrf.mxu0  ;;  %v1223_v3 = vrot.slane %v1221_v57, 1 }
  0xf7   : > { %v3425_v4 = vpop.f32.mrf.mxu1  ;;  %v1219_v0 = vor.u32 %v1217_v55, %v1215_v45 }
  0xf8   : > { %v634_v9 = vpop.f32.mrf.mxu0  ;;  %v3762_v4 = vld [vmem:[%s3844_s8 + $0x88] sm:$0xff]  }
  0xf9   : > { %v861_v8 = vpop.f32.mrf.mxu1  ;;  %v1229_v15 = vshll.u32 %v3762_v4, 16  ;;  %v1233_v36 = vshrl.u32 %v3762_v4, 16 }
  0xfa   : > { %v4139_v12 = vadd.f32 %v861_v8, %v634_v9  ;;  %v3350_v17 = vpop.f32.mrf.mxu0  ;;  %v1563_v8 = vsel %vm1532_vm3, %v1560_v41, %v1562_v61 }
  0xfb   : > { %v3426_v13 = vpop.f32.mrf.mxu1  ;;  %v1231_v25 = vrot.slane %v1229_v15, 1 }
  0xfc   : > { %v639_v19 = vpop.f32.mrf.mxu0  ;;  %3532 = vmatmul.mubr.msk.bf16.gmra.mxu0 %vm521_vm2, %v1200_v14  ;;  %v1224_v13 = vsel %vm356_vm1, %v1219_v0, %v1223_v3  ;;  %v1225_v14 = vshrl.u32 %v3761_v46, 16 }
  0xfd   : > { %v866_v18 = vpop.f32.mrf.mxu1  ;;  %3608 = vmatmul.mubr.msk.bf16.gmra.mxu1 %vm521_vm2, %v1557_v10  ;;  %3535 = vmatprep.mubr.msk.bf16.mxu0 %vm3773_vm0, %v3772_v1  ;;  %v1235_v46 = vor.u32 %v1233_v36, %v1231_v25 }
  0xfe   : > { %3611 = vmatprep.mubr.msk.bf16.mxu1 %vm3773_vm0, %v3772_v1  ;;  %v4146_v22 = vadd.f32 %v866_v18, %v639_v19  ;;  %v3353_v27 = vpop.f32.mrf.mxu0  ;;  %v1564_v19 = vrot.slane %v3762_v4, 1  ;;  %v1227_v24 = vor.u32 %v1225_v14, %v1223_v3 }
  0xff   : > { %v3429_v23 = vpop.f32.mrf.mxu1 }
 0x100   : > { %v642_v30 = vpop.f32.mrf.mxu0  ;;  %v1232_v35 = vsel %vm356_vm1, %v1227_v24, %v1231_v25  ;;  %v2017_v25 = vlaneseq }
 0x101   : > { %v869_v28 = vpop.f32.mrf.mxu1 }
 0x102   : > { %v4152_v32 = vadd.f32 %v869_v28, %v642_v30  ;;  %v3354_v37 = vpop.f32.mrf.mxu0 }
 0x103   : > { %v3430_v33 = vpop.f32.mrf.mxu1  ;;  %v1237_v37 = vshll.u32 %v3763_v26, 16 }
 0x104   : > { %v647_v40 = vpop.f32.mrf.mxu0  ;;  %3536 = vmatmul.mubr.msk.bf16.gmra.mxu0 %vm521_vm2, %v1208_v34 }
 0x105   : > { %v874_v39 = vpop.f32.mrf.mxu1  ;;  %3612 = vmatmul.mubr.msk.bf16.gmra.mxu1 %vm521_vm2, %v1559_v31  ;;  %3539 = vmatprep.mubr.msk.bf16.mxu0 %vm3773_vm0, %v3772_v1  ;;  %v1565_v31 = vsel %vm1532_vm3, %v1562_v61, %v1564_v19 }
 0x106   : > { %3615 = vmatprep.mubr.msk.bf16.mxu1 %vm3773_vm0, %v3772_v1  ;;  %v4159_v42 = vadd.f32 %v874_v39, %v647_v40  ;;  %v3357_v48 = vpop.f32.mrf.mxu0 }
 0x107   : > { %v3433_v43 = vpop.f32.mrf.mxu1  ;;  %v1239_v48 = vrot.slane %v1237_v37, 1 }
 0x108   : > { %v650_v50 = vpop.f32.mrf.mxu0  ;;  %v1566_v43 = vrot.slane %v3763_v26, 1 }
 0x109   : > { %v877_v49 = vpop.f32.mrf.mxu1  ;;  %v1240_v57 = vsel %vm356_vm1, %v1235_v46, %v1239_v48 }
 0x10a   : > { %v4165_v52 = vadd.f32 %v877_v49, %v650_v50  ;;  %v3358_v58 = vpop.f32.mrf.mxu0 }
 0x10b   : > { %v3434_v53 = vpop.f32.mrf.mxu1 }
 0x10c   : > { %v655_v60 = vpop.f32.mrf.mxu0  ;;  %3540 = vmatmul.mubr.msk.bf16.gmra.mxu0 %vm521_vm2, %v1216_v54  ;;  %v1567_v53 = vsel %vm1532_vm3, %v1564_v19, %v1566_v43 }
 0x10d   : > { %v882_v59 = vpop.f32.mrf.mxu1  ;;  %3616 = vmatmul.mubr.msk.bf16.gmra.mxu1 %vm521_vm2, %v1561_v51  ;;  %3543 = vmatprep.mubr.msk.bf16.mxu0 %vm3773_vm0, %v3772_v1 }
 0x10e   : > { %3619 = vmatprep.mubr.msk.bf16.mxu1 %vm3773_vm0, %v3772_v1  ;;  %v4172_v62 = vadd.f32 %v882_v59, %v655_v60  ;;  %v3361_v5 = vpop.f32.mrf.mxu0 }
 0x10f   : > { %v3437_v63 = vpop.f32.mrf.mxu1 }
 0x110   : > { %v658_v7 = vpop.f32.mrf.mxu0 }
 0x111   : > { %v885_v6 = vpop.f32.mrf.mxu1 }
 0x112   : > { %v4178_v9 = vadd.f32 %v885_v6, %v658_v7  ;;  %v3362_v16 = vpop.f32.mrf.mxu0 }
 0x113   : > { %v3438_v10 = vpop.f32.mrf.mxu1 }
 0x114   : > { %v663_v18 = vpop.f32.mrf.mxu0  ;;  %3544 = vmatmul.mubr.msk.bf16.gmra.mxu0 %vm521_vm2, %v1224_v13 }
 0x115   : > { %v890_v17 = vpop.f32.mrf.mxu1  ;;  %3620 = vmatmul.mubr.msk.bf16.gmra.mxu1 %vm521_vm2, %v1563_v8  ;;  %3547 = vmatprep.mubr.msk.bf16.mxu0 %vm3773_vm0, %v3772_v1 }
 0x116   : > { %3623 = vmatprep.mubr.msk.bf16.mxu1 %vm3773_vm0, %v3772_v1  ;;  %v4185_v21 = vadd.f32 %v890_v17, %v663_v18  ;;  %v3365_v27 = vpop.f32.mrf.mxu0 }
 0x117   : > { %v3441_v23 = vpop.f32.mrf.mxu1 }
 0x118   : > { %v666_v30 = vpop.f32.mrf.mxu0 }
 0x119   : > { %v893_v28 = vpop.f32.mrf.mxu1 }
 0x11a   : > { %v4191_v33 = vadd.f32 %v893_v28, %v666_v30  ;;  %v3366_v39 = vpop.f32.mrf.mxu0 }
 0x11b   : > { %v3442_v34 = vpop.f32.mrf.mxu1 }
 0x11c   : > { %v671_v41 = vpop.f32.mrf.mxu0  ;;  %3548 = vmatmul.mubr.msk.bf16.gmra.mxu0 %vm521_vm2, %v1232_v35  ;;  %v4218_v34 = vshrl.u32 %v2017_v25, 7 }
 0x11d   : > { %v898_v40 = vpop.f32.mrf.mxu1  ;;  %3624 = vmatmul.mubr.msk.bf16.gmra.mxu1 %vm521_vm2, %v1565_v31  ;;  %3551 = vmatprep.mubr.msk.bf16.mxu0 %vm3773_vm0, %v3772_v1 }
 0x11e   : > { %3627 = vmatprep.mubr.msk.bf16.mxu1 %vm3773_vm0, %v3772_v1  ;;  %v4198_v44 = vadd.f32 %v898_v40, %v671_v41  ;;  %v3369_v49 = vpop.f32.mrf.mxu0  ;;  %v2019_v39 = vadd.s32 8, %v4218_v34  ;;  %v2020_v46 = vadd.s32 16, %v4218_v34 }
 0x11f   : > { %v3445_v45 = vpop.f32.mrf.mxu1 }
 0x120   : > { %v674_v51 = vpop.f32.mrf.mxu0  ;;  %v4224_v43 = vmul.u32.u64.low 4042322161, %v4218_v34  ;;  %v4225_v45 = vmul.u32.u64.high 4042322161, %v4218_v34, %v4224_v43 }
 0x121   : > { %v901_v50 = vpop.f32.mrf.mxu1 }
 0x122   : > { %v4203_v54 = vadd.f32 %v901_v50, %v674_v51  ;;  %v3370_v58 = vpop.f32.mrf.mxu0 }
 0x123   : > { %v3446_v55 = vpop.f32.mrf.mxu1 }
 0x124   : > { %v679_v60 = vpop.f32.mrf.mxu0  ;;  %3552 = vmatmul.mubr.msk.bf16.gmra.mxu0 %vm521_vm2, %v1240_v57  ;;  %v4234_v55 = vadd.s32 24, %v4218_v34 }
 0x125   : > { %v906_v59 = vpop.f32.mrf.mxu1  ;;  %3628 = vmatmul.mubr.msk.bf16.gmra.mxu1 %vm521_vm2, %v1567_v53  ;;  %v4230_v51 = vmul.u32.u64.low 4042322161, %v2019_v39  ;;  %v4231_v53 = vmul.u32.u64.high 4042322161, %v2019_v39, %v4230_v51 }
 0x126   : > { %v4208_v1 = vadd.f32 %v906_v59, %v679_v60  ;;  %v3373_v63 = vpop.f32.mrf.mxu0  ;;  %v4236_v59 = vmul.u32.u64.low 4042322161, %v2020_v46  ;;  %v4237_v60 = vmul.u32.u64.high 4042322161, %v2020_v46, %v4236_v59 }
 0x127   : > { %v3449_v61 = vpop.f32.mrf.mxu1 }
 0x128   : > { %v682_v3 = vpop.f32.mrf.mxu0 }
 0x129   : > { %v909_v0 = vpop.f32.mrf.mxu1 }
 0x12a   : > { %v4210_v4 = vadd.f32 %v909_v0, %v682_v3  ;;  %v3374_v6 = vpop.f32.mrf.mxu0 }
 0x12b   : > { %v3450_v5 = vpop.f32.mrf.mxu1 }
 0x12c   : > { %5593 = vst [vmem:[#allocation2_spill] sm:$0xff] %v4210_v4  ;;  %v687_v8 = vpop.f32.mrf.mxu0  ;;  %v4242_v3 = vmul.u32.u64.low 4042322161, %v4234_v55  ;;  %v4243_v5 = vmul.u32.u64.high 4042322161, %v4234_v55, %v4242_v3 }
 0x12d   : > { %v914_v7 = vpop.f32.mrf.mxu1 }
 0x12e   : > { %v4212_v10 = vadd.f32 %v914_v7, %v687_v8  ;;  %v3377_v14 = vpop.f32.mrf.mxu0  ;;  %v2058_v8 = vshrl.u32 %v4225_v45, 4  ;;  %v2091_v45 = vshrl.u32 %v4243_v5, 4 }
 0x12f   : > { %v3453_v13 = vpop.f32.mrf.mxu1 }
 0x130   : > { %5594 = vst [vmem:[#allocation3_spill] sm:$0xff] %v4212_v10  ;;  %v690_v16 = vpop.f32.mrf.mxu0  ;;  %v2059_v25 = vmul.u32 17, %v2058_v8 }
 0x131   : > { %v917_v15 = vpop.f32.mrf.mxu1 }
 0x132   : > { %v4214_v17 = vadd.f32 %v917_v15, %v690_v16  ;;  %v3378_v19 = vpop.f32.mrf.mxu0  ;;  %v4249_v15 = vadd.s32 32, %v4218_v34  ;;  %v4286_v5 = vsub.s32 %v4218_v34, %v2059_v25 }
 0x133   : > { %v3454_v18 = vpop.f32.mrf.mxu1 }
 0x134   : > { %5595 = vst [vmem:[#allocation4_spill] sm:$0xff] %v4214_v17  ;;  %v695_v24 = vpop.f32.mrf.mxu0  ;;  %v2069_v18 = vshrl.u32 %v4231_v53, 4  ;;  %v4274_v53 = vadd.s32 64, %v4218_v34  ;;  %vm2426_vm4 = vcmp.ne.s32.totalorder %v4286_v5, 0  ;;  %vm2460_vm5 = vcmp.lt.s32.totalorder %v4286_v5, 0 }
 0x135   : > { %v922_v23 = vpop.f32.mrf.mxu1  ;;  %vm4350_vm11 = vmand %vm2460_vm5, %vm2426_vm4 }
 0x136   : > { %v4216_v26 = vadd.f32 %v922_v23, %v695_v24  ;;  %v3381_v28 = vpop.f32.mrf.mxu0  ;;  %v4253_v23 = vadd.s32 40, %v4218_v34  ;;  %v2070_v43 = vmul.u32 17, %v2069_v18  ;;  %v4295_v18 = vadd.s32 80, %v4218_v34 }
 0x137   : > { %v3457_v27 = vpop.f32.mrf.mxu1  ;;  %v4257_v28 = vadd.s32 48, %v4218_v34 }
 0x138   : > { %5596 = vst [vmem:[#allocation5_spill] sm:$0xff] %v4216_v26  ;;  %v698_v31 = vpop.f32.mrf.mxu0  ;;  %v2080_v27 = vshrl.u32 %v4237_v60, 4 }
 0x139   : > { %v925_v30 = vpop.f32.mrf.mxu1 }
 0x13a   : > { %v4220_v35 = vadd.f32 %v925_v30, %v698_v31  ;;  %v3382_v37 = vpop.f32.mrf.mxu0  ;;  %v2081_v59 = vmul.u32 17, %v2080_v27 }
 0x13b   : > { %v3458_v36 = vpop.f32.mrf.mxu1 }
 0x13c   : > { %5597 = vst [vmem:[#allocation6_spill] sm:$0xff] %v4220_v35  ;;  %v703_v41 = vpop.f32.mrf.mxu0  ;;  %v4262_v36 = vmul.u32.u64.low 4042322161, %v4249_v15  ;;  %v4263_v37 = vmul.u32.u64.high 4042322161, %v4249_v15, %v4262_v36 }
 0x13d   : > { %v930_v40 = vpop.f32.mrf.mxu1 }
 0x13e   : > { %v4228_v48 = vadd.f32 %v930_v40, %v703_v41  ;;  %v3385_v50 = vpop.f32.mrf.mxu0  ;;  %v4266_v40 = vadd.s32 56, %v4218_v34 }
 0x13f   : > { %v3461_v49 = vpop.f32.mrf.mxu1  ;;  %v4270_v50 = vmul.u32.u64.low 4042322161, %v4253_v23  ;;  %v4271_v51 = vmul.u32.u64.high 4042322161, %v4253_v23, %v4270_v50 }
 0x140   : > { %5598 = vst [vmem:[#allocation7_spill] sm:$0xff] %v4228_v48  ;;  %v706_v58 = vpop.f32.mrf.mxu0 }
 0x141   : > { %v933_v57 = vpop.f32.mrf.mxu1 }
 0x142   : > { %v4239_v61 = vadd.f32 %v933_v57, %v706_v58  ;;  %v3386_v0 = vpop.f32.mrf.mxu0  ;;  %v4277_v57 = vadd.s32 72, %v4218_v34 }
 0x143   : > { %v3462_v63 = vpop.f32.mrf.mxu1 }
 0x144   : > { %5599 = vst [vmem:[#allocation8_spill] sm:$0xff] %v4239_v61  ;;  %v711_v7 = vpop.f32.mrf.mxu0  ;;  %v4280_v60 = vmul.u32.u64.low 4042322161, %v4257_v28  ;;  %v4281_v63 = vmul.u32.u64.high 4042322161, %v4257_v28, %v4280_v60 }
 0x145   : > { %v938_v6 = vpop.f32.mrf.mxu1 }
 0x146   : > { %v4246_v13 = vadd.f32 %v938_v6, %v711_v7  ;;  %v3389_v16 = vpop.f32.mrf.mxu0  ;;  %v4289_v6 = vmul.u32.u64.low 4042322161, %v4266_v40  ;;  %v4290_v7 = vmul.u32.u64.high 4042322161, %v4266_v40, %v4289_v6 }
 0x147   : > { %v3465_v14 = vpop.f32.mrf.mxu1  ;;  %v2092_v16 = vmul.u32 17, %v2091_v45 }
 0x148   : > { %5600 = vst [vmem:[#allocation9_spill] sm:$0xff] %v4246_v13  ;;  %v714_v24 = vpop.f32.mrf.mxu0  ;;  %v4292_v14 = vsub.s32 %v2019_v39, %v2070_v43  ;;  %v2102_v43 = vshrl.u32 %v4263_v37, 4  ;;  %v2113_v37 = vshrl.u32 %v4271_v51, 4 }
 0x149   : > { %v941_v19 = vpop.f32.mrf.mxu1  ;;  %v4313_v50 = vsub.s32 %v4234_v55, %v2092_v16  ;;  %v4332_v16 = vadd.s32 96, %v4218_v34 }
 0x14a   : > { %v4259_v30 = vadd.f32 %v941_v19, %v714_v24  ;;  %v3390_v41 = vpop.f32.mrf.mxu0  ;;  %v4298_v24 = vmul.u32.u64.low 4042322161, %v4274_v53  ;;  %v4299_v27 = vmul.u32.u64.high 4042322161, %v4274_v53, %v4298_v24  ;;  %vm2427_vm6 = vcmp.ne.s32.totalorder %v4292_v14, 0 }
 0x14b   : > { %v3466_v31 = vpop.f32.mrf.mxu1  ;;  %v4305_v41 = vsub.s32 %v2020_v46, %v2081_v59  ;;  %v4320_v46 = vadd.s32 88, %v4218_v34  ;;  %vm2461_vm7 = vcmp.lt.s32.totalorder %v4292_v14, 0  ;;  %v4327_v55 = vadd.s32 17, %v4292_v14 }
 0x14c   : > { %5601 = vst [vmem:[#allocation10_spill] sm:$0xff] %v4259_v30  ;;  %v719_v58 = vpop.f32.mrf.mxu0  ;;  %v4302_v31 = vmul.u32.u64.low 4042322161, %v4277_v57  ;;  %v4303_v25 = vmul.u32.u64.high 4042322161, %v4277_v57, %v4302_v31  ;;  %vm2429_vm10 = vcmp.ne.s32.totalorder %v4313_v50, 0  ;;  %vm2463_vm12 = vcmp.lt.s32.totalorder %v4313_v50, 0  ;;  %vm4361_vm13 = vmand %vm2461_vm7, %vm2427_vm6 }
 0x14d   : > { %v946_v49 = vpop.f32.mrf.mxu1  ;;  %vm2428_vm8 = vcmp.ne.s32.totalorder %v4305_v41, 0  ;;  %vm2462_vm9 = vcmp.lt.s32.totalorder %v4305_v41, 0  ;;  %v2103_v31 = vmul.u32 17, %v2102_v43  ;;  %v2146_v43 = vshrl.u32 %v4299_v27, 4  ;;  %vm4392_vm15 = vmand %vm2463_vm12, %vm2429_vm10 }
 0x14e   : > { %v4283_v0 = vadd.f32 %v946_v49, %v719_v58  ;;  %v3393_v8 = vpop.f32.mrf.mxu0  ;;  %v4316_v58 = vmul.u32.u64.low 4042322161, %v4295_v18  ;;  %v4317_v60 = vmul.u32.u64.high 4042322161, %v4295_v18, %v4316_v58  ;;  %vm4378_vm14 = vmand %vm2462_vm9, %vm2428_vm8  ;;  %v4383_v30 = vadd.s32 17, %v4313_v50 }
 0x14f   : > { %v3469_v3 = vpop.f32.mrf.mxu1  ;;  %v2124_v8 = vshrl.u32 %v4281_v63, 4  ;;  %v4344_v63 = vadd.s32 104, %v4218_v34 }
 0x150   : > { %5602 = vst [vmem:[#allocation11_spill] sm:$0xff] %v4283_v0  ;;  %v722_v36 = vpop.f32.mrf.mxu0  ;;  %v2528_v3 = vadd.s32 17, %v4286_v5 }
 0x151   : > { %v949_v19 = vpop.f32.mrf.mxu1 }
 0x152   : > { %v4307_v49 = vadd.f32 %v949_v19, %v722_v36  ;;  %v3394_v45 = vpop.f32.mrf.mxu0  ;;  %v2135_v36 = vshrl.u32 %v4290_v7, 4  ;;  %v2114_v7 = vmul.u32 17, %v2113_v37 }
 0x153   : > { %v3470_v39 = vpop.f32.mrf.mxu1 }
 0x154   : > { %5603 = vst [vmem:[#allocation12_spill] sm:$0xff] %v4307_v49  ;;  %v727_v6 = vpop.f32.mrf.mxu0  ;;  %v4340_v39 = vmul.u32.u64.low 4042322161, %v4320_v46  ;;  %v4341_v45 = vmul.u32.u64.high 4042322161, %v4320_v46, %v4340_v39  ;;  %v4369_v49 = vmul.u32.u64.low 4042322161, %v4332_v16  ;;  %v4370_v37 = vmul.u32.u64.high 4042322161, %v4332_v16, %v4369_v49 }
 0x155   : > { %v954_v59 = vpop.f32.mrf.mxu1  ;;  %v4366_v39 = vadd.s32 17, %v4305_v41  ;;  %v2136_v13 = vmul.u32 17, %v2135_v36 }
 0x156   : > { %v4334_v19 = vadd.f32 %v954_v59, %v727_v6  ;;  %v3397_v51 = vpop.f32.mrf.mxu0  ;;  %v2157_v6 = vshrl.u32 %v4303_v25, 4 }
 0x157   : > { %v3473_v24 = vpop.f32.mrf.mxu1 }
 0x158   : > { %5604 = vst [vmem:[#allocation13_spill] sm:$0xff] %v4334_v19  ;;  %v730_v24 = vpop.f32.mrf.mxu0  ;;  %v2125_v19 = vmul.u32 17, %v2124_v8  ;;  %v4386_v8 = vsub.s32 %v4249_v15, %v2103_v31  ;;  %v2562_v15 = vsel %vm4350_vm11, %v2528_v3, %v4286_v5  ;;  %v2147_v31 = vmul.u32 17, %v2146_v43 }
 0x159   : > { %v957_v58 = vpop.f32.mrf.mxu1  ;;  %v2158_v36 = vmul.u32 17, %v2157_v6  ;;  %vm4428_vm1 = vcmp.lt.s32.totalorder %v2562_v15, 16  ;;  %v4451_v43 = vadd.s32 112, %v4218_v34 }
 0x15a   : > { %v4372_v27 = vadd.f32 %v957_v58, %v730_v24  ;;  %v3398_v61 = vpop.f32.mrf.mxu0  ;;  %v2168_v58 = vshrl.u32 %v4317_v60, 4  ;;  %v2563_v60 = vsel %vm4361_vm13, %v4327_v55, %v4292_v14  ;;  %v4416_v35 = vsub.s32 %v4257_v28, %v2125_v19 }
 0x15b   : > { %v3474_v25 = vpop.f32.mrf.mxu1  ;;  %v4405_v61 = vsub.s32 %v4253_v23, %v2114_v7  ;;  %vm2430_vm0 = vcmp.ne.s32.totalorder %v4386_v8, 0  ;;  %v4426_v14 = vsub.s32 %v4266_v40, %v2136_v13  ;;  %vm2464_vm2 = vcmp.lt.s32.totalorder %v4386_v8, 0 }
 0x15c   : > { %5609 = vst [vmem:[#allocation14_spill] sm:$0xff] %v4372_v27  ;;  %v4398_v24 = vmul.u32.u64.low 4042322161, %v4344_v63  ;;  %v4399_v25 = vmul.u32.u64.high 4042322161, %v4344_v63, %v4398_v24  ;;  %v735_v48 = vpop.f32.mrf.mxu0  ;;  %v2169_v28 = vmul.u32 17, %v2168_v58  ;;  %v4440_v13 = vsub.s32 %v4274_v53, %v2147_v31  ;;  %vm4468_vm10 = vmand %vm2464_vm2, %vm2430_vm0 }
 0x15d   : > { %v962_v27 = vpop.f32.mrf.mxu1  ;;  %v2564_v24 = vsel %vm4378_vm14, %v4366_v39, %v4305_v41  ;;  %v2179_v41 = vshrl.u32 %v4341_v45, 4  ;;  %vm2431_vm3 = vcmp.ne.s32.totalorder %v4405_v61, 0  ;;  %vm2465_vm4 = vcmp.lt.s32.totalorder %v4405_v61, 0 }
 0x15e   : > { %v4418_v5 = vadd.f32 %v962_v27, %v735_v48  ;;  %v3401_v55 = vpop.f32.mrf.mxu0  ;;  %v4434_v48 = vadd.s32 17, %v4386_v8  ;;  %v4443_v40 = vsub.s32 %v4277_v57, %v2158_v36  ;;  %v4446_v7 = vadd.s32 17, %v4405_v61  ;;  %vm4481_vm13 = vmand %vm2465_vm4, %vm2431_vm3 }
 0x15f   : > { %v3477_v23 = vpop.f32.mrf.mxu1  ;;  %vm2432_vm6 = vcmp.ne.s32.totalorder %v4416_v35, 0  ;;  %v2190_v45 = vshrl.u32 %v4370_v37, 4  ;;  %vm2466_vm7 = vcmp.lt.s32.totalorder %v4416_v35, 0  ;;  %v4457_v53 = vadd.s32 17, %v4416_v35 }
 0x160   : > { %5614 = vst [vmem:[#allocation15_spill] sm:$0xff] %v4418_v5  ;;  %v738_v59 = vpop.f32.mrf.mxu0  ;;  %vm2433_vm8 = vcmp.ne.s32.totalorder %v4426_v14, 0  ;;  %vm4460_vm9 = vcmp.lt.s32.totalorder %v2563_v60, 16  ;;  %vm2467_vm11 = vcmp.lt.s32.totalorder %v4426_v14, 0  ;;  %v4474_v27 = vsub.s32 %v4295_v18, %v2169_v28  ;;  %vm4494_vm12 = vmand %vm2466_vm7, %vm2432_vm6 }
 0x161   : > { %v965_v19 = vpop.f32.mrf.mxu1  ;;  %v2180_v58 = vmul.u32 17, %v2179_v41  ;;  %v2201_v15 = vshrl.u32 %v4399_v25, 4  ;;  %vm2434_vm14 = vcmp.ne.s32.totalorder %v4440_v13, 0  ;;  %vm2468_vm0 = vcmp.lt.s32.totalorder %v4440_v13, 0  ;;  %vm4510_vm3 = vmand %vm2467_vm11, %vm2433_vm8 }
 0x162   : > { %v4453_v6 = vadd.f32 %v965_v19, %v738_v59  ;;  %v3402_v57 = vpop.f32.mrf.mxu0  ;;  %vm2435_vm2 = vcmp.ne.s32.totalorder %v4443_v40, 0  ;;  %vm2469_vm5 = vcmp.lt.s32.totalorder %v4443_v40, 0  ;;  %v2191_v60 = vmul.u32 17, %v2190_v45  ;;  %vm4531_vm6 = vmand %vm2468_vm0, %vm2434_vm14 }
 0x163   : > { %v3478_v51 = vpop.f32.mrf.mxu1  ;;  %v4499_v23 = vmul.u32.u64.low 4042322161, %v4451_v43  ;;  %v4500_v55 = vmul.u32.u64.high 4042322161, %v4451_v43, %v4499_v23  ;;  %v4503_v28 = vadd.s32 120, %v4218_v34  ;;  %v4515_v45 = vadd.s32 17, %v4426_v14  ;;  %vm4556_vm11 = vmand %vm2469_vm5, %vm2435_vm2 }
 0x164   : > { %5617 = vst [vmem:[#allocation16_spill] sm:$0xff] %v4453_v6  ;;  %v1350_v18 = vpop.f32.mrf.mxu0  ;;  %v4518_v51 = vadd.s32 17, %v4440_v13  ;;  %v4521_v57 = vadd.s32 17, %v4443_v40  ;;  %vm4523_vm4 = vcmp.lt.s32.totalorder %v2564_v24, 16  ;;  %vm2436_vm7 = vcmp.ne.s32.totalorder %v4474_v27, 0 }
 0x165   : > { %v1677_v31 = vpop.f32.mrf.mxu1  ;;  %v1485_v41 = vadd.f32 %v1350_v18, %v4094_v11  ;;  %vm2470_vm8 = vcmp.lt.s32.totalorder %v4474_v27, 0  ;;  %v2566_v6 = vsel %vm4468_vm10, %v4434_v48, %v4386_v8  ;;  %v2567_v5 = vsel %vm4481_vm13, %v4446_v7, %v4405_v61 }
 0x166   : > { %v3489_v23 = vpop.f32.mrf.mxu0  ;;  %v4566_v61 = vadd.s32 17, %v4474_v27  ;;  %v4569_v48 = vsub.s32 %v4332_v16, %v2191_v60  ;;  %v4572_v7 = vmul.u32.u64.low 4042322161, %v4503_v28  ;;  %v4573_v37 = vmul.u32.u64.high 4042322161, %v4503_v28, %v4572_v7  ;;  %vm4586_vm5 = vmand %vm2470_vm8, %vm2436_vm7 }
 0x167   : > { %v3565_v19 = vpop.f32.mrf.mxu1  ;;  %v2202_v23 = vmul.u32 17, %v2201_v15  ;;  %v1812_v24 = vadd.f32 %v1677_v31, %v1485_v41  ;;  %vm5640_vm2 = vcmask 261120   ;;  %vm4632_vm8 = vcmp.lt.s32.totalorder %v2566_v6, 16 }
 0x168   : > { %v4538_v19 = vsub.s32 %v4320_v46, %v2180_v58  ;;  %v1353_v8 = vpop.f32.mrf.mxu0  ;;  %vm2472_vm0 = vcmp.lt.s32.totalorder %v4569_v48, 0  ;;  %vm5641_vm7 = vmmov %vm5640_vm2  ;;  %vm5644_vm14 = vcmask 257024   ;;  %v5659_v0 = vsel %vm4494_vm12, %v4457_v53, %v4416_v35 }
 0x169   : > { %v1680_v3 = vpop.f32.mrf.mxu1  ;;  %v3209_v58 = vpack.c.bf16 %v1812_v24, %v1812_v24  ;;  %v2698_v15 = vsel %vm4428_vm1, %v1812_v24, 0.0  ;;  %v1486_v31 = vadd.f32 %v1353_v8, %v4100_v20  ;;  %v5636_v20 = vsel %vm4392_vm15, %v4383_v30, %v4313_v50 }
 0x16a   : > { %v3490_v60 = vpop.f32.mrf.mxu0  ;;  %vm4595_vm1 = vcmp.lt.s32.totalorder %v5636_v20, 16  ;;  %vm2437_vm10 = vcmp.ne.s32.totalorder %v4538_v19, 0  ;;  %v4609_v49 = vsub.s32 %v4344_v63, %v2202_v23  ;;  %vm5639_vm15 = vcmask 257024  }
 0x16b   : > { %v3566_v36 = vpop.f32.mrf.mxu1  ;;  %1983 = vst.msk [vmem:[%s4563_s6] sm:$0xf] %vm5639_vm15, %v3209_v58  ;;  %v1813_v30 = vadd.f32 %v1680_v3, %v1486_v31  ;;  %vm2471_vm13 = vcmp.lt.s32.totalorder %v4538_v19, 0  ;;  %v4615_v7 = vadd.s32 17, %v4538_v19  ;;  %v2808_v60 = vmul.f32 %v2698_v15, %v2698_v15 }
 0x16c   : > { %v4618_v36 = vadd.s32 128, %v4218_v34  ;;  %v1358_v20 = vpop.f32.mrf.mxu0  ;;  %v2212_v3 = vshrl.u32 %v4500_v55, 4  ;;  %v2733_v24 = vsel %vm5640_vm2, %v2698_v15, 0.0  ;;  %vm2439_vm15 = vcmp.ne.s32.totalorder %v4609_v49, 0 }
 0x16d   : > { %v1685_v50 = vpop.f32.mrf.mxu1  ;;  %v3210_v23 = vpack.c.bf16 %v1813_v30, %v1813_v30  ;;  %v2699_v58 = vsel %vm4460_vm9, %v1813_v30, 0.0  ;;  %v1487_v31 = vadd.f32 %v1358_v20, %v4107_v29  ;;  %vm5645_vm9 = vmmov %vm5640_vm2  ;;  %v4813_v46 = vadd.s32 168, %v4218_v34 }
 0x16e   : > { %v2734_v41 = vsel %vm5641_vm7, %v2699_v58, 0.0  ;;  %v2809_v26 = vmul.f32 %v2699_v58, %v2699_v58  ;;  %v3493_v17 = vpop.f32.mrf.mxu0  ;;  %v2842_v15 = vsel %vm5645_vm9, %v2808_v60, 0.0  ;;  %vm4649_vm7 = vmand %vm2471_vm13, %vm2437_vm10  ;;  %vm4658_vm9 = vcmp.lt.s32.totalorder %v2567_v5, 16 }
 0x16f   : > { %v3569_v8 = vpop.f32.mrf.mxu1  ;;  %1984 = vst.msk [vmem:[%s4563_s6 + $0x4] sm:$0xf] %vm5644_vm14, %v3210_v23  ;;  %v2735_v39 = vadd.f32 %v2734_v41, %v2733_v24  ;;  %v1814_v55 = vadd.f32 %v1685_v50, %v1487_v31  ;;  %v2213_v41 = vmul.u32 17, %v2212_v3  ;;  %v2223_v24 = vshrl.u32 %v4573_v37, 4  ;;  %vm5648_vm14 = vmmov %vm5640_vm2 }
 0x170   : > { %v4640_v8 = vmul.u32.u64.low 4042322161, %v4618_v36  ;;  %v4641_v30 = vmul.u32.u64.high 4042322161, %v4618_v36, %v4640_v8  ;;  %v2843_v20 = vsel %vm5640_vm2, %v2809_v26, 0.0  ;;  %v1361_v17 = vpop.f32.mrf.mxu0  ;;  %vm2473_vm10 = vcmp.lt.s32.totalorder %v4609_v49, 0 }
 0x171   : > { %v1688_v29 = vpop.f32.mrf.mxu1  ;;  %v2844_v50 = vadd.f32 %v2843_v20, %v2842_v15  ;;  %v3211_v23 = vpack.c.bf16 %v1814_v55, %v1814_v55  ;;  %v2700_v60 = vsel %vm4523_vm4, %v1814_v55, 0.0  ;;  %v1488_v26 = vadd.f32 %v1361_v17, %v4113_v38  ;;  %vm5652_vm4 = vmmov %vm5640_vm2 }
 0x172   : > { %v2736_v31 = vsel %vm5648_vm14, %v2700_v60, 0.0  ;;  %v2810_v8 = vmul.f32 %v2700_v60, %v2700_v60  ;;  %v3494_v10 = vpop.f32.mrf.mxu0  ;;  %v4664_v37 = vadd.s32 136, %v4218_v34  ;;  %vm5651_vm13 = vcmask 257024   ;;  %vm5663_vm12 = vmmov %vm5652_vm4 }
 0x173   : > { %v3570_v58 = vpop.f32.mrf.mxu1  ;;  %1985 = vst.msk [vmem:[%s4563_s6 + $0x8] sm:$0xf] %vm5651_vm13, %v3211_v23  ;;  %v2737_v11 = vadd.f32 %v2736_v31, %v2735_v39  ;;  %v1815_v3 = vadd.f32 %v1688_v29, %v1488_v26  ;;  %v2573_v38 = vsel %vm4649_vm7, %v4615_v7, %v4538_v19  ;;  %v4673_v10 = vadd.s32 17, %v4569_v48  ;;  %vm5658_vm13 = vmmov %vm5652_vm4 }
 0x174   : > { %v2845_v5 = vsel %vm5652_vm4, %v2810_v8, 0.0  ;;  %v1366_v15 = vpop.f32.mrf.mxu0  ;;  %vm5653_vm2 = vcmp.ne.s32.totalorder %v4569_v48, 0  ;;  %v4685_v29 = vadd.s32 17, %v4609_v49  ;;  %v4688_v20 = vsub.s32 %v4451_v43, %v2213_v41 }
 0x175   : > { %v1693_v55 = vpop.f32.mrf.mxu1  ;;  %vm4680_vm14 = vmand %vm2472_vm0, %vm5653_vm2  ;;  %v2224_v17 = vmul.u32 17, %v2223_v24  ;;  %v2846_v23 = vadd.f32 %v2845_v5, %v2844_v50  ;;  %v3212_v60 = vpack.c.bf16 %v1815_v3, %v1815_v3  ;;  %v2701_v26 = vsel %vm4595_vm1, %v1815_v3, 0.0 }
 0x176   : > { %v1489_v58 = vadd.f32 %v1366_v15, %v4120_v47  ;;  %vm4697_vm0 = vmand %vm2473_vm10, %vm2439_vm15  ;;  %v2738_v43 = vsel %vm5658_vm13, %v2701_v26, 0.0  ;;  %v2811_v41 = vmul.f32 %v2701_v26, %v2701_v26  ;;  %v3497_v24 = vpop.f32.mrf.mxu0  ;;  %vm4707_vm1 = vcmp.lt.s32.totalorder %v5659_v0, 16 }
 0x177   : > { %v3573_v31 = vpop.f32.mrf.mxu1  ;;  %v4712_v50 = vmul.u32.u64.low 4042322161, %v4664_v37  ;;  %v4713_v3 = vmul.u32.u64.high 4042322161, %v4664_v37, %v4712_v50  ;;  %vm5662_vm15 = vcmask 257024   ;;  %v2739_v5 = vadd.f32 %v2738_v43, %v2737_v11  ;;  %vm5664_vm10 = vmmov %vm5652_vm4 }
 0x178   : > { %1986 = vst.msk [vmem:[%s4563_s6 + $0xc] sm:$0xf] %vm5662_vm15, %v3212_v60  ;;  %v1816_v15 = vadd.f32 %v1693_v55, %v1489_v58  ;;  %v2234_v35 = vshrl.u32 %v4641_v30, 4  ;;  %v2847_v53 = vsel %vm5663_vm12, %v2811_v41, 0.0  ;;  %v1369_v26 = vpop.f32.mrf.mxu0  ;;  %v2575_v24 = vsel %vm4697_vm0, %v4685_v29, %v4609_v49  ;;  %vm5668_vm13 = vmmov %vm5662_vm15 }
 0x179   : > { %v1696_v31 = vpop.f32.mrf.mxu1  ;;  %v4728_v11 = vsub.s32 %v4503_v28, %v2224_v17  ;;  %v4731_v55 = vadd.s32 144, %v4218_v34  ;;  %v2848_v60 = vadd.f32 %v2847_v53, %v2846_v23  ;;  %v1490_v43 = vadd.f32 %v1369_v26, %v4126_v56 }
 0x17a   : > { %v3213_v58 = vpack.c.bf16 %v1816_v15, %v1816_v15  ;;  %v2702_v30 = vsel %vm4632_vm8, %v1816_v15, 0.0  ;;  %v3498_v25 = vpop.f32.mrf.mxu0  ;;  %v5665_v28 = vsel %vm4510_vm3, %v4515_v45, %v4426_v14  ;;  %vm2440_vm2 = vcmp.ne.s32.totalorder %v4688_v20, 0  ;;  %vm5669_vm3 = vmmov %vm5664_vm10 }
 0x17b   : > { %v3574_v41 = vpop.f32.mrf.mxu1  ;;  %v2740_v0 = vsel %vm5664_vm10, %v2702_v30, 0.0  ;;  %v2812_v50 = vmul.f32 %v2702_v30, %v2702_v30  ;;  %vm4742_vm4 = vcmp.lt.s32.totalorder %v5665_v28, 16  ;;  %vm2474_vm8 = vcmp.lt.s32.totalorder %v4688_v20, 0  ;;  %vm5670_vm15 = vmmov %vm5669_vm3 }
 0x17c   : > { %v4749_v56 = vadd.s32 152, %v4218_v34  ;;  %1987 = vst.msk [vmem:[%s4563_s6 + $0x10] sm:$0xf] %vm5668_vm13, %v3213_v58  ;;  %v2741_v63 = vadd.f32 %v2740_v0, %v2739_v5  ;;  %v1817_v23 = vadd.f32 %v1696_v31, %v1490_v43  ;;  %v4754_v59 = vadd.s32 17, %v4688_v20  ;;  %v1374_v25 = vpop.f32.mrf.mxu0 }
 0x17d   : > { %v1701_v15 = vpop.f32.mrf.mxu1  ;;  %v2235_v14 = vmul.u32 17, %v2234_v35  ;;  %v2849_v45 = vsel %vm5669_vm3, %v2812_v50, 0.0  ;;  %v4758_v53 = vmul.u32.u64.low 4042322161, %v4731_v55  ;;  %v4759_v26 = vmul.u32.u64.high 4042322161, %v4731_v55, %v4758_v53 }
 0x17e   : > { %v4762_v30 = vadd.s32 160, %v4218_v34  ;;  %v2850_v41 = vadd.f32 %v2849_v45, %v2848_v60  ;;  %v3214_v58 = vpack.c.bf16 %v1817_v23, %v1817_v23  ;;  %v2703_v5 = vsel %vm4658_vm9, %v1817_v23, 0.0  ;;  %v3501_v50 = vpop.f32.mrf.mxu0  ;;  %vm5674_vm9 = vmmov %vm5668_vm13 }
 0x17f   : > { %v1491_v31 = vadd.f32 %v1374_v25, %v4133_v2  ;;  %v3577_v43 = vpop.f32.mrf.mxu1  ;;  %v2742_v35 = vsel %vm5670_vm15, %v2703_v5, 0.0  ;;  %v2813_v0 = vmul.f32 %v2703_v5, %v2703_v5  ;;  %v5671_v28 = vsel %vm4531_vm6, %v4518_v51, %v4440_v13  ;;  %vm5675_vm13 = vmmov %vm5669_vm3 }
 0x180   : > { %vm4773_vm12 = vcmp.lt.s32.totalorder %v5671_v28, 16  ;;  %v4778_v60 = vmul.u32.u64.low 4042322161, %v4749_v56  ;;  %v4779_v4 = vmul.u32.u64.high 4042322161, %v4749_v56, %v4778_v60  ;;  %1988 = vst.msk [vmem:[%s4563_s6 + $0x14] sm:$0xf] %vm5674_vm9, %v3214_v58  ;;  %v2743_v2 = vadd.f32 %v2742_v35, %v2741_v63  ;;  %v1377_v51 = vpop.f32.mrf.mxu0  ;;  %vm5676_vm6 = vmmov %vm5669_vm3 }
 0x181   : > { %v1818_v23 = vadd.f32 %v1701_v15, %v1491_v31  ;;  %v1704_v45 = vpop.f32.mrf.mxu1  ;;  %vm2441_vm10 = vcmp.ne.s32.totalorder %v4728_v11, 0  ;;  %v2245_v18 = vshrl.u32 %v4713_v3, 4  ;;  %v2851_v13 = vsel %vm5675_vm13, %v2813_v0, 0.0 }
 0x182   : > { %v4787_v25 = vsub.s32 %v4618_v36, %v2235_v14  ;;  %v4790_v5 = vmul.u32.u64.low 4042322161, %v4762_v30  ;;  %v4791_v43 = vmul.u32.u64.high 4042322161, %v4762_v30, %v4790_v5  ;;  %v2852_v50 = vadd.f32 %v2851_v13, %v2850_v41  ;;  %v3502_v0 = vpop.f32.mrf.mxu0 }
 0x183   : > { %v3215_v58 = vpack.c.bf16 %v1818_v23, %v1818_v23  ;;  %v2704_v63 = vsel %vm4707_vm1, %v1818_v23, 0.0  ;;  %v1492_v15 = vadd.f32 %v1377_v51, %v4139_v12  ;;  %v3578_v31 = vpop.f32.mrf.mxu1  ;;  %v5677_v36 = vsel %vm4556_vm11, %v4521_v57, %v4443_v40  ;;  %vm5680_vm1 = vmmov %vm5674_vm9 }
 0x184   : > { %v2744_v3 = vsel %vm5676_vm6, %v2704_v63, 0.0  ;;  %v2814_v35 = vmul.f32 %v2704_v63, %v2704_v63  ;;  %vm4802_vm3 = vcmp.lt.s32.totalorder %v5677_v36, 16  ;;  %vm2475_vm15 = vcmp.lt.s32.totalorder %v4728_v11, 0  ;;  %vm5681_vm9 = vmmov %vm5676_vm6  ;;  %v1382_v57 = vpop.f32.mrf.mxu0 }
 0x185   : > { %v4808_v47 = vadd.s32 17, %v4728_v11  ;;  %1989 = vst.msk [vmem:[%s4563_s6 + $0x18] sm:$0xf] %vm5680_vm1, %v3215_v58  ;;  %v2745_v12 = vadd.f32 %v2744_v3, %v2743_v2  ;;  %v1819_v41 = vadd.f32 %v1704_v45, %v1492_v15  ;;  %v1709_v28 = vpop.f32.mrf.mxu1  ;;  %v2246_v60 = vmul.u32 17, %v2245_v18  ;;  %vm4826_vm6 = vmand %vm2474_vm8, %vm2440_vm2 }
 0x186   : > { %v2853_v40 = vsel %vm5681_vm9, %v2814_v35, 0.0  ;;  %vm2442_vm11 = vcmp.ne.s32.totalorder %v4787_v25, 0  ;;  %vm2476_vm13 = vcmp.lt.s32.totalorder %v4787_v25, 0  ;;  %v2256_v23 = vshrl.u32 %v4759_v26, 4  ;;  %vm5684_vm1 = vmmov %vm5681_vm9  ;;  %v3505_v26 = vpop.f32.mrf.mxu0 }
 0x187   : > { %v2854_v13 = vadd.f32 %v2853_v40, %v2852_v50  ;;  %v3216_v51 = vpack.c.bf16 %v1819_v41, %v1819_v41  ;;  %v2705_v2 = vsel %vm4742_vm4, %v1819_v41, 0.0  ;;  %v1493_v45 = vadd.f32 %v1382_v57, %v4146_v22  ;;  %v3581_v18 = vpop.f32.mrf.mxu1  ;;  %vm4850_vm8 = vmand %vm2475_vm15, %vm2441_vm10 }
 0x188   : > { %v2746_v58 = vsel %vm5684_vm1, %v2705_v2, 0.0  ;;  %v2815_v63 = vmul.f32 %v2705_v2, %v2705_v2  ;;  %v5685_v17 = vsel %vm4586_vm5, %v4566_v61, %v4474_v27  ;;  %v4841_v50 = vadd.s32 17, %v4787_v25  ;;  %vm5691_vm5 = vmmov %vm5684_vm1 }
 0x189   : > { %vm4836_vm4 = vcmp.lt.s32.totalorder %v5685_v17, 16  ;;  %v2267_v15 = vshrl.u32 %v4779_v4, 4  ;;  %vm5688_vm2 = vcmask 257024   ;;  %v2747_v31 = vadd.f32 %v2746_v58, %v2745_v12  ;;  %v1712_v35 = vpop.f32.mrf.mxu1  ;;  %v1385_v4 = vpop.f32.mrf.mxu0  ;;  %vm4867_vm10 = vmand %vm2476_vm13, %vm2442_vm11 }
 0x18a   : > { %1990 = vst.msk [vmem:[%s4563_s6 + $0x1c] sm:$0xf] %vm5688_vm2, %v3216_v51  ;;  %v1820_v3 = vadd.f32 %v1709_v28, %v1493_v45  ;;  %v4855_v61 = vmul.u32.u64.low 4042322161, %v4813_v46  ;;  %v4856_v16 = vmul.u32.u64.high 4042322161, %v4813_v46, %v4855_v61  ;;  %v2855_v0 = vsel %vm5691_vm5, %v2815_v63, 0.0  ;;  %vm5694_vm15 = vmmov %vm5684_vm1 }
 0x18b   : > { %v2576_v36 = vsel %vm4826_vm6, %v4754_v59, %v4688_v20  ;;  %v2257_v41 = vmul.u32 17, %v2256_v23  ;;  %v2278_v28 = vshrl.u32 %v4791_v43, 4  ;;  %v2856_v40 = vadd.f32 %v2855_v0, %v2854_v13  ;;  %v3582_v45 = vpop.f32.mrf.mxu1  ;;  %v3506_v63 = vpop.f32.mrf.mxu0  ;;  %vm5698_vm7 = vmmov %vm5684_vm1 }
 0x18c   : > { %v3217_v57 = vpack.c.bf16 %v1820_v3, %v1820_v3  ;;  %v2706_v51 = vsel %vm4773_vm12, %v1820_v3, 0.0  ;;  %v1494_v2 = vadd.f32 %v1385_v4, %v4152_v32  ;;  %vm4881_vm9 = vcmp.lt.s32.totalorder %v2573_v38, 16  ;;  %vm5697_vm12 = vmmov %vm5688_vm2 }
 0x18d   : > { %v2748_v18 = vsel %vm5694_vm15, %v2706_v51, 0.0  ;;  %v2816_v58 = vmul.f32 %v2706_v51, %v2706_v51  ;;  %v2577_v53 = vsel %vm4850_vm8, %v4808_v47, %v4728_v11  ;;  %v4890_v32 = vsub.s32 %v4664_v37, %v2246_v60  ;;  %v1717_v6 = vpop.f32.mrf.mxu1  ;;  %v1390_v26 = vpop.f32.mrf.mxu0  ;;  %vm5699_vm11 = vmmov %vm5684_vm1 }
 0x18e   : > { %1991 = vst.msk [vmem:[%s4563_s6 + $0x20] sm:$0xf] %vm5697_vm12, %v3217_v57  ;;  %v2749_v43 = vadd.f32 %v2748_v18, %v2747_v31  ;;  %v1821_v13 = vadd.f32 %v1712_v35, %v1494_v2  ;;  %v2578_v19 = vsel %vm4867_vm10, %v4841_v50, %v4787_v25  ;;  %v2268_v7 = vmul.u32 17, %v2267_v15  ;;  %vm5705_vm15 = vmmov %vm5698_vm7 }
 0x18f   : > { %v2857_v38 = vsel %vm5698_vm7, %v2816_v58, 0.0  ;;  %v4900_v17 = vsub.s32 %v4731_v55, %v2257_v41  ;;  %v2279_v37 = vmul.u32 17, %v2278_v28  ;;  %v4903_v60 = vadd.s32 176, %v4218_v34  ;;  %v3585_v0 = vpop.f32.mrf.mxu1  ;;  %v3509_v57 = vpop.f32.mrf.mxu0 }
 0x190   : > { %v2858_v31 = vadd.f32 %v2857_v38, %v2856_v40  ;;  %v3218_v3 = vpack.c.bf16 %v1821_v13, %v1821_v13  ;;  %v2707_v35 = vsel %vm4802_vm3, %v1821_v13, 0.0  ;;  %v1495_v61 = vadd.f32 %v1390_v26, %v4159_v42  ;;  %vm5703_vm3 = vmmov %vm5688_vm2 }
 0x191   : > { %v2750_v15 = vsel %vm5699_vm11, %v2707_v35, 0.0  ;;  %v2817_v4 = vmul.f32 %v2707_v35, %v2707_v35  ;;  %v5700_v55 = vsel %vm4680_vm14, %v4673_v10, %v4569_v48  ;;  %v4919_v28 = vadd.s32 17, %v4890_v32  ;;  %v1720_v51 = vpop.f32.mrf.mxu1  ;;  %vm5704_vm14 = vmmov %vm5691_vm5  ;;  %v1393_v2 = vpop.f32.mrf.mxu0 }
 0x192   : > { %vm4914_vm13 = vcmp.lt.s32.totalorder %v5700_v55, 16  ;;  %v4922_v14 = vadd.s32 184, %v4218_v34  ;;  %1992 = vst.msk [vmem:[%s4563_s6 + $0x24] sm:$0xf] %vm5703_vm3, %v3218_v3  ;;  %v2751_v42 = vadd.f32 %v2750_v15, %v2749_v43  ;;  %v1822_v40 = vadd.f32 %v1717_v6, %v1495_v61 }
 0x193   : > { %vm2443_vm1 = vcmp.ne.s32.totalorder %v4890_v32, 0  ;;  %vm2477_vm2 = vcmp.lt.s32.totalorder %v4890_v32, 0  ;;  %v4929_v48 = vsub.s32 %v4749_v56, %v2268_v7  ;;  %v2289_v10 = vshrl.u32 %v4856_v16, 4  ;;  %v3586_v13 = vpop.f32.mrf.mxu1  ;;  %v3510_v38 = vpop.f32.mrf.mxu0 }
 0x194   : > { %v2859_v39 = vsel %vm5704_vm14, %v2817_v4, 0.0  ;;  %vm2444_vm5 = vcmp.ne.s32.totalorder %v4900_v17, 0  ;;  %v4935_v45 = vsub.s32 %v4762_v30, %v2279_v37  ;;  %v3219_v43 = vpack.c.bf16 %v1822_v40, %v1822_v40  ;;  %vm5709_vm14 = vmmov %vm5699_vm11 }
 0x195   : > { %v4938_v18 = vmul.u32.u64.low 4042322161, %v4903_v60  ;;  %v4939_v58 = vmul.u32.u64.high 4042322161, %v4903_v60, %v4938_v18  ;;  %v2860_v63 = vadd.f32 %v2859_v39, %v2858_v31  ;;  %v2708_v56 = vsel %vm4836_vm4, %v1822_v40, 0.0  ;;  %vm5708_vm4 = vmmov %vm5703_vm3  ;;  %v1725_v31 = vpop.f32.mrf.mxu1  ;;  %v1398_v29 = vpop.f32.mrf.mxu0 }
 0x196   : > { %v1496_v16 = vadd.f32 %v1393_v2, %v4165_v52  ;;  %v2752_v6 = vsel %vm5705_vm15, %v2708_v56, 0.0  ;;  %v2818_v7 = vmul.f32 %v2708_v56, %v2708_v56  ;;  %vm4950_vm12 = vcmp.lt.s32.totalorder %v2575_v24, 16  ;;  %1993 = vst.msk [vmem:[%s4563_s6 + $0x28] sm:$0xf] %vm5708_vm4, %v3219_v43  ;;  %vm5713_vm6 = vmmov %vm5709_vm14 }
 0x197   : > { %v4955_v26 = vmul.u32.u64.low 4042322161, %v4922_v14  ;;  %v4956_v22 = vmul.u32.u64.high 4042322161, %v4922_v14, %v4955_v26  ;;  %v2753_v52 = vadd.f32 %v2752_v6, %v2751_v42  ;;  %vm2478_vm7 = vcmp.lt.s32.totalorder %v4900_v17, 0  ;;  %v3589_v15 = vpop.f32.mrf.mxu1  ;;  %v3513_v55 = vpop.f32.mrf.mxu0 }
 0x198   : > { %v1823_v37 = vadd.f32 %v1720_v51, %v1496_v16  ;;  %v4962_v8 = vadd.s32 17, %v4900_v17  ;;  %v2861_v49 = vsel %vm5699_vm11, %v2818_v7, 0.0  ;;  %vm2445_vm0 = vcmp.ne.s32.totalorder %v4929_v48, 0  ;;  %vm5029_vm8 = vmand %vm2478_vm7, %vm2444_vm5 }
 0x199   : > { %vm2479_vm3 = vcmp.lt.s32.totalorder %v4929_v48, 0  ;;  %v4968_v24 = vadd.s32 17, %v4929_v48  ;;  %v2862_v3 = vadd.f32 %v2861_v49, %v2860_v63  ;;  %v1497_v0 = vadd.f32 %v1398_v29, %v4172_v62  ;;  %v1728_v51 = vpop.f32.mrf.mxu1  ;;  %v1401_v20 = vpop.f32.mrf.mxu0 }
 0x19a   : > { %v3220_v35 = vpack.c.bf16 %v1823_v37, %v1823_v37  ;;  %v2709_v61 = vsel %vm4881_vm9, %v1823_v37, 0.0  ;;  %vm4979_vm15 = vcmp.lt.s32.totalorder %v2576_v36, 16  ;;  %vm2446_vm4 = vcmp.ne.s32.totalorder %v4935_v45, 0 }
 0x19b   : > { %v2754_v4 = vsel %vm5709_vm14, %v2709_v61, 0.0  ;;  %v2819_v57 = vmul.f32 %v2709_v61, %v2709_v61  ;;  %v2290_v23 = vmul.u32 17, %v2289_v10  ;;  %vm5712_vm9 = vcmask 257024   ;;  %v3590_v56 = vpop.f32.mrf.mxu1  ;;  %v3514_v6 = vpop.f32.mrf.mxu0 }
 0x19c   : > { %1994 = vst.msk [vmem:[%s4563_s6 + $0x2c] sm:$0xf] %vm5712_vm9, %v3220_v35  ;;  %v2755_v62 = vadd.f32 %v2754_v4, %v2753_v52  ;;  %v1824_v40 = vadd.f32 %v1725_v31, %v1497_v0  ;;  %vm2480_vm11 = vcmp.lt.s32.totalorder %v4935_v45, 0  ;;  %v4988_v39 = vadd.s32 192, %v4218_v34 }
 0x19d   : > { %v2863_v5 = vsel %vm5709_vm14, %v2819_v57, 0.0  ;;  %v4992_v59 = vadd.s32 17, %v4935_v45  ;;  %v2300_v36 = vshrl.u32 %v4939_v58, 4  ;;  %v4996_v10 = vadd.s32 200, %v4218_v34  ;;  %vm5057_vm5 = vmand %vm2480_vm11, %vm2446_vm4 }
 0x19e   : > { %v2864_v2 = vadd.f32 %v2863_v5, %v2862_v3  ;;  %v3221_v18 = vpack.c.bf16 %v1824_v40, %v1824_v40  ;;  %v2710_v63 = vsel %vm4914_vm13, %v1824_v40, 0.0  ;;  %v1498_v43 = vadd.f32 %v1401_v20, %v4178_v9  ;;  %vm5015_vm13 = vmand %vm2477_vm2, %vm2443_vm1 }
 0x19f   : > { %v2756_v16 = vsel %vm5713_vm6, %v2710_v63, 0.0  ;;  %v2820_v13 = vmul.f32 %v2710_v63, %v2710_v63  ;;  %vm5007_vm9 = vcmp.lt.s32.totalorder %v2577_v53, 16  ;;  %v5020_v41 = vsub.s32 %v4813_v46, %v2290_v23  ;;  %v1733_v53 = vpop.f32.mrf.mxu1  ;;  %vm5721_vm1 = vmmov %vm5713_vm6 }
 0x1a0   : > { %v2311_v27 = vshrl.u32 %v4956_v22, 4  ;;  %vm5718_vm14 = vcmask 257024   ;;  %v2757_v11 = vadd.f32 %v2756_v16, %v2755_v62  ;;  %v1825_v47 = vadd.f32 %v1728_v51, %v1498_v43  ;;  %v1406_v22 = vpop.f32.mrf.mxu0  ;;  %vm5042_vm2 = vmand %vm2479_vm3, %vm2445_vm0 }
 0x1a1   : > { %1995 = vst.msk [vmem:[%s4563_s6 + $0x30] sm:$0xf] %vm5718_vm14, %v3221_v18  ;;  %v5034_v38 = vmul.u32.u64.low 4042322161, %v4988_v39  ;;  %v5035_v26 = vmul.u32.u64.high 4042322161, %v4988_v39, %v5034_v38  ;;  %v2865_v46 = vsel %vm5721_vm1, %v2820_v13, 0.0  ;;  %v2301_v37 = vmul.u32 17, %v2300_v36  ;;  %v3593_v0 = vpop.f32.mrf.mxu1  ;;  %vm5726_vm7 = vmmov %vm5721_vm1 }
 0x1a2   : > { %v5047_v31 = vmul.u32.u64.low 4042322161, %v4996_v10  ;;  %v5048_v49 = vmul.u32.u64.high 4042322161, %v4996_v10, %v5047_v31  ;;  %v2866_v29 = vadd.f32 %v2865_v46, %v2864_v2  ;;  %v3222_v3 = vpack.c.bf16 %v1825_v47, %v1825_v47  ;;  %v3517_v55 = vpop.f32.mrf.mxu0  ;;  %vm5729_vm0 = vmmov %vm5718_vm14 }
 0x1a3   : > { %v2711_v35 = vsel %vm4950_vm12, %v1825_v47, 0.0  ;;  %v1499_v61 = vadd.f32 %v1406_v22, %v4185_v21  ;;  %vm5067_vm12 = vcmp.lt.s32.totalorder %v2578_v19, 16  ;;  %v2579_v30 = vsel %vm5015_vm13, %v4919_v28, %v4890_v32  ;;  %v1736_v40 = vpop.f32.mrf.mxu1  ;;  %vm5730_vm10 = vmmov %vm5721_vm1 }
 0x1a4   : > { %v2758_v4 = vsel %vm5726_vm7, %v2711_v35, 0.0  ;;  %v2821_v57 = vmul.f32 %v2711_v35, %v2711_v35  ;;  %v2580_v23 = vsel %vm5029_vm8, %v4962_v8, %v4900_v17  ;;  %1996 = vst.msk [vmem:[%s4563_s6 + $0x34] sm:$0xf] %vm5729_vm0, %v3222_v3  ;;  %v2581_v25 = vsel %vm5042_vm2, %v4968_v24, %v4929_v48  ;;  %v1409_v32 = vpop.f32.mrf.mxu0  ;;  %vm5731_vm4 = vmmov %vm5721_vm1 }
 0x1a5   : > { %v2759_v12 = vadd.f32 %v2758_v4, %v2757_v11  ;;  %v1826_v62 = vadd.f32 %v1733_v53, %v1499_v61  ;;  %v2312_v50 = vmul.u32 17, %v2311_v27  ;;  %v2582_v17 = vsel %vm5057_vm5, %v4992_v59, %v4935_v45  ;;  %v3594_v5 = vpop.f32.mrf.mxu1  ;;  %vm5734_vm13 = vmmov %vm5729_vm0 }
 0x1a6   : > { %v2867_v19 = vsel %vm5730_vm10, %v2821_v57, 0.0  ;;  %vm2447_vm3 = vcmp.ne.s32.totalorder %v5020_v41, 0  ;;  %v5092_v28 = vsub.s32 %v4903_v60, %v2301_v37  ;;  %v1500_v24 = vadd.f32 %v1409_v32, %v4191_v33  ;;  %v3518_v2 = vpop.f32.mrf.mxu0  ;;  %vm5736_vm8 = vmmov %vm5721_vm1 }
 0x1a7   : > { %v2868_v8 = vadd.f32 %v2867_v19, %v2866_v29  ;;  %v3223_v51 = vpack.c.bf16 %v1826_v62, %v1826_v62  ;;  %v2712_v48 = vsel %vm4979_vm15, %v1826_v62, 0.0  ;;  %vm5098_vm11 = vcmp.lt.s32.totalorder %v2579_v30, 16  ;;  %v1741_v43 = vpop.f32.mrf.mxu1  ;;  %vm5735_vm15 = vmmov %vm5721_vm1 }
 0x1a8   : > { %v2760_v20 = vsel %vm5731_vm4, %v2712_v48, 0.0  ;;  %v2822_v36 = vmul.f32 %v2712_v48, %v2712_v48  ;;  %vm2481_vm6 = vcmp.lt.s32.totalorder %v5020_v41, 0  ;;  %v5104_v60 = vadd.s32 17, %v5020_v41  ;;  %v1414_v13 = vpop.f32.mrf.mxu0  ;;  %vm5739_vm7 = vmmov %vm5729_vm0 }
 0x1a9   : > { %1997 = vst.msk [vmem:[%s4563_s6 + $0x38] sm:$0xf] %vm5734_vm13, %v3223_v51  ;;  %v2761_v42 = vadd.f32 %v2760_v20, %v2759_v12  ;;  %v1827_v63 = vadd.f32 %v1736_v40, %v1500_v24  ;;  %v5109_v33 = vsub.s32 %v4922_v14, %v2312_v50  ;;  %v2322_v56 = vshrl.u32 %v5035_v26, 4  ;;  %v3597_v53 = vpop.f32.mrf.mxu1  ;;  %vm5140_vm0 = vmand %vm2481_vm6, %vm2447_vm3 }
 0x1aa   : > { %v2869_v16 = vsel %vm5735_vm15, %v2822_v36, 0.0  ;;  %vm2448_vm14 = vcmp.ne.s32.totalorder %v5092_v28, 0  ;;  %v2333_v6 = vshrl.u32 %v5048_v49, 4  ;;  %v5116_v9 = vadd.s32 208, %v4218_v34  ;;  %v3521_v26 = vpop.f32.mrf.mxu0  ;;  %vm5743_vm10 = vmmov %vm5731_vm4 }
 0x1ab   : > { %v2870_v27 = vadd.f32 %v2869_v16, %v2868_v8  ;;  %v3224_v11 = vpack.c.bf16 %v1827_v63, %v1827_v63  ;;  %v2713_v47 = vsel %vm5007_vm9, %v1827_v63, 0.0  ;;  %v1501_v14 = vadd.f32 %v1414_v13, %v4198_v44  ;;  %v1744_v37 = vpop.f32.mrf.mxu1  ;;  %vm5740_vm9 = vmmov %vm5731_vm4 }
 0x1ac   : > { %v2762_v7 = vsel %vm5736_vm8, %v2713_v47, 0.0  ;;  %v2823_v38 = vmul.f32 %v2713_v47, %v2713_v47  ;;  %vm5122_vm1 = vcmp.lt.s32.totalorder %v2580_v23, 16  ;;  %vm2482_vm2 = vcmp.lt.s32.totalorder %v5092_v28, 0  ;;  %v1417_v29 = vpop.f32.mrf.mxu0  ;;  %vm5746_vm4 = vmmov %vm5739_vm7  ;;  %v5755_v47 = vld [vmem:[#allocation2_spill] sm:$0xff] }
 0x1ad   : > { %v5128_v22 = vadd.s32 216, %v4218_v34  ;;  %1998 = vst.msk [vmem:[%s4563_s6 + $0x3c] sm:$0xf] %vm5739_vm7, %v3224_v11  ;;  %v2763_v58 = vadd.f32 %v2762_v7, %v2761_v42  ;;  %v1828_v52 = vadd.f32 %v1741_v43, %v1501_v14  ;;  %v5133_v44 = vadd.s32 17, %v5092_v28  ;;  %v3598_v23 = vpop.f32.mrf.mxu1  ;;  %vm5749_vm6 = vmmov %vm5736_vm8 }
 0x1ae   : > { %v2323_v31 = vmul.u32 17, %v2322_v56  ;;  %v2871_v49 = vsel %vm5740_vm9, %v2823_v38, 0.0  ;;  %v2334_v35 = vmul.u32 17, %v2333_v6  ;;  %v1502_v30 = vadd.f32 %v1417_v29, %v4203_v54  ;;  %v3522_v40 = vpop.f32.mrf.mxu0  ;;  %vm5754_vm5 = vmmov %vm5749_vm6  ;;  %v5764_v23 = vld [vmem:[#allocation3_spill] sm:$0xff] }
 0x1af   : > { %v5145_v61 = vmul.u32.u64.low 4042322161, %v5116_v9  ;;  %v5146_v0 = vmul.u32.u64.high 4042322161, %v5116_v9, %v5145_v61  ;;  %v2872_v4 = vadd.f32 %v2871_v49, %v2870_v27  ;;  %v3225_v57 = vpack.c.bf16 %v1828_v52, %v1828_v52  ;;  %v1749_v51 = vpop.f32.mrf.mxu1  ;;  %vm5756_vm9 = vmmov %vm5754_vm5 }
 0x1b0   : > { %v2714_v55 = vsel %vm5067_vm12, %v1828_v52, 0.0  ;;  %vm5152_vm3 = vcmp.lt.s32.totalorder %v2581_v25, 16  ;;  %v5157_v19 = vmul.u32.u64.low 4042322161, %v5128_v22  ;;  %v5158_v32 = vmul.u32.u64.high 4042322161, %v5128_v22, %v5157_v19  ;;  %vm5170_vm12 = vmand %vm2482_vm2, %vm2448_vm14  ;;  %v1422_v5 = vpop.f32.mrf.mxu0  ;;  %v5794_v61 = vld [vmem:[#allocation7_spill] sm:$0xff] }
 0x1b1   : > { %v2764_v12 = vsel %vm5743_vm10, %v2714_v55, 0.0  ;;  %v2824_v62 = vmul.f32 %v2714_v55, %v2714_v55  ;;  %1999 = vst.msk [vmem:[%s4563_s6 + $0x40] sm:$0xf] %vm5746_vm4, %v3225_v57  ;;  %v1829_v21 = vadd.f32 %v1744_v37, %v1502_v30  ;;  %v2583_v54 = vsel %vm5140_vm0, %v5104_v60, %v5020_v41  ;;  %vm5750_vm14 = vmmov %vm5749_vm6 }
 0x1b2   : > { %v2765_v8 = vadd.f32 %v2764_v12, %v2763_v58  ;;  %v5175_v48 = vsub.s32 %v4988_v39, %v2323_v31  ;;  %vm2449_vm13 = vcmp.ne.s32.totalorder %v5109_v33, 0  ;;  %vm2483_vm15 = vcmp.lt.s32.totalorder %v5109_v33, 0  ;;  %v3601_v39 = vpop.f32.mrf.mxu1  ;;  %v3525_v43 = vpop.f32.mrf.mxu0 }
 0x1b3   : > { %v2873_v24 = vsel %vm5749_vm6, %v2824_v62, 0.0  ;;  %v5181_v41 = vadd.s32 17, %v5109_v33  ;;  %v3226_v36 = vpack.c.bf16 %v1829_v21, %v1829_v21  ;;  %v2715_v2 = vsel %vm5098_vm11, %v1829_v21, 0.0  ;;  %vm5753_vm11 = vmmov %vm5746_vm4  ;;  %v5772_v43 = vld [vmem:[#allocation4_spill] sm:$0xff] }
 0x1b4   : > { %v2874_v20 = vadd.f32 %v2873_v24, %v2872_v4  ;;  %v1503_v60 = vadd.f32 %v1422_v5, %v4208_v1  ;;  %v2766_v42 = vsel %vm5750_vm14, %v2715_v2, 0.0  ;;  %v2825_v63 = vmul.f32 %v2715_v2, %v2715_v2  ;;  %v1752_v15 = vpop.f32.mrf.mxu1 }
 0x1b5   : > { %vm5192_vm8 = vcmp.lt.s32.totalorder %v2582_v17, 16  ;;  %v2584_v18 = vsel %vm5170_vm12, %v5133_v44, %v5092_v28  ;;  %v5201_v1 = vsub.s32 %v4996_v10, %v2334_v35  ;;  %2000 = vst.msk [vmem:[%s4563_s6 + $0x44] sm:$0xf] %vm5753_vm11, %v3226_v36  ;;  %v2767_v16 = vadd.f32 %v2766_v42, %v2765_v8  ;;  %v1425_v17 = vpop.f32.mrf.mxu0  ;;  %vm5761_vm12 = vmmov %vm5754_vm5 }
 0x1b6   : > { %v1830_v13 = vadd.f32 %v1749_v51, %v1503_v60  ;;  %vm2450_vm2 = vcmp.ne.s32.totalorder %v5175_v48, 0  ;;  %v5207_v45 = vadd.s32 224, %v4218_v34  ;;  %v2875_v59 = vsel %vm5754_vm5, %v2825_v63, 0.0  ;;  %v3602_v53 = vpop.f32.mrf.mxu1  ;;  %vm5768_vm11 = vmmov %vm5746_vm4 }
 0x1b7   : > { %vm2484_vm7 = vcmp.lt.s32.totalorder %v5175_v48, 0  ;;  %v5212_v28 = vadd.s32 17, %v5175_v48  ;;  %v2344_v10 = vshrl.u32 %v5146_v0, 4  ;;  %v2876_v6 = vadd.f32 %v2875_v59, %v2874_v20  ;;  %v3526_v26 = vpop.f32.mrf.mxu0 }
 0x1b8   : > { %v3227_v27 = vpack.c.bf16 %v1830_v13, %v1830_v13  ;;  %v2716_v11 = vsel %vm5122_vm1, %v1830_v13, 0.0  ;;  %v1504_v14 = vadd.f32 %v1425_v17, %v5755_v47  ;;  %vm5219_vm0 = vcmp.lt.s32.totalorder %v2583_v54, 16  ;;  %v1757_v44 = vpop.f32.mrf.mxu1  ;;  %vm5231_vm1 = vmand %vm2483_vm15, %vm2449_vm13  ;;  %v5778_v26 = vld [vmem:[#allocation5_spill] sm:$0xff] }
 0x1b9   : > { %v2768_v7 = vsel %vm5756_vm9, %v2716_v11, 0.0  ;;  %v2826_v38 = vmul.f32 %v2716_v11, %v2716_v11  ;;  %vm2451_vm10 = vcmp.ne.s32.totalorder %v5201_v1, 0  ;;  %v2355_v52 = vshrl.u32 %v5158_v32, 4  ;;  %v1430_v35 = vpop.f32.mrf.mxu0  ;;  %vm5244_vm6 = vmand %vm2484_vm7, %vm2450_vm2 }
 0x1ba   : > { %2001 = vst.msk [vmem:[%s4563_s6 + $0x48] sm:$0xf] %vm5746_vm4, %v3227_v27  ;;  %v2769_v37 = vadd.f32 %v2768_v7, %v2767_v16  ;;  %v1831_v46 = vadd.f32 %v1752_v15, %v1504_v14  ;;  %v5236_v49 = vmul.u32.u64.low 4042322161, %v5207_v45  ;;  %v5237_v29 = vmul.u32.u64.high 4042322161, %v5207_v45, %v5236_v49  ;;  %v3605_v62 = vpop.f32.mrf.mxu1  ;;  %vm5765_vm15 = vmmov %vm5754_vm5 }
 0x1bb   : > { %v2877_v3 = vsel %vm5761_vm12, %v2826_v38, 0.0  ;;  %vm2485_vm13 = vcmp.lt.s32.totalorder %v5201_v1, 0  ;;  %v2345_v0 = vmul.u32 17, %v2344_v10  ;;  %v5250_v4 = vadd.s32 232, %v4218_v34  ;;  %v3529_v32 = vpop.f32.mrf.mxu0  ;;  %vm5771_vm2 = vmmov %vm5754_vm5 }
 0x1bc   : > { %v2878_v57 = vadd.f32 %v2877_v3, %v2876_v6  ;;  %v3228_v55 = vpack.c.bf16 %v1831_v46, %v1831_v46  ;;  %v2717_v30 = vsel %vm5152_vm3, %v1831_v46, 0.0  ;;  %v1505_v12 = vadd.f32 %v1430_v35, %v5764_v23  ;;  %v1760_v25 = vpop.f32.mrf.mxu1  ;;  %vm5277_vm3 = vmand %vm2485_vm13, %vm2451_vm10  ;;  %v5784_v32 = vld [vmem:[#allocation6_spill] sm:$0xff] }
 0x1bd   : > { %v2770_v40 = vsel %vm5765_vm15, %v2717_v30, 0.0  ;;  %v2827_v19 = vmul.f32 %v2717_v30, %v2717_v30  ;;  %vm5256_vm14 = vcmp.lt.s32.totalorder %v2584_v18, 16  ;;  %v5261_v21 = vadd.s32 17, %v5201_v1  ;;  %v1433_v2 = vpop.f32.mrf.mxu0  ;;  %vm5773_vm5 = vmmov %vm5771_vm2 }
 0x1be   : > { %v2356_v51 = vmul.u32 17, %v2355_v52  ;;  %2002 = vst.msk [vmem:[%s4563_s6 + $0x4c] sm:$0xf] %vm5768_vm11, %v3228_v55  ;;  %v2771_v54 = vadd.f32 %v2770_v40, %v2769_v37  ;;  %v1832_v50 = vadd.f32 %v1757_v44, %v1505_v12  ;;  %v2585_v24 = vsel %vm5231_vm1, %v5181_v41, %v5109_v33  ;;  %v3606_v16 = vpop.f32.mrf.mxu1  ;;  %vm5777_vm9 = vmmov %vm5771_vm2 }
 0x1bf   : > { %v2586_v5 = vsel %vm5244_vm6, %v5212_v28, %v5175_v48  ;;  %v2879_v36 = vsel %vm5771_vm2, %v2827_v19, 0.0  ;;  %v5283_v60 = vsub.s32 %v5116_v9, %v2345_v0  ;;  %v1506_v18 = vadd.f32 %v1433_v2, %v5772_v43  ;;  %v3530_v59 = vpop.f32.mrf.mxu0  ;;  %vm5779_vm1 = vmmov %vm5771_vm2 }
 0x1c0   : > { %v5286_v33 = vmul.u32.u64.low 4042322161, %v5250_v4  ;;  %v5287_v41 = vmul.u32.u64.high 4042322161, %v5250_v4, %v5286_v33  ;;  %v2880_v39 = vadd.f32 %v2879_v36, %v2878_v57  ;;  %v3229_v42 = vpack.c.bf16 %v1832_v50, %v1832_v50  ;;  %v1765_v27 = vpop.f32.mrf.mxu1  ;;  %vm5783_vm15 = vmmov %vm5779_vm1 }
 0x1c1   : > { %v2718_v63 = vsel %vm5192_vm8, %v1832_v50, 0.0  ;;  %vm5293_vm7 = vcmp.lt.s32.totalorder %v2585_v24, 16  ;;  %v2587_v9 = vsel %vm5277_vm3, %v5261_v21, %v5201_v1  ;;  %v5302_v10 = vsub.s32 %v5128_v22, %v2356_v51  ;;  %vm5776_vm8 = vmmov %vm5746_vm4  ;;  %v1438_v53 = vpop.f32.mrf.mxu0 }
 0x1c2   : > { %v2772_v13 = vsel %vm5773_vm5, %v2718_v63, 0.0  ;;  %v2828_v15 = vmul.f32 %v2718_v63, %v2718_v63  ;;  %2003 = vst.msk [vmem:[%s4563_s6 + $0x50] sm:$0xf] %vm5776_vm8, %v3229_v42  ;;  %v1833_v6 = vadd.f32 %v1760_v25, %v1506_v18  ;;  %v2366_v11 = vshrl.u32 %v5237_v29, 4  ;;  %v3609_v37 = vpop.f32.mrf.mxu1  ;;  %vm5780_vm13 = vmmov %vm5776_vm8 }
 0x1c3   : > { %v2773_v56 = vadd.f32 %v2772_v13, %v2771_v54  ;;  %v5308_v47 = vadd.s32 240, %v4218_v34  ;;  %vm2452_vm10 = vcmp.ne.s32.totalorder %v5283_v60, 0  ;;  %vm2486_vm4 = vcmp.lt.s32.totalorder %v5283_v60, 0  ;;  %v3533_v31 = vpop.f32.mrf.mxu0  ;;  %vm5785_vm3 = vmmov %vm5779_vm1 }
 0x1c4   : > { %v2881_v14 = vsel %vm5777_vm9, %v2828_v15, 0.0  ;;  %v2554_v22 = vadd.s32 17, %v5283_v60  ;;  %v3230_v7 = vpack.c.bf16 %v1833_v6, %v1833_v6  ;;  %v2719_v38 = vsel %vm5219_vm0, %v1833_v6, 0.0  ;;  %v1768_v35 = vpop.f32.mrf.mxu1  ;;  %vm5328_vm0 = vmand %vm2486_vm4, %vm2452_vm10 }
 0x1c5   : > { %v2882_v1 = vadd.f32 %v2881_v14, %v2880_v39  ;;  %v1507_v52 = vadd.f32 %v1438_v53, %v5778_v26  ;;  %v2774_v46 = vsel %vm5779_vm1, %v2719_v38, 0.0  ;;  %v2829_v44 = vmul.f32 %v2719_v38, %v2719_v38  ;;  %v1441_v30 = vpop.f32.mrf.mxu0  ;;  %vm5786_vm2 = vmmov %vm5776_vm8 }
 0x1c6   : > { %vm2453_vm12 = vcmp.ne.s32.totalorder %v5302_v10, 0  ;;  %v5320_v49 = vadd.s32 248, %v4218_v34  ;;  %2004 = vst.msk [vmem:[%s4563_s6 + $0x54] sm:$0xf] %vm5780_vm13, %v3230_v7  ;;  %v2775_v29 = vadd.f32 %v2774_v46, %v2773_v56  ;;  %vm2487_vm11 = vcmp.lt.s32.totalorder %v5302_v10, 0  ;;  %v3610_v51 = vpop.f32.mrf.mxu1  ;;  %vm5789_vm5 = vmmov %vm5779_vm1  ;;  %v5800_v46 = vld [vmem:[#allocation8_spill] sm:$0xff] }
 0x1c7   : > { %v1834_v3 = vadd.f32 %v1765_v27, %v1507_v52  ;;  %v5333_v0 = vmul.u32.u64.low 4042322161, %v5308_v47  ;;  %v5334_v57 = vmul.u32.u64.high 4042322161, %v5308_v47, %v5333_v0  ;;  %v2883_v55 = vsel %vm5783_vm15, %v2829_v44, 0.0  ;;  %v3534_v25 = vpop.f32.mrf.mxu0  ;;  %vm5795_vm6 = vmmov %vm5779_vm1  ;;  %v5803_v51 = vld [vmem:[#allocation9_spill] sm:$0xff] }
 0x1c8   : > { %v5339_v23 = vadd.s32 17, %v5302_v10  ;;  %v2367_v12 = vmul.u32 17, %v2366_v11  ;;  %v2884_v62 = vadd.f32 %v2883_v55, %v2882_v1  ;;  %v1508_v21 = vadd.f32 %v1441_v30, %v5784_v32  ;;  %v1773_v33 = vpop.f32.mrf.mxu1  ;;  %vm5799_vm4 = vmmov %vm5779_vm1 }
 0x1c9   : > { %v3231_v40 = vpack.c.bf16 %v1834_v3, %v1834_v3  ;;  %v2720_v19 = vsel %vm5256_vm14, %v1834_v3, 0.0  ;;  %v2588_v24 = vsel %vm5328_vm0, %v2554_v22, %v5283_v60  ;;  %v2377_v20 = vshrl.u32 %v5287_v41, 4  ;;  %vm5355_vm14 = vmand %vm2487_vm11, %vm2453_vm12  ;;  %v1446_v41 = vpop.f32.mrf.mxu0 }
 0x1ca   : > { %v2776_v54 = vsel %vm5785_vm3, %v2720_v19, 0.0  ;;  %v2830_v50 = vmul.f32 %v2720_v19, %v2720_v19  ;;  %v1835_v2 = vadd.f32 %v1768_v35, %v1508_v21  ;;  %vm5369_vm8 = vcmp.lt.s32.totalorder %v2586_v5, 16  ;;  %v3613_v56 = vpop.f32.mrf.mxu1  ;;  %vm5801_vm0 = vmmov %vm5786_vm2 }
 0x1cb   : > { %2005 = vst.msk [vmem:[%s4563_s6 + $0x58] sm:$0xf] %vm5786_vm2, %v3231_v40  ;;  %v2777_v36 = vadd.f32 %v2776_v54, %v2775_v29  ;;  %v5360_v39 = vmul.u32.u64.low 4042322161, %v5320_v49  ;;  %v5361_v42 = vmul.u32.u64.high 4042322161, %v5320_v49, %v5360_v39  ;;  %vm5373_vm9 = vcmp.lt.s32.totalorder %v2587_v9, 16  ;;  %v3537_v5 = vpop.f32.mrf.mxu0  ;;  %vm5802_vm15 = vmmov %vm5779_vm1 }
 0x1cc   : > { %v2885_v60 = vsel %vm5789_vm5, %v2830_v50, 0.0  ;;  %v5378_v18 = vadd.s32 256, %v4218_v34  ;;  %v3232_v13 = vpack.c.bf16 %v1835_v2, %v1835_v2  ;;  %v2721_v15 = vsel %vm5293_vm7, %v1835_v2, 0.0  ;;  %vm5798_vm7 = vmmov %vm5786_vm2  ;;  %v1776_v14 = vpop.f32.mrf.mxu1 }
 0x1cd   : > { %v2886_v16 = vadd.f32 %v2885_v60, %v2884_v62  ;;  %v1509_v59 = vadd.f32 %v1446_v41, %v5794_v61  ;;  %v2778_v48 = vsel %vm5795_vm6, %v2721_v15, 0.0  ;;  %v2831_v28 = vmul.f32 %v2721_v15, %v2721_v15  ;;  %v1449_v7 = vpop.f32.mrf.mxu0  ;;  %vm5804_vm11 = vmmov %vm5779_vm1  ;;  %v5811_v61 = vld [vmem:[#allocation10_spill] sm:$0xff] }
 0x1ce   : > { %vm5384_vm10 = vcmp.lt.s32.totalorder %v2588_v24, 16  ;;  %v2589_v6 = vsel %vm5355_vm14, %v5339_v23, %v5302_v10  ;;  %v5393_v27 = vsub.s32 %v5207_v45, %v2367_v12  ;;  %2006 = vst.msk [vmem:[%s4563_s6 + $0x5c] sm:$0xf] %vm5798_vm7, %v3232_v13  ;;  %v2779_v17 = vadd.f32 %v2778_v48, %v2777_v36  ;;  %v3614_v31 = vpop.f32.mrf.mxu1  ;;  %vm5807_vm2 = vmmov %vm5801_vm0 }
 0x1cf   : > { %v1836_v11 = vadd.f32 %v1773_v33, %v1509_v59  ;;  %v2378_v53 = vmul.u32 17, %v2377_v20  ;;  %v2388_v22 = vshrl.u32 %v5334_v57, 4  ;;  %v2887_v1 = vsel %vm5799_vm4, %v2831_v28, 0.0  ;;  %v3538_v35 = vpop.f32.mrf.mxu0  ;;  %vm5810_vm5 = vmmov %vm5779_vm1 }
 0x1d0   : > { %v5400_v38 = vmul.u32.u64.low 4042322161, %v5378_v18  ;;  %v5401_v26 = vmul.u32.u64.high 4042322161, %v5378_v18, %v5400_v38  ;;  %v5404_v10 = vadd.s32 264, %v4218_v34  ;;  %v2888_v45 = vadd.f32 %v2887_v1, %v2886_v16  ;;  %v1781_v0 = vpop.f32.mrf.mxu1  ;;  %vm5812_vm6 = vmmov %vm5779_vm1 }
 0x1d1   : > { %v3233_v52 = vpack.c.bf16 %v1836_v11, %v1836_v11  ;;  %v2722_v37 = vsel %vm5369_vm8, %v1836_v11, 0.0  ;;  %v1510_v44 = vadd.f32 %v1449_v7, %v5800_v46  ;;  %vm2454_vm12 = vcmp.ne.s32.totalorder %v5393_v27, 0  ;;  %v1454_v23 = vpop.f32.mrf.mxu0  ;;  %vm5813_vm7 = vmmov %vm5801_vm0 }
 0x1d2   : > { %v2780_v29 = vsel %vm5779_vm1, %v2722_v37, 0.0  ;;  %v2832_v3 = vmul.f32 %v2722_v37, %v2722_v37  ;;  %vm2488_vm13 = vcmp.lt.s32.totalorder %v5393_v27, 0  ;;  %v2389_v57 = vmul.u32 17, %v2388_v22  ;;  %v3617_v50 = vpop.f32.mrf.mxu1 }
 0x1d3   : > { %2007 = vst.msk [vmem:[%s4563_s6 + $0x60] sm:$0xf] %vm5801_vm0, %v3233_v52  ;;  %v2781_v34 = vadd.f32 %v2780_v29, %v2779_v17  ;;  %v1837_v58 = vadd.f32 %v1776_v14, %v1510_v44  ;;  %v2399_v55 = vshrl.u32 %v5361_v42, 4  ;;  %v5417_v12 = vsub.s32 %v5250_v4, %v2378_v53  ;;  %v3541_v20 = vpop.f32.mrf.mxu0  ;;  %vm5438_vm14 = vmand %vm2488_vm13, %vm2454_vm12  ;;  %v5816_v52 = vld [vmem:[#allocation11_spill] sm:$0xff] }
 0x1d4   : > { %v2889_v30 = vsel %vm5802_vm15, %v2832_v3, 0.0  ;;  %v5420_v62 = vmul.u32.u64.low 4042322161, %v5404_v10  ;;  %v5421_v40 = vmul.u32.u64.high 4042322161, %v5404_v10, %v5420_v62  ;;  %v1511_v54 = vadd.f32 %v1454_v23, %v5803_v51  ;;  %v1784_v8 = vpop.f32.mrf.mxu1  ;;  %vm5817_vm13 = vmmov %vm5779_vm1 }
 0x1d5   : > { %v2890_v19 = vadd.f32 %v2889_v30, %v2888_v45  ;;  %v3234_v32 = vpack.c.bf16 %v1837_v58, %v1837_v58  ;;  %v2723_v21 = vsel %vm5373_vm9, %v1837_v58, 0.0  ;;  %vm5427_vm3 = vcmp.lt.s32.totalorder %v2589_v6, 16  ;;  %v1457_v63 = vpop.f32.mrf.mxu0  ;;  %vm5820_vm15 = vmmov %vm5807_vm2 }
 0x1d6   : > { %v2782_v25 = vsel %vm5804_vm11, %v2723_v21, 0.0  ;;  %v2833_v24 = vmul.f32 %v2723_v21, %v2723_v21  ;;  %v2556_v4 = vadd.s32 17, %v5393_v27  ;;  %v1838_v33 = vadd.f32 %v1781_v0, %v1511_v54 }
 0x1d7   : > { %2008 = vst.msk [vmem:[%s4563_s6 + $0x64] sm:$0xf] %vm5807_vm2, %v3234_v32  ;;  %v2783_v2 = vadd.f32 %v2782_v25, %v2781_v34  ;;  %v5443_v42 = vsub.s32 %v5308_v47, %v2389_v57  ;;  %v2400_v60 = vmul.u32 17, %v2399_v55  ;;  %vm2455_vm8 = vcmp.ne.s32.totalorder %v5417_v12, 0  ;;  %v3618_v47 = vpop.f32.mrf.mxu1  ;;  %v3542_v28 = vpop.f32.mrf.mxu0  ;;  %v5824_v32 = vld [vmem:[#allocation12_spill] sm:$0xff] }
 0x1d8   : > { %v2891_v41 = vsel %vm5810_vm5, %v2833_v24, 0.0  ;;  %vm2489_vm9 = vcmp.lt.s32.totalorder %v5417_v12, 0  ;;  %v2410_v43 = vshrl.u32 %v5401_v26, 4  ;;  %v3235_v13 = vpack.c.bf16 %v1838_v33, %v1838_v33  ;;  %vm5825_vm5 = vmmov %vm5779_vm1 }
 0x1d9   : > { %v2892_v16 = vadd.f32 %v2891_v41, %v2890_v19  ;;  %v2724_v15 = vsel %vm5384_vm10, %v1838_v33, 0.0  ;;  %v1512_v59 = vadd.f32 %v1457_v63, %v5811_v61  ;;  %v2590_v5 = vsel %vm5438_vm14, %v2556_v4, %v5393_v27  ;;  %v1789_v14 = vpop.f32.mrf.mxu1  ;;  %vm5463_vm10 = vmand %vm2489_vm9, %vm2455_vm8  ;;  %v1462_v22 = vpop.f32.mrf.mxu0 }
 0x1da   : > { %v2784_v56 = vsel %vm5812_vm6, %v2724_v15, 0.0  ;;  %v2834_v48 = vmul.f32 %v2724_v15, %v2724_v15  ;;  %v2557_v6 = vadd.s32 17, %v5417_v12  ;;  %2009 = vst.msk [vmem:[%s4563_s6 + $0x68] sm:$0xf] %vm5813_vm7, %v3235_v13  ;;  %vm2456_vm4 = vcmp.ne.s32.totalorder %v5443_v42, 0  ;;  %vm5828_vm9 = vmmov %vm5813_vm7 }
 0x1db   : > { %v2785_v17 = vadd.f32 %v2784_v56, %v2783_v2  ;;  %v1839_v11 = vadd.f32 %v1784_v8, %v1512_v59  ;;  %v5469_v53 = vsub.s32 %v5320_v49, %v2400_v60  ;;  %vm2490_vm12 = vcmp.lt.s32.totalorder %v5443_v42, 0  ;;  %v3621_v46 = vpop.f32.mrf.mxu1  ;;  %v3545_v29 = vpop.f32.mrf.mxu0  ;;  %vm5829_vm6 = vmmov %vm5779_vm1 }
 0x1dc   : > { %v2893_v27 = vsel %vm5779_vm1, %v2834_v48, 0.0  ;;  %v2411_v1 = vmul.u32 17, %v2410_v43  ;;  %v2421_v7 = vshrl.u32 %v5421_v40, 4  ;;  %v1513_v37 = vadd.f32 %v1462_v22, %v5816_v52  ;;  %vm5494_vm2 = vmand %vm2490_vm12, %vm2456_vm4  ;;  %v5832_v43 = vld [vmem:[#allocation13_spill] sm:$0xff] }
 0x1dd   : > { %v2894_v38 = vadd.f32 %v2893_v27, %v2892_v16  ;;  %v3236_v26 = vpack.c.bf16 %v1839_v11, %v1839_v11  ;;  %v2725_v45 = vsel %vm5427_vm3, %v1839_v11, 0.0  ;;  %vm5478_vm0 = vcmp.lt.s32.totalorder %v2590_v5, 16  ;;  %v1792_v58 = vpop.f32.mrf.mxu1  ;;  %vm5821_vm3 = vmmov %vm5779_vm1  ;;  %v1465_v55 = vpop.f32.mrf.mxu0 }
 0x1de   : > { %v2786_v49 = vsel %vm5817_vm13, %v2725_v45, 0.0  ;;  %v2835_v44 = vmul.f32 %v2725_v45, %v2725_v45  ;;  %v2591_v3 = vsel %vm5463_vm10, %v2557_v6, %v5417_v12  ;;  %v1840_v34 = vadd.f32 %v1789_v14, %v1513_v37  ;;  %vm5833_vm13 = vmmov %vm5828_vm9 }
 0x1df   : > { %2010 = vst.msk [vmem:[%s4563_s6 + $0x6c] sm:$0xf] %vm5820_vm15, %v3236_v26  ;;  %v2787_v35 = vadd.f32 %v2786_v49, %v2785_v17  ;;  %v2558_v0 = vadd.s32 17, %v5443_v42  ;;  %vm2457_vm11 = vcmp.ne.s32.totalorder %v5469_v53, 0  ;;  %vm2491_vm14 = vcmp.lt.s32.totalorder %v5469_v53, 0  ;;  %v3622_v51 = vpop.f32.mrf.mxu1  ;;  %v3546_v24 = vpop.f32.mrf.mxu0 }
 0x1e0   : > { %v2895_v57 = vsel %vm5821_vm3, %v2835_v44, 0.0  ;;  %v5500_v23 = vsub.s32 %v5378_v18, %v2411_v1  ;;  %v2422_v12 = vmul.u32 17, %v2421_v7  ;;  %v3237_v40 = vpack.c.bf16 %v1840_v34, %v1840_v34  ;;  %vm5521_vm7 = vmand %vm2491_vm14, %vm2457_vm11 }
 0x1e1   : > { %v2896_v62 = vadd.f32 %v2895_v57, %v2894_v38  ;;  %v2726_v19 = vsel %vm5478_vm0, %v1840_v34, 0.0  ;;  %v1514_v21 = vadd.f32 %v1465_v55, %v5824_v32  ;;  %vm5506_vm8 = vcmp.lt.s32.totalorder %v2591_v3, 16  ;;  %v1797_v36 = vpop.f32.mrf.mxu1  ;;  %v1470_v8 = vpop.f32.mrf.mxu0  ;;  %vm5834_vm0 = vmmov %vm5779_vm1  ;;  %v5843_v34 = vld [vmem:[#allocation15_spill] sm:$0xff] }
 0x1e2   : > { %v2788_v54 = vsel %vm5825_vm5, %v2726_v19, 0.0  ;;  %v2836_v50 = vmul.f32 %v2726_v19, %v2726_v19  ;;  %2011 = vst.msk [vmem:[%s4563_s6 + $0x70] sm:$0xf] %vm5828_vm9, %v3237_v40  ;;  %v2592_v4 = vsel %vm5494_vm2, %v2558_v0, %v5443_v42  ;;  %v2559_v2 = vadd.s32 17, %v5469_v53  ;;  %vm5838_vm2 = vmmov %vm5834_vm0 }
 0x1e3   : > { %v2789_v18 = vadd.f32 %v2788_v54, %v2787_v35  ;;  %v1841_v20 = vadd.f32 %v1792_v58, %v1514_v21  ;;  %vm2458_vm10 = vcmp.ne.s32.totalorder %v5500_v23, 0  ;;  %vm2492_vm4 = vcmp.lt.s32.totalorder %v5500_v23, 0  ;;  %v3625_v13 = vpop.f32.mrf.mxu1  ;;  %v3549_v59 = vpop.f32.mrf.mxu0  ;;  %vm5839_vm5 = vmmov %vm5828_vm9 }
 0x1e4   : > { %v2897_v33 = vsel %vm5829_vm6, %v2836_v50, 0.0  ;;  %v2423_v42 = vsub.s32 %v5404_v10, %v2422_v12  ;;  %v1515_v16 = vadd.f32 %v1470_v8, %v5832_v43  ;;  %vm2626_vm12 = vcmp.lt.s32.totalorder %v2592_v4, 16  ;;  %vm5543_vm15 = vmand %vm2492_vm4, %vm2458_vm10  ;;  %v5847_v50 = vld [vmem:[#allocation16_spill] sm:$0xff] }
 0x1e5   : > { %v2898_v60 = vadd.f32 %v2897_v33, %v2896_v62  ;;  %v3238_v41 = vpack.c.bf16 %v1841_v20, %v1841_v20  ;;  %v2727_v63 = vsel %vm5506_vm8, %v1841_v20, 0.0  ;;  %v1800_v48 = vpop.f32.mrf.mxu1  ;;  %v2593_v10 = vsel %vm5521_vm7, %v2559_v2, %v5469_v53  ;;  %v1473_v6 = vpop.f32.mrf.mxu0  ;;  %v5837_v53 = vld [vmem:[#allocation14_spill] sm:$0xff]  ;;  %vm5840_vm8 = vmmov %vm5834_vm0 }
 0x1e6   : > { %v2790_v15 = vsel %vm5779_vm1, %v2727_v63, 0.0  ;;  %v2837_v61 = vmul.f32 %v2727_v63, %v2727_v63  ;;  %v1842_v56 = vadd.f32 %v1797_v36, %v1515_v16  ;;  %v2560_v28 = vadd.s32 17, %v5500_v23  ;;  %vm5844_vm6 = vmmov %vm5834_vm0 }
 0x1e7   : > { %2012 = vst.msk [vmem:[%s4563_s6 + $0x74] sm:$0xf] %vm5833_vm13, %v3238_v41  ;;  %v2791_v47 = vadd.f32 %v2790_v15, %v2789_v18  ;;  %vm2459_vm11 = vcmp.ne.s32.totalorder %v2423_v42, 0  ;;  %vm2493_vm3 = vcmp.lt.s32.totalorder %v2423_v42, 0  ;;  %v1516_v27 = vadd.f32 %v1473_v6, %v5837_v53  ;;  %v3626_v22 = vpop.f32.mrf.mxu1  ;;  %v3550_v38 = vpop.f32.mrf.mxu0  ;;  %vm5845_vm10 = vmmov %vm5839_vm5 }
 0x1e8   : > { %v2899_v5 = vsel %vm5834_vm0, %v2837_v61, 0.0  ;;  %v3239_v14 = vpack.c.bf16 %v1842_v56, %v1842_v56  ;;  %v2728_v9 = vsel %vm2626_vm12, %v1842_v56, 0.0  ;;  %vm2627_vm14 = vcmp.lt.s32.totalorder %v2593_v10, 16  ;;  %vm5557_vm9 = vmand %vm2493_vm3, %vm2459_vm11 }
 0x1e9   : > { %v2900_v11 = vadd.f32 %v2899_v5, %v2898_v60  ;;  %v2792_v1 = vsel %vm5838_vm2, %v2728_v9, 0.0  ;;  %v2838_v7 = vmul.f32 %v2728_v9, %v2728_v9  ;;  %v1843_v45 = vadd.f32 %v1800_v48, %v1516_v27  ;;  %v1805_v52 = vpop.f32.mrf.mxu1  ;;  %v1478_v44 = vpop.f32.mrf.mxu0  ;;  %vm5846_vm4 = vmmov %vm5834_vm0 }
 0x1ea   : > { %2013 = vst.msk [vmem:[%s4563_s6 + $0x78] sm:$0xf] %vm5839_vm5, %v3239_v14  ;;  %v2793_v26 = vadd.f32 %v2792_v1, %v2791_v47  ;;  %v2594_v37 = vsel %vm5543_vm15, %v2560_v28, %v5500_v23  ;;  %v2561_v46 = vadd.s32 17, %v2423_v42  ;;  %v1517_v58 = vadd.f32 %v1478_v44, %v5843_v34  ;;  %vm5848_vm1 = vmmov %vm5834_vm0 }
 0x1eb   : > { %v2901_v49 = vsel %vm5840_vm8, %v2838_v7, 0.0  ;;  %v3240_v3 = vpack.c.bf16 %v1843_v45, %v1843_v45  ;;  %v2729_v35 = vsel %vm2627_vm14, %v1843_v45, 0.0  ;;  %v3629_v0 = vpop.f32.mrf.mxu1  ;;  %vm2628_vm7 = vcmp.lt.s32.totalorder %v2594_v37, 16  ;;  %v3553_v30 = vpop.f32.mrf.mxu0  ;;  %vm5849_vm13 = vmmov %vm5839_vm5 }
 0x1ec   : > { %v2902_v29 = vadd.f32 %v2901_v49, %v2900_v11  ;;  %v2794_v57 = vsel %vm5844_vm6, %v2729_v35, 0.0  ;;  %v2839_v55 = vmul.f32 %v2729_v35, %v2729_v35  ;;  %v1844_v12 = vadd.f32 %v1805_v52, %v1517_v58  ;;  %vm5850_vm15 = vmmov %vm5834_vm0 }
 0x1ed   : > { %2014 = vst.msk [vmem:[%s4563_s6 + $0x7c] sm:$0xf] %vm5845_vm10, %v3240_v3  ;;  %v2795_v23 = vadd.f32 %v2794_v57, %v2793_v26  ;;  %v1808_v62 = vpop.f32.mrf.mxu1  ;;  %v2595_v40 = vsel %vm5557_vm9, %v2561_v46, %v2423_v42  ;;  %v1481_v32 = vpop.f32.mrf.mxu0  ;;  %vm5851_vm11 = vmmov %vm5839_vm5  ;;  %vm2806_vm2 = vcmask 253952  }
 0x1ee   : > { %v2903_v19 = vsel %vm5846_vm4, %v2839_v55, 0.0  ;;  %v3241_v51 = vpack.c.bf16 %v1844_v12, %v1844_v12  ;;  %v2730_v54 = vsel %vm2628_vm7, %v1844_v12, 0.0  ;;  %v1518_v25 = vadd.f32 %v1481_v32, %v5847_v50  ;;  %vm5852_vm3 = vmmov %vm5834_vm0 }
 0x1ef   : > { %v2904_v21 = vadd.f32 %v2903_v19, %v2902_v29  ;;  %v3630_v24 = vpop.f32.mrf.mxu1  ;;  %v2796_v18 = vsel %vm5848_vm1, %v2730_v54, 0.0  ;;  %v2840_v20 = vmul.f32 %v2730_v54, %v2730_v54  ;;  %vm2629_vm12 = vcmp.lt.s32.totalorder %v2595_v40, 16  ;;  %v3554_v36 = vpop.f32.mrf.mxu0 }
 0x1f0   : > { %2015 = vst.msk [vmem:[%s4563_s6 + $0x80] sm:$0xf] %vm5849_vm13, %v3241_v51  ;;  %v2797_v4 = vadd.f32 %v2796_v18, %v2795_v23  ;;  %v1845_v2 = vadd.f32 %v1808_v62, %v1518_v25 }
 0x1f1   : > { %v2905_v33 = vsel %vm5834_vm0, %v2840_v20, 0.0 }
 0x1f2   : > { %v2906_v8 = vadd.f32 %v2905_v33, %v2904_v21  ;;  %v3242_v39 = vpack.c.bf16 %v1845_v2, %v1845_v2  ;;  %v2731_v42 = vsel %vm2629_vm12, %v1845_v2, 0.0 }
 0x1f3   : > { %v2798_v60 = vsel %vm5850_vm15, %v2731_v42, 0.0  ;;  %v2841_v41 = vmul.f32 %v2731_v42, %v2731_v42 }
 0x1f4   : > { %2016 = vst.msk [vmem:[%s4563_s6 + $0x84] sm:$0xf] %vm5851_vm11, %v3242_v39  ;;  %v2799_v63 = vadd.f32 %v2798_v60, %v2797_v4 }
 0x1f5   : > { %v2907_v43 = vsel %vm5852_vm3, %v2841_v41, 0.0 }
 0x1f6   : > { %v2800_v16 = vrot.slane %v2799_v63, 4  ;;  %v2908_v13 = vadd.f32 %v2907_v43, %v2906_v8 }
 0x1f8   : > { %v2801_v15 = vadd.f32 %v2800_v16, %v2799_v63  ;;  %v2909_v61 = vrot.slane %v2908_v13, 4 }
 0x1fa   : > { %v2802_v59 = vrot.slane %v2801_v15, 2  ;;  %v2910_v47 = vadd.f32 %v2909_v61, %v2908_v13 }
 0x1fc   : > { %v2803_v56 = vadd.f32 %v2802_v59, %v2801_v15  ;;  %v2911_v48 = vrot.slane %v2910_v47, 2 }
 0x1fe   : > { %v2804_v10 = vrot.slane %v2803_v56, 1  ;;  %v2912_v28 = vadd.f32 %v2911_v48, %v2910_v47 }
 0x200   : > { %v2805_v5 = vadd.f32 %v2804_v10, %v2803_v56  ;;  %v2913_v6 = vrot.slane %v2912_v28, 1 }
 0x202   : > { %2807 = vst.msk [vmem:[%s211_s9] sm:$0x1] %vm2806_vm2, %v2805_v5  ;;  %v2914_v17 = vadd.f32 %v2913_v6, %v2912_v28 }
 0x204   : > { %2915 = vst.msk [vmem:[%s214_s12] sm:$0x1] %vm2806_vm2, %v2914_v17 }
 0x205 PF: > { %s15_s15 = sadd.s32 1, %s3770_s15  }
 0x206   : > { %p12_p4 = scmp.ge.s32.totalorder %s15_s15, 4  }
 0x208   :  { %14 = sbr.rel (!%p12_p4) target bundleno = 1 (0x1), region = 85 }

// kernel: discriminator_forward.6
= control target key start
LH: loop header
LB: loop body
LE: loop exit
PB: predicated region body
PF: predicated region fallthrough
CT: control target
= control target key end

     0   :  { %s1790_s15 = smov 0   ;;  %s2394_s0 = inlined_call_operand.vmem [shape: bf16[2,89,128], index: 0, kind: input, shape index: {}]   ;;  %s2395_s1 = inlined_call_operand.vmem [shape: bf16[4,128,64], index: 1, kind: input, shape index: {}]   ;;  %s2396_s2 = inlined_call_operand.vmem [shape: bf16[2,72,64], index: 2, kind: output, shape index: {0}]   ;;  %s2397_s3 = inlined_call_operand.vmem [shape: f32[2,1,64], index: 3, kind: output, shape index: {1}]   ;;  %s2398_s4 = inlined_call_operand.vmem [shape: f32[2,1,64], index: 4, kind: output, shape index: {2}]  }
   0x1 LB: > { %s1366_s16 = sadd.s32 4294967295, %s1761_s15   ;;  %p1370_p0 = scmp.ge.s32.totalorder %s1761_s15, 1  ;;  %s1761_s15 = sphi %s1790_s15, %s15_s15  }
   0x2   : > { %p167_p1 = scmp.lt.s32.totalorder %s1761_s15, 3 }
   0x4   : > { %p168_p2 = pnand %p1370_p0, %p167_p1 }
   0x5   : > { %p199_p3 = scmp.lt.s32.totalorder (!%p168_p2), %s1366_s16, 1 }
   0x6   : > { %171 = sbr.rel (%p168_p2) target bundleno = 332 (0x14c), region = 28 }
   0xb   : > { %v1711_v0 = vld [vmem:[%s2395_s1 + $0x78] sm:$0xff]   ;;  %v1763_v1 = vmov 0.0   ;;  %v1713_v3 = vld [vmem:[%s2395_s1 + $0x70] sm:$0xff]   ;;  %vm1764_vm0 = vmmov 0   ;;  %v1715_v5 = vld [vmem:[%s2395_s1 + $0x68] sm:$0xff]   ;;  %s2432_s16 = smov (!%p199_p3, %s1366_s16), 1 }
   0xc   : > { %1537 = vmatprep.subr.bf16.mxu0 %v1763_v1  ;;  %1573 = vmatprep.subr.bf16.mxu1 %v1763_v1  ;;  %v1712_v2 = vld [vmem:[%s2395_s1 + $0x38] sm:$0xff]   ;;  %v1714_v4 = vld [vmem:[%s2395_s1 + $0x30] sm:$0xff]   ;;  %v1716_v6 = vld [vmem:[%s2395_s1 + $0x28] sm:$0xff]   ;;  %s1681_s5 = smul.u32 48, %s2432_s16  ;;  %vm284_vm1 = vsmask.f32 7424  ;;  %s211_s20 = scalar_lea.vmem %s2397_s3, %s2432_s16 }
   0xd   : > { %1538 = vmatpush3.bf16.msra.mxu0 %v1711_v0  ;;  %1553 = vmatprep.mubr.msk.bf16.mxu0 %vm1764_vm0, %v1763_v1  ;;  %v1717_v7 = vld [vmem:[%s2395_s1 + $0x60] sm:$0xff]   ;;  %v1719_v9 = vld [vmem:[%s2395_s1 + $0x58] sm:$0xff]   ;;  %v1721_v11 = vld [vmem:[%s2395_s1 + $0x50] sm:$0xff]   ;;  %vm821_vm2 = vcmask 1046528   ;;  %vm1002_vm3 = vcmask 519168   ;;  %s214_s23 = scalar_lea.vmem %s2398_s4, %s2432_s16 }
   0xe   : > { %1574 = vmatpush3.bf16.msra.mxu1 %v1712_v2  ;;  %1539 = vmatprep.subr.bf16.mxu0 %v1763_v1  ;;  %v1718_v8 = vld [vmem:[%s2395_s1 + $0x20] sm:$0xff]   ;;  %s1843_s12 = scalar_lea.vmem %s2394_s0, %s1681_s5  ;;  %v1720_v10 = vld [vmem:[%s2395_s1 + $0x18] sm:$0xff]   ;;  %v1722_v14 = vld [vmem:[%s2395_s1 + $0x10] sm:$0xff]  }
   0xf   : > { %1575 = vmatprep.subr.bf16.mxu1 %v1763_v1  ;;  %1589 = vmatprep.mubr.msk.bf16.mxu1 %vm1764_vm0, %v1763_v1  ;;  %v1727_v12 = vld [vmem:[%s1843_s12] sm:$0xff]   ;;  %v1728_v13 = vld [vmem:[%s1843_s12 + $0x8] sm:$0xff]   ;;  %v1875_v25 = vld [vmem:[%s1843_s12 + $0x10] sm:$0xff]  }
  0x10   : > { %v288_v15 = vshll.u32 %v1727_v12, 16  ;;  %v1723_v16 = vld [vmem:[%s2395_s1 + $0x48] sm:$0xff]   ;;  %v286_v17 = vshrl.u32 %v1727_v12, 16  ;;  %v293_v19 = vshll.u32 %v1728_v13, 16  ;;  %v1725_v21 = vld [vmem:[%s2395_s1 + $0x40] sm:$0xff]   ;;  %v1729_v27 = vld [vmem:[%s2395_s1 + $0xb8] sm:$0xff]  }
  0x11   : > { %1540 = vmatpush3.bf16.msra.mxu0 %v1713_v3  ;;  %v1724_v20 = vld [vmem:[%s2395_s1 + $0x8] sm:$0xff]   ;;  %v1726_v22 = vld [vmem:[%s2395_s1] sm:$0xff]   ;;  %v297_v28 = vshrl.u32 %v1728_v13, 16  ;;  %v301_v29 = vshll.u32 %v1875_v25, 16  ;;  %v1730_v30 = vld [vmem:[%s2395_s1 + $0xf8] sm:$0xff]   ;;  %v305_v39 = vshrl.u32 %v1875_v25, 16 }
  0x12   : > { %1576 = vmatpush3.bf16.msra.mxu1 %v1714_v4  ;;  %1541 = vmatprep.subr.bf16.mxu0 %v1763_v1  ;;  %v290_v18 = vrot.slane %v288_v15, 1  ;;  %v295_v24 = vrot.slane %v293_v19, 1  ;;  %v1731_v31 = vld [vmem:[%s2395_s1 + $0xb0] sm:$0xff]   ;;  %v1893_v34 = vld [vmem:[%s1843_s12 + $0x18] sm:$0xff]   ;;  %v1734_v36 = vld [vmem:[%s2395_s1 + $0xa8] sm:$0xff]  }
  0x13   : > { %1577 = vmatprep.subr.bf16.mxu1 %v1763_v1  ;;  %v303_v33 = vrot.slane %v301_v29, 1  ;;  %v1733_v35 = vld [vmem:[%s2395_s1 + $0xf0] sm:$0xff]   ;;  %v1735_v37 = vld [vmem:[%s2395_s1 + $0xe8] sm:$0xff]   ;;  %v309_v40 = vshll.u32 %v1893_v34, 16  ;;  %v1914_v41 = vld [vmem:[%s1843_s12 + $0x20] sm:$0xf] }
  0x14   : > { %v291_v23 = vor.u32 %v290_v18, %v286_v17  ;;  %v299_v32 = vor.u32 %v297_v28, %v295_v24  ;;  %v241_v42 = vld [vmem:[%s1843_s12 + $0x24] sm:$0x1]  ;;  %v1924_v47 = vld [vmem:[%s1843_s12 + $0x1c] sm:$0xff]   ;;  %v313_v55 = vshrl.u32 %v1893_v34, 16  ;;  %v1742_v63 = vld [vmem:[%s2395_s1 + $0x90] sm:$0xff]  }
  0x15   : > { %1542 = vmatpush3.bf16.msra.mxu0 %v1715_v5  ;;  %v307_v43 = vor.u32 %v305_v39, %v303_v33  ;;  %v311_v44 = vrot.slane %v309_v40, 1  ;;  %v1737_v45 = vld [vmem:[%s2395_s1 + $0xa0] sm:$0xff]   ;;  %v1393_v46 = vcombine.low %v1914_v41, %v241_v42  ;;  %v651_v50 = vshll.u32 %v1924_v47, 16  ;;  %v1739_v54 = vld [vmem:[%s2395_s1 + $0x98] sm:$0xff]   ;;  %v576_v3 = vld [vmem:[%s1843_s12 + $0x8] sm:$0xf] }
  0x16   : > { %1578 = vmatpush3.bf16.msra.mxu1 %v1716_v6  ;;  %1543 = vmatprep.subr.bf16.mxu0 %v1763_v1  ;;  %v296_v26 = vsel %vm284_vm1, %v291_v23, %v295_v24  ;;  %v304_v38 = vsel %vm284_vm1, %v299_v32, %v303_v33  ;;  %v1738_v48 = vld [vmem:[%s2395_s1 + $0xe0] sm:$0xff]   ;;  %v655_v51 = vshrl.u32 %v1924_v47, 16  ;;  %v1740_v59 = vld [vmem:[%s2395_s1 + $0xd8] sm:$0xff]   ;;  %v1743_v4 = vld [vmem:[%s2395_s1 + $0xd0] sm:$0xff]  }
  0x17   : > { %1579 = vmatprep.subr.bf16.mxu1 %v1763_v1  ;;  %v1932_v49 = vld [vmem:[%s1843_s12 + $0x24] sm:$0x1f]   ;;  %v312_v53 = vsel %vm284_vm1, %v307_v43, %v311_v44  ;;  %v317_v56 = vshll.u32 %v1393_v46, 16  ;;  %v1946_v57 = vrot.slane %v651_v50, 1  ;;  %v315_v61 = vor.u32 %v313_v55, %v311_v44  ;;  %v1752_v23 = vld [vmem:[%s1843_s12 + $0x14] sm:$0xff]  }
  0x18   : > { %v659_v52 = vshll.u32 %v1932_v49, 16  ;;  %v575_v2 = vld [vmem:[%s1843_s12 + $0x4] sm:$0xf]  ;;  %v643_v28 = vshll.u32 %v1752_v23, 16  ;;  %v825_v32 = vrot.slane %v1752_v23, 1  ;;  %v829_v40 = vrot.slane %v1932_v49, 1 }
  0x19   : > { %1544 = vmatpush3.bf16.msra.mxu0 %v1717_v7  ;;  %v657_v60 = vor.u32 %v655_v51, %v1946_v57  ;;  %v319_v62 = vrot.slane %v317_v56, 1  ;;  %v1427_v6 = vcombine.low %v575_v2, %v576_v3  ;;  %v1744_v7 = vld [vmem:[%s2395_s1 + $0x88] sm:$0xff]   ;;  %v663_v42 = vshrl.u32 %v1932_v49, 16 }
  0x1a   : > { %1580 = vmatpush3.bf16.msra.mxu1 %v1718_v8  ;;  %1545 = vmatprep.subr.bf16.mxu0 %v1763_v1  ;;  %v1949_v58 = vrot.slane %v659_v52, 1  ;;  %v1746_v8 = vld [vmem:[%s2395_s1 + $0xc8] sm:$0xff]  }
  0x1b   : > { %1581 = vmatprep.subr.bf16.mxu1 %v1763_v1  ;;  %v320_v5 = vsel %vm284_vm1, %v315_v61, %v319_v62  ;;  %v628_v17 = vshrl.u32 %v1427_v6, 16 }
  0x1c   : > { %v1962_v0 = vsel %vm284_vm1, %v657_v60, %v1949_v58  ;;  %v665_v43 = vor.u32 %v663_v42, %v1949_v58 }
  0x1d   : > { %1546 = vmatpush3.bf16.msra.mxu0 %v1719_v9  ;;  %v321_v9 = vshrl.u32 %v1393_v46, 16 }
  0x1e   : > { %1582 = vmatpush3.bf16.msra.mxu1 %v1720_v10  ;;  %1547 = vmatprep.subr.bf16.mxu0 %v1763_v1  ;;  %v1750_v10 = vld [vmem:[%s1843_s12 + $0xc] sm:$0xff]  }
  0x1f   : > { %1583 = vmatprep.subr.bf16.mxu1 %v1763_v1  ;;  %v323_v15 = vor.u32 %v321_v9, %v319_v62  ;;  %v635_v19 = vshll.u32 %v1750_v10, 16 }
  0x21   : > { %1548 = vmatpush3.bf16.msra.mxu0 %v1721_v11  ;;  %v630_v11 = vshll.u32 %v1427_v6, 16 }
  0x22   : > { %1584 = vmatpush3.bf16.msra.mxu1 %v1722_v14  ;;  %1549 = vmatprep.subr.bf16.mxu0 %v1763_v1  ;;  %v800_v14 = vld [vmem:[%s1843_s12 + $0x4] sm:$0xe]  ;;  %s1682_s12 = smul.u32 36, %s2432_s16 }
  0x23   : > { %1585 = vmatprep.subr.bf16.mxu1 %v1763_v1  ;;  %v632_v18 = vrot.slane %v630_v11, 1 }
  0x24   : > { %s2146_s17 = scalar_lea.vmem %s2396_s2, %s1682_s12 }
  0x25   : > { %1550 = vmatpush3.bf16.msra.mxu0 %v1723_v16  ;;  %v1402_v16 = vcombine.low %v1914_v41, %v1914_v41 }
  0x26   : > { %1586 = vmatpush3.bf16.msra.mxu1 %v1724_v20  ;;  %1551 = vmatprep.subr.bf16.mxu0 %v1763_v1  ;;  %v1456_v20 = vcombine.low %v800_v14, %v576_v3 }
  0x27   : > { %1587 = vmatprep.subr.bf16.mxu1 %v1763_v1 }
  0x28   : > { %v822_v24 = vrot.slane %v1456_v20, 1 }
  0x29   : > { %1552 = vmatpush3.bf16.msra.mxu0 %v1725_v21  ;;  %v633_v21 = vor.u32 %v632_v18, %v628_v17 }
  0x2a   : > { %1588 = vmatpush3.bf16.msra.mxu1 %v1726_v22  ;;  %1609 = vmatprep.subr.bf16.mxu0 %v1763_v1  ;;  %v637_v22 = vrot.slane %v635_v19, 1 }
  0x2b   : > { %1645 = vmatprep.subr.bf16.mxu1 %v1763_v1 }
  0x2c   : > { %1554 = vmatmul.mubr.bf16.vlgmr.msra.gmra.mxu0 %v296_v26  ;;  %v638_v26 = vsel %vm284_vm1, %v633_v21, %v637_v22 }
  0x2d   : > { %1590 = vmatmul.mubr.bf16.vlgmr.msra.gmra.mxu1 %v1727_v12  ;;  %1610 = vmatpush3.bf16.msra.mxu0 %v1729_v27  ;;  %v1747_v12 = vld [vmem:[%s2395_s1 + $0x80] sm:$0xff]   ;;  %v639_v27 = vshrl.u32 %v1750_v10, 16 }
  0x2e   : > { %1646 = vmatpush3.bf16.msra.mxu1 %v1730_v30  ;;  %1611 = vmatprep.subr.bf16.mxu0 %v1763_v1 }
  0x2f   : > { %1557 = vmatprep.mubr.msk.bf16.mxu0 %vm1764_vm0, %v1763_v1  ;;  %1593 = vmatprep.mubr.msk.bf16.mxu1 %vm1764_vm0, %v1763_v1  ;;  %v641_v30 = vor.u32 %v639_v27, %v637_v22 }
  0x30   : > { %1647 = vmatprep.subr.bf16.mxu1 %v1763_v1 }
  0x31   : > { %1612 = vmatpush3.bf16.msra.mxu0 %v1731_v31  ;;  %v645_v31 = vrot.slane %v643_v28, 1 }
  0x32   : > { %1648 = vmatpush3.bf16.msra.mxu1 %v1733_v35  ;;  %1613 = vmatprep.subr.bf16.mxu0 %v1763_v1 }
  0x33   : > { %1649 = vmatprep.subr.bf16.mxu1 %v1763_v1  ;;  %v646_v33 = vsel %vm284_vm1, %v641_v30, %v645_v31 }
  0x34   : > { %1558 = vmatmul.mubr.bf16.gmra.mxu0 %v304_v38 }
  0x35   : > { %1594 = vmatmul.mubr.bf16.gmra.mxu1 %v1728_v13  ;;  %1614 = vmatpush3.bf16.msra.mxu0 %v1734_v36  ;;  %v1748_v13 = vld [vmem:[%s2395_s1 + $0xc0] sm:$0xff]  }
  0x36   : > { %1650 = vmatpush3.bf16.msra.mxu1 %v1735_v37  ;;  %1561 = vmatprep.mubr.msk.bf16.mxu0 %vm1764_vm0, %v1763_v1  ;;  %v827_v37 = vrot.slane %v1924_v47, 1 }
  0x37   : > { %1597 = vmatprep.mubr.msk.bf16.mxu1 %vm1764_vm0, %v1763_v1  ;;  %1615 = vmatprep.subr.bf16.mxu0 %v1763_v1 }
  0x38   : > { %1651 = vmatprep.subr.bf16.mxu1 %v1763_v1  ;;  %v828_v39 = vsel %vm821_vm2, %v825_v32, %v827_v37  ;;  %v830_v41 = vsel %vm821_vm2, %v827_v37, %v829_v40 }
  0x39   : > { %1616 = vmatpush3.bf16.msra.mxu0 %v1737_v45 }
  0x3a   : > { %1652 = vmatpush3.bf16.msra.mxu1 %v1738_v48  ;;  %1617 = vmatprep.subr.bf16.mxu0 %v1763_v1 }
  0x3b   : > { %1653 = vmatprep.subr.bf16.mxu1 %v1763_v1 }
  0x3c   : > { %1562 = vmatmul.mubr.bf16.gmra.mxu0 %v312_v53 }
  0x3d   : > { %1598 = vmatmul.mubr.bf16.gmra.mxu1 %v1875_v25  ;;  %1618 = vmatpush3.bf16.msra.mxu0 %v1739_v54  ;;  %v823_v25 = vrot.slane %v1750_v10, 1 }
  0x3e   : > { %1565 = vmatprep.mubr.msk.bf16.mxu0 %vm1764_vm0, %v1763_v1  ;;  %1601 = vmatprep.mubr.msk.bf16.mxu1 %vm1764_vm0, %v1763_v1 }
  0x3f   : > { %1654 = vmatpush3.bf16.msra.mxu1 %v1740_v59  ;;  %1619 = vmatprep.subr.bf16.mxu0 %v1763_v1  ;;  %v824_v29 = vsel %vm821_vm2, %v822_v24, %v823_v25  ;;  %v826_v35 = vsel %vm821_vm2, %v823_v25, %v825_v32 }
  0x40   : > { %1655 = vmatprep.subr.bf16.mxu1 %v1763_v1 }
  0x41   : > { %1620 = vmatpush3.bf16.msra.mxu0 %v1742_v63 }
  0x42   : > { %1621 = vmatprep.subr.bf16.mxu0 %v1763_v1 }
  0x43   : > { %1656 = vmatpush3.bf16.msra.mxu1 %v1743_v4 }
  0x44   : > { %1566 = vmatmul.mubr.bf16.gmra.mxu0 %v320_v5  ;;  %1657 = vmatprep.subr.bf16.mxu1 %v1763_v1 }
  0x45   : > { %1602 = vmatmul.mubr.bf16.gmra.mxu1 %v1893_v34  ;;  %1569 = vmatprep.mubr.msk.bf16.mxu0 %vm1764_vm0, %v1763_v1  ;;  %v647_v34 = vshrl.u32 %v1752_v23, 16 }
  0x46   : > { %1605 = vmatprep.mubr.msk.bf16.mxu1 %vm1764_vm0, %v1763_v1  ;;  %1622 = vmatpush3.bf16.msra.mxu0 %v1744_v7 }
  0x47   : > { %1658 = vmatpush3.bf16.msra.mxu1 %v1746_v8  ;;  %1623 = vmatprep.subr.bf16.mxu0 %v1763_v1  ;;  %v649_v36 = vor.u32 %v647_v34, %v645_v31 }
  0x48   : > { %1659 = vmatprep.subr.bf16.mxu1 %v1763_v1 }
  0x49   : > { %v654_v38 = vsel %vm284_vm1, %v649_v36, %v1946_v57  ;;  %v1012_v57 = vlaneseq }
  0x4a   : > { %1624 = vmatpush3.bf16.msra.mxu0 %v1747_v12 }
  0x4b   : > { %1660 = vmatpush3.bf16.msra.mxu1 %v1748_v13  ;;  %v1013_v62 = vshrl.u32 %v1012_v57, 7 }
  0x4c   : > { %1570 = vmatmul.mubr.bf16.gmra.mxu0 %v323_v15 }
  0x4d   : > { %1606 = vmatmul.mubr.bf16.gmra.mxu1 %v1402_v16  ;;  %1625 = vmatprep.mubr.msk.bf16.mxu0 %vm1764_vm0, %v1763_v1  ;;  %v1014_v2 = vadd.s32 8, %v1013_v62  ;;  %v1015_v3 = vadd.s32 16, %v1013_v62  ;;  %v2059_v7 = vmul.u32.u64.low 3817748708, %v1013_v62  ;;  %v2060_v8 = vmul.u32.u64.high 3817748708, %v1013_v62, %v2059_v7 }
  0x4e   : > { %1661 = vmatprep.mubr.msk.bf16.mxu1 %vm1764_vm0, %v1763_v1  ;;  %v2062_v9 = vadd.s32 24, %v1013_v62  ;;  %v2072_v16 = vadd.s32 32, %v1013_v62  ;;  %v2076_v18 = vadd.s32 40, %v1013_v62  ;;  %v2108_v42 = vadd.s32 56, %v1013_v62 }
  0x4f   : > { %v2064_v11 = vmul.u32.u64.low 3817748708, %v1014_v2  ;;  %v2065_v12 = vmul.u32.u64.high 3817748708, %v1014_v2, %v2064_v11  ;;  %v2067_v13 = vmul.u32.u64.low 3817748708, %v1015_v3  ;;  %v2068_v14 = vmul.u32.u64.high 3817748708, %v1015_v3, %v2067_v13 }
  0x50   : > { %v2079_v20 = vmul.u32.u64.low 3817748708, %v2062_v9  ;;  %v2080_v21 = vmul.u32.u64.high 3817748708, %v2062_v9, %v2079_v20  ;;  %v2085_v24 = vmul.u32.u64.low 3817748708, %v2072_v16  ;;  %v2086_v25 = vmul.u32.u64.high 3817748708, %v2072_v16, %v2085_v24 }
  0x51   : > { %v1028_v31 = vshrl.u32 %v2060_v8, 3  ;;  %v1050_v34 = vshrl.u32 %v2068_v14, 3 }
  0x54   : > { %1626 = vmatmul.mubr.bf16.vlgmr.msra.gmra.mxu0 %v638_v26  ;;  %v2088_v26 = vadd.s32 48, %v1013_v62 }
  0x55   : > { %1662 = vmatmul.mubr.bf16.vlgmr.msra.gmra.mxu1 %v824_v29  ;;  %1629 = vmatprep.mubr.msk.bf16.mxu0 %vm1764_vm0, %v1763_v1  ;;  %v2093_v28 = vmul.u32.u64.low 3817748708, %v2076_v18  ;;  %v2094_v29 = vmul.u32.u64.high 3817748708, %v2076_v18, %v2093_v28 }
  0x56   : > { %1665 = vmatprep.mubr.msk.bf16.mxu1 %vm1764_vm0, %v1763_v1  ;;  %v2102_v36 = vmul.u32.u64.low 3817748708, %v2088_v26  ;;  %v2103_v37 = vmul.u32.u64.high 3817748708, %v2088_v26, %v2102_v36 }
  0x57   : > { %v1083_v57 = vshrl.u32 %v2094_v29, 3 }
  0x58   : > { %v1094_v14 = vshrl.u32 %v2103_v37, 3 }
  0x5c   : > { %1630 = vmatmul.mubr.bf16.gmra.mxu0 %v646_v33  ;;  %v1039_v33 = vshrl.u32 %v2065_v12, 3 }
  0x5d   : > { %1666 = vmatmul.mubr.bf16.gmra.mxu1 %v826_v35  ;;  %1633 = vmatprep.mubr.msk.bf16.mxu0 %vm1764_vm0, %v1763_v1 }
  0x5e   : > { %1669 = vmatprep.mubr.msk.bf16.mxu1 %vm1764_vm0, %v1763_v1 }
  0x64   : > { %1634 = vmatmul.mubr.bf16.gmra.mxu0 %v654_v38 }
  0x65   : > { %1670 = vmatmul.mubr.bf16.gmra.mxu1 %v828_v39  ;;  %1637 = vmatprep.mubr.msk.bf16.mxu0 %vm1764_vm0, %v1763_v1 }
  0x66   : > { %1673 = vmatprep.mubr.msk.bf16.mxu1 %vm1764_vm0, %v1763_v1 }
  0x6c   : > { %1638 = vmatmul.mubr.bf16.gmra.mxu0 %v1962_v0 }
  0x6d   : > { %1674 = vmatmul.mubr.bf16.gmra.mxu1 %v830_v41  ;;  %1641 = vmatprep.mubr.msk.bf16.mxu0 %vm1764_vm0, %v1763_v1  ;;  %v1061_v41 = vshrl.u32 %v2080_v21, 3 }
  0x6e   : > { %1677 = vmatprep.mubr.msk.bf16.mxu1 %vm1764_vm0, %v1763_v1 }
  0x74   : > { %1642 = vmatmul.mubr.bf16.gmra.mxu0 %v665_v43 }
  0x75   : > { %1678 = vmatmul.mubr.bf16.gmra.mxu1 %v829_v40  ;;  %v1029_v40 = vmul.u32 9, %v1028_v31 }
  0xec   : > { %v2035_v44 = vpop.f32.mrf.mxu0 }
  0xed   : > { %v2037_v45 = vpop.f32.mrf.mxu1 }
  0xee   : > { %v1555_v46 = vpop.f32.mrf.mxu0  ;;  %v538_v7 = vadd.f32 %v2037_v45, %v2035_v44 }
  0xef   : > { %v1591_v47 = vpop.f32.mrf.mxu1  ;;  %v1040_v46 = vmul.u32 9, %v1039_v33 }
  0xf0   : > { %v2039_v48 = vpop.f32.mrf.mxu0  ;;  %v1051_v47 = vmul.u32 9, %v1050_v34 }
  0xf1   : > { %v2041_v49 = vpop.f32.mrf.mxu1 }
  0xf2   : > { %v1556_v50 = vpop.f32.mrf.mxu0  ;;  %v2124_v11 = vsub.s32 %v1015_v3, %v1051_v47 }
  0xf3   : > { %v1592_v51 = vpop.f32.mrf.mxu1 }
  0xf4   : > { %v2043_v52 = vpop.f32.mrf.mxu0  ;;  %v1072_v51 = vshrl.u32 %v2086_v25, 3  ;;  %vm1123_vm8 = vcmp.ne.s32.totalorder %v2124_v11, 0  ;;  %vm1132_vm9 = vcmp.lt.s32.totalorder %v2124_v11, 0  ;;  %v1150_v36 = vadd.s32 9, %v2124_v11 }
  0xf5   : > { %v2045_v53 = vpop.f32.mrf.mxu1  ;;  %vm2185_vm13 = vmand %vm1132_vm9, %vm1123_vm8 }
  0xf6   : > { %v1559_v1 = vpop.f32.mrf.mxu0  ;;  %v1073_v13 = vmul.u32 9, %v1072_v51 }
  0xf7   : > { %v1595_v54 = vpop.f32.mrf.mxu1  ;;  %v2111_v1 = vadd.s32 64, %v1013_v62 }
  0xf8   : > { %v2047_v55 = vpop.f32.mrf.mxu0 }
  0xf9   : > { %v2049_v56 = vpop.f32.mrf.mxu1 }
  0xfa   : > { %v1560_v58 = vpop.f32.mrf.mxu0 }
  0xfb   : > { %v1596_v59 = vpop.f32.mrf.mxu1 }
  0xfc   : > { %v2051_v60 = vpop.f32.mrf.mxu0  ;;  %v2114_v59 = vsub.s32 %v1013_v62, %v1029_v40 }
  0xfd   : > { %v2053_v61 = vpop.f32.mrf.mxu1 }
  0xfe   : > { %v1563_v63 = vpop.f32.mrf.mxu0  ;;  %vm1121_vm4 = vcmp.ne.s32.totalorder %v2114_v59, 0  ;;  %vm1130_vm5 = vcmp.lt.s32.totalorder %v2114_v59, 0  ;;  %v1148_v29 = vadd.s32 9, %v2114_v59 }
  0xff   : > { %v1599_v0 = vpop.f32.mrf.mxu1  ;;  %v1062_v63 = vmul.u32 9, %v1061_v41  ;;  %vm2159_vm10 = vmand %vm1130_vm5, %vm1121_vm4 }
 0x100   : > { %v2055_v4 = vpop.f32.mrf.mxu0 }
 0x101   : > { %v2057_v5 = vpop.f32.mrf.mxu1  ;;  %v2135_v45 = vsub.s32 %v2062_v9, %v1062_v63 }
 0x102   : > { %v1564_v6 = vpop.f32.mrf.mxu0 }
 0x103   : > { %v1600_v10 = vpop.f32.mrf.mxu1  ;;  %v2117_v0 = vmul.u32.u64.low 3817748708, %v2108_v42  ;;  %v2118_v6 = vmul.u32.u64.high 3817748708, %v2108_v42, %v2117_v0  ;;  %vm1124_vm12 = vcmp.ne.s32.totalorder %v2135_v45, 0  ;;  %vm1133_vm14 = vcmp.lt.s32.totalorder %v2135_v45, 0 }
 0x104   : > { %v2070_v15 = vpop.f32.mrf.mxu0  ;;  %v2122_v10 = vsub.s32 %v1014_v2, %v1040_v46  ;;  %v541_v2 = vadd.f32 %v2041_v49, %v2039_v48  ;;  %v2151_v48 = vsub.s32 %v2072_v16, %v1073_v13  ;;  %v1095_v49 = vmul.u32 9, %v1094_v14  ;;  %vm2212_vm4 = vmand %vm1133_vm14, %vm1124_vm12 }
 0x105   : > { %v2074_v17 = vpop.f32.mrf.mxu1  ;;  %v1105_v37 = vshrl.u32 %v2118_v6, 3 }
 0x106   : > { %v1567_v19 = vpop.f32.mrf.mxu0  ;;  %vm1122_vm6 = vcmp.ne.s32.totalorder %v2122_v10, 0  ;;  %vm1131_vm7 = vcmp.lt.s32.totalorder %v2122_v10, 0  ;;  %v1149_v33 = vadd.s32 9, %v2122_v10  ;;  %vm1125_vm15 = vcmp.ne.s32.totalorder %v2151_v48, 0 }
 0x107   : > { %v1603_v22 = vpop.f32.mrf.mxu1  ;;  %v2129_v62 = vmul.u32.u64.low 3817748708, %v2111_v1  ;;  %v2130_v19 = vmul.u32.u64.high 3817748708, %v2111_v1, %v2129_v62  ;;  %vm2169_vm11 = vmand %vm1131_vm7, %vm1122_vm6  ;;  %vm1134_vm0 = vcmp.lt.s32.totalorder %v2151_v48, 0  ;;  %v1106_v0 = vmul.u32 9, %v1105_v37 }
 0x108   : > { %v2082_v23 = vpop.f32.mrf.mxu0  ;;  %v1084_v22 = vmul.u32 9, %v1083_v57  ;;  %v1158_v57 = vsel %vm2169_vm11, %v1149_v33, %v2122_v10  ;;  %vm2224_vm5 = vmand %vm1134_vm0, %vm1125_vm15  ;;  %v1152_v10 = vadd.s32 9, %v2151_v48 }
 0x109   : > { %v2090_v27 = vpop.f32.mrf.mxu1  ;;  %vm2240_vm9 = vcmp.lt.s32.totalorder %v1158_v57, 8 }
 0x10a   : > { %v1568_v30 = vpop.f32.mrf.mxu0 }
 0x10b   : > { %v1604_v32 = vpop.f32.mrf.mxu1 }
 0x10c   : > { %v2099_v35 = vpop.f32.mrf.mxu0  ;;  %v2165_v32 = vsub.s32 %v2076_v18, %v1084_v22 }
 0x10d   : > { %v2105_v38 = vpop.f32.mrf.mxu1 }
 0x10e   : > { %v1571_v39 = vpop.f32.mrf.mxu0  ;;  %vm1126_vm1 = vcmp.ne.s32.totalorder %v2165_v32, 0  ;;  %vm1135_vm2 = vcmp.lt.s32.totalorder %v2165_v32, 0 }
 0x10f   : > { %v1607_v43 = vpop.f32.mrf.mxu1  ;;  %v546_v39 = vadd.f32 %v2045_v53, %v2043_v52  ;;  %v2194_v52 = vsub.s32 %v2088_v26, %v1095_v49  ;;  %v1116_v53 = vshrl.u32 %v2130_v19, 3  ;;  %v1159_v26 = vsel %vm2185_vm13, %v1150_v36, %v2124_v11  ;;  %vm2234_vm6 = vmand %vm1135_vm2, %vm1126_vm1 }
 0x110   : > { %v446_v50 = vpop.f32.mrf.mxu0  ;;  %v1151_v43 = vadd.s32 9, %v2135_v45  ;;  %v1153_v11 = vadd.s32 9, %v2165_v32  ;;  %vm2251_vm11 = vcmp.lt.s32.totalorder %v1159_v26, 8  ;;  %vm1202_vm13 = vcmask 523264  }
 0x111   : > { %v572_v54 = vpop.f32.mrf.mxu1  ;;  %vm1127_vm7 = vcmp.ne.s32.totalorder %v2194_v52, 0  ;;  %vm1136_vm8 = vcmp.lt.s32.totalorder %v2194_v52, 0 }
 0x112   : > { %v1572_v58 = vpop.f32.mrf.mxu0  ;;  %v1157_v54 = vsel %vm2159_vm10, %v1148_v29, %v2114_v59  ;;  %v549_v59 = vadd.f32 %v2049_v56, %v2047_v55  ;;  %v1117_v56 = vmul.u32 9, %v1116_v53  ;;  %v1162_v28 = vsel %vm2234_vm6, %v1153_v11, %v2165_v32  ;;  %vm2275_vm12 = vmand %vm1136_vm8, %vm1127_vm7 }
 0x113   : > { %v1608_v8 = vpop.f32.mrf.mxu1  ;;  %vm2247_vm10 = vcmp.lt.s32.totalorder %v1157_v54, 8  ;;  %vm2297_vm0 = vcmp.lt.s32.totalorder %v1162_v28, 8 }
 0x114   : > { %v753_v12 = vpop.f32.mrf.mxu0  ;;  %v2286_v29 = vsub.s32 %v2111_v1, %v1117_v56 }
 0x115   : > { %v791_v20 = vadd.f32 %v753_v12, %v538_v7  ;;  %v918_v21 = vpop.f32.mrf.mxu1 }
 0x116   : > { %v1627_v44 = vpop.f32.mrf.mxu0 }
 0x117   : > { %v2139_v3 = vadd.f32 %v918_v21, %v791_v20  ;;  %v1663_v24 = vpop.f32.mrf.mxu1  ;;  %v1160_v20 = vsel %vm2212_vm4, %v1151_v43, %v2135_v45  ;;  %vm1129_vm4 = vcmp.ne.s32.totalorder %v2286_v29, 0 }
 0x118   : > { %v756_v25 = vpop.f32.mrf.mxu0  ;;  %v2259_v24 = vsub.s32 %v2108_v42, %v1106_v0  ;;  %vm2281_vm14 = vcmp.lt.s32.totalorder %v1160_v20, 8 }
 0x119   : > { %v1476_v9 = vpack.c.bf16 %v2139_v3, %v2139_v3  ;;  %v792_v30 = vadd.f32 %v756_v25, %v541_v2  ;;  %v921_v31 = vpop.f32.mrf.mxu1  ;;  %v2256_v2 = vadd.s32 9, %v2194_v52  ;;  %v554_v25 = vadd.f32 %v2053_v61, %v2051_v60 }
 0x11a   : > { %v1628_v34 = vpop.f32.mrf.mxu0  ;;  %vm1128_vm1 = vcmp.ne.s32.totalorder %v2259_v24, 0  ;;  %vm1137_vm2 = vcmp.lt.s32.totalorder %v2259_v24, 0 }
 0x11b   : > { %1003 = vst.msk [vmem:[%s2146_s17] sm:$0xf] %vm1002_vm3, %v1476_v9  ;;  %v957_v18 = vadd.f32 %v921_v31, %v792_v30  ;;  %v1664_v40 = vpop.f32.mrf.mxu1  ;;  %v1161_v9 = vsel %vm2224_vm5, %v1152_v10, %v2151_v48  ;;  %v1193_v30 = vsel %vm2247_vm10, %v2139_v3, 0.0  ;;  %v1163_v1 = vsel %vm2275_vm12, %v2256_v2, %v2194_v52  ;;  %vm2330_vm6 = vmand %vm1137_vm2, %vm1128_vm1 }
 0x11c   : > { %v761_v46 = vpop.f32.mrf.mxu0  ;;  %vm2293_vm15 = vcmp.lt.s32.totalorder %v1161_v9, 8  ;;  %v557_v3 = vadd.f32 %v2057_v5, %v2055_v4  ;;  %v1228_v41 = vmul.f32 %v1193_v30, %v1193_v30  ;;  %v1155_v52 = vadd.s32 9, %v2259_v24 }
 0x11d   : > { %v1477_v47 = vpack.c.bf16 %v957_v18, %v957_v18  ;;  %v793_v50 = vadd.f32 %v761_v46, %v546_v39  ;;  %v926_v51 = vpop.f32.mrf.mxu1  ;;  %v1194_v60 = vsel %vm2240_vm9, %v957_v18, 0.0  ;;  %v1203_v54 = vsel %vm1202_vm13, %v1193_v30, 0.0 }
 0x11e   : > { %v1631_v58 = vpop.f32.mrf.mxu0  ;;  %v1229_v39 = vmul.f32 %v1194_v60, %v1194_v60  ;;  %vm1138_vm5 = vcmp.lt.s32.totalorder %v2286_v29, 0  ;;  %vm2339_vm7 = vcmp.lt.s32.totalorder %v1163_v1, 8  ;;  %v1164_v22 = vsel %vm2330_vm6, %v1155_v52, %v2259_v24 }
 0x11f   : > { %1004 = vst.msk [vmem:[%s2146_s17 + $0x4] sm:$0xf] %vm1002_vm3, %v1477_v47  ;;  %v958_v6 = vadd.f32 %v926_v51, %v793_v50  ;;  %v1667_v7 = vpop.f32.mrf.mxu1  ;;  %v1204_v47 = vsel %vm1202_vm13, %v1194_v60, 0.0  ;;  %v562_v51 = vadd.f32 %v2074_v17, %v2070_v15  ;;  %v1237_v17 = vsel %vm1202_vm13, %v1228_v41, 0.0  ;;  %vm2357_vm8 = vmand %vm1138_vm5, %vm1129_vm4 }
 0x120   : > { %v764_v12 = vpop.f32.mrf.mxu0  ;;  %v1238_v58 = vsel %vm1202_vm13, %v1229_v39, 0.0  ;;  %v1205_v7 = vadd.f32 %v1204_v47, %v1203_v54  ;;  %vm1173_vm9 = vcmp.lt.s32.totalorder %v1164_v22, 8 }
 0x121   : > { %v1478_v14 = vpack.c.bf16 %v958_v6, %v958_v6  ;;  %v794_v62 = vadd.f32 %v764_v12, %v549_v59  ;;  %v929_v19 = vpop.f32.mrf.mxu1  ;;  %v1195_v31 = vsel %vm2251_vm11, %v958_v6, 0.0 }
 0x122   : > { %v1632_v44 = vpop.f32.mrf.mxu0  ;;  %v1230_v43 = vmul.f32 %v1195_v31, %v1195_v31  ;;  %v1206_v63 = vsel %vm1202_vm13, %v1195_v31, 0.0 }
 0x123   : > { %1005 = vst.msk [vmem:[%s2146_s17 + $0x8] sm:$0xf] %vm1002_vm3, %v1478_v14  ;;  %v959_v45 = vadd.f32 %v929_v19, %v794_v62  ;;  %v1668_v49 = vpop.f32.mrf.mxu1  ;;  %v1239_v62 = vadd.f32 %v1238_v58, %v1237_v17  ;;  %v1207_v19 = vadd.f32 %v1206_v63, %v1205_v7  ;;  %v565_v44 = vadd.f32 %v2090_v27, %v2082_v23 }
 0x124   : > { %v769_v48 = vpop.f32.mrf.mxu0  ;;  %v1240_v8 = vsel %vm1202_vm13, %v1230_v43, 0.0  ;;  %v1156_v49 = vadd.s32 9, %v2286_v29 }
 0x125   : > { %v1479_v32 = vpack.c.bf16 %v959_v45, %v959_v45  ;;  %v795_v16 = vadd.f32 %v769_v48, %v554_v25  ;;  %v934_v33 = vpop.f32.mrf.mxu1  ;;  %v1196_v46 = vsel %vm2281_vm14, %v959_v45, 0.0  ;;  %v1241_v9 = vadd.f32 %v1240_v8, %v1239_v62 }
 0x126   : > { %v1635_v36 = vpop.f32.mrf.mxu0  ;;  %v1231_v0 = vmul.f32 %v1196_v46, %v1196_v46  ;;  %v1208_v10 = vsel %vm1202_vm13, %v1196_v46, 0.0  ;;  %v1165_v39 = vsel %vm2357_vm8, %v1156_v49, %v2286_v29 }
 0x127   : > { %1006 = vst.msk [vmem:[%s2146_s17 + $0xc] sm:$0xf] %vm1002_vm3, %v1479_v32  ;;  %v960_v18 = vadd.f32 %v934_v33, %v795_v16  ;;  %v1671_v40 = vpop.f32.mrf.mxu1  ;;  %v1209_v28 = vadd.f32 %v1208_v10, %v1207_v19  ;;  %v570_v36 = vadd.f32 %v2105_v38, %v2099_v35  ;;  %vm1174_vm10 = vcmp.lt.s32.totalorder %v1165_v39, 8 }
 0x128   : > { %v772_v53 = vpop.f32.mrf.mxu0  ;;  %v1242_v2 = vsel %vm1202_vm13, %v1231_v0, 0.0 }
 0x129   : > { %v1480_v50 = vpack.c.bf16 %v960_v18, %v960_v18  ;;  %v796_v4 = vadd.f32 %v772_v53, %v557_v3  ;;  %v937_v5 = vpop.f32.mrf.mxu1  ;;  %v1197_v57 = vsel %vm2293_vm15, %v960_v18, 0.0  ;;  %v1243_v32 = vadd.f32 %v1242_v2, %v1241_v9 }
 0x12a   : > { %v1636_v26 = vpop.f32.mrf.mxu0  ;;  %v1232_v12 = vmul.f32 %v1197_v57, %v1197_v57  ;;  %v1210_v42 = vsel %vm1202_vm13, %v1197_v57, 0.0 }
 0x12b   : > { %1007 = vst.msk [vmem:[%s2146_s17 + $0x10] sm:$0xf] %vm1002_vm3, %v1480_v50  ;;  %v961_v59 = vadd.f32 %v937_v5, %v796_v4  ;;  %v1672_v6 = vpop.f32.mrf.mxu1  ;;  %v1211_v37 = vadd.f32 %v1210_v42, %v1209_v28 }
 0x12c   : > { %v777_v11 = vpop.f32.mrf.mxu0  ;;  %v1244_v27 = vsel %vm1202_vm13, %v1232_v12, 0.0 }
 0x12d   : > { %v1481_v55 = vpack.c.bf16 %v961_v59, %v961_v59  ;;  %v1198_v56 = vsel %vm2297_vm0, %v961_v59, 0.0  ;;  %v797_v13 = vadd.f32 %v777_v11, %v562_v51  ;;  %v942_v14 = vpop.f32.mrf.mxu1  ;;  %v1245_v18 = vadd.f32 %v1244_v27, %v1243_v32 }
 0x12e   : > { %v1639_v21 = vpop.f32.mrf.mxu0  ;;  %v1233_v60 = vmul.f32 %v1198_v56, %v1198_v56  ;;  %v1212_v16 = vsel %vm1202_vm13, %v1198_v56, 0.0 }
 0x12f   : > { %1008 = vst.msk [vmem:[%s2146_s17 + $0x14] sm:$0xf] %vm1002_vm3, %v1481_v55  ;;  %v962_v25 = vadd.f32 %v942_v14, %v797_v13  ;;  %v1675_v45 = vpop.f32.mrf.mxu1  ;;  %v1213_v46 = vadd.f32 %v1212_v16, %v1211_v37 }
 0x130   : > { %v780_v61 = vpop.f32.mrf.mxu0  ;;  %v1246_v40 = vsel %vm1202_vm13, %v1233_v60, 0.0 }
 0x131   : > { %v1482_v24 = vpack.c.bf16 %v962_v25, %v962_v25  ;;  %v1199_v48 = vsel %vm2339_vm7, %v962_v25, 0.0  ;;  %v798_v30 = vadd.f32 %v780_v61, %v565_v44  ;;  %v945_v31 = vpop.f32.mrf.mxu1  ;;  %v1247_v29 = vadd.f32 %v1246_v40, %v1245_v18 }
 0x132   : > { %v1234_v33 = vmul.f32 %v1199_v48, %v1199_v48  ;;  %v1640_v34 = vpop.f32.mrf.mxu0  ;;  %v1214_v41 = vsel %vm1202_vm13, %v1199_v48, 0.0 }
 0x133   : > { %1009 = vst.msk [vmem:[%s2146_s17 + $0x18] sm:$0xf] %vm1002_vm3, %v1482_v24  ;;  %v963_v1 = vadd.f32 %v945_v31, %v798_v30  ;;  %v1676_v3 = vpop.f32.mrf.mxu1  ;;  %v1215_v51 = vadd.f32 %v1214_v41, %v1213_v46 }
 0x134   : > { %v785_v43 = vpop.f32.mrf.mxu0  ;;  %v1248_v47 = vsel %vm1202_vm13, %v1234_v33, 0.0 }
 0x135   : > { %v1483_v53 = vpack.c.bf16 %v963_v1, %v963_v1  ;;  %v1200_v52 = vsel %vm1173_vm9, %v963_v1, 0.0  ;;  %v799_v35 = vadd.f32 %v785_v43, %v570_v36  ;;  %v950_v38 = vpop.f32.mrf.mxu1  ;;  %v1249_v63 = vadd.f32 %v1248_v47, %v1247_v29 }
 0x136   : > { %v1216_v50 = vsel %vm1202_vm13, %v1200_v52, 0.0  ;;  %v1235_v4 = vmul.f32 %v1200_v52, %v1200_v52  ;;  %v1643_v5 = vpop.f32.mrf.mxu0 }
 0x137   : > { %1010 = vst.msk [vmem:[%s2146_s17 + $0x1c] sm:$0xf] %vm1002_vm3, %v1483_v53  ;;  %v964_v54 = vadd.f32 %v950_v38, %v799_v35  ;;  %v1679_v57 = vpop.f32.mrf.mxu1  ;;  %v1217_v0 = vadd.f32 %v1216_v50, %v1215_v51 }
 0x138   : > { %v1250_v26 = vsel %vm1202_vm13, %v1235_v4, 0.0  ;;  %v788_v58 = vpop.f32.mrf.mxu0 }
 0x139   : > { %v1484_v59 = vpack.c.bf16 %v964_v54, %v964_v54  ;;  %v1201_v6 = vsel %vm1174_vm10, %v964_v54, 0.0  ;;  %v953_v15 = vpop.f32.mrf.mxu1  ;;  %v1251_v10 = vadd.f32 %v1250_v26, %v1249_v63 }
 0x13a   : > { %v1218_v17 = vsel %vm1202_vm13, %v1201_v6, 0.0  ;;  %v1236_v7 = vmul.f32 %v1201_v6, %v1201_v6  ;;  %v1644_v8 = vpop.f32.mrf.mxu0 }
 0x13b   : > { %1011 = vst.msk [vmem:[%s2146_s17 + $0x20] sm:$0xf] %vm1002_vm3, %v1484_v59  ;;  %v1219_v11 = vadd.f32 %v1218_v17, %v1217_v0  ;;  %v1680_v12 = vpop.f32.mrf.mxu1  ;;  %vm1226_vm3 = vcmask 516096  }
 0x13c   : > { %v1252_v55 = vsel %vm1202_vm13, %v1236_v7, 0.0 }
 0x13d   : > { %v1220_v56 = vrot.slane %v1219_v11, 4  ;;  %v1253_v13 = vadd.f32 %v1252_v55, %v1251_v10 }
 0x13f   : > { %v1221_v14 = vadd.f32 %v1220_v56, %v1219_v11  ;;  %v1254_v62 = vrot.slane %v1253_v13, 4 }
 0x141   : > { %v1222_v19 = vrot.slane %v1221_v14, 2  ;;  %v1255_v20 = vadd.f32 %v1254_v62, %v1253_v13 }
 0x143   : > { %v1223_v21 = vadd.f32 %v1222_v19, %v1221_v14  ;;  %v1256_v22 = vrot.slane %v1255_v20, 2 }
 0x145   : > { %v1224_v44 = vrot.slane %v1223_v21, 1  ;;  %v1257_v2 = vadd.f32 %v1256_v22, %v1255_v20 }
 0x147   : > { %v1225_v25 = vadd.f32 %v1224_v44, %v1223_v21  ;;  %v1258_v45 = vrot.slane %v1257_v2, 1 }
 0x149   : > { %1227 = vst.msk [vmem:[%s211_s20] sm:$0x1] %vm1226_vm3, %v1225_v25  ;;  %v1259_v49 = vadd.f32 %v1258_v45, %v1257_v2 }
 0x14b   : > { %1260 = vst.msk [vmem:[%s214_s23] sm:$0x1] %vm1226_vm3, %v1259_v49 }
 0x14c PF: > { %s15_s15 = sadd.s32 1, %s1761_s15  }
 0x14d   : > { %p12_p4 = scmp.ge.s32.totalorder %s15_s15, 4  }
 0x14f   :  { %14 = sbr.rel (!%p12_p4) target bundleno = 1 (0x1), region = 85 }

// kernel: discriminator_forward.7
= control target key start
LH: loop header
LB: loop body
LE: loop exit
PB: predicated region body
PF: predicated region fallthrough
CT: control target
= control target key end

     0   :  { %s1705_s15 = smov 0   ;;  %s1985_s0 = inlined_call_operand.vmem [shape: bf16[2,33,256], index: 0, kind: input, shape index: {}]   ;;  %s1986_s1 = inlined_call_operand.vmem [shape: bf16[4,256,128], index: 1, kind: input, shape index: {}]   ;;  %s1987_s2 = inlined_call_operand.vmem [shape: bf16[2,20,128], index: 2, kind: output, shape index: {0}]   ;;  %s1988_s3 = inlined_call_operand.vmem [shape: f32[2,1,128], index: 3, kind: output, shape index: {1}]   ;;  %s1989_s4 = inlined_call_operand.vmem [shape: f32[2,1,128], index: 4, kind: output, shape index: {2}]  }
   0x1 LB: > { %s1275_s16 = sadd.s32 4294967295, %s1678_s15   ;;  %p1279_p0 = scmp.ge.s32.totalorder %s1678_s15, 1  ;;  %s1678_s15 = sphi %s1705_s15, %s15_s15  }
   0x2   : > { %p167_p1 = scmp.lt.s32.totalorder %s1678_s15, 3 }
   0x4   : > { %p168_p2 = pnand %p1279_p0, %p167_p1 }
   0x5   : > { %p199_p3 = scmp.lt.s32.totalorder (!%p168_p2), %s1275_s16, 1 }
   0x6   : > { %171 = sbr.rel (%p168_p2) target bundleno = 305 (0x131), region = 28 }
   0xb   : > { %v1595_v0 = vld [vmem:[%s1986_s1 + $0xf8] sm:$0xff]   ;;  %v1599_v4 = vld [vmem:[%s1986_s1 + $0xf0] sm:$0xff]   ;;  %v1603_v8 = vld [vmem:[%s1986_s1 + $0xe8] sm:$0xff]   ;;  %s1997_s16 = smov (!%p199_p3, %s1275_s16), 1  ;;  %vm298_vm0 = vsmask.f32 7424 }
   0xc   : > { %v1596_v1 = vld [vmem:[%s1986_s1 + $0x78] sm:$0xff]   ;;  %1467 = vmatprep.subr.bf16.mxu0 %v1595_v0  ;;  %v1600_v5 = vld [vmem:[%s1986_s1 + $0x70] sm:$0xff]   ;;  %v1604_v9 = vld [vmem:[%s1986_s1 + $0x68] sm:$0xff]   ;;  %s1579_s21 = smul.u32 40, %s1997_s16  ;;  %vm908_vm1 = vcmask 1044480   ;;  %vm1147_vm15 = vcmask 1043456   ;;  %s211_s11 = scalar_lea.vmem %s1988_s3, %s1997_s16 }
   0xd   : > { %v1597_v2 = vld [vmem:[%s1986_s1 + $0xb8] sm:$0xff]   ;;  %1495 = vmatprep.subr.bf16.mxu1 %v1596_v1  ;;  %v1601_v6 = vld [vmem:[%s1986_s1 + $0xb0] sm:$0xff]   ;;  %v1605_v10 = vld [vmem:[%s1986_s1 + $0xa8] sm:$0xff]   ;;  %vm683_vm2 = vsmask.f32 5376  ;;  %s214_s14 = scalar_lea.vmem %s1989_s4, %s1997_s16 }
   0xe   : > { %v1598_v3 = vld [vmem:[%s1986_s1 + $0x38] sm:$0xff]   ;;  %1468 = vmatpush3.bf16.msra.mxu0 %v1597_v2  ;;  %v1602_v7 = vld [vmem:[%s1986_s1 + $0x30] sm:$0xff]   ;;  %v1606_v11 = vld [vmem:[%s1986_s1 + $0x28] sm:$0xff]   ;;  %s1813_s6 = scalar_lea.vmem %s1985_s0, %s1579_s21 }
   0xf   : > { %1496 = vmatpush3.bf16.msra.mxu1 %v1598_v3  ;;  %1469 = vmatprep.subr.bf16.mxu0 %v1599_v4  ;;  %v1607_v12 = vld [vmem:[%s1986_s1 + $0xe0] sm:$0xff]   ;;  %v1611_v16 = vld [vmem:[%s1986_s1 + $0xd8] sm:$0xff]   ;;  %v1615_v20 = vld [vmem:[%s1986_s1 + $0xd0] sm:$0xff]  }
  0x10   : > { %1497 = vmatprep.subr.bf16.mxu1 %v1600_v5  ;;  %v1608_v13 = vld [vmem:[%s1986_s1 + $0x60] sm:$0xff]   ;;  %v1612_v17 = vld [vmem:[%s1986_s1 + $0x58] sm:$0xff]   ;;  %v1616_v21 = vld [vmem:[%s1986_s1 + $0x50] sm:$0xff]  }
  0x11   : > { %v1609_v14 = vld [vmem:[%s1986_s1 + $0xa0] sm:$0xff]   ;;  %v1613_v18 = vld [vmem:[%s1986_s1 + $0x98] sm:$0xff]   ;;  %v1617_v22 = vld [vmem:[%s1986_s1 + $0x90] sm:$0xff]  }
  0x12   : > { %1470 = vmatpush3.bf16.msra.mxu0 %v1601_v6  ;;  %v1610_v15 = vld [vmem:[%s1986_s1 + $0x20] sm:$0xff]   ;;  %v1614_v19 = vld [vmem:[%s1986_s1 + $0x18] sm:$0xff]   ;;  %v1618_v23 = vld [vmem:[%s1986_s1 + $0x10] sm:$0xff]  }
  0x13   : > { %1498 = vmatpush3.bf16.msra.mxu1 %v1602_v7  ;;  %1471 = vmatprep.subr.bf16.mxu0 %v1603_v8  ;;  %v1619_v24 = vld [vmem:[%s1986_s1 + $0xc8] sm:$0xff]   ;;  %v1623_v28 = vld [vmem:[%s1986_s1 + $0xc0] sm:$0xff]   ;;  %v251_v34 = vld [vmem:[%s1813_s6 + $0x10] sm:$0x77] }
  0x14   : > { %1499 = vmatprep.subr.bf16.mxu1 %v1604_v9  ;;  %v1620_v25 = vld [vmem:[%s1986_s1 + $0x48] sm:$0xff]   ;;  %v1624_v29 = vld [vmem:[%s1986_s1 + $0x40] sm:$0xff]   ;;  %v1317_v36 = vcombine.high %v251_v34, %v251_v34  ;;  %v1316_v38 = vcombine.low %v251_v34, %v251_v34  ;;  %v1631_v39 = vld [vmem:[%s1986_s1 + $0x178] sm:$0xff]  }
  0x15   : > { %v1621_v26 = vld [vmem:[%s1986_s1 + $0x88] sm:$0xff]   ;;  %v1625_v30 = vld [vmem:[%s1986_s1 + $0x80] sm:$0xff]   ;;  %v1632_v40 = vld [vmem:[%s1986_s1 + $0x1f8] sm:$0xff]  }
  0x16   : > { %1472 = vmatpush3.bf16.msra.mxu0 %v1605_v10  ;;  %v1622_v27 = vld [vmem:[%s1986_s1 + $0x8] sm:$0xff]   ;;  %v1626_v31 = vld [vmem:[%s1986_s1] sm:$0xff]   ;;  %v319_v43 = vshll.u32 %v1317_v36, 16  ;;  %v307_v46 = vshll.u32 %v1316_v38, 16  ;;  %v1634_v47 = vld [vmem:[%s1986_s1 + $0x1b8] sm:$0xff]   ;;  %v326_v54 = vshrl.u32 %v1317_v36, 16 }
  0x17   : > { %1500 = vmatpush3.bf16.msra.mxu1 %v1606_v11  ;;  %1473 = vmatprep.subr.bf16.mxu0 %v1607_v12  ;;  %v216_v32 = vld [vmem:[%s1813_s6] sm:$0xff]  ;;  %v1823_v33 = vld [vmem:[%s1813_s6 + $0x8] sm:$0xff]  ;;  %v1633_v53 = vld [vmem:[%s1986_s1 + $0x138] sm:$0xff]   ;;  %v323_v63 = vshrl.u32 %v1316_v38, 16 }
  0x18   : > { %1501 = vmatprep.subr.bf16.mxu1 %v1608_v13  ;;  %v1315_v35 = vcombine.high %v216_v32, %v1823_v33  ;;  %v1314_v37 = vcombine.low %v216_v32, %v1823_v33  ;;  %v321_v49 = vrot.slane %v319_v43, 1  ;;  %v309_v51 = vrot.slane %v307_v46, 1  ;;  %v1636_v56 = vld [vmem:[%s1986_s1 + $0x1f0] sm:$0xff]   ;;  %v1640_v0 = vld [vmem:[%s1986_s1 + $0x1e8] sm:$0xff]   ;;  %v1644_v5 = vld [vmem:[%s1986_s1 + $0x1e0] sm:$0xff]  }
  0x19   : > { %v1635_v58 = vld [vmem:[%s1986_s1 + $0x170] sm:$0xff]   ;;  %v1639_v1 = vld [vmem:[%s1986_s1 + $0x168] sm:$0xff]   ;;  %v1643_v6 = vld [vmem:[%s1986_s1 + $0x160] sm:$0xff]  }
  0x1a   : > { %1474 = vmatpush3.bf16.msra.mxu0 %v1609_v14  ;;  %v312_v41 = vshrl.u32 %v1315_v35, 16  ;;  %v314_v42 = vshll.u32 %v1315_v35, 16  ;;  %614 = vmatprep.mubr.bf16.mxu1 %v1315_v35  ;;  %v300_v44 = vshrl.u32 %v1314_v37, 16  ;;  %v302_v45 = vshll.u32 %v1314_v37, 16  ;;  %v1638_v61 = vld [vmem:[%s1986_s1 + $0x1b0] sm:$0xff]   ;;  %v1642_v2 = vld [vmem:[%s1986_s1 + $0x1a8] sm:$0xff]  }
  0x1b   : > { %1502 = vmatpush3.bf16.msra.mxu1 %v1610_v15  ;;  %1475 = vmatprep.subr.bf16.mxu0 %v1611_v16  ;;  %v328_v59 = vor.u32 %v326_v54, %v321_v49  ;;  %v1637_v62 = vld [vmem:[%s1986_s1 + $0x130] sm:$0xff]   ;;  %v1641_v3 = vld [vmem:[%s1986_s1 + $0x128] sm:$0xff]   ;;  %v325_v4 = vor.u32 %v323_v63, %v309_v51  ;;  %v1646_v7 = vld [vmem:[%s1986_s1 + $0x1a0] sm:$0xff]  }
  0x1c   : > { %1503 = vmatprep.subr.bf16.mxu1 %v1612_v17  ;;  %v316_v48 = vrot.slane %v314_v42, 1  ;;  %v304_v50 = vrot.slane %v302_v45, 1  ;;  %v1645_v8 = vld [vmem:[%s1986_s1 + $0x120] sm:$0xff]   ;;  %v1648_v9 = vld [vmem:[%s1986_s1 + $0x1d8] sm:$0xff]   ;;  %v218_v12 = vld [vmem:[%s1813_s6 + $0x10] sm:$0x33] }
  0x1d   : > { %v1647_v10 = vld [vmem:[%s1986_s1 + $0x158] sm:$0xff]   ;;  %v1335_v14 = vcombine.high %v218_v12, %v218_v12  ;;  %v1334_v15 = vcombine.low %v218_v12, %v218_v12  ;;  %v1654_v16 = vld [vmem:[%s1986_s1 + $0x1d0] sm:$0xff]   ;;  %v869_v36 = vld [vmem:[%s1813_s6] sm:$0x88] }
  0x1e   : > { %1476 = vmatpush3.bf16.msra.mxu0 %v1613_v18  ;;  %v317_v52 = vor.u32 %v316_v48, %v312_v41  ;;  %v305_v55 = vor.u32 %v304_v50, %v300_v44  ;;  %v1650_v11 = vld [vmem:[%s1986_s1 + $0x198] sm:$0xff]   ;;  %v1653_v17 = vld [vmem:[%s1986_s1 + $0x150] sm:$0xff]   ;;  %v1436_v41 = vcombine.low %v869_v36, %v1823_v33  ;;  %v1437_v42 = vcombine.high %v869_v36, %v1823_v33 }
  0x1f   : > { %1504 = vmatpush3.bf16.msra.mxu1 %v1614_v19  ;;  %1477 = vmatprep.subr.bf16.mxu0 %v1615_v20  ;;  %v1649_v13 = vld [vmem:[%s1986_s1 + $0x118] sm:$0xff]   ;;  %v1656_v18 = vld [vmem:[%s1986_s1 + $0x190] sm:$0xff]   ;;  %v1658_v20 = vld [vmem:[%s1986_s1 + $0x1c8] sm:$0xff]  }
  0x20   : > { %1505 = vmatprep.subr.bf16.mxu1 %v1616_v21  ;;  %v322_v57 = vsel %vm298_vm0, %v317_v52, %v321_v49  ;;  %v310_v60 = vsel %vm298_vm0, %v305_v55, %v309_v51  ;;  %v1655_v19 = vld [vmem:[%s1986_s1 + $0x110] sm:$0xff]   ;;  %v1657_v21 = vld [vmem:[%s1986_s1 + $0x148] sm:$0xff]   ;;  %v909_v49 = vrot.slane %v1436_v41, 3  ;;  %v912_v50 = vrot.slane %v1437_v42, 3 }
  0x21   : > { %461 = vmatprep.mubr.bf16.mxu0 %v322_v57  ;;  %v1669_v32 = vld [vmem:[%s1813_s6 + $0x14] ss:$8 sps:$4 sm:$0x1f]  }
  0x22   : > { %1478 = vmatpush3.bf16.msra.mxu0 %v1617_v22  ;;  %v1660_v22 = vld [vmem:[%s1986_s1 + $0x188] sm:$0xff]   ;;  %v913_v45 = vrot.slane %v1669_v32, 3 }
  0x23   : > { %1506 = vmatpush3.bf16.msra.mxu1 %v1618_v23  ;;  %1479 = vmatprep.subr.bf16.mxu0 %v1619_v24  ;;  %v1659_v23 = vld [vmem:[%s1986_s1 + $0x108] sm:$0xff]   ;;  %v1662_v24 = vld [vmem:[%s1986_s1 + $0x1c0] sm:$0xff]  }
  0x24   : > { %1507 = vmatprep.subr.bf16.mxu1 %v1620_v25  ;;  %v1661_v25 = vld [vmem:[%s1986_s1 + $0x140] sm:$0xff]  }
  0x26   : > { %1480 = vmatpush3.bf16.msra.mxu0 %v1621_v26  ;;  %v1664_v26 = vld [vmem:[%s1986_s1 + $0x180] sm:$0xff]  }
  0x27   : > { %1508 = vmatpush3.bf16.msra.mxu1 %v1622_v27  ;;  %1481 = vmatprep.subr.bf16.mxu0 %v1623_v28  ;;  %v630_v27 = vld [vmem:[%s1813_s6] sm:$0xcc] }
  0x28   : > { %1509 = vmatprep.subr.bf16.mxu1 %v1624_v29  ;;  %v1384_v28 = vcombine.low %v630_v27, %v1823_v33  ;;  %v1385_v29 = vcombine.high %v630_v27, %v1823_v33 }
  0x2a   : > { %1482 = vmatpush3.bf16.msra.mxu0 %v1625_v30  ;;  %v1667_v30 = vld [vmem:[%s1813_s6 + $0x10] ss:$8 sps:$4 sm:$0x1f]   ;;  %v702_v34 = vshrl.u32 %v1385_v29, 16  ;;  %v705_v35 = vshll.u32 %v1385_v29, 16  ;;  %v688_v38 = vshll.u32 %v1384_v28, 16 }
  0x2b   : > { %1510 = vmatpush3.bf16.msra.mxu1 %v1626_v31  ;;  %1523 = vmatprep.subr.bf16.mxu0 %v1631_v39  ;;  %v1663_v31 = vld [vmem:[%s1986_s1 + $0x100] sm:$0xff]   ;;  %v710_v39 = vshrl.u32 %v1669_v32, 16  ;;  %v696_v54 = vshll.u32 %v1667_v30, 16  ;;  %v910_v57 = vrot.slane %v1667_v30, 3  ;;  %s1580_s6 = smul.u32 12, %s1997_s16 }
  0x2c   : > { %1551 = vmatprep.subr.bf16.mxu1 %v1632_v40  ;;  %v713_v40 = vshll.u32 %v1669_v32, 16  ;;  %v704_v43 = vrot.slane %v702_v34, 2  ;;  %v707_v44 = vrot.slane %v705_v35, 3  ;;  %v690_v52 = vrot.slane %v688_v38, 3 }
  0x2d   : > { %462 = vmatmul.mubr.bf16.vlgmr.msra.gmra.mxu0 %v310_v60  ;;  %s208_s8 = scalar_lea.vmem %s1987_s2, %s1580_s6 }
  0x2e   : > { %615 = vmatmul.mubr.bf16.vlgmr.msra.gmra.mxu1 %v1314_v37  ;;  %1524 = vmatpush3.bf16.msra.mxu0 %v1633_v53  ;;  %v685_v37 = vshrl.u32 %v1384_v28, 16  ;;  %v715_v48 = vrot.slane %v713_v40, 3  ;;  %v708_v51 = vor.u32 %v707_v44, %v704_v43  ;;  %v693_v53 = vshrl.u32 %v1667_v30, 16 }
  0x2f   : > { %1552 = vmatpush3.bf16.msra.mxu1 %v1634_v47  ;;  %1525 = vmatprep.subr.bf16.mxu0 %v1635_v58  ;;  %v712_v47 = vrot.slane %v710_v39, 2 }
  0x30   : > { %1553 = vmatprep.subr.bf16.mxu1 %v1636_v56  ;;  %469 = vmatprep.mubr.bf16.mxu0 %v328_v59  ;;  %v687_v46 = vrot.slane %v685_v37, 2  ;;  %v914_v56 = vsel %vm908_vm1, %v912_v50, %v913_v45  ;;  %v695_v33 = vrot.slane %v693_v53, 2  ;;  %v698_v59 = vrot.slane %v696_v54, 3 }
  0x31   : > { %622 = vmatprep.mubr.bf16.mxu1 %v1335_v14  ;;  %v716_v55 = vor.u32 %v715_v48, %v712_v47 }
  0x32   : > { %1526 = vmatpush3.bf16.msra.mxu0 %v1637_v62  ;;  %v691_v58 = vor.u32 %v690_v52, %v687_v46  ;;  %v699_v62 = vor.u32 %v698_v59, %v695_v33 }
  0x33   : > { %1554 = vmatpush3.bf16.msra.mxu1 %v1638_v61  ;;  %1527 = vmatprep.subr.bf16.mxu0 %v1639_v1  ;;  %v717_v60 = vsel %vm683_vm2, %v708_v51, %v716_v55  ;;  %v911_v61 = vsel %vm908_vm1, %v909_v49, %v910_v57 }
  0x34   : > { %1555 = vmatprep.subr.bf16.mxu1 %v1640_v0  ;;  %v700_v63 = vsel %vm683_vm2, %v691_v58, %v699_v62 }
  0x35   : > { %470 = vmatmul.mubr.bf16.gmra.mxu0 %v325_v4 }
  0x36   : > { %1528 = vmatpush3.bf16.msra.mxu0 %v1641_v3  ;;  %623 = vmatmul.mubr.bf16.gmra.mxu1 %v1334_v15 }
  0x37   : > { %1556 = vmatpush3.bf16.msra.mxu1 %v1642_v2  ;;  %1529 = vmatprep.subr.bf16.mxu0 %v1643_v6  ;;  %v1082_v6 = vlaneseq }
  0x38   : > { %1557 = vmatprep.subr.bf16.mxu1 %v1644_v5  ;;  %1047 = vmatprep.mubr.bf16.mxu1 %v914_v56 }
  0x39   : > { %850 = vmatprep.mubr.bf16.mxu0 %v717_v60 }
  0x3a   : > { %1530 = vmatpush3.bf16.msra.mxu0 %v1645_v8 }
  0x3b   : > { %1558 = vmatpush3.bf16.msra.mxu1 %v1646_v7  ;;  %1531 = vmatprep.subr.bf16.mxu0 %v1647_v10  ;;  %v1083_v10 = vshrl.u32 %v1082_v6, 7 }
  0x3c   : > { %1559 = vmatprep.subr.bf16.mxu1 %v1648_v9 }
  0x3e   : > { %1532 = vmatpush3.bf16.msra.mxu0 %v1649_v13  ;;  %v1084_v13 = vadd.s32 8, %v1083_v10 }
  0x3f   : > { %1560 = vmatpush3.bf16.msra.mxu1 %v1650_v11  ;;  %1533 = vmatprep.subr.bf16.mxu0 %v1653_v17 }
  0x40   : > { %1561 = vmatprep.subr.bf16.mxu1 %v1654_v16  ;;  %v1939_v16 = vmul.u32.u64.low 3435973837, %v1083_v10  ;;  %v1940_v17 = vmul.u32.u64.high 3435973837, %v1083_v10, %v1939_v16 }
  0x42   : > { %1534 = vmatpush3.bf16.msra.mxu0 %v1655_v19 }
  0x43   : > { %1562 = vmatpush3.bf16.msra.mxu1 %v1656_v18  ;;  %1535 = vmatprep.subr.bf16.mxu0 %v1657_v21  ;;  %v1085_v21 = vadd.s32 16, %v1083_v10 }
  0x44   : > { %1563 = vmatprep.subr.bf16.mxu1 %v1658_v20  ;;  %v1942_v19 = vmul.u32.u64.low 3435973837, %v1084_v13  ;;  %v1943_v20 = vmul.u32.u64.high 3435973837, %v1084_v13, %v1942_v19 }
  0x46   : > { %1536 = vmatpush3.bf16.msra.mxu0 %v1659_v23  ;;  %v1103_v27 = vshrl.u32 %v1943_v20, 2 }
  0x47   : > { %1564 = vmatpush3.bf16.msra.mxu1 %v1660_v22  ;;  %1537 = vmatprep.subr.bf16.mxu0 %v1661_v25 }
  0x48   : > { %1565 = vmatprep.subr.bf16.mxu1 %v1662_v24  ;;  %v1945_v24 = vmul.u32.u64.low 3435973837, %v1085_v21  ;;  %v1946_v25 = vmul.u32.u64.high 3435973837, %v1085_v21, %v1945_v24  ;;  %v1104_v29 = vmul.u32 5, %v1103_v27 }
  0x4a   : > { %1538 = vmatpush3.bf16.msra.mxu0 %v1663_v31  ;;  %v1114_v30 = vshrl.u32 %v1946_v25, 2  ;;  %v1105_v32 = vsub.s32 %v1084_v13, %v1104_v29 }
  0x4b   : > { %1566 = vmatpush3.bf16.msra.mxu1 %v1664_v26  ;;  %v1092_v26 = vshrl.u32 %v1940_v17, 2 }
  0x4c   : > { %v1115_v35 = vmul.u32 5, %v1114_v30  ;;  %vm1120_vm5 = vcmp.ne.s32.totalorder %v1105_v32, 0  ;;  %vm1123_vm6 = vcmp.lt.s32.totalorder %v1105_v32, 0 }
  0x4d   : > { %851 = vmatmul.mubr.bf16.vlgmr.msra.gmra.mxu0 %v700_v63  ;;  %v1093_v28 = vmul.u32 5, %v1092_v26  ;;  %vm1955_vm8 = vmand %vm1123_vm6, %vm1120_vm5 }
  0x4e   : > { %1048 = vmatmul.mubr.bf16.vlgmr.msra.gmra.mxu1 %v911_v61  ;;  %858 = vmatprep.mubr.bf16.mxu0 %v716_v55  ;;  %v1116_v41 = vsub.s32 %v1085_v21, %v1115_v35 }
  0x4f   : > { %1055 = vmatprep.mubr.bf16.mxu1 %v913_v45  ;;  %v1094_v31 = vsub.s32 %v1083_v10, %v1093_v28  ;;  %v1129_v45 = vadd.s32 5, %v1105_v32 }
  0x50   : > { %vm1121_vm9 = vcmp.ne.s32.totalorder %v1116_v41, 0  ;;  %vm1124_vm10 = vcmp.lt.s32.totalorder %v1116_v41, 0  ;;  %v1130_v58 = vadd.s32 5, %v1116_v41 }
  0x51   : > { %vm1119_vm3 = vcmp.ne.s32.totalorder %v1094_v31, 0  ;;  %vm1122_vm4 = vcmp.lt.s32.totalorder %v1094_v31, 0  ;;  %v1128_v44 = vadd.s32 5, %v1094_v31  ;;  %vm1965_vm11 = vmand %vm1124_vm10, %vm1121_vm9 }
  0x52   : > { %vm1951_vm7 = vmand %vm1122_vm4, %vm1119_vm3  ;;  %v1133_v10 = vsel %vm1965_vm11, %v1130_v58, %v1116_v41 }
  0x53   : > { %v1131_v55 = vsel %vm1951_vm7, %v1128_v44, %v1094_v31  ;;  %vm1136_vm14 = vcmp.lt.s32.totalorder %v1133_v10, 4 }
  0x54   : > { %vm1134_vm12 = vcmp.lt.s32.totalorder %v1131_v55, 4 }
  0x55   : > { %859 = vmatmul.mubr.bf16.gmra.mxu0 %v699_v62 }
  0x56   : > { %1056 = vmatmul.mubr.bf16.gmra.mxu1 %v910_v57  ;;  %v1132_v57 = vsel %vm1955_vm8, %v1129_v45, %v1105_v32 }
  0x57   : > { %vm1135_vm13 = vcmp.lt.s32.totalorder %v1132_v57, 4 }
  0xed   : > { %v1483_v0 = vpop.f32.mrf.mxu0 }
  0xee   : > { %v1511_v1 = vpop.f32.mrf.mxu1 }
  0xef   : > { %v1484_v2 = vpop.f32.mrf.mxu0 }
  0xf0   : > { %v1512_v4 = vpop.f32.mrf.mxu1  ;;  %v1485_v37 = vadd.f32 %v1484_v2, %v1483_v0 }
  0xf1   : > { %v1486_v3 = vpop.f32.mrf.mxu0  ;;  %v1513_v38 = vadd.f32 %v1512_v4, %v1511_v1 }
  0xf2   : > { %v1514_v8 = vpop.f32.mrf.mxu1 }
  0xf3   : > { %v1487_v5 = vpop.f32.mrf.mxu0  ;;  %v617_v51 = vadd.f32 %v1513_v38, %v1485_v37 }
  0xf4   : > { %v1515_v12 = vpop.f32.mrf.mxu1  ;;  %v1488_v46 = vadd.f32 %v1487_v5, %v1486_v3 }
  0xf5   : > { %v1489_v7 = vpop.f32.mrf.mxu0  ;;  %v1516_v47 = vadd.f32 %v1515_v12, %v1514_v8 }
  0xf6   : > { %v1517_v15 = vpop.f32.mrf.mxu1 }
  0xf7   : > { %v1490_v9 = vpop.f32.mrf.mxu0  ;;  %v620_v33 = vadd.f32 %v1516_v47, %v1488_v46 }
  0xf8   : > { %v1518_v18 = vpop.f32.mrf.mxu1  ;;  %v1491_v59 = vadd.f32 %v1490_v9, %v1489_v7 }
  0xf9   : > { %v1492_v11 = vpop.f32.mrf.mxu0  ;;  %v1519_v60 = vadd.f32 %v1518_v18, %v1517_v15 }
  0xfa   : > { %v1520_v22 = vpop.f32.mrf.mxu1 }
  0xfb   : > { %v1493_v14 = vpop.f32.mrf.mxu0  ;;  %v625_v8 = vadd.f32 %v1519_v60, %v1491_v59 }
  0xfc   : > { %v1521_v23 = vpop.f32.mrf.mxu1 }
 0x10d   : > { %v1539_v39 = vpop.f32.mrf.mxu0 }
 0x10e   : > { %v1567_v34 = vpop.f32.mrf.mxu1 }
 0x10f   : > { %v1540_v42 = vpop.f32.mrf.mxu0 }
 0x110   : > { %v1568_v36 = vpop.f32.mrf.mxu1  ;;  %v1541_v48 = vadd.f32 %v1540_v42, %v1539_v39 }
 0x111   : > { %v1542_v52 = vpop.f32.mrf.mxu0  ;;  %v1569_v63 = vadd.f32 %v1568_v36, %v1567_v34 }
 0x112   : > { %v1570_v40 = vpop.f32.mrf.mxu1  ;;  %v866_v54 = vadd.f32 %v1541_v48, %v617_v51 }
 0x113   : > { %v1543_v56 = vpop.f32.mrf.mxu0 }
 0x114   : > { %v1571_v49 = vpop.f32.mrf.mxu1  ;;  %v1544_v61 = vadd.f32 %v1543_v56, %v1542_v52  ;;  %v1063_v5 = vadd.f32 %v1569_v63, %v866_v54 }
 0x115   : > { %v1545_v0 = vpop.f32.mrf.mxu0  ;;  %v1572_v3 = vadd.f32 %v1571_v49, %v1570_v40 }
 0x116   : > { %v1573_v53 = vpop.f32.mrf.mxu1  ;;  %v867_v2 = vadd.f32 %v1544_v61, %v620_v33  ;;  %v1143_v17 = vsel %vm1134_vm12, %v1063_v5, 0.0 }
 0x117   : > { %v1546_v6 = vpop.f32.mrf.mxu0  ;;  %v1157_v21 = vmul.f32 %v1143_v17, %v1143_v17 }
 0x118   : > { %v1574_v62 = vpop.f32.mrf.mxu1  ;;  %v1064_v7 = vadd.f32 %v1572_v3, %v867_v2  ;;  %v1547_v9 = vadd.f32 %v1546_v6, %v1545_v0 }
 0x119   : > { %v1548_v12 = vpop.f32.mrf.mxu0  ;;  %v1575_v16 = vadd.f32 %v1574_v62, %v1573_v53 }
 0x11a   : > { %v1576_v4 = vpop.f32.mrf.mxu1  ;;  %v1465_v13 = vpack.c.bf16 %v1064_v7, %v1063_v5  ;;  %v1144_v14 = vsel %vm1135_vm13, %v1064_v7, 0.0  ;;  %v868_v15 = vadd.f32 %v1547_v9, %v625_v8 }
 0x11b   : > { %v1549_v18 = vpop.f32.mrf.mxu0  ;;  %v1158_v19 = vmul.f32 %v1144_v14, %v1144_v14  ;;  %v1146_v22 = vadd.f32 %v1144_v14, %v1143_v17 }
 0x11c   : > { %v1577_v11 = vpop.f32.mrf.mxu1  ;;  %1466 = vst [vmem:[%s208_s8] sm:$0xff] %v1465_v13   ;;  %v1065_v20 = vadd.f32 %v1575_v16, %v868_v15 }
 0x11d   : > { %v1160_v27 = vadd.f32 %v1158_v19, %v1157_v21 }
 0x11e   : > { %v1461_v23 = vpack.c.bf16 %v1065_v20, %v1065_v20  ;;  %v1145_v24 = vsel %vm1136_vm14, %v1065_v20, 0.0 }
 0x11f   : > { %v1148_v25 = vsel %vm1147_vm15, %v1145_v24, 0.0  ;;  %v1159_v26 = vmul.f32 %v1145_v24, %v1145_v24 }
 0x120   : > { %1081 = vst [vmem:[%s208_s8 + $0x8] sm:$0x3] %v1461_v23  ;;  %v1149_v28 = vadd.f32 %v1148_v25, %v1146_v22 }
 0x121   : > { %v1161_v29 = vsel %vm1147_vm15, %v1159_v26, 0.0 }
 0x122   : > { %v1150_v30 = vrot.slane %v1149_v28, 4  ;;  %v1162_v31 = vadd.f32 %v1161_v29, %v1160_v27 }
 0x124   : > { %v1151_v32 = vadd.f32 %v1150_v30, %v1149_v28  ;;  %v1163_v34 = vrot.slane %v1162_v31, 4 }
 0x126   : > { %v1152_v35 = vrot.slane %v1151_v32, 2  ;;  %v1164_v36 = vadd.f32 %v1163_v34, %v1162_v31 }
 0x128   : > { %v1153_v37 = vadd.f32 %v1152_v35, %v1151_v32  ;;  %v1165_v38 = vrot.slane %v1164_v36, 2 }
 0x12a   : > { %v1154_v39 = vrot.slane %v1153_v37, 1  ;;  %v1166_v40 = vadd.f32 %v1165_v38, %v1164_v36 }
 0x12c   : > { %v1155_v41 = vadd.f32 %v1154_v39, %v1153_v37  ;;  %v1167_v42 = vrot.slane %v1166_v40, 1 }
 0x12e   : > { %1156 = vst [vmem:[%s211_s11] sm:$0x1] %v1155_v41  ;;  %v1168_v43 = vadd.f32 %v1167_v42, %v1166_v40 }
 0x130   : > { %1169 = vst [vmem:[%s214_s14] sm:$0x1] %v1168_v43 }
 0x131 PF: > { %s15_s15 = sadd.s32 1, %s1678_s15  }
 0x132   : > { %p12_p4 = scmp.ge.s32.totalorder %s15_s15, 4  }
 0x134   :  { %14 = sbr.rel (!%p12_p4) target bundleno = 1 (0x1), region = 85 }

</bundles_post_ra>
